<compile_context>
chip_gen: v5e
topology: v5e:2x2
jax: 0.10.0
libtpu: 0.0.40
codegen_flags: <defaults>
</compile_context>

<pallas_src>
import functools

import jax
import jax.numpy as jnp
import numpy as np
from jax.experimental import pallas as pl
from jax.experimental.pallas import tpu as pltpu

DILATIONS = (2, 4, 8, 12)
NB = len(DILATIONS)
PAD = 16                       # shared spatial zero-pad (>= max dilation, 8-aligned)
BN_EPS = 1e-5
# TODO(synk): re-derive per generation (halve conv row-strip / pass-2 tiles for
# v7x's 64 MiB physical VMEM); explicit limit avoids v5e's 16 MiB scoped default.
VMEM_LIMIT = 64 * 1024 * 1024


def _largest_divisor_leq(n, cap):
    cap = max(1, min(n, cap))
    for d in range(cap, 0, -1):
        if n % d == 0:
            return d
    return 1


# ---------------------------------------------------------------------------
# Pass 1: dilated 3x3 conv (9 shifted MXU matmuls per row strip) + per-(image,
# branch) BN partial statistics.  Grid = (image, branch), branch innermost so
# the image block (indexed only by n) is DMA'd once per image.
# ---------------------------------------------------------------------------
def _conv_stats_kernel(dil_ref, x_ref, w_ref, y_ref, sum_ref, ssq_ref,
                       xp_s, wsh_s, *, H, W, Cin, Cout, TH):
    b = pl.program_id(1)                  # branch (dilation) index
    d = dil_ref[b]                        # runtime dilation (SMEM scalar)

    # Build the shared zero-padded image in VMEM once per image (first branch).
    @pl.when(b == 0)
    def _():
        xp_s[...] = jnp.zeros_like(xp_s)
        xp_s[PAD:PAD + H, PAD:PAD + W, :] = x_ref[0]

    # Three W-shifted views (kw = -1, 0, +1), each re-used by its 3 kh taps.
    # Sublane (W) shifts want static offsets, so only this small copy is
    # unrolled over the 4 dilation rates; exactly one body runs per step.
    for bi, dd in enumerate(DILATIONS):
        @pl.when(b == bi)
        def _(dd=dd):
            for kwi in range(3):
                ow = PAD + (kwi - 1) * dd
                wsh_s[kwi] = xp_s[:, ow:ow + W, :]

    # 9-tap conv per row strip: the (TH*W, Cout) f32 accumulator fits in vregs.
    part_sum = jnp.zeros((1, Cout), jnp.float32)
    part_ssq = jnp.zeros((1, Cout), jnp.float32)
    for r0 in range(0, H, TH):
        acc = jnp.zeros((TH * W, Cout), jnp.float32)
        for t in range(9):
            kh, kw = divmod(t, 3)
            oh = PAD + (kh - 1) * d + r0                 # dynamic, major dim only
            xt = wsh_s[kw, pl.ds(oh, TH), :, :]          # (TH, W, Cin) bf16
            acc = acc + jnp.dot(xt.reshape(TH * W, Cin), w_ref[b, t],
                                preferred_element_type=jnp.float32)
        # NOTE: conv bias intentionally omitted -- train-mode BN subtracts the
        # per-channel mean, so a constant per-channel bias cancels exactly.
        y_ref[0, 0, r0 * W:(r0 + TH) * W, :] = acc.astype(y_ref.dtype)
        part_sum = part_sum + jnp.sum(acc, axis=0, keepdims=True)
        part_ssq = part_ssq + jnp.sum(acc * acc, axis=0, keepdims=True)
    sum_ref[0, 0] = part_sum
    ssq_ref[0, 0] = part_ssq


# ---------------------------------------------------------------------------
# Pass 2: y * scale + shift, ReLU (folded BatchNorm epilogue, lane-dense,
# H*W-tiled, bf16 input, VMEM-resident per-branch scale/shift).
# ---------------------------------------------------------------------------
def _bn_relu_kernel(y_ref, scale_ref, shift_ref, o_ref):
    b = pl.program_id(1)
    y = y_ref[0, 0].astype(jnp.float32)                  # (TR, Cout)
    o_ref[0, 0] = jnp.maximum(y * scale_ref[b] + shift_ref[b], 0.0)


def scale_pyramid_module(x_nchw, params):
    """params: list of 4 dicts with keys 'w' (3,3,Cin,Cout), 'b', 'gamma', 'beta'."""
    N, Cin, H, W = x_nchw.shape
    Cout = params[0]["w"].shape[-1]
    HW = H * W
    Hp, Wp = H + 2 * PAD, W + 2 * PAD

    # NCHW -> NHWC bf16 MXU operand.  TODO(synk): accept/return NHWC end-to-end
    # if the surrounding model allows, to drop these wrapper layout passes.
    x_nhwc = jnp.transpose(x_nchw, (0, 2, 3, 1)).astype(jnp.bfloat16)

    w_all = jnp.stack([p["w"].reshape(9, Cin, Cout) for p in params]
                      ).astype(jnp.bfloat16)             # (NB, 9, Cin, Cout)
    dil = jnp.asarray(DILATIONS, jnp.int32)

    TH = _largest_divisor_leq(H, max(1, 128 // W))        # rows per conv strip

    conv = functools.partial(_conv_stats_kernel,
                             H=H, W=W, Cin=Cin, Cout=Cout, TH=TH)
    y, ch_sum, ch_ssq = pl.pallas_call(
        conv,
        grid_spec=pltpu.PrefetchScalarGridSpec(
            num_scalar_prefetch=1,                        # dilation table in SMEM
            grid=(N, NB),
            in_specs=[
                # Image block indexed only by n: one HBM read per image, reused
                # by all 4 branches (branch axis is the inner grid axis).
                pl.BlockSpec((1, H, W, Cin), lambda n, b, d_ref: (n, 0, 0, 0)),
                # Full weight stack resident in VMEM (single copy).
                pl.BlockSpec(memory_space=pltpu.MemorySpace.VMEM),
            ],
            out_specs=[
                pl.BlockSpec((1, 1, HW, Cout), lambda n, b, d_ref: (n, b, 0, 0)),
                pl.BlockSpec((1, 1, 1, Cout), lambda n, b, d_ref: (n, b, 0, 0)),
                pl.BlockSpec((1, 1, 1, Cout), lambda n, b, d_ref: (n, b, 0, 0)),
            ],
            scratch_shapes=[
                pltpu.VMEM((Hp, Wp, Cin), jnp.bfloat16),      # zero-padded image
                pltpu.VMEM((3, Hp, W, Cin), jnp.bfloat16),    # 3 W-shifted views
            ],
        ),
        out_shape=[
            jax.ShapeDtypeStruct((N, NB, HW, Cout), jnp.bfloat16),   # pre-BN y
            jax.ShapeDtypeStruct((N, NB, 1, Cout), jnp.float32),     # partial sum
            jax.ShapeDtypeStruct((N, NB, 1, Cout), jnp.float32),     # partial ssq
        ],
        compiler_params=pltpu.CompilerParams(
            dimension_semantics=("parallel", "arbitrary"),
            vmem_limit_bytes=VMEM_LIMIT),
    )(dil, x_nhwc, w_all)

    # Fold train-mode BN (biased variance over N*H*W) into one FMA per channel.
    # TODO(synk): E[x^2]-E[x]^2 in f32 can cancel for very large N*H*W; use a
    # shifted / Welford-style accumulation if the deployed batch is large.
    cnt = jnp.float32(N * HW)
    mean = jnp.sum(ch_sum[:, :, 0, :], axis=0) / cnt              # (NB, Cout)
    var = jnp.maximum(jnp.sum(ch_ssq[:, :, 0, :], axis=0) / cnt - mean * mean, 0.0)
    gamma = jnp.stack([p["gamma"] for p in params])               # (NB, Cout)
    beta = jnp.stack([p["beta"] for p in params])
    scale = (gamma * jax.lax.rsqrt(var + BN_EPS)).astype(jnp.float32)
    shift = (beta - mean * scale).astype(jnp.float32)

    # Pass 2: tiled over H*W, scale/shift fully VMEM-resident.
    TR = _largest_divisor_leq(HW, 2048)
    out = pl.pallas_call(
        _bn_relu_kernel,
        grid=(N, NB, HW // TR),
        in_specs=[
            pl.BlockSpec((1, 1, TR, Cout), lambda n, b, r: (n, b, r, 0)),
            pl.BlockSpec(memory_space=pltpu.MemorySpace.VMEM),
            pl.BlockSpec(memory_space=pltpu.MemorySpace.VMEM),
        ],
        out_specs=pl.BlockSpec((1, 1, TR, Cout), lambda n, b, r: (n, b, r, 0)),
        out_shape=jax.ShapeDtypeStruct((N, NB, HW, Cout), jnp.float32),
        compiler_params=pltpu.CompilerParams(
            dimension_semantics=("parallel", "parallel", "arbitrary"),
            vmem_limit_bytes=VMEM_LIMIT),
    )(y, scale[:, None, :], shift[:, None, :])

    # (N, NB, H*W, Cout) -> NCHW, channels ordered [branch0 | branch1 | ...].
    out = out.reshape(N, NB, H, W, Cout)
    return jnp.transpose(out, (0, 1, 4, 2, 3)).reshape(N, NB * Cout, H, W)


# ---------------------------------------------------------------------------
# Pure-JAX reference (dilated conv with the same bf16-in / f32-accum precision,
# conv bias, train-mode BN, ReLU) used only for the correctness check.  The
# kernel additionally stores the pre-BN intermediate in bf16 (a deliberate
# precision/bandwidth tradeoff), so the comparison tolerance is ~1 bf16 ulp of
# the normalized activations.
# ---------------------------------------------------------------------------
def _reference(x_nchw, params):
    outs = []
    xb = x_nchw.astype(jnp.bfloat16)
    for d, p in zip(DILATIONS, params):
        w_oihw = jnp.transpose(p["w"], (3, 2, 0, 1)).astype(jnp.bfloat16)
        y = jax.lax.conv_general_dilated(
            xb, w_oihw, window_strides=(1, 1),
            padding=((d, d), (d, d)), rhs_dilation=(d, d),
            dimension_numbers=("NCHW", "OIHW", "NCHW"),
            preferred_element_type=jnp.float32)
        y = y + p["b"][None, :, None, None]   # kernel folds this away (BN cancels it)
        mean = jnp.mean(y, axis=(0, 2, 3), keepdims=True)
        var = jnp.mean((y - mean) ** 2, axis=(0, 2, 3), keepdims=True)
        y = (y - mean) * jax.lax.rsqrt(var + BN_EPS)
        y = y * p["gamma"][None, :, None, None] + p["beta"][None, :, None, None]
        outs.append(jnp.maximum(y, 0.0))
    return jnp.concatenate(outs, axis=1)


def make_params(key, cin, cout):
    params = []
    for _ in range(4):
        k1, k2, k3, k4, key = jax.random.split(key, 5)
        fan_in = cin * 9
        params.append({
            "w": jax.random.normal(k1, (3, 3, cin, cout), jnp.float32)
                 / np.sqrt(fan_in),
            "b": 0.01 * jax.random.normal(k2, (cout,), jnp.float32),
            "gamma": 1.0 + 0.1 * jax.random.normal(k3, (cout,), jnp.float32),
            "beta": 0.05 * jax.random.normal(k4, (cout,), jnp.float32),
        })
    return params


if __name__ == "__main__":
    # Small stand-in for the real (B, 512, H, W) input: lane-dense 128 channels.
    N, C, H, W = 2, 128, 16, 16
    key = jax.random.PRNGKey(0)
    kx, kp = jax.random.split(key)
    x = jax.random.normal(kx, (N, C, H, W), jnp.float32)
    params = make_params(kp, C, C)

    fwd = jax.jit(scale_pyramid_module)
    out = jax.block_until_ready(fwd(x, params))
    assert out.shape == (N, NB * C, H, W), out.shape

    ref = jax.block_until_ready(jax.jit(_reference)(x, params))
    # Both paths use bf16 MXU inputs with f32 accumulation; the kernel also
    # stores the pre-BN intermediate in bf16, so allow ~1 bf16 ulp of the
    # normalized activations (<~0.015 abs) of slack.
    np.testing.assert_allclose(np.asarray(out), np.asarray(ref),
                               rtol=2e-2, atol=3e-2)
    print("KERNEL_OK")
</pallas_src>

<mosaic_0001>
module attributes {stable_mosaic.version = 11 : i64} {
  func.func @_conv_stats_kernel(%arg0: i32, %arg1: i32, %arg2: memref<4xi32, #tpu.memory_space<smem>>, %arg3: memref<1x16x16x128xbf16, #tpu.memory_space<vmem>>, %arg4: memref<4x9x128x128xbf16, #tpu.memory_space<vmem>>, %arg5: memref<1x1x256x128xbf16, #tpu.memory_space<vmem>>, %arg6: memref<1x1x1x128xf32, #tpu.memory_space<vmem>>, %arg7: memref<1x1x1x128xf32, #tpu.memory_space<vmem>>, %arg8: memref<48x48x128xbf16, #tpu.memory_space<vmem>>, %arg9: memref<3x48x16x128xbf16, #tpu.memory_space<vmem>>) attributes {dimension_semantics = [#tpu.dimension_semantics<parallel>, #tpu.dimension_semantics<arbitrary>], iteration_bounds = array<i64: 2, 4>, scalar_prefetch = 1 : i64, scratch_operands = 2 : i64, tpu.core_type = #tpu.core_type<tc>, window_params = [{transform_indices = @transform_0, window_bounds = array<i64: 1, 16, 16, 128>}, {pipeline_mode = #tpu.pipeline_mode<synchronous>, transform_indices = @transform_1, window_bounds = array<i64: 4, 9, 128, 128>}, {transform_indices = @transform_2, window_bounds = array<i64: 1, 1, 256, 128>}, {transform_indices = @transform_3, window_bounds = array<i64: 1, 1, 1, 128>}, {transform_indices = @transform_4, window_bounds = array<i64: 1, 1, 1, 128>}]} {
    %0 = arith.index_cast %arg1 : i32 to index
    %1 = memref.load %arg2[%0] : memref<4xi32, #tpu.memory_space<smem>>
    %c0_i32 = arith.constant 0 : i32
    %2 = arith.cmpi eq, %arg1, %c0_i32 : i32
    %3 = arith.extui %2 : i1 to i32
    %c0_i32_0 = arith.constant 0 : i32
    %4 = arith.cmpi ne, %3, %c0_i32_0 : i32
    scf.if %4 {
      %cst_196 = arith.constant 0.000000e+00 : bf16
      %265 = vector.broadcast %cst_196 : bf16 to vector<48x48x128xbf16>
      %c0_197 = arith.constant 0 : index
      %c0_198 = arith.constant 0 : index
      %c0_199 = arith.constant 0 : index
      %266 = vector.load %arg8[%c0_197, %c0_198, %c0_199] : memref<48x48x128xbf16, #tpu.memory_space<vmem>>, vector<48x48x128xbf16>
      tpu.vector_store %arg8[%c0_197, %c0_198, %c0_199], %265 {strides = array<i32>} : memref<48x48x128xbf16, #tpu.memory_space<vmem>>, vector<48x48x128xbf16>,
      %c0_200 = arith.constant 0 : index
      %c0_201 = arith.constant 0 : index
      %c0_202 = arith.constant 0 : index
      %c0_203 = arith.constant 0 : index
      %267 = vector.load %arg3[%c0_200, %c0_201, %c0_202, %c0_203] : memref<1x16x16x128xbf16, #tpu.memory_space<vmem>>, vector<1x16x16x128xbf16>
      %268 = vector.shape_cast %267 : vector<1x16x16x128xbf16> to vector<16x16x128xbf16>
      %c16 = arith.constant 16 : index
      %c16_204 = arith.constant 16 : index
      %c0_205 = arith.constant 0 : index
      %269 = vector.load %arg8[%c16, %c16_204, %c0_205] : memref<48x48x128xbf16, #tpu.memory_space<vmem>>, vector<16x16x128xbf16>
      tpu.vector_store %arg8[%c16, %c16_204, %c0_205], %268 {strides = array<i32>} : memref<48x48x128xbf16, #tpu.memory_space<vmem>>, vector<16x16x128xbf16>,
    } else {
    }
    %c0_i32_1 = arith.constant 0 : i32
    %5 = arith.cmpi eq, %arg1, %c0_i32_1 : i32
    %6 = arith.extui %5 : i1 to i32
    %c0_i32_2 = arith.constant 0 : i32
    %7 = arith.cmpi ne, %6, %c0_i32_2 : i32
    scf.if %7 {
      %c0_196 = arith.constant 0 : index
      %c14 = arith.constant 14 : index
      %c0_197 = arith.constant 0 : index
      %265 = vector.load %arg8[%c0_196, %c14, %c0_197] : memref<48x48x128xbf16, #tpu.memory_space<vmem>>, vector<48x16x128xbf16>
      %c0_198 = arith.constant 0 : index
      %c0_199 = arith.constant 0 : index
      %c0_200 = arith.constant 0 : index
      %c0_201 = arith.constant 0 : index
      %266 = vector.load %arg9[%c0_198, %c0_199, %c0_200, %c0_201] : memref<3x48x16x128xbf16, #tpu.memory_space<vmem>>, vector<1x48x16x128xbf16>
      %267 = vector.shape_cast %266 : vector<1x48x16x128xbf16> to vector<48x16x128xbf16>
      %268 = vector.shape_cast %265 : vector<48x16x128xbf16> to vector<1x48x16x128xbf16>
      tpu.vector_store %arg9[%c0_198, %c0_199, %c0_200, %c0_201], %268 {strides = array<i32>} : memref<3x48x16x128xbf16, #tpu.memory_space<vmem>>, vector<1x48x16x128xbf16>,
      %c0_202 = arith.constant 0 : index
      %c16 = arith.constant 16 : index
      %c0_203 = arith.constant 0 : index
      %269 = vector.load %arg8[%c0_202, %c16, %c0_203] : memref<48x48x128xbf16, #tpu.memory_space<vmem>>, vector<48x16x128xbf16>
      %c1_204 = arith.constant 1 : index
      %c0_205 = arith.constant 0 : index
      %c0_206 = arith.constant 0 : index
      %c0_207 = arith.constant 0 : index
      %270 = vector.load %arg9[%c1_204, %c0_205, %c0_206, %c0_207] : memref<3x48x16x128xbf16, #tpu.memory_space<vmem>>, vector<1x48x16x128xbf16>
      %271 = vector.shape_cast %270 : vector<1x48x16x128xbf16> to vector<48x16x128xbf16>
      %272 = vector.shape_cast %269 : vector<48x16x128xbf16> to vector<1x48x16x128xbf16>
      tpu.vector_store %arg9[%c1_204, %c0_205, %c0_206, %c0_207], %272 {strides = array<i32>} : memref<3x48x16x128xbf16, #tpu.memory_space<vmem>>, vector<1x48x16x128xbf16>,
      %c0_208 = arith.constant 0 : index
      %c18 = arith.constant 18 : index
      %c0_209 = arith.constant 0 : index
      %273 = vector.load %arg8[%c0_208, %c18, %c0_209] : memref<48x48x128xbf16, #tpu.memory_space<vmem>>, vector<48x16x128xbf16>
      %c2_210 = arith.constant 2 : index
      %c0_211 = arith.constant 0 : index
      %c0_212 = arith.constant 0 : index
      %c0_213 = arith.constant 0 : index
      %274 = vector.load %arg9[%c2_210, %c0_211, %c0_212, %c0_213] : memref<3x48x16x128xbf16, #tpu.memory_space<vmem>>, vector<1x48x16x128xbf16>
      %275 = vector.shape_cast %274 : vector<1x48x16x128xbf16> to vector<48x16x128xbf16>
      %276 = vector.shape_cast %273 : vector<48x16x128xbf16> to vector<1x48x16x128xbf16>
      tpu.vector_store %arg9[%c2_210, %c0_211, %c0_212, %c0_213], %276 {strides = array<i32>} : memref<3x48x16x128xbf16, #tpu.memory_space<vmem>>, vector<1x48x16x128xbf16>,
    } else {
    }
    %c1_i32 = arith.constant 1 : i32
    %8 = arith.cmpi eq, %arg1, %c1_i32 : i32
    %9 = arith.extui %8 : i1 to i32
    %c0_i32_3 = arith.constant 0 : i32
    %10 = arith.cmpi ne, %9, %c0_i32_3 : i32
    scf.if %10 {
      %c0_196 = arith.constant 0 : index
      %c12 = arith.constant 12 : index
      %c0_197 = arith.constant 0 : index
      %265 = vector.load %arg8[%c0_196, %c12, %c0_197] : memref<48x48x128xbf16, #tpu.memory_space<vmem>>, vector<48x16x128xbf16>
      %c0_198 = arith.constant 0 : index
      %c0_199 = arith.constant 0 : index
      %c0_200 = arith.constant 0 : index
      %c0_201 = arith.constant 0 : index
      %266 = vector.load %arg9[%c0_198, %c0_199, %c0_200, %c0_201] : memref<3x48x16x128xbf16, #tpu.memory_space<vmem>>, vector<1x48x16x128xbf16>
      %267 = vector.shape_cast %266 : vector<1x48x16x128xbf16> to vector<48x16x128xbf16>
      %268 = vector.shape_cast %265 : vector<48x16x128xbf16> to vector<1x48x16x128xbf16>
      tpu.vector_store %arg9[%c0_198, %c0_199, %c0_200, %c0_201], %268 {strides = array<i32>} : memref<3x48x16x128xbf16, #tpu.memory_space<vmem>>, vector<1x48x16x128xbf16>,
      %c0_202 = arith.constant 0 : index
      %c16 = arith.constant 16 : index
      %c0_203 = arith.constant 0 : index
      %269 = vector.load %arg8[%c0_202, %c16, %c0_203] : memref<48x48x128xbf16, #tpu.memory_space<vmem>>, vector<48x16x128xbf16>
      %c1_204 = arith.constant 1 : index
      %c0_205 = arith.constant 0 : index
      %c0_206 = arith.constant 0 : index
      %c0_207 = arith.constant 0 : index
      %270 = vector.load %arg9[%c1_204, %c0_205, %c0_206, %c0_207] : memref<3x48x16x128xbf16, #tpu.memory_space<vmem>>, vector<1x48x16x128xbf16>
      %271 = vector.shape_cast %270 : vector<1x48x16x128xbf16> to vector<48x16x128xbf16>
      %272 = vector.shape_cast %269 : vector<48x16x128xbf16> to vector<1x48x16x128xbf16>
      tpu.vector_store %arg9[%c1_204, %c0_205, %c0_206, %c0_207], %272 {strides = array<i32>} : memref<3x48x16x128xbf16, #tpu.memory_space<vmem>>, vector<1x48x16x128xbf16>,
      %c0_208 = arith.constant 0 : index
      %c20 = arith.constant 20 : index
      %c0_209 = arith.constant 0 : index
      %273 = vector.load %arg8[%c0_208, %c20, %c0_209] : memref<48x48x128xbf16, #tpu.memory_space<vmem>>, vector<48x16x128xbf16>
      %c2_210 = arith.constant 2 : index
      %c0_211 = arith.constant 0 : index
      %c0_212 = arith.constant 0 : index
      %c0_213 = arith.constant 0 : index
      %274 = vector.load %arg9[%c2_210, %c0_211, %c0_212, %c0_213] : memref<3x48x16x128xbf16, #tpu.memory_space<vmem>>, vector<1x48x16x128xbf16>
      %275 = vector.shape_cast %274 : vector<1x48x16x128xbf16> to vector<48x16x128xbf16>
      %276 = vector.shape_cast %273 : vector<48x16x128xbf16> to vector<1x48x16x128xbf16>
      tpu.vector_store %arg9[%c2_210, %c0_211, %c0_212, %c0_213], %276 {strides = array<i32>} : memref<3x48x16x128xbf16, #tpu.memory_space<vmem>>, vector<1x48x16x128xbf16>,
    } else {
    }
    %c2_i32 = arith.constant 2 : i32
    %11 = arith.cmpi eq, %arg1, %c2_i32 : i32
    %12 = arith.extui %11 : i1 to i32
    %c0_i32_4 = arith.constant 0 : i32
    %13 = arith.cmpi ne, %12, %c0_i32_4 : i32
    scf.if %13 {
      %c0_196 = arith.constant 0 : index
      %c8_197 = arith.constant 8 : index
      %c0_198 = arith.constant 0 : index
      %265 = vector.load %arg8[%c0_196, %c8_197, %c0_198] : memref<48x48x128xbf16, #tpu.memory_space<vmem>>, vector<48x16x128xbf16>
      %c0_199 = arith.constant 0 : index
      %c0_200 = arith.constant 0 : index
      %c0_201 = arith.constant 0 : index
      %c0_202 = arith.constant 0 : index
      %266 = vector.load %arg9[%c0_199, %c0_200, %c0_201, %c0_202] : memref<3x48x16x128xbf16, #tpu.memory_space<vmem>>, vector<1x48x16x128xbf16>
      %267 = vector.shape_cast %266 : vector<1x48x16x128xbf16> to vector<48x16x128xbf16>
      %268 = vector.shape_cast %265 : vector<48x16x128xbf16> to vector<1x48x16x128xbf16>
      tpu.vector_store %arg9[%c0_199, %c0_200, %c0_201, %c0_202], %268 {strides = array<i32>} : memref<3x48x16x128xbf16, #tpu.memory_space<vmem>>, vector<1x48x16x128xbf16>,
      %c0_203 = arith.constant 0 : index
      %c16 = arith.constant 16 : index
      %c0_204 = arith.constant 0 : index
      %269 = vector.load %arg8[%c0_203, %c16, %c0_204] : memref<48x48x128xbf16, #tpu.memory_space<vmem>>, vector<48x16x128xbf16>
      %c1_205 = arith.constant 1 : index
      %c0_206 = arith.constant 0 : index
      %c0_207 = arith.constant 0 : index
      %c0_208 = arith.constant 0 : index
      %270 = vector.load %arg9[%c1_205, %c0_206, %c0_207, %c0_208] : memref<3x48x16x128xbf16, #tpu.memory_space<vmem>>, vector<1x48x16x128xbf16>
      %271 = vector.shape_cast %270 : vector<1x48x16x128xbf16> to vector<48x16x128xbf16>
      %272 = vector.shape_cast %269 : vector<48x16x128xbf16> to vector<1x48x16x128xbf16>
      tpu.vector_store %arg9[%c1_205, %c0_206, %c0_207, %c0_208], %272 {strides = array<i32>} : memref<3x48x16x128xbf16, #tpu.memory_space<vmem>>, vector<1x48x16x128xbf16>,
      %c0_209 = arith.constant 0 : index
      %c24 = arith.constant 24 : index
      %c0_210 = arith.constant 0 : index
      %273 = vector.load %arg8[%c0_209, %c24, %c0_210] : memref<48x48x128xbf16, #tpu.memory_space<vmem>>, vector<48x16x128xbf16>
      %c2_211 = arith.constant 2 : index
      %c0_212 = arith.constant 0 : index
      %c0_213 = arith.constant 0 : index
      %c0_214 = arith.constant 0 : index
      %274 = vector.load %arg9[%c2_211, %c0_212, %c0_213, %c0_214] : memref<3x48x16x128xbf16, #tpu.memory_space<vmem>>, vector<1x48x16x128xbf16>
      %275 = vector.shape_cast %274 : vector<1x48x16x128xbf16> to vector<48x16x128xbf16>
      %276 = vector.shape_cast %273 : vector<48x16x128xbf16> to vector<1x48x16x128xbf16>
      tpu.vector_store %arg9[%c2_211, %c0_212, %c0_213, %c0_214], %276 {strides = array<i32>} : memref<3x48x16x128xbf16, #tpu.memory_space<vmem>>, vector<1x48x16x128xbf16>,
    } else {
    }
    %c3_i32 = arith.constant 3 : i32
    %14 = arith.cmpi eq, %arg1, %c3_i32 : i32
    %15 = arith.extui %14 : i1 to i32
    %c0_i32_5 = arith.constant 0 : i32
    %16 = arith.cmpi ne, %15, %c0_i32_5 : i32
    scf.if %16 {
      %c0_196 = arith.constant 0 : index
      %c4_197 = arith.constant 4 : index
      %c0_198 = arith.constant 0 : index
      %265 = vector.load %arg8[%c0_196, %c4_197, %c0_198] : memref<48x48x128xbf16, #tpu.memory_space<vmem>>, vector<48x16x128xbf16>
      %c0_199 = arith.constant 0 : index
      %c0_200 = arith.constant 0 : index
      %c0_201 = arith.constant 0 : index
      %c0_202 = arith.constant 0 : index
      %266 = vector.load %arg9[%c0_199, %c0_200, %c0_201, %c0_202] : memref<3x48x16x128xbf16, #tpu.memory_space<vmem>>, vector<1x48x16x128xbf16>
      %267 = vector.shape_cast %266 : vector<1x48x16x128xbf16> to vector<48x16x128xbf16>
      %268 = vector.shape_cast %265 : vector<48x16x128xbf16> to vector<1x48x16x128xbf16>
      tpu.vector_store %arg9[%c0_199, %c0_200, %c0_201, %c0_202], %268 {strides = array<i32>} : memref<3x48x16x128xbf16, #tpu.memory_space<vmem>>, vector<1x48x16x128xbf16>,
      %c0_203 = arith.constant 0 : index
      %c16 = arith.constant 16 : index
      %c0_204 = arith.constant 0 : index
      %269 = vector.load %arg8[%c0_203, %c16, %c0_204] : memref<48x48x128xbf16, #tpu.memory_space<vmem>>, vector<48x16x128xbf16>
      %c1_205 = arith.constant 1 : index
      %c0_206 = arith.constant 0 : index
      %c0_207 = arith.constant 0 : index
      %c0_208 = arith.constant 0 : index
      %270 = vector.load %arg9[%c1_205, %c0_206, %c0_207, %c0_208] : memref<3x48x16x128xbf16, #tpu.memory_space<vmem>>, vector<1x48x16x128xbf16>
      %271 = vector.shape_cast %270 : vector<1x48x16x128xbf16> to vector<48x16x128xbf16>
      %272 = vector.shape_cast %269 : vector<48x16x128xbf16> to vector<1x48x16x128xbf16>
      tpu.vector_store %arg9[%c1_205, %c0_206, %c0_207, %c0_208], %272 {strides = array<i32>} : memref<3x48x16x128xbf16, #tpu.memory_space<vmem>>, vector<1x48x16x128xbf16>,
      %c0_209 = arith.constant 0 : index
      %c28 = arith.constant 28 : index
      %c0_210 = arith.constant 0 : index
      %273 = vector.load %arg8[%c0_209, %c28, %c0_210] : memref<48x48x128xbf16, #tpu.memory_space<vmem>>, vector<48x16x128xbf16>
      %c2_211 = arith.constant 2 : index
      %c0_212 = arith.constant 0 : index
      %c0_213 = arith.constant 0 : index
      %c0_214 = arith.constant 0 : index
      %274 = vector.load %arg9[%c2_211, %c0_212, %c0_213, %c0_214] : memref<3x48x16x128xbf16, #tpu.memory_space<vmem>>, vector<1x48x16x128xbf16>
      %275 = vector.shape_cast %274 : vector<1x48x16x128xbf16> to vector<48x16x128xbf16>
      %276 = vector.shape_cast %273 : vector<48x16x128xbf16> to vector<1x48x16x128xbf16>
      tpu.vector_store %arg9[%c2_211, %c0_212, %c0_213, %c0_214], %276 {strides = array<i32>} : memref<3x48x16x128xbf16, #tpu.memory_space<vmem>>, vector<1x48x16x128xbf16>,
    } else {
    }
    %cst = arith.constant 0.000000e+00 : f32
    %17 = vector.broadcast %cst : f32 to vector<1x128xf32>
    %cst_6 = arith.constant 0.000000e+00 : f32
    %18 = vector.broadcast %cst_6 : f32 to vector<1x128xf32>
    %cst_7 = arith.constant 0.000000e+00 : f32
    %19 = vector.broadcast %cst_7 : f32 to vector<128x128xf32>
    %c-1_i32 = arith.constant -1 : i32
    %20 = arith.muli %c-1_i32, %1 : i32
    %c16_i32 = arith.constant 16 : i32
    %21 = arith.addi %c16_i32, %20 : i32
    %c0_i32_8 = arith.constant 0 : i32
    %22 = arith.addi %21, %c0_i32_8 : i32
    %c0 = arith.constant 0 : index
    %23 = arith.index_cast %22 : i32 to index
    %c0_9 = arith.constant 0 : index
    %c0_10 = arith.constant 0 : index
    %24 = vector.load %arg9[%c0, %23, %c0_9, %c0_10] : memref<3x48x16x128xbf16, #tpu.memory_space<vmem>>, vector<1x8x16x128xbf16>
    %25 = vector.shape_cast %24 : vector<1x8x16x128xbf16> to vector<8x16x128xbf16>
    %26 = vector.shape_cast %25 : vector<8x16x128xbf16> to vector<128x128xbf16>
    %27 = arith.index_cast %arg1 : i32 to index
    %c0_11 = arith.constant 0 : index
    %c0_12 = arith.constant 0 : index
    %c0_13 = arith.constant 0 : index
    %28 = vector.load %arg4[%27, %c0_11, %c0_12, %c0_13] : memref<4x9x128x128xbf16, #tpu.memory_space<vmem>>, vector<1x1x128x128xbf16>
    %29 = vector.shape_cast %28 : vector<1x1x128x128xbf16> to vector<128x128xbf16>
    %cst_14 = arith.constant dense<0.000000e+00> : vector<128x128xf32>
    %30 = tpu.matmul %26, %29, %cst_14 {dimension_numbers = #tpu.dot_dimension_numbers<[1], [0], [0], [1], [0, 0, 1, 1], [], []>} : vector<128x128xbf16>, vector<128x128xbf16>, vector<128x128xf32> -> vector<128x128xf32>
    %31 = arith.addf %19, %30 : vector<128x128xf32>
    %c-1_i32_15 = arith.constant -1 : i32
    %32 = arith.muli %c-1_i32_15, %1 : i32
    %c16_i32_16 = arith.constant 16 : i32
    %33 = arith.addi %c16_i32_16, %32 : i32
    %c0_i32_17 = arith.constant 0 : i32
    %34 = arith.addi %33, %c0_i32_17 : i32
    %c1 = arith.constant 1 : index
    %35 = arith.index_cast %34 : i32 to index
    %c0_18 = arith.constant 0 : index
    %c0_19 = arith.constant 0 : index
    %36 = vector.load %arg9[%c1, %35, %c0_18, %c0_19] : memref<3x48x16x128xbf16, #tpu.memory_space<vmem>>, vector<1x8x16x128xbf16>
    %37 = vector.shape_cast %36 : vector<1x8x16x128xbf16> to vector<8x16x128xbf16>
    %38 = vector.shape_cast %37 : vector<8x16x128xbf16> to vector<128x128xbf16>
    %39 = arith.index_cast %arg1 : i32 to index
    %c1_20 = arith.constant 1 : index
    %c0_21 = arith.constant 0 : index
    %c0_22 = arith.constant 0 : index
    %40 = vector.load %arg4[%39, %c1_20, %c0_21, %c0_22] : memref<4x9x128x128xbf16, #tpu.memory_space<vmem>>, vector<1x1x128x128xbf16>
    %41 = vector.shape_cast %40 : vector<1x1x128x128xbf16> to vector<128x128xbf16>
    %cst_23 = arith.constant dense<0.000000e+00> : vector<128x128xf32>
    %42 = tpu.matmul %38, %41, %cst_23 {dimension_numbers = #tpu.dot_dimension_numbers<[1], [0], [0], [1], [0, 0, 1, 1], [], []>} : vector<128x128xbf16>, vector<128x128xbf16>, vector<128x128xf32> -> vector<128x128xf32>
    %43 = arith.addf %31, %42 : vector<128x128xf32>
    %c-1_i32_24 = arith.constant -1 : i32
    %44 = arith.muli %c-1_i32_24, %1 : i32
    %c16_i32_25 = arith.constant 16 : i32
    %45 = arith.addi %c16_i32_25, %44 : i32
    %c0_i32_26 = arith.constant 0 : i32
    %46 = arith.addi %45, %c0_i32_26 : i32
    %c2 = arith.constant 2 : index
    %47 = arith.index_cast %46 : i32 to index
    %c0_27 = arith.constant 0 : index
    %c0_28 = arith.constant 0 : index
    %48 = vector.load %arg9[%c2, %47, %c0_27, %c0_28] : memref<3x48x16x128xbf16, #tpu.memory_space<vmem>>, vector<1x8x16x128xbf16>
    %49 = vector.shape_cast %48 : vector<1x8x16x128xbf16> to vector<8x16x128xbf16>
    %50 = vector.shape_cast %49 : vector<8x16x128xbf16> to vector<128x128xbf16>
    %51 = arith.index_cast %arg1 : i32 to index
    %c2_29 = arith.constant 2 : index
    %c0_30 = arith.constant 0 : index
    %c0_31 = arith.constant 0 : index
    %52 = vector.load %arg4[%51, %c2_29, %c0_30, %c0_31] : memref<4x9x128x128xbf16, #tpu.memory_space<vmem>>, vector<1x1x128x128xbf16>
    %53 = vector.shape_cast %52 : vector<1x1x128x128xbf16> to vector<128x128xbf16>
    %cst_32 = arith.constant dense<0.000000e+00> : vector<128x128xf32>
    %54 = tpu.matmul %50, %53, %cst_32 {dimension_numbers = #tpu.dot_dimension_numbers<[1], [0], [0], [1], [0, 0, 1, 1], [], []>} : vector<128x128xbf16>, vector<128x128xbf16>, vector<128x128xf32> -> vector<128x128xf32>
    %55 = arith.addf %43, %54 : vector<128x128xf32>
    %c0_i32_33 = arith.constant 0 : i32
    %56 = arith.muli %c0_i32_33, %1 : i32
    %c16_i32_34 = arith.constant 16 : i32
    %57 = arith.addi %c16_i32_34, %56 : i32
    %c0_i32_35 = arith.constant 0 : i32
    %58 = arith.addi %57, %c0_i32_35 : i32
    %c0_36 = arith.constant 0 : index
    %59 = arith.index_cast %58 : i32 to index
    %c0_37 = arith.constant 0 : index
    %c0_38 = arith.constant 0 : index
    %60 = vector.load %arg9[%c0_36, %59, %c0_37, %c0_38] : memref<3x48x16x128xbf16, #tpu.memory_space<vmem>>, vector<1x8x16x128xbf16>
    %61 = vector.shape_cast %60 : vector<1x8x16x128xbf16> to vector<8x16x128xbf16>
    %62 = vector.shape_cast %61 : vector<8x16x128xbf16> to vector<128x128xbf16>
    %63 = arith.index_cast %arg1 : i32 to index
    %c3 = arith.constant 3 : index
    %c0_39 = arith.constant 0 : index
    %c0_40 = arith.constant 0 : index
    %64 = vector.load %arg4[%63, %c3, %c0_39, %c0_40] : memref<4x9x128x128xbf16, #tpu.memory_space<vmem>>, vector<1x1x128x128xbf16>
    %65 = vector.shape_cast %64 : vector<1x1x128x128xbf16> to vector<128x128xbf16>
    %cst_41 = arith.constant dense<0.000000e+00> : vector<128x128xf32>
    %66 = tpu.matmul %62, %65, %cst_41 {dimension_numbers = #tpu.dot_dimension_numbers<[1], [0], [0], [1], [0, 0, 1, 1], [], []>} : vector<128x128xbf16>, vector<128x128xbf16>, vector<128x128xf32> -> vector<128x128xf32>
    %67 = arith.addf %55, %66 : vector<128x128xf32>
    %c0_i32_42 = arith.constant 0 : i32
    %68 = arith.muli %c0_i32_42, %1 : i32
    %c16_i32_43 = arith.constant 16 : i32
    %69 = arith.addi %c16_i32_43, %68 : i32
    %c0_i32_44 = arith.constant 0 : i32
    %70 = arith.addi %69, %c0_i32_44 : i32
    %c1_45 = arith.constant 1 : index
    %71 = arith.index_cast %70 : i32 to index
    %c0_46 = arith.constant 0 : index
    %c0_47 = arith.constant 0 : index
    %72 = vector.load %arg9[%c1_45, %71, %c0_46, %c0_47] : memref<3x48x16x128xbf16, #tpu.memory_space<vmem>>, vector<1x8x16x128xbf16>
    %73 = vector.shape_cast %72 : vector<1x8x16x128xbf16> to vector<8x16x128xbf16>
    %74 = vector.shape_cast %73 : vector<8x16x128xbf16> to vector<128x128xbf16>
    %75 = arith.index_cast %arg1 : i32 to index
    %c4 = arith.constant 4 : index
    %c0_48 = arith.constant 0 : index
    %c0_49 = arith.constant 0 : index
    %76 = vector.load %arg4[%75, %c4, %c0_48, %c0_49] : memref<4x9x128x128xbf16, #tpu.memory_space<vmem>>, vector<1x1x128x128xbf16>
    %77 = vector.shape_cast %76 : vector<1x1x128x128xbf16> to vector<128x128xbf16>
    %cst_50 = arith.constant dense<0.000000e+00> : vector<128x128xf32>
    %78 = tpu.matmul %74, %77, %cst_50 {dimension_numbers = #tpu.dot_dimension_numbers<[1], [0], [0], [1], [0, 0, 1, 1], [], []>} : vector<128x128xbf16>, vector<128x128xbf16>, vector<128x128xf32> -> vector<128x128xf32>
    %79 = arith.addf %67, %78 : vector<128x128xf32>
    %c0_i32_51 = arith.constant 0 : i32
    %80 = arith.muli %c0_i32_51, %1 : i32
    %c16_i32_52 = arith.constant 16 : i32
    %81 = arith.addi %c16_i32_52, %80 : i32
    %c0_i32_53 = arith.constant 0 : i32
    %82 = arith.addi %81, %c0_i32_53 : i32
    %c2_54 = arith.constant 2 : index
    %83 = arith.index_cast %82 : i32 to index
    %c0_55 = arith.constant 0 : index
    %c0_56 = arith.constant 0 : index
    %84 = vector.load %arg9[%c2_54, %83, %c0_55, %c0_56] : memref<3x48x16x128xbf16, #tpu.memory_space<vmem>>, vector<1x8x16x128xbf16>
    %85 = vector.shape_cast %84 : vector<1x8x16x128xbf16> to vector<8x16x128xbf16>
    %86 = vector.shape_cast %85 : vector<8x16x128xbf16> to vector<128x128xbf16>
    %87 = arith.index_cast %arg1 : i32 to index
    %c5 = arith.constant 5 : index
    %c0_57 = arith.constant 0 : index
    %c0_58 = arith.constant 0 : index
    %88 = vector.load %arg4[%87, %c5, %c0_57, %c0_58] : memref<4x9x128x128xbf16, #tpu.memory_space<vmem>>, vector<1x1x128x128xbf16>
    %89 = vector.shape_cast %88 : vector<1x1x128x128xbf16> to vector<128x128xbf16>
    %cst_59 = arith.constant dense<0.000000e+00> : vector<128x128xf32>
    %90 = tpu.matmul %86, %89, %cst_59 {dimension_numbers = #tpu.dot_dimension_numbers<[1], [0], [0], [1], [0, 0, 1, 1], [], []>} : vector<128x128xbf16>, vector<128x128xbf16>, vector<128x128xf32> -> vector<128x128xf32>
    %91 = arith.addf %79, %90 : vector<128x128xf32>
    %c1_i32_60 = arith.constant 1 : i32
    %92 = arith.muli %c1_i32_60, %1 : i32
    %c16_i32_61 = arith.constant 16 : i32
    %93 = arith.addi %c16_i32_61, %92 : i32
    %c0_i32_62 = arith.constant 0 : i32
    %94 = arith.addi %93, %c0_i32_62 : i32
    %c0_63 = arith.constant 0 : index
    %95 = arith.index_cast %94 : i32 to index
    %c0_64 = arith.constant 0 : index
    %c0_65 = arith.constant 0 : index
    %96 = vector.load %arg9[%c0_63, %95, %c0_64, %c0_65] : memref<3x48x16x128xbf16, #tpu.memory_space<vmem>>, vector<1x8x16x128xbf16>
    %97 = vector.shape_cast %96 : vector<1x8x16x128xbf16> to vector<8x16x128xbf16>
    %98 = vector.shape_cast %97 : vector<8x16x128xbf16> to vector<128x128xbf16>
    %99 = arith.index_cast %arg1 : i32 to index
    %c6 = arith.constant 6 : index
    %c0_66 = arith.constant 0 : index
    %c0_67 = arith.constant 0 : index
    %100 = vector.load %arg4[%99, %c6, %c0_66, %c0_67] : memref<4x9x128x128xbf16, #tpu.memory_space<vmem>>, vector<1x1x128x128xbf16>
    %101 = vector.shape_cast %100 : vector<1x1x128x128xbf16> to vector<128x128xbf16>
    %cst_68 = arith.constant dense<0.000000e+00> : vector<128x128xf32>
    %102 = tpu.matmul %98, %101, %cst_68 {dimension_numbers = #tpu.dot_dimension_numbers<[1], [0], [0], [1], [0, 0, 1, 1], [], []>} : vector<128x128xbf16>, vector<128x128xbf16>, vector<128x128xf32> -> vector<128x128xf32>
    %103 = arith.addf %91, %102 : vector<128x128xf32>
    %c1_i32_69 = arith.constant 1 : i32
    %104 = arith.muli %c1_i32_69, %1 : i32
    %c16_i32_70 = arith.constant 16 : i32
    %105 = arith.addi %c16_i32_70, %104 : i32
    %c0_i32_71 = arith.constant 0 : i32
    %106 = arith.addi %105, %c0_i32_71 : i32
    %c1_72 = arith.constant 1 : index
    %107 = arith.index_cast %106 : i32 to index
    %c0_73 = arith.constant 0 : index
    %c0_74 = arith.constant 0 : index
    %108 = vector.load %arg9[%c1_72, %107, %c0_73, %c0_74] : memref<3x48x16x128xbf16, #tpu.memory_space<vmem>>, vector<1x8x16x128xbf16>
    %109 = vector.shape_cast %108 : vector<1x8x16x128xbf16> to vector<8x16x128xbf16>
    %110 = vector.shape_cast %109 : vector<8x16x128xbf16> to vector<128x128xbf16>
    %111 = arith.index_cast %arg1 : i32 to index
    %c7 = arith.constant 7 : index
    %c0_75 = arith.constant 0 : index
    %c0_76 = arith.constant 0 : index
    %112 = vector.load %arg4[%111, %c7, %c0_75, %c0_76] : memref<4x9x128x128xbf16, #tpu.memory_space<vmem>>, vector<1x1x128x128xbf16>
    %113 = vector.shape_cast %112 : vector<1x1x128x128xbf16> to vector<128x128xbf16>
    %cst_77 = arith.constant dense<0.000000e+00> : vector<128x128xf32>
    %114 = tpu.matmul %110, %113, %cst_77 {dimension_numbers = #tpu.dot_dimension_numbers<[1], [0], [0], [1], [0, 0, 1, 1], [], []>} : vector<128x128xbf16>, vector<128x128xbf16>, vector<128x128xf32> -> vector<128x128xf32>
    %115 = arith.addf %103, %114 : vector<128x128xf32>
    %c1_i32_78 = arith.constant 1 : i32
    %116 = arith.muli %c1_i32_78, %1 : i32
    %c16_i32_79 = arith.constant 16 : i32
    %117 = arith.addi %c16_i32_79, %116 : i32
    %c0_i32_80 = arith.constant 0 : i32
    %118 = arith.addi %117, %c0_i32_80 : i32
    %c2_81 = arith.constant 2 : index
    %119 = arith.index_cast %118 : i32 to index
    %c0_82 = arith.constant 0 : index
    %c0_83 = arith.constant 0 : index
    %120 = vector.load %arg9[%c2_81, %119, %c0_82, %c0_83] : memref<3x48x16x128xbf16, #tpu.memory_space<vmem>>, vector<1x8x16x128xbf16>
    %121 = vector.shape_cast %120 : vector<1x8x16x128xbf16> to vector<8x16x128xbf16>
    %122 = vector.shape_cast %121 : vector<8x16x128xbf16> to vector<128x128xbf16>
    %123 = arith.index_cast %arg1 : i32 to index
    %c8 = arith.constant 8 : index
    %c0_84 = arith.constant 0 : index
    %c0_85 = arith.constant 0 : index
    %124 = vector.load %arg4[%123, %c8, %c0_84, %c0_85] : memref<4x9x128x128xbf16, #tpu.memory_space<vmem>>, vector<1x1x128x128xbf16>
    %125 = vector.shape_cast %124 : vector<1x1x128x128xbf16> to vector<128x128xbf16>
    %cst_86 = arith.constant dense<0.000000e+00> : vector<128x128xf32>
    %126 = tpu.matmul %122, %125, %cst_86 {dimension_numbers = #tpu.dot_dimension_numbers<[1], [0], [0], [1], [0, 0, 1, 1], [], []>} : vector<128x128xbf16>, vector<128x128xbf16>, vector<128x128xf32> -> vector<128x128xf32>
    %127 = arith.addf %115, %126 : vector<128x128xf32>
    %128 = arith.truncf %127 : vector<128x128xf32> to vector<128x128xbf16>
    %c0_87 = arith.constant 0 : index
    %c0_88 = arith.constant 0 : index
    %c0_89 = arith.constant 0 : index
    %c0_90 = arith.constant 0 : index
    %129 = vector.load %arg5[%c0_87, %c0_88, %c0_89, %c0_90] : memref<1x1x256x128xbf16, #tpu.memory_space<vmem>>, vector<1x1x128x128xbf16>
    %130 = vector.shape_cast %129 : vector<1x1x128x128xbf16> to vector<128x128xbf16>
    %131 = vector.shape_cast %128 : vector<128x128xbf16> to vector<1x1x128x128xbf16>
    tpu.vector_store %arg5[%c0_87, %c0_88, %c0_89, %c0_90], %131 {strides = array<i32>} : memref<1x1x256x128xbf16, #tpu.memory_space<vmem>>, vector<1x1x128x128xbf16>,
    %cst_91 = arith.constant dense<0.000000e+00> : vector<128xf32>
    %132 = vector.multi_reduction <add>, %127, %cst_91 [0] : vector<128x128xf32> to vector<128xf32>
    %133 = vector.shape_cast %132 : vector<128xf32> to vector<1x128xf32>
    %134 = arith.addf %17, %133 : vector<1x128xf32>
    %135 = arith.mulf %127, %127 : vector<128x128xf32>
    %cst_92 = arith.constant dense<0.000000e+00> : vector<128xf32>
    %136 = vector.multi_reduction <add>, %135, %cst_92 [0] : vector<128x128xf32> to vector<128xf32>
    %137 = vector.shape_cast %136 : vector<128xf32> to vector<1x128xf32>
    %138 = arith.addf %18, %137 : vector<1x128xf32>
    %cst_93 = arith.constant 0.000000e+00 : f32
    %139 = vector.broadcast %cst_93 : f32 to vector<128x128xf32>
    %c-1_i32_94 = arith.constant -1 : i32
    %140 = arith.muli %c-1_i32_94, %1 : i32
    %c16_i32_95 = arith.constant 16 : i32
    %141 = arith.addi %c16_i32_95, %140 : i32
    %c8_i32 = arith.constant 8 : i32
    %142 = arith.addi %141, %c8_i32 : i32
    %c0_96 = arith.constant 0 : index
    %143 = arith.index_cast %142 : i32 to index
    %c0_97 = arith.constant 0 : index
    %c0_98 = arith.constant 0 : index
    %144 = vector.load %arg9[%c0_96, %143, %c0_97, %c0_98] : memref<3x48x16x128xbf16, #tpu.memory_space<vmem>>, vector<1x8x16x128xbf16>
    %145 = vector.shape_cast %144 : vector<1x8x16x128xbf16> to vector<8x16x128xbf16>
    %146 = vector.shape_cast %145 : vector<8x16x128xbf16> to vector<128x128xbf16>
    %147 = arith.index_cast %arg1 : i32 to index
    %c0_99 = arith.constant 0 : index
    %c0_100 = arith.constant 0 : index
    %c0_101 = arith.constant 0 : index
    %148 = vector.load %arg4[%147, %c0_99, %c0_100, %c0_101] : memref<4x9x128x128xbf16, #tpu.memory_space<vmem>>, vector<1x1x128x128xbf16>
    %149 = vector.shape_cast %148 : vector<1x1x128x128xbf16> to vector<128x128xbf16>
    %cst_102 = arith.constant dense<0.000000e+00> : vector<128x128xf32>
    %150 = tpu.matmul %146, %149, %cst_102 {dimension_numbers = #tpu.dot_dimension_numbers<[1], [0], [0], [1], [0, 0, 1, 1], [], []>} : vector<128x128xbf16>, vector<128x128xbf16>, vector<128x128xf32> -> vector<128x128xf32>
    %151 = arith.addf %139, %150 : vector<128x128xf32>
    %c-1_i32_103 = arith.constant -1 : i32
    %152 = arith.muli %c-1_i32_103, %1 : i32
    %c16_i32_104 = arith.constant 16 : i32
    %153 = arith.addi %c16_i32_104, %152 : i32
    %c8_i32_105 = arith.constant 8 : i32
    %154 = arith.addi %153, %c8_i32_105 : i32
    %c1_106 = arith.constant 1 : index
    %155 = arith.index_cast %154 : i32 to index
    %c0_107 = arith.constant 0 : index
    %c0_108 = arith.constant 0 : index
    %156 = vector.load %arg9[%c1_106, %155, %c0_107, %c0_108] : memref<3x48x16x128xbf16, #tpu.memory_space<vmem>>, vector<1x8x16x128xbf16>
    %157 = vector.shape_cast %156 : vector<1x8x16x128xbf16> to vector<8x16x128xbf16>
    %158 = vector.shape_cast %157 : vector<8x16x128xbf16> to vector<128x128xbf16>
    %159 = arith.index_cast %arg1 : i32 to index
    %c1_109 = arith.constant 1 : index
    %c0_110 = arith.constant 0 : index
    %c0_111 = arith.constant 0 : index
    %160 = vector.load %arg4[%159, %c1_109, %c0_110, %c0_111] : memref<4x9x128x128xbf16, #tpu.memory_space<vmem>>, vector<1x1x128x128xbf16>
    %161 = vector.shape_cast %160 : vector<1x1x128x128xbf16> to vector<128x128xbf16>
    %cst_112 = arith.constant dense<0.000000e+00> : vector<128x128xf32>
    %162 = tpu.matmul %158, %161, %cst_112 {dimension_numbers = #tpu.dot_dimension_numbers<[1], [0], [0], [1], [0, 0, 1, 1], [], []>} : vector<128x128xbf16>, vector<128x128xbf16>, vector<128x128xf32> -> vector<128x128xf32>
    %163 = arith.addf %151, %162 : vector<128x128xf32>
    %c-1_i32_113 = arith.constant -1 : i32
    %164 = arith.muli %c-1_i32_113, %1 : i32
    %c16_i32_114 = arith.constant 16 : i32
    %165 = arith.addi %c16_i32_114, %164 : i32
    %c8_i32_115 = arith.constant 8 : i32
    %166 = arith.addi %165, %c8_i32_115 : i32
    %c2_116 = arith.constant 2 : index
    %167 = arith.index_cast %166 : i32 to index
    %c0_117 = arith.constant 0 : index
    %c0_118 = arith.constant 0 : index
    %168 = vector.load %arg9[%c2_116, %167, %c0_117, %c0_118] : memref<3x48x16x128xbf16, #tpu.memory_space<vmem>>, vector<1x8x16x128xbf16>
    %169 = vector.shape_cast %168 : vector<1x8x16x128xbf16> to vector<8x16x128xbf16>
    %170 = vector.shape_cast %169 : vector<8x16x128xbf16> to vector<128x128xbf16>
    %171 = arith.index_cast %arg1 : i32 to index
    %c2_119 = arith.constant 2 : index
    %c0_120 = arith.constant 0 : index
    %c0_121 = arith.constant 0 : index
    %172 = vector.load %arg4[%171, %c2_119, %c0_120, %c0_121] : memref<4x9x128x128xbf16, #tpu.memory_space<vmem>>, vector<1x1x128x128xbf16>
    %173 = vector.shape_cast %172 : vector<1x1x128x128xbf16> to vector<128x128xbf16>
    %cst_122 = arith.constant dense<0.000000e+00> : vector<128x128xf32>
    %174 = tpu.matmul %170, %173, %cst_122 {dimension_numbers = #tpu.dot_dimension_numbers<[1], [0], [0], [1], [0, 0, 1, 1], [], []>} : vector<128x128xbf16>, vector<128x128xbf16>, vector<128x128xf32> -> vector<128x128xf32>
    %175 = arith.addf %163, %174 : vector<128x128xf32>
    %c0_i32_123 = arith.constant 0 : i32
    %176 = arith.muli %c0_i32_123, %1 : i32
    %c16_i32_124 = arith.constant 16 : i32
    %177 = arith.addi %c16_i32_124, %176 : i32
    %c8_i32_125 = arith.constant 8 : i32
    %178 = arith.addi %177, %c8_i32_125 : i32
    %c0_126 = arith.constant 0 : index
    %179 = arith.index_cast %178 : i32 to index
    %c0_127 = arith.constant 0 : index
    %c0_128 = arith.constant 0 : index
    %180 = vector.load %arg9[%c0_126, %179, %c0_127, %c0_128] : memref<3x48x16x128xbf16, #tpu.memory_space<vmem>>, vector<1x8x16x128xbf16>
    %181 = vector.shape_cast %180 : vector<1x8x16x128xbf16> to vector<8x16x128xbf16>
    %182 = vector.shape_cast %181 : vector<8x16x128xbf16> to vector<128x128xbf16>
    %183 = arith.index_cast %arg1 : i32 to index
    %c3_129 = arith.constant 3 : index
    %c0_130 = arith.constant 0 : index
    %c0_131 = arith.constant 0 : index
    %184 = vector.load %arg4[%183, %c3_129, %c0_130, %c0_131] : memref<4x9x128x128xbf16, #tpu.memory_space<vmem>>, vector<1x1x128x128xbf16>
    %185 = vector.shape_cast %184 : vector<1x1x128x128xbf16> to vector<128x128xbf16>
    %cst_132 = arith.constant dense<0.000000e+00> : vector<128x128xf32>
    %186 = tpu.matmul %182, %185, %cst_132 {dimension_numbers = #tpu.dot_dimension_numbers<[1], [0], [0], [1], [0, 0, 1, 1], [], []>} : vector<128x128xbf16>, vector<128x128xbf16>, vector<128x128xf32> -> vector<128x128xf32>
    %187 = arith.addf %175, %186 : vector<128x128xf32>
    %c0_i32_133 = arith.constant 0 : i32
    %188 = arith.muli %c0_i32_133, %1 : i32
    %c16_i32_134 = arith.constant 16 : i32
    %189 = arith.addi %c16_i32_134, %188 : i32
    %c8_i32_135 = arith.constant 8 : i32
    %190 = arith.addi %189, %c8_i32_135 : i32
    %c1_136 = arith.constant 1 : index
    %191 = arith.index_cast %190 : i32 to index
    %c0_137 = arith.constant 0 : index
    %c0_138 = arith.constant 0 : index
    %192 = vector.load %arg9[%c1_136, %191, %c0_137, %c0_138] : memref<3x48x16x128xbf16, #tpu.memory_space<vmem>>, vector<1x8x16x128xbf16>
    %193 = vector.shape_cast %192 : vector<1x8x16x128xbf16> to vector<8x16x128xbf16>
    %194 = vector.shape_cast %193 : vector<8x16x128xbf16> to vector<128x128xbf16>
    %195 = arith.index_cast %arg1 : i32 to index
    %c4_139 = arith.constant 4 : index
    %c0_140 = arith.constant 0 : index
    %c0_141 = arith.constant 0 : index
    %196 = vector.load %arg4[%195, %c4_139, %c0_140, %c0_141] : memref<4x9x128x128xbf16, #tpu.memory_space<vmem>>, vector<1x1x128x128xbf16>
    %197 = vector.shape_cast %196 : vector<1x1x128x128xbf16> to vector<128x128xbf16>
    %cst_142 = arith.constant dense<0.000000e+00> : vector<128x128xf32>
    %198 = tpu.matmul %194, %197, %cst_142 {dimension_numbers = #tpu.dot_dimension_numbers<[1], [0], [0], [1], [0, 0, 1, 1], [], []>} : vector<128x128xbf16>, vector<128x128xbf16>, vector<128x128xf32> -> vector<128x128xf32>
    %199 = arith.addf %187, %198 : vector<128x128xf32>
    %c0_i32_143 = arith.constant 0 : i32
    %200 = arith.muli %c0_i32_143, %1 : i32
    %c16_i32_144 = arith.constant 16 : i32
    %201 = arith.addi %c16_i32_144, %200 : i32
    %c8_i32_145 = arith.constant 8 : i32
    %202 = arith.addi %201, %c8_i32_145 : i32
    %c2_146 = arith.constant 2 : index
    %203 = arith.index_cast %202 : i32 to index
    %c0_147 = arith.constant 0 : index
    %c0_148 = arith.constant 0 : index
    %204 = vector.load %arg9[%c2_146, %203, %c0_147, %c0_148] : memref<3x48x16x128xbf16, #tpu.memory_space<vmem>>, vector<1x8x16x128xbf16>
    %205 = vector.shape_cast %204 : vector<1x8x16x128xbf16> to vector<8x16x128xbf16>
    %206 = vector.shape_cast %205 : vector<8x16x128xbf16> to vector<128x128xbf16>
    %207 = arith.index_cast %arg1 : i32 to index
    %c5_149 = arith.constant 5 : index
    %c0_150 = arith.constant 0 : index
    %c0_151 = arith.constant 0 : index
    %208 = vector.load %arg4[%207, %c5_149, %c0_150, %c0_151] : memref<4x9x128x128xbf16, #tpu.memory_space<vmem>>, vector<1x1x128x128xbf16>
    %209 = vector.shape_cast %208 : vector<1x1x128x128xbf16> to vector<128x128xbf16>
    %cst_152 = arith.constant dense<0.000000e+00> : vector<128x128xf32>
    %210 = tpu.matmul %206, %209, %cst_152 {dimension_numbers = #tpu.dot_dimension_numbers<[1], [0], [0], [1], [0, 0, 1, 1], [], []>} : vector<128x128xbf16>, vector<128x128xbf16>, vector<128x128xf32> -> vector<128x128xf32>
    %211 = arith.addf %199, %210 : vector<128x128xf32>
    %c1_i32_153 = arith.constant 1 : i32
    %212 = arith.muli %c1_i32_153, %1 : i32
    %c16_i32_154 = arith.constant 16 : i32
    %213 = arith.addi %c16_i32_154, %212 : i32
    %c8_i32_155 = arith.constant 8 : i32
    %214 = arith.addi %213, %c8_i32_155 : i32
    %c0_156 = arith.constant 0 : index
    %215 = arith.index_cast %214 : i32 to index
    %c0_157 = arith.constant 0 : index
    %c0_158 = arith.constant 0 : index
    %216 = vector.load %arg9[%c0_156, %215, %c0_157, %c0_158] : memref<3x48x16x128xbf16, #tpu.memory_space<vmem>>, vector<1x8x16x128xbf16>
    %217 = vector.shape_cast %216 : vector<1x8x16x128xbf16> to vector<8x16x128xbf16>
    %218 = vector.shape_cast %217 : vector<8x16x128xbf16> to vector<128x128xbf16>
    %219 = arith.index_cast %arg1 : i32 to index
    %c6_159 = arith.constant 6 : index
    %c0_160 = arith.constant 0 : index
    %c0_161 = arith.constant 0 : index
    %220 = vector.load %arg4[%219, %c6_159, %c0_160, %c0_161] : memref<4x9x128x128xbf16, #tpu.memory_space<vmem>>, vector<1x1x128x128xbf16>
    %221 = vector.shape_cast %220 : vector<1x1x128x128xbf16> to vector<128x128xbf16>
    %cst_162 = arith.constant dense<0.000000e+00> : vector<128x128xf32>
    %222 = tpu.matmul %218, %221, %cst_162 {dimension_numbers = #tpu.dot_dimension_numbers<[1], [0], [0], [1], [0, 0, 1, 1], [], []>} : vector<128x128xbf16>, vector<128x128xbf16>, vector<128x128xf32> -> vector<128x128xf32>
    %223 = arith.addf %211, %222 : vector<128x128xf32>
    %c1_i32_163 = arith.constant 1 : i32
    %224 = arith.muli %c1_i32_163, %1 : i32
    %c16_i32_164 = arith.constant 16 : i32
    %225 = arith.addi %c16_i32_164, %224 : i32
    %c8_i32_165 = arith.constant 8 : i32
    %226 = arith.addi %225, %c8_i32_165 : i32
    %c1_166 = arith.constant 1 : index
    %227 = arith.index_cast %226 : i32 to index
    %c0_167 = arith.constant 0 : index
    %c0_168 = arith.constant 0 : index
    %228 = vector.load %arg9[%c1_166, %227, %c0_167, %c0_168] : memref<3x48x16x128xbf16, #tpu.memory_space<vmem>>, vector<1x8x16x128xbf16>
    %229 = vector.shape_cast %228 : vector<1x8x16x128xbf16> to vector<8x16x128xbf16>
    %230 = vector.shape_cast %229 : vector<8x16x128xbf16> to vector<128x128xbf16>
    %231 = arith.index_cast %arg1 : i32 to index
    %c7_169 = arith.constant 7 : index
    %c0_170 = arith.constant 0 : index
    %c0_171 = arith.constant 0 : index
    %232 = vector.load %arg4[%231, %c7_169, %c0_170, %c0_171] : memref<4x9x128x128xbf16, #tpu.memory_space<vmem>>, vector<1x1x128x128xbf16>
    %233 = vector.shape_cast %232 : vector<1x1x128x128xbf16> to vector<128x128xbf16>
    %cst_172 = arith.constant dense<0.000000e+00> : vector<128x128xf32>
    %234 = tpu.matmul %230, %233, %cst_172 {dimension_numbers = #tpu.dot_dimension_numbers<[1], [0], [0], [1], [0, 0, 1, 1], [], []>} : vector<128x128xbf16>, vector<128x128xbf16>, vector<128x128xf32> -> vector<128x128xf32>
    %235 = arith.addf %223, %234 : vector<128x128xf32>
    %c1_i32_173 = arith.constant 1 : i32
    %236 = arith.muli %c1_i32_173, %1 : i32
    %c16_i32_174 = arith.constant 16 : i32
    %237 = arith.addi %c16_i32_174, %236 : i32
    %c8_i32_175 = arith.constant 8 : i32
    %238 = arith.addi %237, %c8_i32_175 : i32
    %c2_176 = arith.constant 2 : index
    %239 = arith.index_cast %238 : i32 to index
    %c0_177 = arith.constant 0 : index
    %c0_178 = arith.constant 0 : index
    %240 = vector.load %arg9[%c2_176, %239, %c0_177, %c0_178] : memref<3x48x16x128xbf16, #tpu.memory_space<vmem>>, vector<1x8x16x128xbf16>
    %241 = vector.shape_cast %240 : vector<1x8x16x128xbf16> to vector<8x16x128xbf16>
    %242 = vector.shape_cast %241 : vector<8x16x128xbf16> to vector<128x128xbf16>
    %243 = arith.index_cast %arg1 : i32 to index
    %c8_179 = arith.constant 8 : index
    %c0_180 = arith.constant 0 : index
    %c0_181 = arith.constant 0 : index
    %244 = vector.load %arg4[%243, %c8_179, %c0_180, %c0_181] : memref<4x9x128x128xbf16, #tpu.memory_space<vmem>>, vector<1x1x128x128xbf16>
    %245 = vector.shape_cast %244 : vector<1x1x128x128xbf16> to vector<128x128xbf16>
    %cst_182 = arith.constant dense<0.000000e+00> : vector<128x128xf32>
    %246 = tpu.matmul %242, %245, %cst_182 {dimension_numbers = #tpu.dot_dimension_numbers<[1], [0], [0], [1], [0, 0, 1, 1], [], []>} : vector<128x128xbf16>, vector<128x128xbf16>, vector<128x128xf32> -> vector<128x128xf32>
    %247 = arith.addf %235, %246 : vector<128x128xf32>
    %248 = arith.truncf %247 : vector<128x128xf32> to vector<128x128xbf16>
    %c0_183 = arith.constant 0 : index
    %c0_184 = arith.constant 0 : index
    %c128 = arith.constant 128 : index
    %c0_185 = arith.constant 0 : index
    %249 = vector.load %arg5[%c0_183, %c0_184, %c128, %c0_185] : memref<1x1x256x128xbf16, #tpu.memory_space<vmem>>, vector<1x1x128x128xbf16>
    %250 = vector.shape_cast %249 : vector<1x1x128x128xbf16> to vector<128x128xbf16>
    %251 = vector.shape_cast %248 : vector<128x128xbf16> to vector<1x1x128x128xbf16>
    tpu.vector_store %arg5[%c0_183, %c0_184, %c128, %c0_185], %251 {strides = array<i32>} : memref<1x1x256x128xbf16, #tpu.memory_space<vmem>>, vector<1x1x128x128xbf16>,
    %cst_186 = arith.constant dense<0.000000e+00> : vector<128xf32>
    %252 = vector.multi_reduction <add>, %247, %cst_186 [0] : vector<128x128xf32> to vector<128xf32>
    %253 = vector.shape_cast %252 : vector<128xf32> to vector<1x128xf32>
    %254 = arith.addf %134, %253 : vector<1x128xf32>
    %255 = arith.mulf %247, %247 : vector<128x128xf32>
    %cst_187 = arith.constant dense<0.000000e+00> : vector<128xf32>
    %256 = vector.multi_reduction <add>, %255, %cst_187 [0] : vector<128x128xf32> to vector<128xf32>
    %257 = vector.shape_cast %256 : vector<128xf32> to vector<1x128xf32>
    %258 = arith.addf %138, %257 : vector<1x128xf32>
    %c0_188 = arith.constant 0 : index
    %c0_189 = arith.constant 0 : index
    %c0_190 = arith.constant 0 : index
    %c0_191 = arith.constant 0 : index
    %259 = vector.load %arg6[%c0_188, %c0_189, %c0_190, %c0_191] : memref<1x1x1x128xf32, #tpu.memory_space<vmem>>, vector<1x1x1x128xf32>
    %260 = vector.shape_cast %259 : vector<1x1x1x128xf32> to vector<1x128xf32>
    %261 = vector.shape_cast %254 : vector<1x128xf32> to vector<1x1x1x128xf32>
    tpu.vector_store %arg6[%c0_188, %c0_189, %c0_190, %c0_191], %261 {strides = array<i32>} : memref<1x1x1x128xf32, #tpu.memory_space<vmem>>, vector<1x1x1x128xf32>,
    %c0_192 = arith.constant 0 : index
    %c0_193 = arith.constant 0 : index
    %c0_194 = arith.constant 0 : index
    %c0_195 = arith.constant 0 : index
    %262 = vector.load %arg7[%c0_192, %c0_193, %c0_194, %c0_195] : memref<1x1x1x128xf32, #tpu.memory_space<vmem>>, vector<1x1x1x128xf32>
    %263 = vector.shape_cast %262 : vector<1x1x1x128xf32> to vector<1x128xf32>
    %264 = vector.shape_cast %258 : vector<1x128xf32> to vector<1x1x1x128xf32>
    tpu.vector_store %arg7[%c0_192, %c0_193, %c0_194, %c0_195], %264 {strides = array<i32>} : memref<1x1x1x128xf32, #tpu.memory_space<vmem>>, vector<1x1x1x128xf32>,
    return
  }
  func.func @transform_0(%arg0: i32, %arg1: i32, %arg2: memref<4xi32, #tpu.memory_space<smem>>) -> (i32, i32, i32, i32) {
    %c0_i32 = arith.constant 0 : i32
    %c0_i32_0 = arith.constant 0 : i32
    %c0_i32_1 = arith.constant 0 : i32
    %c0_i32_2 = arith.constant 0 : i32
    return %arg0, %c0_i32, %c0_i32_0, %c0_i32_1 : i32, i32, i32, i32
  }
  func.func @transform_1(%arg0: i32, %arg1: i32, %arg2: memref<4xi32, #tpu.memory_space<smem>>) -> (i32, i32, i32, i32) {
    %c0_i32 = arith.constant 0 : i32
    %c0_i32_0 = arith.constant 0 : i32
    %c0_i32_1 = arith.constant 0 : i32
    %c0_i32_2 = arith.constant 0 : i32
    %c0_i32_3 = arith.constant 0 : i32
    return %c0_i32, %c0_i32_0, %c0_i32_1, %c0_i32_2 : i32, i32, i32, i32
  }
  func.func @transform_2(%arg0: i32, %arg1: i32, %arg2: memref<4xi32, #tpu.memory_space<smem>>) -> (i32, i32, i32, i32) {
    %c0_i32 = arith.constant 0 : i32
    %c0_i32_0 = arith.constant 0 : i32
    %c0_i32_1 = arith.constant 0 : i32
    return %arg0, %arg1, %c0_i32, %c0_i32_0 : i32, i32, i32, i32
  }
  func.func @transform_3(%arg0: i32, %arg1: i32, %arg2: memref<4xi32, #tpu.memory_space<smem>>) -> (i32, i32, i32, i32) {
    %c0_i32 = arith.constant 0 : i32
    %c0_i32_0 = arith.constant 0 : i32
    %c0_i32_1 = arith.constant 0 : i32
    return %arg0, %arg1, %c0_i32, %c0_i32_0 : i32, i32, i32, i32
  }
  func.func @transform_4(%arg0: i32, %arg1: i32, %arg2: memref<4xi32, #tpu.memory_space<smem>>) -> (i32, i32, i32, i32) {
    %c0_i32 = arith.constant 0 : i32
    %c0_i32_0 = arith.constant 0 : i32
    %c0_i32_1 = arith.constant 0 : i32
    return %arg0, %arg1, %c0_i32, %c0_i32_0 : i32, i32, i32, i32
  }
}

module attributes {stable_mosaic.version = 11 : i64} {
  func.func @_bn_relu_kernel(%arg0: i32, %arg1: i32, %arg2: i32, %arg3: memref<1x1x256x128xbf16, #tpu.memory_space<vmem>>, %arg4: memref<4x1x128xf32, #tpu.memory_space<vmem>>, %arg5: memref<4x1x128xf32, #tpu.memory_space<vmem>>, %arg6: memref<1x1x256x128xf32, #tpu.memory_space<vmem>>) attributes {dimension_semantics = [#tpu.dimension_semantics<parallel>, #tpu.dimension_semantics<parallel>, #tpu.dimension_semantics<arbitrary>], iteration_bounds = array<i64: 2, 4, 1>, scalar_prefetch = 0 : i64, scratch_operands = 0 : i64, tpu.core_type = #tpu.core_type<tc>, window_params = [{transform_indices = @transform_0, window_bounds = array<i64: 1, 1, 256, 128>}, {pipeline_mode = #tpu.pipeline_mode<synchronous>, transform_indices = @transform_1, window_bounds = array<i64: 4, 1, 128>}, {pipeline_mode = #tpu.pipeline_mode<synchronous>, transform_indices = @transform_2, window_bounds = array<i64: 4, 1, 128>}, {transform_indices = @transform_3, window_bounds = array<i64: 1, 1, 256, 128>}]} {
    %c0 = arith.constant 0 : index
    %c0_0 = arith.constant 0 : index
    %c0_1 = arith.constant 0 : index
    %c0_2 = arith.constant 0 : index
    %0 = vector.load %arg3[%c0, %c0_0, %c0_1, %c0_2] : memref<1x1x256x128xbf16, #tpu.memory_space<vmem>>, vector<1x1x256x128xbf16>
    %1 = vector.shape_cast %0 : vector<1x1x256x128xbf16> to vector<256x128xbf16>
    %2 = arith.extf %1 : vector<256x128xbf16> to vector<256x128xf32>
    %3 = arith.index_cast %arg1 : i32 to index
    %c0_3 = arith.constant 0 : index
    %c0_4 = arith.constant 0 : index
    %4 = vector.load %arg4[%3, %c0_3, %c0_4] : memref<4x1x128xf32, #tpu.memory_space<vmem>>, vector<1x1x128xf32>
    %5 = vector.shape_cast %4 : vector<1x1x128xf32> to vector<1x128xf32>
    %6 = vector.broadcast %5 : vector<1x128xf32> to vector<256x128xf32>
    %7 = arith.mulf %2, %6 : vector<256x128xf32>
    %8 = arith.index_cast %arg1 : i32 to index
    %c0_5 = arith.constant 0 : index
    %c0_6 = arith.constant 0 : index
    %9 = vector.load %arg5[%8, %c0_5, %c0_6] : memref<4x1x128xf32, #tpu.memory_space<vmem>>, vector<1x1x128xf32>
    %10 = vector.shape_cast %9 : vector<1x1x128xf32> to vector<1x128xf32>
    %11 = vector.broadcast %10 : vector<1x128xf32> to vector<256x128xf32>
    %12 = arith.addf %7, %11 : vector<256x128xf32>
    %cst = arith.constant 0.000000e+00 : f32
    %13 = vector.broadcast %cst : f32 to vector<256x128xf32>
    %14 = arith.maximumf %12, %13 : vector<256x128xf32>
    %c0_7 = arith.constant 0 : index
    %c0_8 = arith.constant 0 : index
    %c0_9 = arith.constant 0 : index
    %c0_10 = arith.constant 0 : index
    %15 = vector.load %arg6[%c0_7, %c0_8, %c0_9, %c0_10] : memref<1x1x256x128xf32, #tpu.memory_space<vmem>>, vector<1x1x256x128xf32>
    %16 = vector.shape_cast %15 : vector<1x1x256x128xf32> to vector<256x128xf32>
    %17 = vector.shape_cast %14 : vector<256x128xf32> to vector<1x1x256x128xf32>
    tpu.vector_store %arg6[%c0_7, %c0_8, %c0_9, %c0_10], %17 {strides = array<i32>} : memref<1x1x256x128xf32, #tpu.memory_space<vmem>>, vector<1x1x256x128xf32>,
    return
  }
  func.func @transform_0(%arg0: i32, %arg1: i32, %arg2: i32) -> (i32, i32, i32, i32) {
    %c0_i32 = arith.constant 0 : i32
    %c0_i32_0 = arith.constant 0 : i32
    return %arg0, %arg1, %arg2, %c0_i32 : i32, i32, i32, i32
  }
  func.func @transform_1(%arg0: i32, %arg1: i32, %arg2: i32) -> (i32, i32, i32) {
    %c0_i32 = arith.constant 0 : i32
    %c0_i32_0 = arith.constant 0 : i32
    %c0_i32_1 = arith.constant 0 : i32
    %c0_i32_2 = arith.constant 0 : i32
    return %c0_i32, %c0_i32_0, %c0_i32_1 : i32, i32, i32
  }
  func.func @transform_2(%arg0: i32, %arg1: i32, %arg2: i32) -> (i32, i32, i32) {
    %c0_i32 = arith.constant 0 : i32
    %c0_i32_0 = arith.constant 0 : i32
    %c0_i32_1 = arith.constant 0 : i32
    %c0_i32_2 = arith.constant 0 : i32
    return %c0_i32, %c0_i32_0, %c0_i32_1 : i32, i32, i32
  }
  func.func @transform_3(%arg0: i32, %arg1: i32, %arg2: i32) -> (i32, i32, i32, i32) {
    %c0_i32 = arith.constant 0 : i32
    %c0_i32_0 = arith.constant 0 : i32
    return %arg0, %arg1, %arg2, %c0_i32 : i32, i32, i32, i32
  }
}

</mosaic_0001>

<bundles_post_ra>
// kernel: scale_pyramid_module.3
= control target key start
LH: loop header
LB: loop body
LE: loop exit
PB: predicated region body
PF: predicated region fallthrough
CT: control target
= control target key end

     0   :  { %s754_s12 = smov 0   ;;  %s756_s13 = smov 0   ;;  %s941_s0 = inlined_call_operand.vmem [shape: bf16[2,4,256,128], index: 0, kind: input, shape index: {}]   ;;  %s942_s1 = inlined_call_operand.vmem [shape: f32[4,1,128], index: 1, kind: input, shape index: {}]   ;;  %s943_s2 = inlined_call_operand.vmem [shape: f32[4,1,128], index: 2, kind: input, shape index: {}]   ;;  %s944_s3 = inlined_call_operand.vmem [shape: f32[2,4,256,128], index: 3, kind: output, shape index: {}]  }
   0x1   :  { %s758_s14 = smov 0   ;;  %s760_s15 = smov 0  }
   0x2   :  { %s762_s16 = smov 0  }
   0x3 LB: > { %s28_s17 = sadd.s32 1, %s724_s14  ;;  %s32_s18 = sadd.s32 1, %s728_s15  ;;  %s732_s16 = sphi %s762_s16, %s13_s16   ;;  %s728_s15 = sphi %s760_s15, %s948_s15   ;;  %s724_s14 = sphi %s758_s14, %s947_s14   ;;  %s720_s13 = sphi %s756_s13, %s946_s13   ;;  %s716_s12 = sphi %s754_s12, %s945_s12  }
   0x4   : > { %p30_p0 = scmp.ge.s32.totalorder %s28_s17, 4  ;;  %p564_p1 = scmp.ge.s32.totalorder %s732_s16, 1 }
   0x5   : > { %p173_p2 = scmp.lt.s32.totalorder %s732_s16, 9 }
   0x6   : > { %s950_s17 = smov (%p30_p0, %s28_s17), 0  ;;  %s952_s18 = smov (!%p30_p0, %s32_s18), %s728_s15 }
   0x7   : > { %p174_p3 = pnand %p564_p1, %p173_p2  ;;  %p34_p4 = scmp.ge.s32.totalorder %s952_s18, 2 }
   0x8   : > { %p214_p5 = scmp.lt.s32.totalorder (!%p174_p3), %s720_s13, 1  ;;  %p216_p6 = scmp.lt.s32.totalorder (!%p174_p3), %s716_s12, 3 }
   0x9   : > { %s954_s18 = smov (%p34_p4, %s952_s18), 0  ;;  %177 = sbr.rel (%p174_p3) target bundleno = 60 (0x3c), region = 32 }
   0xa   : > { %s305_s21 = scalar_lea.vmem (!%p174_p3), %s942_s1, %s716_s12  ;;  %s342_s24 = scalar_lea.vmem (!%p174_p3), %s943_s2, %s716_s12 }
   0xe   : > { %s956_s13 = smov (!%p214_p5, %s720_s13), 1  ;;  %s958_s12 = smov (!%p216_p6, %s716_s12), 3  ;;  %v804_v0 = vld [vmem:[%s305_s21] ss:$0 sm:$0xff] }
   0xf   : > { %s566_s25 = sshll.u32 %s956_s13, 7  ;;  %s565_s26 = sshll.u32 %s958_s12, 5  ;;  %v809_v5 = vld [vmem:[%s342_s24] ss:$0 sm:$0xff] }
  0x10   : > { %s796_s27 = sadd.s32 %s566_s25, %s565_s26 }
  0x11   : > { %s567_s28 = sshll.u32 %s796_s27, 2  ;;  %s570_s5 = sshll.u32 %s796_s27, 3 }
  0x12   : > { %s802_s4 = scalar_lea.vmem %s941_s0, %s567_s28  ;;  %s828_s8 = scalar_lea.vmem %s944_s3, %s570_s5 }
  0x13   : > { %v574_v1 = vld [vmem:[%s802_s4] sm:$0xff]   ;;  %v637_v2 = vld [vmem:[%s802_s4 + $0x8] sm:$0xff]   ;;  %v638_v3 = vld [vmem:[%s802_s4 + $0x10] sm:$0xff]  }
  0x14   : > { %v575_v4 = vunpack.c.l.bf16 %v574_v1  ;;  %v576_v6 = vunpack.c.h.bf16 %v574_v1  ;;  %v579_v7 = vunpack.c.l.bf16 %v637_v2  ;;  %v580_v8 = vunpack.c.h.bf16 %v637_v2  ;;  %v639_v9 = vld [vmem:[%s802_s4 + $0x18] sm:$0xff]   ;;  %v640_v30 = vld [vmem:[%s802_s4 + $0x20] sm:$0xff]   ;;  %v641_v31 = vld [vmem:[%s802_s4 + $0x28] sm:$0xff]  }
  0x15   : > { %v583_v10 = vunpack.c.l.bf16 %v638_v3  ;;  %v584_v11 = vunpack.c.h.bf16 %v638_v3  ;;  %v587_v12 = vunpack.c.l.bf16 %v639_v9  ;;  %v588_v13 = vunpack.c.h.bf16 %v639_v9  ;;  %v642_v36 = vld [vmem:[%s802_s4 + $0x30] sm:$0xff]   ;;  %v643_v37 = vld [vmem:[%s802_s4 + $0x38] sm:$0xff]   ;;  %v644_v3 = vld [vmem:[%s802_s4 + $0x40] sm:$0xff]  }
  0x16   : > { %v310_v14 = vmul.f32 %v804_v0, %v575_v4  ;;  %v311_v15 = vmul.f32 %v804_v0, %v576_v6  ;;  %v312_v16 = vmul.f32 %v804_v0, %v579_v7  ;;  %v313_v17 = vmul.f32 %v804_v0, %v580_v8  ;;  %v645_v4 = vld [vmem:[%s802_s4 + $0x48] sm:$0xff]   ;;  %v646_v6 = vld [vmem:[%s802_s4 + $0x50] sm:$0xff]  }
  0x17   : > { %v314_v18 = vmul.f32 %v804_v0, %v583_v10  ;;  %v315_v19 = vmul.f32 %v804_v0, %v584_v11  ;;  %v316_v20 = vmul.f32 %v804_v0, %v587_v12  ;;  %v317_v21 = vmul.f32 %v804_v0, %v588_v13  ;;  %v647_v11 = vld [vmem:[%s802_s4 + $0x58] sm:$0xff]  }
  0x18   : > { %v347_v22 = vadd.f32 %v809_v5, %v310_v14  ;;  %v348_v23 = vadd.f32 %v809_v5, %v311_v15  ;;  %v349_v24 = vadd.f32 %v809_v5, %v312_v16  ;;  %v350_v25 = vadd.f32 %v809_v5, %v313_v17 }
  0x19   : > { %v351_v26 = vadd.f32 %v809_v5, %v314_v18  ;;  %v352_v27 = vadd.f32 %v809_v5, %v315_v19  ;;  %v353_v28 = vadd.f32 %v809_v5, %v316_v20  ;;  %v354_v29 = vadd.f32 %v809_v5, %v317_v21 }
  0x1a   : > { %v379_v32 = vmax.f32 %v347_v22, 0.0  ;;  %v380_v33 = vmax.f32 %v348_v23, 0.0  ;;  %v381_v34 = vmax.f32 %v349_v24, 0.0  ;;  %v382_v35 = vmax.f32 %v350_v25, 0.0 }
  0x1b   : > { %v383_v38 = vmax.f32 %v351_v26, 0.0  ;;  %v384_v39 = vmax.f32 %v352_v27, 0.0  ;;  %v385_v40 = vmax.f32 %v353_v28, 0.0  ;;  %v386_v41 = vmax.f32 %v354_v29, 0.0 }
  0x1c   : > { %411 = vst [vmem:[%s828_s8] sm:$0xff] %v379_v32  ;;  %v591_v42 = vunpack.c.l.bf16 %v640_v30  ;;  %v592_v43 = vunpack.c.h.bf16 %v640_v30  ;;  %v595_v44 = vunpack.c.l.bf16 %v641_v31  ;;  %v596_v45 = vunpack.c.h.bf16 %v641_v31 }
  0x1d   : > { %412 = vst [vmem:[%s828_s8 + $0x8] sm:$0xff] %v380_v33  ;;  %v599_v46 = vunpack.c.l.bf16 %v642_v36  ;;  %v600_v47 = vunpack.c.h.bf16 %v642_v36  ;;  %v603_v48 = vunpack.c.l.bf16 %v643_v37  ;;  %v604_v49 = vunpack.c.h.bf16 %v643_v37 }
  0x1e   : > { %413 = vst [vmem:[%s828_s8 + $0x10] sm:$0xff] %v381_v34  ;;  %v318_v50 = vmul.f32 %v804_v0, %v591_v42  ;;  %v319_v51 = vmul.f32 %v804_v0, %v592_v43  ;;  %v320_v52 = vmul.f32 %v804_v0, %v595_v44  ;;  %v321_v53 = vmul.f32 %v804_v0, %v596_v45  ;;  %v650_v42 = vld [vmem:[%s802_s4 + $0x70] sm:$0xff]  }
  0x1f   : > { %414 = vst [vmem:[%s828_s8 + $0x18] sm:$0xff] %v382_v35  ;;  %v322_v54 = vmul.f32 %v804_v0, %v599_v46  ;;  %v323_v55 = vmul.f32 %v804_v0, %v600_v47  ;;  %v324_v56 = vmul.f32 %v804_v0, %v603_v48  ;;  %v325_v57 = vmul.f32 %v804_v0, %v604_v49  ;;  %v651_v47 = vld [vmem:[%s802_s4 + $0x78] sm:$0xff]  }
  0x20   : > { %415 = vst [vmem:[%s828_s8 + $0x20] sm:$0xff] %v383_v38  ;;  %v355_v58 = vadd.f32 %v809_v5, %v318_v50  ;;  %v356_v59 = vadd.f32 %v809_v5, %v319_v51  ;;  %v357_v60 = vadd.f32 %v809_v5, %v320_v52  ;;  %v358_v61 = vadd.f32 %v809_v5, %v321_v53 }
  0x21   : > { %416 = vst [vmem:[%s828_s8 + $0x28] sm:$0xff] %v384_v39  ;;  %v359_v62 = vadd.f32 %v809_v5, %v322_v54  ;;  %v360_v63 = vadd.f32 %v809_v5, %v323_v55  ;;  %v361_v1 = vadd.f32 %v809_v5, %v324_v56  ;;  %v362_v2 = vadd.f32 %v809_v5, %v325_v57 }
  0x22   : > { %417 = vst [vmem:[%s828_s8 + $0x30] sm:$0xff] %v385_v40  ;;  %v387_v7 = vmax.f32 %v355_v58, 0.0  ;;  %v388_v8 = vmax.f32 %v356_v59, 0.0  ;;  %v389_v9 = vmax.f32 %v357_v60, 0.0  ;;  %v390_v10 = vmax.f32 %v358_v61, 0.0  ;;  %v648_v40 = vld [vmem:[%s802_s4 + $0x60] sm:$0xff]  }
  0x23   : > { %418 = vst [vmem:[%s828_s8 + $0x38] sm:$0xff] %v386_v41  ;;  %v391_v12 = vmax.f32 %v359_v62, 0.0  ;;  %v392_v13 = vmax.f32 %v360_v63, 0.0  ;;  %v393_v14 = vmax.f32 %v361_v1, 0.0  ;;  %v394_v15 = vmax.f32 %v362_v2, 0.0  ;;  %v649_v41 = vld [vmem:[%s802_s4 + $0x68] sm:$0xff]  }
  0x24   : > { %419 = vst [vmem:[%s828_s8 + $0x40] sm:$0xff] %v387_v7  ;;  %v607_v16 = vunpack.c.l.bf16 %v644_v3  ;;  %v608_v17 = vunpack.c.h.bf16 %v644_v3  ;;  %v611_v18 = vunpack.c.l.bf16 %v645_v4  ;;  %v612_v19 = vunpack.c.h.bf16 %v645_v4 }
  0x25   : > { %420 = vst [vmem:[%s828_s8 + $0x48] sm:$0xff] %v388_v8  ;;  %v615_v20 = vunpack.c.l.bf16 %v646_v6  ;;  %v616_v21 = vunpack.c.h.bf16 %v646_v6  ;;  %v619_v22 = vunpack.c.l.bf16 %v647_v11  ;;  %v620_v23 = vunpack.c.h.bf16 %v647_v11 }
  0x26   : > { %421 = vst [vmem:[%s828_s8 + $0x50] sm:$0xff] %v389_v9  ;;  %v326_v24 = vmul.f32 %v804_v0, %v607_v16  ;;  %v327_v25 = vmul.f32 %v804_v0, %v608_v17  ;;  %v328_v26 = vmul.f32 %v804_v0, %v611_v18  ;;  %v329_v27 = vmul.f32 %v804_v0, %v612_v19 }
  0x27   : > { %422 = vst [vmem:[%s828_s8 + $0x58] sm:$0xff] %v390_v10  ;;  %v330_v28 = vmul.f32 %v804_v0, %v615_v20  ;;  %v331_v29 = vmul.f32 %v804_v0, %v616_v21  ;;  %v332_v30 = vmul.f32 %v804_v0, %v619_v22  ;;  %v333_v31 = vmul.f32 %v804_v0, %v620_v23 }
  0x28   : > { %423 = vst [vmem:[%s828_s8 + $0x60] sm:$0xff] %v391_v12  ;;  %v363_v32 = vadd.f32 %v809_v5, %v326_v24  ;;  %v364_v33 = vadd.f32 %v809_v5, %v327_v25  ;;  %v365_v34 = vadd.f32 %v809_v5, %v328_v26  ;;  %v366_v35 = vadd.f32 %v809_v5, %v329_v27 }
  0x29   : > { %424 = vst [vmem:[%s828_s8 + $0x68] sm:$0xff] %v392_v13  ;;  %v367_v36 = vadd.f32 %v809_v5, %v330_v28  ;;  %v368_v37 = vadd.f32 %v809_v5, %v331_v29  ;;  %v369_v38 = vadd.f32 %v809_v5, %v332_v30  ;;  %v370_v39 = vadd.f32 %v809_v5, %v333_v31 }
  0x2a   : > { %425 = vst [vmem:[%s828_s8 + $0x70] sm:$0xff] %v393_v14  ;;  %v395_v43 = vmax.f32 %v363_v32, 0.0  ;;  %v396_v44 = vmax.f32 %v364_v33, 0.0  ;;  %v397_v45 = vmax.f32 %v365_v34, 0.0  ;;  %v398_v46 = vmax.f32 %v366_v35, 0.0 }
  0x2b   : > { %426 = vst [vmem:[%s828_s8 + $0x78] sm:$0xff] %v394_v15  ;;  %v399_v48 = vmax.f32 %v367_v36, 0.0  ;;  %v400_v49 = vmax.f32 %v368_v37, 0.0  ;;  %v401_v50 = vmax.f32 %v369_v38, 0.0  ;;  %v402_v51 = vmax.f32 %v370_v39, 0.0 }
  0x2c   : > { %427 = vst [vmem:[%s828_s8 + $0x80] sm:$0xff] %v395_v43  ;;  %v623_v52 = vunpack.c.l.bf16 %v648_v40  ;;  %v624_v53 = vunpack.c.h.bf16 %v648_v40  ;;  %v627_v54 = vunpack.c.l.bf16 %v649_v41  ;;  %v628_v55 = vunpack.c.h.bf16 %v649_v41 }
  0x2d   : > { %428 = vst [vmem:[%s828_s8 + $0x88] sm:$0xff] %v396_v44  ;;  %v631_v56 = vunpack.c.l.bf16 %v650_v42  ;;  %v632_v57 = vunpack.c.h.bf16 %v650_v42  ;;  %v635_v58 = vunpack.c.l.bf16 %v651_v47  ;;  %v636_v59 = vunpack.c.h.bf16 %v651_v47 }
  0x2e   : > { %429 = vst [vmem:[%s828_s8 + $0x90] sm:$0xff] %v397_v45  ;;  %v334_v60 = vmul.f32 %v804_v0, %v623_v52  ;;  %v335_v61 = vmul.f32 %v804_v0, %v624_v53  ;;  %v336_v62 = vmul.f32 %v804_v0, %v627_v54  ;;  %v337_v63 = vmul.f32 %v804_v0, %v628_v55 }
  0x2f   : > { %430 = vst [vmem:[%s828_s8 + $0x98] sm:$0xff] %v398_v46  ;;  %v338_v1 = vmul.f32 %v804_v0, %v631_v56  ;;  %v339_v2 = vmul.f32 %v804_v0, %v632_v57  ;;  %v340_v3 = vmul.f32 %v804_v0, %v635_v58  ;;  %v341_v4 = vmul.f32 %v804_v0, %v636_v59 }
  0x30   : > { %431 = vst [vmem:[%s828_s8 + $0xa0] sm:$0xff] %v399_v48  ;;  %v371_v6 = vadd.f32 %v809_v5, %v334_v60  ;;  %v372_v7 = vadd.f32 %v809_v5, %v335_v61  ;;  %v373_v8 = vadd.f32 %v809_v5, %v336_v62  ;;  %v374_v9 = vadd.f32 %v809_v5, %v337_v63 }
  0x31   : > { %432 = vst [vmem:[%s828_s8 + $0xa8] sm:$0xff] %v400_v49  ;;  %v375_v10 = vadd.f32 %v809_v5, %v338_v1  ;;  %v376_v11 = vadd.f32 %v809_v5, %v339_v2  ;;  %v377_v14 = vadd.f32 %v809_v5, %v340_v3  ;;  %v378_v16 = vadd.f32 %v809_v5, %v341_v4 }
  0x32   : > { %433 = vst [vmem:[%s828_s8 + $0xb0] sm:$0xff] %v401_v50  ;;  %v403_v0 = vmax.f32 %v371_v6, 0.0  ;;  %v404_v12 = vmax.f32 %v372_v7, 0.0  ;;  %v405_v13 = vmax.f32 %v373_v8, 0.0  ;;  %v406_v15 = vmax.f32 %v374_v9, 0.0 }
  0x33   : > { %434 = vst [vmem:[%s828_s8 + $0xb8] sm:$0xff] %v402_v51  ;;  %v407_v17 = vmax.f32 %v375_v10, 0.0  ;;  %v408_v18 = vmax.f32 %v376_v11, 0.0  ;;  %v409_v19 = vmax.f32 %v377_v14, 0.0  ;;  %v410_v20 = vmax.f32 %v378_v16, 0.0 }
  0x34   : > { %435 = vst [vmem:[%s828_s8 + $0xc0] sm:$0xff] %v403_v0 }
  0x35   : > { %436 = vst [vmem:[%s828_s8 + $0xc8] sm:$0xff] %v404_v12 }
  0x36   : > { %437 = vst [vmem:[%s828_s8 + $0xd0] sm:$0xff] %v405_v13 }
  0x37   : > { %438 = vst [vmem:[%s828_s8 + $0xd8] sm:$0xff] %v406_v15 }
  0x38   : > { %439 = vst [vmem:[%s828_s8 + $0xe0] sm:$0xff] %v407_v17 }
  0x39   : > { %440 = vst [vmem:[%s828_s8 + $0xe8] sm:$0xff] %v408_v18 }
  0x3a   : > { %441 = vst [vmem:[%s828_s8 + $0xf0] sm:$0xff] %v409_v19 }
  0x3b   : > { %442 = vst [vmem:[%s828_s8 + $0xf8] sm:$0xff] %v410_v20 }
  0x3c PF: > { %s13_s16 = sadd.s32 1, %s732_s16   ;;  %s945_s12 = smov %s724_s14 }
  0x3d   : > { %p10_p7 = scmp.ge.s32.totalorder %s13_s16, 10   ;;  %s946_s13 = smov %s728_s15 }
  0x3e   : > { %s947_s14 = smov %s950_s17  ;;  %s948_s15 = smov %s954_s18 }
  0x3f   :  { %12 = sbr.rel (!%p10_p7) target bundleno = 3 (0x3), region = 64 }

// kernel: scale_pyramid_module.2
= control target key start
LH: loop header
LB: loop body
LE: loop exit
PB: predicated region body
PF: predicated region fallthrough
CT: control target
= control target key end

     0   :  { %s13030_s21 = smov [#allocation5]   ;;  %s17057_s0 = inlined_call_operand.vmem [shape: s32[4], index: 0, kind: input, shape index: {}]   ;;  %s17058_s1 = inlined_call_operand.vmem [shape: bf16[2,16,16,128], index: 1, kind: input, shape index: {}]   ;;  %s17059_s2 = inlined_call_operand.vmem [shape: bf16[4,9,128,128], index: 2, kind: input, shape index: {}]   ;;  %s17060_s3 = inlined_call_operand.vmem [shape: bf16[2,4,256,128], index: 3, kind: output, shape index: {0}]   ;;  %s17061_s4 = inlined_call_operand.vmem [shape: f32[2,4,1,128], index: 4, kind: output, shape index: {1}]   ;;  %s17062_s5 = inlined_call_operand.vmem [shape: f32[2,4,1,128], index: 5, kind: output, shape index: {2}]  }
   0x1   :  { %s12_s20 = sshll.u32 %s17057_s0, 4  ;;  %s13_s20 = int_to_ptr.vmem [resolvable:$true] %s12_s20 }
   0x2   :  { %15 = dma.vmem_to_smem %s13_s20, 16, %s13030_s21, [#allocation4] }
   0x3   :  { %13008 = dma.done.wait [#allocation4], 16 }
   0x4   :  { %13009 = vsyncadd [#allocation4], 4294967280 }
   0x5   :  { %18 = sfence }
   0x6   :  { %s13065_s22 = smov 0   ;;  %s13067_s23 = smov 0  }
   0x7   :  { %s13069_s24 = smov 0   ;;  %s13071_s25 = smov 0  }
   0x8   :  { %s13073_s26 = smov 0  }
   0x9 LB: > { %s33_s0 = sadd.s32 1, %s13020_s24  ;;  %s36_s27 = sadd.s32 1, %s13024_s25  ;;  %s13028_s26 = sphi %s13073_s26, %s24_s26   ;;  %s13024_s25 = sphi %s13071_s25, %s17499_s25   ;;  %s13020_s24 = sphi %s13069_s24, %s17498_s24   ;;  %s13016_s23 = sphi %s13067_s23, %s17497_s23   ;;  %s13012_s22 = sphi %s13065_s22, %s17496_s22  }
   0xa   : > { %p34_p0 = scmp.ge.s32.totalorder %s33_s0, 4  ;;  %p10622_p1 = scmp.ge.s32.totalorder %s13028_s26, 1 }
   0xb   : > { %p194_p2 = scmp.lt.s32.totalorder %s13028_s26, 9 }
   0xc   : > { %s17501_s0 = smov (%p34_p0, %s33_s0), 0  ;;  %s17503_s27 = smov (!%p34_p0, %s36_s27), %s13024_s25 }
   0xd   : > { %p195_p3 = pnand %p10622_p1, %p194_p2  ;;  %p38_p4 = scmp.ge.s32.totalorder %s17503_s27, 2 }
   0xe   : > { %p238_p5 = scmp.lt.s32.totalorder (!%p195_p3), %s13016_s23, 1  ;;  %p245_p6 = scmp.lt.s32.totalorder (!%p195_p3), %s13012_s22, 3 }
   0xf   : > { %s17505_s27 = smov (%p38_p4, %s17503_s27), 0  ;;  %198 = sbr.rel (%p195_p3) target bundleno = 2114 (0x842), region = 28 }
  0x10   : > { %s13099_s28 = sld [smem:[#allocation5 + %s13012_s22]] (!%p195_p3)  ;;  %p10630_p7 = scmp.ne.s32.totalorder (!%p195_p3), %s13012_s22, 0 }
  0x14   : > { %s17507_s23 = smov (!%p238_p5, %s13016_s23), 1 }
  0x15   : > { %s246_s29 = scalar_select %p245_p6, %s13012_s22, 3 }
  0x16   : > { %s12523_s30 = sshll.u32 %s17507_s23, 7  ;;  %s10628_s6 = sshll.u32 %s17507_s23, 2 }
  0x17   : > { %s13105_s9 = scalar_lea.vmem %s17058_s1, %s12523_s30  ;;  %s10625_s10 = sshll.u32 %s246_s29, 5 }
  0x18   : > { %s249_s11 = sadd.s32 %s12523_s30, %s10625_s10  ;;  %s13107_s12 = sadd.s32 %s10628_s6, %s246_s29 }
  0x19   : > { %s10627_s13 = sshll.u32 %s249_s11, 2  ;;  %s258_s16 = scalar_lea.vmem %s17061_s4, %s13107_s12 }
  0x1a   : > { %s13116_s19 = scalar_lea.vmem %s17060_s3, %s10627_s13  ;;  %s265_s23 = scalar_lea.vmem %s17062_s5, %s13107_s12 }
  0x1b   : > { %271 = sbr.rel (%p10630_p7) target bundleno = 650 (0x28a), region = 32 }
  0x20   : > { %v13031_v0 = vmov 0   ;;  %v560_v1 = vld [vmem:[%s13105_s9] sm:$0xff]   ;;  %v562_v2 = vld [vmem:[%s13105_s9 + $0x8] sm:$0xff]   ;;  %v564_v3 = vld [vmem:[%s13105_s9 + $0x10] sm:$0xff]   ;;  %vm913_vm0 = vcmask 1040384   ;;  %vm914_vm1 = vcmask 1044484  }
  0x21   : > { %274 = vst [vmem:[#allocation2 + $0x8] sm:$0xf] %v13031_v0  ;;  %v566_v4 = vld [vmem:[%s13105_s9 + $0x18] sm:$0xff]   ;;  %v568_v5 = vld [vmem:[%s13105_s9 + $0x20] sm:$0xff]   ;;  %v570_v6 = vld [vmem:[%s13105_s9 + $0x28] sm:$0xff]   ;;  %vm1925_vm3 = vcmask 1042432  }
  0x22   : > { %272 = vst [vmem:[#allocation2] sm:$0xf] %v13031_v0  ;;  %v572_v7 = vld [vmem:[%s13105_s9 + $0x30] sm:$0xff]   ;;  %v574_v8 = vld [vmem:[%s13105_s9 + $0x38] sm:$0xff]   ;;  %v576_v9 = vld [vmem:[%s13105_s9 + $0x40] sm:$0xff]   ;;  %vm1926_vm4 = vcmask 1046532  }
  0x23   : > { %273 = vst [vmem:[#allocation2 + $0x4] sm:$0xf] %v13031_v0  ;;  %v578_v10 = vld [vmem:[%s13105_s9 + $0x48] sm:$0xff]   ;;  %v580_v11 = vld [vmem:[%s13105_s9 + $0x50] sm:$0xff]   ;;  %v582_v12 = vld [vmem:[%s13105_s9 + $0x58] sm:$0xff]  }
  0x24   : > { %275 = vst [vmem:[#allocation2 + $0xc] sm:$0xf] %v13031_v0  ;;  %v584_v13 = vld [vmem:[%s13105_s9 + $0x60] sm:$0xff]   ;;  %v586_v14 = vld [vmem:[%s13105_s9 + $0x68] sm:$0xff]   ;;  %v588_v15 = vld [vmem:[%s13105_s9 + $0x70] sm:$0xff]  }
  0x25   : > { %276 = vst [vmem:[#allocation2 + $0x10] sm:$0xf] %v13031_v0  ;;  %v590_v16 = vld [vmem:[%s13105_s9 + $0x78] sm:$0xff]   ;;  %vm13501_vm2 = vmor %vm913_vm0, %vm914_vm1 }
  0x26   : > { %277 = vst [vmem:[#allocation2 + $0x14] sm:$0xf] %v13031_v0  ;;  %vm13866_vm5 = vmor %vm1925_vm3, %vm1926_vm4 }
  0x27   : > { %278 = vst [vmem:[#allocation2 + $0x18] sm:$0xf] %v13031_v0 }
  0x28   : > { %279 = vst [vmem:[#allocation2 + $0x1c] sm:$0xf] %v13031_v0  ;;  %v13427_v49 = vld [vmem:[#allocation2 + $0x8] sm:$0xf] }
  0x29   : > { %280 = vst [vmem:[#allocation2 + $0x20] sm:$0xf] %v13031_v0  ;;  %v17063_v59 = vrot.slane %v13427_v49, 7 }
  0x2a   : > { %281 = vst [vmem:[#allocation2 + $0x24] sm:$0xf] %v13031_v0  ;;  %v13429_v52 = vld [vmem:[#allocation2 + $0x4] sm:$0x8] }
  0x2b   : > { %282 = vst [vmem:[#allocation2 + $0x28] sm:$0xf] %v13031_v0  ;;  %v1444_v17 = vld [vmem:[#allocation2 + $0x8] sm:$0xff]   ;;  %v10631_v63 = vrot.slane %v13429_v52, 11 }
  0x2c   : > { %283 = vst [vmem:[#allocation2 + $0x2c] sm:$0xf] %v13031_v0 }
  0x2d   : > { %284 = vst [vmem:[#allocation2 + $0x30] sm:$0xf] %v13031_v0 }
  0x2e   : > { %285 = vst [vmem:[#allocation2 + $0x34] sm:$0xf] %v13031_v0 }
  0x2f   : > { %286 = vst [vmem:[#allocation2 + $0x38] sm:$0xf] %v13031_v0  ;;  %v13431_v53 = vld [vmem:[#allocation2 + $0x1c] sm:$0x8] }
  0x30   : > { %287 = vst [vmem:[#allocation2 + $0x3c] sm:$0xf] %v13031_v0  ;;  %v13433_v54 = vld [vmem:[#allocation2 + $0x20] sm:$0xf] }
  0x31   : > { %288 = vst [vmem:[#allocation2 + $0x40] sm:$0xf] %v13031_v0  ;;  %v1446_v18 = vld [vmem:[#allocation2 + $0x20] sm:$0xff]  }
  0x32   : > { %289 = vst [vmem:[#allocation2 + $0x44] sm:$0xf] %v13031_v0 }
  0x33   : > { %290 = vst [vmem:[#allocation2 + $0x48] sm:$0xf] %v13031_v0 }
  0x34   : > { %291 = vst [vmem:[#allocation2 + $0x4c] sm:$0xf] %v13031_v0 }
  0x35   : > { %292 = vst [vmem:[#allocation2 + $0x50] sm:$0xf] %v13031_v0  ;;  %v13435_v56 = vld [vmem:[#allocation2 + $0x34] sm:$0x8] }
  0x36   : > { %293 = vst [vmem:[#allocation2 + $0x54] sm:$0xf] %v13031_v0  ;;  %v13437_v57 = vld [vmem:[#allocation2 + $0x38] sm:$0xf] }
  0x37   : > { %294 = vst [vmem:[#allocation2 + $0x58] sm:$0xf] %v13031_v0  ;;  %v1448_v19 = vld [vmem:[#allocation2 + $0x38] sm:$0xff]  }
  0x38   : > { %295 = vst [vmem:[#allocation2 + $0x5c] sm:$0xf] %v13031_v0 }
  0x39   : > { %296 = vst [vmem:[#allocation2 + $0x60] sm:$0xf] %v13031_v0 }
  0x3a   : > { %297 = vst [vmem:[#allocation2 + $0x64] sm:$0xf] %v13031_v0 }
  0x3b   : > { %298 = vst [vmem:[#allocation2 + $0x68] sm:$0xf] %v13031_v0  ;;  %v13440_v60 = vld [vmem:[#allocation2 + $0x4c] sm:$0x8] }
  0x3c   : > { %299 = vst [vmem:[#allocation2 + $0x6c] sm:$0xf] %v13031_v0  ;;  %v13442_v61 = vld [vmem:[#allocation2 + $0x50] sm:$0xf] }
  0x3d   : > { %300 = vst [vmem:[#allocation2 + $0x70] sm:$0xf] %v13031_v0  ;;  %v1450_v20 = vld [vmem:[#allocation2 + $0x50] sm:$0xff]  }
  0x3e   : > { %301 = vst [vmem:[#allocation2 + $0x74] sm:$0xf] %v13031_v0 }
  0x3f   : > { %302 = vst [vmem:[#allocation2 + $0x78] sm:$0xf] %v13031_v0 }
  0x40   : > { %303 = vst [vmem:[#allocation2 + $0x7c] sm:$0xf] %v13031_v0 }
  0x41   : > { %304 = vst [vmem:[#allocation2 + $0x80] sm:$0xf] %v13031_v0 }
  0x42   : > { %305 = vst [vmem:[#allocation2 + $0x84] sm:$0xf] %v13031_v0 }
  0x43   : > { %306 = vst [vmem:[#allocation2 + $0x88] sm:$0xf] %v13031_v0  ;;  %v1452_v21 = vld [vmem:[#allocation2 + $0x68] sm:$0xff]  }
  0x44   : > { %307 = vst [vmem:[#allocation2 + $0x8c] sm:$0xf] %v13031_v0 }
  0x45   : > { %308 = vst [vmem:[#allocation2 + $0x90] sm:$0xf] %v13031_v0 }
  0x46   : > { %309 = vst [vmem:[#allocation2 + $0x94] sm:$0xf] %v13031_v0 }
  0x47   : > { %310 = vst [vmem:[#allocation2 + $0x98] sm:$0xf] %v13031_v0 }
  0x48   : > { %311 = vst [vmem:[#allocation2 + $0x9c] sm:$0xf] %v13031_v0 }
  0x49   : > { %312 = vst [vmem:[#allocation2 + $0xa0] sm:$0xf] %v13031_v0  ;;  %v1454_v22 = vld [vmem:[#allocation2 + $0x80] sm:$0xff]  }
  0x4a   : > { %313 = vst [vmem:[#allocation2 + $0xa4] sm:$0xf] %v13031_v0 }
  0x4b   : > { %314 = vst [vmem:[#allocation2 + $0xa8] sm:$0xf] %v13031_v0 }
  0x4c   : > { %315 = vst [vmem:[#allocation2 + $0xac] sm:$0xf] %v13031_v0 }
  0x4d   : > { %316 = vst [vmem:[#allocation2 + $0xb0] sm:$0xf] %v13031_v0 }
  0x4e   : > { %317 = vst [vmem:[#allocation2 + $0xb4] sm:$0xf] %v13031_v0 }
  0x4f   : > { %318 = vst [vmem:[#allocation2 + $0xb8] sm:$0xf] %v13031_v0  ;;  %v1456_v23 = vld [vmem:[#allocation2 + $0x98] sm:$0xff]  }
  0x50   : > { %319 = vst [vmem:[#allocation2 + $0xbc] sm:$0xf] %v13031_v0 }
  0x51   : > { %320 = vst [vmem:[#allocation2 + $0xc0] sm:$0xf] %v13031_v0 }
  0x52   : > { %321 = vst [vmem:[#allocation2 + $0xc4] sm:$0xf] %v13031_v0 }
  0x53   : > { %322 = vst [vmem:[#allocation2 + $0xc8] sm:$0xf] %v13031_v0 }
  0x54   : > { %323 = vst [vmem:[#allocation2 + $0xcc] sm:$0xf] %v13031_v0 }
  0x55   : > { %324 = vst [vmem:[#allocation2 + $0xd0] sm:$0xf] %v13031_v0  ;;  %v1458_v24 = vld [vmem:[#allocation2 + $0xb0] sm:$0xff]  }
  0x56   : > { %325 = vst [vmem:[#allocation2 + $0xd4] sm:$0xf] %v13031_v0 }
  0x57   : > { %326 = vst [vmem:[#allocation2 + $0xd8] sm:$0xf] %v13031_v0 }
  0x58   : > { %327 = vst [vmem:[#allocation2 + $0xdc] sm:$0xf] %v13031_v0 }
  0x59   : > { %328 = vst [vmem:[#allocation2 + $0xe0] sm:$0xf] %v13031_v0 }
  0x5a   : > { %329 = vst [vmem:[#allocation2 + $0xe4] sm:$0xf] %v13031_v0 }
  0x5b   : > { %330 = vst [vmem:[#allocation2 + $0xe8] sm:$0xf] %v13031_v0  ;;  %v1460_v25 = vld [vmem:[#allocation2 + $0xc8] sm:$0xff]  }
  0x5c   : > { %331 = vst [vmem:[#allocation2 + $0xec] sm:$0xf] %v13031_v0 }
  0x5d   : > { %332 = vst [vmem:[#allocation2 + $0xf0] sm:$0xf] %v13031_v0 }
  0x5e   : > { %333 = vst [vmem:[#allocation2 + $0xf4] sm:$0xf] %v13031_v0 }
  0x5f   : > { %334 = vst [vmem:[#allocation2 + $0xf8] sm:$0xf] %v13031_v0 }
  0x60   : > { %335 = vst [vmem:[#allocation2 + $0xfc] sm:$0xf] %v13031_v0 }
  0x61   : > { %336 = vst [vmem:[#allocation2 + $0x100] sm:$0xf] %v13031_v0  ;;  %v1462_v26 = vld [vmem:[#allocation2 + $0xe0] sm:$0xff]  }
  0x62   : > { %337 = vst [vmem:[#allocation2 + $0x104] sm:$0xf] %v13031_v0 }
  0x63   : > { %338 = vst [vmem:[#allocation2 + $0x108] sm:$0xf] %v13031_v0 }
  0x64   : > { %339 = vst [vmem:[#allocation2 + $0x10c] sm:$0xf] %v13031_v0 }
  0x65   : > { %340 = vst [vmem:[#allocation2 + $0x110] sm:$0xf] %v13031_v0 }
  0x66   : > { %341 = vst [vmem:[#allocation2 + $0x114] sm:$0xf] %v13031_v0 }
  0x67   : > { %342 = vst [vmem:[#allocation2 + $0x118] sm:$0xf] %v13031_v0  ;;  %v1464_v27 = vld [vmem:[#allocation2 + $0xf8] sm:$0xff]  }
  0x68   : > { %343 = vst [vmem:[#allocation2 + $0x11c] sm:$0xf] %v13031_v0 }
  0x69   : > { %344 = vst [vmem:[#allocation2 + $0x120] sm:$0xf] %v13031_v0 }
  0x6a   : > { %345 = vst [vmem:[#allocation2 + $0x124] sm:$0xf] %v13031_v0 }
  0x6b   : > { %346 = vst [vmem:[#allocation2 + $0x128] sm:$0xf] %v13031_v0 }
  0x6c   : > { %347 = vst [vmem:[#allocation2 + $0x12c] sm:$0xf] %v13031_v0 }
  0x6d   : > { %348 = vst [vmem:[#allocation2 + $0x130] sm:$0xf] %v13031_v0  ;;  %v1466_v28 = vld [vmem:[#allocation2 + $0x110] sm:$0xff]  }
  0x6e   : > { %349 = vst [vmem:[#allocation2 + $0x134] sm:$0xf] %v13031_v0 }
  0x6f   : > { %350 = vst [vmem:[#allocation2 + $0x138] sm:$0xf] %v13031_v0 }
  0x70   : > { %351 = vst [vmem:[#allocation2 + $0x13c] sm:$0xf] %v13031_v0 }
  0x71   : > { %352 = vst [vmem:[#allocation2 + $0x140] sm:$0xf] %v13031_v0 }
  0x72   : > { %353 = vst [vmem:[#allocation2 + $0x144] sm:$0xf] %v13031_v0 }
  0x73   : > { %354 = vst [vmem:[#allocation2 + $0x148] sm:$0xf] %v13031_v0  ;;  %v1468_v29 = vld [vmem:[#allocation2 + $0x128] sm:$0xff]  }
  0x74   : > { %355 = vst [vmem:[#allocation2 + $0x14c] sm:$0xf] %v13031_v0 }
  0x75   : > { %356 = vst [vmem:[#allocation2 + $0x150] sm:$0xf] %v13031_v0 }
  0x76   : > { %357 = vst [vmem:[#allocation2 + $0x154] sm:$0xf] %v13031_v0 }
  0x77   : > { %358 = vst [vmem:[#allocation2 + $0x158] sm:$0xf] %v13031_v0 }
  0x78   : > { %359 = vst [vmem:[#allocation2 + $0x15c] sm:$0xf] %v13031_v0 }
  0x79   : > { %360 = vst [vmem:[#allocation2 + $0x160] sm:$0xf] %v13031_v0  ;;  %v1470_v30 = vld [vmem:[#allocation2 + $0x140] sm:$0xff]  }
  0x7a   : > { %361 = vst [vmem:[#allocation2 + $0x164] sm:$0xf] %v13031_v0 }
  0x7b   : > { %362 = vst [vmem:[#allocation2 + $0x168] sm:$0xf] %v13031_v0 }
  0x7c   : > { %363 = vst [vmem:[#allocation2 + $0x16c] sm:$0xf] %v13031_v0 }
  0x7d   : > { %364 = vst [vmem:[#allocation2 + $0x170] sm:$0xf] %v13031_v0 }
  0x7e   : > { %365 = vst [vmem:[#allocation2 + $0x174] sm:$0xf] %v13031_v0 }
  0x7f   : > { %366 = vst [vmem:[#allocation2 + $0x178] sm:$0xf] %v13031_v0  ;;  %v1472_v31 = vld [vmem:[#allocation2 + $0x158] sm:$0xff]  }
  0x80   : > { %367 = vst [vmem:[#allocation2 + $0x17c] sm:$0xf] %v13031_v0 }
  0x81   : > { %368 = vst [vmem:[#allocation2 + $0x180] sm:$0xf] %v13031_v0 }
  0x82   : > { %369 = vst [vmem:[#allocation2 + $0x184] sm:$0xf] %v13031_v0 }
  0x83   : > { %370 = vst [vmem:[#allocation2 + $0x188] sm:$0xf] %v13031_v0 }
  0x84   : > { %371 = vst [vmem:[#allocation2 + $0x18c] sm:$0xf] %v13031_v0 }
  0x85   : > { %372 = vst [vmem:[#allocation2 + $0x190] sm:$0xf] %v13031_v0  ;;  %v1474_v32 = vld [vmem:[#allocation2 + $0x170] sm:$0xff]  }
  0x86   : > { %373 = vst [vmem:[#allocation2 + $0x194] sm:$0xf] %v13031_v0 }
  0x87   : > { %374 = vst [vmem:[#allocation2 + $0x198] sm:$0xf] %v13031_v0 }
  0x88   : > { %375 = vst [vmem:[#allocation2 + $0x19c] sm:$0xf] %v13031_v0 }
  0x89   : > { %376 = vst [vmem:[#allocation2 + $0x1a0] sm:$0xf] %v13031_v0 }
  0x8a   : > { %377 = vst [vmem:[#allocation2 + $0x1a4] sm:$0xf] %v13031_v0 }
  0x8b   : > { %378 = vst [vmem:[#allocation2 + $0x1a8] sm:$0xf] %v13031_v0 }
  0x8c   : > { %379 = vst [vmem:[#allocation2 + $0x1ac] sm:$0xf] %v13031_v0 }
  0x8d   : > { %380 = vst [vmem:[#allocation2 + $0x1b0] sm:$0xf] %v13031_v0 }
  0x8e   : > { %381 = vst [vmem:[#allocation2 + $0x1b4] sm:$0xf] %v13031_v0 }
  0x8f   : > { %382 = vst [vmem:[#allocation2 + $0x1b8] sm:$0xf] %v13031_v0 }
  0x90   : > { %383 = vst [vmem:[#allocation2 + $0x1bc] sm:$0xf] %v13031_v0 }
  0x91   : > { %384 = vst [vmem:[#allocation2 + $0x1c0] sm:$0xf] %v13031_v0 }
  0x92   : > { %385 = vst [vmem:[#allocation2 + $0x1c4] sm:$0xf] %v13031_v0 }
  0x93   : > { %386 = vst [vmem:[#allocation2 + $0x1c8] sm:$0xf] %v13031_v0 }
  0x94   : > { %387 = vst [vmem:[#allocation2 + $0x1cc] sm:$0xf] %v13031_v0 }
  0x95   : > { %388 = vst [vmem:[#allocation2 + $0x1d0] sm:$0xf] %v13031_v0 }
  0x96   : > { %389 = vst [vmem:[#allocation2 + $0x1d4] sm:$0xf] %v13031_v0 }
  0x97   : > { %390 = vst [vmem:[#allocation2 + $0x1d8] sm:$0xf] %v13031_v0 }
  0x98   : > { %391 = vst [vmem:[#allocation2 + $0x1dc] sm:$0xf] %v13031_v0 }
  0x99   : > { %392 = vst [vmem:[#allocation2 + $0x1e0] sm:$0xf] %v13031_v0 }
  0x9a   : > { %393 = vst [vmem:[#allocation2 + $0x1e4] sm:$0xf] %v13031_v0 }
  0x9b   : > { %394 = vst [vmem:[#allocation2 + $0x1e8] sm:$0xf] %v13031_v0 }
  0x9c   : > { %395 = vst [vmem:[#allocation2 + $0x1ec] sm:$0xf] %v13031_v0 }
  0x9d   : > { %396 = vst [vmem:[#allocation2 + $0x1f0] sm:$0xf] %v13031_v0 }
  0x9e   : > { %397 = vst [vmem:[#allocation2 + $0x1f4] sm:$0xf] %v13031_v0 }
  0x9f   : > { %398 = vst [vmem:[#allocation2 + $0x1f8] sm:$0xf] %v13031_v0 }
  0xa0   : > { %399 = vst [vmem:[#allocation2 + $0x1fc] sm:$0xf] %v13031_v0 }
  0xa1   : > { %400 = vst [vmem:[#allocation2 + $0x200] sm:$0xf] %v13031_v0 }
  0xa2   : > { %401 = vst [vmem:[#allocation2 + $0x204] sm:$0xf] %v13031_v0 }
  0xa3   : > { %402 = vst [vmem:[#allocation2 + $0x208] sm:$0xf] %v13031_v0 }
  0xa4   : > { %403 = vst [vmem:[#allocation2 + $0x20c] sm:$0xf] %v13031_v0 }
  0xa5   : > { %404 = vst [vmem:[#allocation2 + $0x210] sm:$0xf] %v13031_v0 }
  0xa6   : > { %405 = vst [vmem:[#allocation2 + $0x214] sm:$0xf] %v13031_v0 }
  0xa7   : > { %406 = vst [vmem:[#allocation2 + $0x218] sm:$0xf] %v13031_v0 }
  0xa8   : > { %407 = vst [vmem:[#allocation2 + $0x21c] sm:$0xf] %v13031_v0 }
  0xa9   : > { %408 = vst [vmem:[#allocation2 + $0x220] sm:$0xf] %v13031_v0 }
  0xaa   : > { %409 = vst [vmem:[#allocation2 + $0x224] sm:$0xf] %v13031_v0 }
  0xab   : > { %410 = vst [vmem:[#allocation2 + $0x228] sm:$0xf] %v13031_v0 }
  0xac   : > { %411 = vst [vmem:[#allocation2 + $0x22c] sm:$0xf] %v13031_v0 }
  0xad   : > { %412 = vst [vmem:[#allocation2 + $0x230] sm:$0xf] %v13031_v0 }
  0xae   : > { %413 = vst [vmem:[#allocation2 + $0x234] sm:$0xf] %v13031_v0 }
  0xaf   : > { %414 = vst [vmem:[#allocation2 + $0x238] sm:$0xf] %v13031_v0 }
  0xb0   : > { %415 = vst [vmem:[#allocation2 + $0x23c] sm:$0xf] %v13031_v0 }
  0xb1   : > { %416 = vst [vmem:[#allocation2 + $0x240] sm:$0xf] %v13031_v0 }
  0xb2   : > { %417 = vst [vmem:[#allocation2 + $0x244] sm:$0xf] %v13031_v0 }
  0xb3   : > { %418 = vst [vmem:[#allocation2 + $0x248] sm:$0xf] %v13031_v0 }
  0xb4   : > { %419 = vst [vmem:[#allocation2 + $0x24c] sm:$0xf] %v13031_v0 }
  0xb5   : > { %420 = vst [vmem:[#allocation2 + $0x250] sm:$0xf] %v13031_v0 }
  0xb6   : > { %421 = vst [vmem:[#allocation2 + $0x254] sm:$0xf] %v13031_v0 }
  0xb7   : > { %422 = vst [vmem:[#allocation2 + $0x258] sm:$0xf] %v13031_v0 }
  0xb8   : > { %423 = vst [vmem:[#allocation2 + $0x25c] sm:$0xf] %v13031_v0 }
  0xb9   : > { %424 = vst [vmem:[#allocation2 + $0x260] sm:$0xf] %v13031_v0 }
  0xba   : > { %425 = vst [vmem:[#allocation2 + $0x264] sm:$0xf] %v13031_v0 }
  0xbb   : > { %426 = vst [vmem:[#allocation2 + $0x268] sm:$0xf] %v13031_v0 }
  0xbc   : > { %427 = vst [vmem:[#allocation2 + $0x26c] sm:$0xf] %v13031_v0 }
  0xbd   : > { %428 = vst [vmem:[#allocation2 + $0x270] sm:$0xf] %v13031_v0 }
  0xbe   : > { %429 = vst [vmem:[#allocation2 + $0x274] sm:$0xf] %v13031_v0 }
  0xbf   : > { %430 = vst [vmem:[#allocation2 + $0x278] sm:$0xf] %v13031_v0 }
  0xc0   : > { %431 = vst [vmem:[#allocation2 + $0x27c] sm:$0xf] %v13031_v0 }
  0xc1   : > { %432 = vst [vmem:[#allocation2 + $0x280] sm:$0xf] %v13031_v0 }
  0xc2   : > { %433 = vst [vmem:[#allocation2 + $0x284] sm:$0xf] %v13031_v0 }
  0xc3   : > { %434 = vst [vmem:[#allocation2 + $0x288] sm:$0xf] %v13031_v0 }
  0xc4   : > { %435 = vst [vmem:[#allocation2 + $0x28c] sm:$0xf] %v13031_v0 }
  0xc5   : > { %436 = vst [vmem:[#allocation2 + $0x290] sm:$0xf] %v13031_v0 }
  0xc6   : > { %437 = vst [vmem:[#allocation2 + $0x294] sm:$0xf] %v13031_v0 }
  0xc7   : > { %438 = vst [vmem:[#allocation2 + $0x298] sm:$0xf] %v13031_v0 }
  0xc8   : > { %439 = vst [vmem:[#allocation2 + $0x29c] sm:$0xf] %v13031_v0 }
  0xc9   : > { %440 = vst [vmem:[#allocation2 + $0x2a0] sm:$0xf] %v13031_v0 }
  0xca   : > { %441 = vst [vmem:[#allocation2 + $0x2a4] sm:$0xf] %v13031_v0 }
  0xcb   : > { %442 = vst [vmem:[#allocation2 + $0x2a8] sm:$0xf] %v13031_v0 }
  0xcc   : > { %443 = vst [vmem:[#allocation2 + $0x2ac] sm:$0xf] %v13031_v0 }
  0xcd   : > { %444 = vst [vmem:[#allocation2 + $0x2b0] sm:$0xf] %v13031_v0 }
  0xce   : > { %445 = vst [vmem:[#allocation2 + $0x2b4] sm:$0xf] %v13031_v0 }
  0xcf   : > { %446 = vst [vmem:[#allocation2 + $0x2b8] sm:$0xf] %v13031_v0 }
  0xd0   : > { %447 = vst [vmem:[#allocation2 + $0x2bc] sm:$0xf] %v13031_v0 }
  0xd1   : > { %448 = vst [vmem:[#allocation2 + $0x2c0] sm:$0xf] %v13031_v0 }
  0xd2   : > { %449 = vst [vmem:[#allocation2 + $0x2c4] sm:$0xf] %v13031_v0 }
  0xd3   : > { %450 = vst [vmem:[#allocation2 + $0x2c8] sm:$0xf] %v13031_v0 }
  0xd4   : > { %451 = vst [vmem:[#allocation2 + $0x2cc] sm:$0xf] %v13031_v0 }
  0xd5   : > { %452 = vst [vmem:[#allocation2 + $0x2d0] sm:$0xf] %v13031_v0 }
  0xd6   : > { %453 = vst [vmem:[#allocation2 + $0x2d4] sm:$0xf] %v13031_v0 }
  0xd7   : > { %454 = vst [vmem:[#allocation2 + $0x2d8] sm:$0xf] %v13031_v0 }
  0xd8   : > { %455 = vst [vmem:[#allocation2 + $0x2dc] sm:$0xf] %v13031_v0 }
  0xd9   : > { %456 = vst [vmem:[#allocation2 + $0x2e0] sm:$0xf] %v13031_v0 }
  0xda   : > { %457 = vst [vmem:[#allocation2 + $0x2e4] sm:$0xf] %v13031_v0 }
  0xdb   : > { %458 = vst [vmem:[#allocation2 + $0x2e8] sm:$0xf] %v13031_v0 }
  0xdc   : > { %459 = vst [vmem:[#allocation2 + $0x2ec] sm:$0xf] %v13031_v0 }
  0xdd   : > { %460 = vst [vmem:[#allocation2 + $0x2f0] sm:$0xf] %v13031_v0 }
  0xde   : > { %461 = vst [vmem:[#allocation2 + $0x2f4] sm:$0xf] %v13031_v0 }
  0xdf   : > { %462 = vst [vmem:[#allocation2 + $0x2f8] sm:$0xf] %v13031_v0 }
  0xe0   : > { %463 = vst [vmem:[#allocation2 + $0x2fc] sm:$0xf] %v13031_v0 }
  0xe1   : > { %464 = vst [vmem:[#allocation2 + $0x300] sm:$0xf] %v13031_v0 }
  0xe2   : > { %465 = vst [vmem:[#allocation2 + $0x304] sm:$0xf] %v13031_v0 }
  0xe3   : > { %466 = vst [vmem:[#allocation2 + $0x308] sm:$0xf] %v13031_v0 }
  0xe4   : > { %467 = vst [vmem:[#allocation2 + $0x30c] sm:$0xf] %v13031_v0 }
  0xe5   : > { %468 = vst [vmem:[#allocation2 + $0x310] sm:$0xf] %v13031_v0 }
  0xe6   : > { %469 = vst [vmem:[#allocation2 + $0x314] sm:$0xf] %v13031_v0 }
  0xe7   : > { %470 = vst [vmem:[#allocation2 + $0x318] sm:$0xf] %v13031_v0 }
  0xe8   : > { %471 = vst [vmem:[#allocation2 + $0x31c] sm:$0xf] %v13031_v0 }
  0xe9   : > { %472 = vst [vmem:[#allocation2 + $0x320] sm:$0xf] %v13031_v0 }
  0xea   : > { %473 = vst [vmem:[#allocation2 + $0x324] sm:$0xf] %v13031_v0 }
  0xeb   : > { %474 = vst [vmem:[#allocation2 + $0x328] sm:$0xf] %v13031_v0  ;;  %v1508_v48 = vld [vmem:[#allocation2 + $0x308] sm:$0xff]  }
  0xec   : > { %475 = vst [vmem:[#allocation2 + $0x32c] sm:$0xf] %v13031_v0 }
  0xed   : > { %476 = vst [vmem:[#allocation2 + $0x330] sm:$0xf] %v13031_v0 }
  0xee   : > { %477 = vst [vmem:[#allocation2 + $0x334] sm:$0xf] %v13031_v0 }
  0xef   : > { %478 = vst [vmem:[#allocation2 + $0x338] sm:$0xf] %v13031_v0 }
  0xf0   : > { %479 = vst [vmem:[#allocation2 + $0x33c] sm:$0xf] %v13031_v0 }
  0xf1   : > { %480 = vst [vmem:[#allocation2 + $0x340] sm:$0xf] %v13031_v0  ;;  %v1510_v51 = vld [vmem:[#allocation2 + $0x320] sm:$0xff]  }
  0xf2   : > { %481 = vst [vmem:[#allocation2 + $0x344] sm:$0xf] %v13031_v0 }
  0xf3   : > { %482 = vst [vmem:[#allocation2 + $0x348] sm:$0xf] %v13031_v0 }
  0xf4   : > { %483 = vst [vmem:[#allocation2 + $0x34c] sm:$0xf] %v13031_v0 }
  0xf5   : > { %484 = vst [vmem:[#allocation2 + $0x350] sm:$0xf] %v13031_v0 }
  0xf6   : > { %485 = vst [vmem:[#allocation2 + $0x354] sm:$0xf] %v13031_v0 }
  0xf7   : > { %486 = vst [vmem:[#allocation2 + $0x358] sm:$0xf] %v13031_v0  ;;  %v1512_v55 = vld [vmem:[#allocation2 + $0x338] sm:$0xff]  }
  0xf8   : > { %487 = vst [vmem:[#allocation2 + $0x35c] sm:$0xf] %v13031_v0 }
  0xf9   : > { %488 = vst [vmem:[#allocation2 + $0x360] sm:$0xf] %v13031_v0 }
  0xfa   : > { %489 = vst [vmem:[#allocation2 + $0x364] sm:$0xf] %v13031_v0 }
  0xfb   : > { %490 = vst [vmem:[#allocation2 + $0x368] sm:$0xf] %v13031_v0 }
  0xfc   : > { %491 = vst [vmem:[#allocation2 + $0x36c] sm:$0xf] %v13031_v0 }
  0xfd   : > { %492 = vst [vmem:[#allocation2 + $0x370] sm:$0xf] %v13031_v0  ;;  %v1514_v58 = vld [vmem:[#allocation2 + $0x350] sm:$0xff]  }
  0xfe   : > { %493 = vst [vmem:[#allocation2 + $0x374] sm:$0xf] %v13031_v0 }
  0xff   : > { %494 = vst [vmem:[#allocation2 + $0x378] sm:$0xf] %v13031_v0 }
 0x100   : > { %495 = vst [vmem:[#allocation2 + $0x37c] sm:$0xf] %v13031_v0 }
 0x101   : > { %496 = vst [vmem:[#allocation2 + $0x380] sm:$0xf] %v13031_v0 }
 0x102   : > { %497 = vst [vmem:[#allocation2 + $0x384] sm:$0xf] %v13031_v0 }
 0x103   : > { %498 = vst [vmem:[#allocation2 + $0x388] sm:$0xf] %v13031_v0  ;;  %v1516_v62 = vld [vmem:[#allocation2 + $0x368] sm:$0xff]  }
 0x104   : > { %499 = vst [vmem:[#allocation2 + $0x38c] sm:$0xf] %v13031_v0 }
 0x105   : > { %500 = vst [vmem:[#allocation2 + $0x390] sm:$0xf] %v13031_v0 }
 0x106   : > { %501 = vst [vmem:[#allocation2 + $0x394] sm:$0xf] %v13031_v0 }
 0x107   : > { %502 = vst [vmem:[#allocation2 + $0x398] sm:$0xf] %v13031_v0 }
 0x108   : > { %503 = vst [vmem:[#allocation2 + $0x39c] sm:$0xf] %v13031_v0 }
 0x109   : > { %504 = vst [vmem:[#allocation2 + $0x3a0] sm:$0xf] %v13031_v0 }
 0x10a   : > { %505 = vst [vmem:[#allocation2 + $0x3a4] sm:$0xf] %v13031_v0 }
 0x10b   : > { %506 = vst [vmem:[#allocation2 + $0x3a8] sm:$0xf] %v13031_v0 }
 0x10c   : > { %507 = vst [vmem:[#allocation2 + $0x3ac] sm:$0xf] %v13031_v0 }
 0x10d   : > { %508 = vst [vmem:[#allocation2 + $0x3b0] sm:$0xf] %v13031_v0 }
 0x10e   : > { %509 = vst [vmem:[#allocation2 + $0x3b4] sm:$0xf] %v13031_v0 }
 0x10f   : > { %510 = vst [vmem:[#allocation2 + $0x3b8] sm:$0xf] %v13031_v0 }
 0x110   : > { %511 = vst [vmem:[#allocation2 + $0x3bc] sm:$0xf] %v13031_v0 }
 0x111   : > { %512 = vst [vmem:[#allocation2 + $0x3c0] sm:$0xf] %v13031_v0 }
 0x112   : > { %513 = vst [vmem:[#allocation2 + $0x3c4] sm:$0xf] %v13031_v0 }
 0x113   : > { %514 = vst [vmem:[#allocation2 + $0x3c8] sm:$0xf] %v13031_v0 }
 0x114   : > { %515 = vst [vmem:[#allocation2 + $0x3cc] sm:$0xf] %v13031_v0 }
 0x115   : > { %516 = vst [vmem:[#allocation2 + $0x3d0] sm:$0xf] %v13031_v0 }
 0x116   : > { %517 = vst [vmem:[#allocation2 + $0x3d4] sm:$0xf] %v13031_v0 }
 0x117   : > { %518 = vst [vmem:[#allocation2 + $0x3d8] sm:$0xf] %v13031_v0 }
 0x118   : > { %519 = vst [vmem:[#allocation2 + $0x3dc] sm:$0xf] %v13031_v0 }
 0x119   : > { %520 = vst [vmem:[#allocation2 + $0x3e0] sm:$0xf] %v13031_v0 }
 0x11a   : > { %521 = vst [vmem:[#allocation2 + $0x3e4] sm:$0xf] %v13031_v0 }
 0x11b   : > { %522 = vst [vmem:[#allocation2 + $0x3e8] sm:$0xf] %v13031_v0 }
 0x11c   : > { %523 = vst [vmem:[#allocation2 + $0x3ec] sm:$0xf] %v13031_v0 }
 0x11d   : > { %524 = vst [vmem:[#allocation2 + $0x3f0] sm:$0xf] %v13031_v0 }
 0x11e   : > { %525 = vst [vmem:[#allocation2 + $0x3f4] sm:$0xf] %v13031_v0 }
 0x11f   : > { %526 = vst [vmem:[#allocation2 + $0x3f8] sm:$0xf] %v13031_v0 }
 0x120   : > { %527 = vst [vmem:[#allocation2 + $0x3fc] sm:$0xf] %v13031_v0 }
 0x121   : > { %528 = vst [vmem:[#allocation2 + $0x400] sm:$0xf] %v13031_v0 }
 0x122   : > { %529 = vst [vmem:[#allocation2 + $0x404] sm:$0xf] %v13031_v0 }
 0x123   : > { %530 = vst [vmem:[#allocation2 + $0x408] sm:$0xf] %v13031_v0 }
 0x124   : > { %531 = vst [vmem:[#allocation2 + $0x40c] sm:$0xf] %v13031_v0 }
 0x125   : > { %532 = vst [vmem:[#allocation2 + $0x410] sm:$0xf] %v13031_v0 }
 0x126   : > { %533 = vst [vmem:[#allocation2 + $0x414] sm:$0xf] %v13031_v0 }
 0x127   : > { %534 = vst [vmem:[#allocation2 + $0x418] sm:$0xf] %v13031_v0 }
 0x128   : > { %535 = vst [vmem:[#allocation2 + $0x41c] sm:$0xf] %v13031_v0 }
 0x129   : > { %536 = vst [vmem:[#allocation2 + $0x420] sm:$0xf] %v13031_v0 }
 0x12a   : > { %537 = vst [vmem:[#allocation2 + $0x424] sm:$0xf] %v13031_v0 }
 0x12b   : > { %538 = vst [vmem:[#allocation2 + $0x428] sm:$0xf] %v13031_v0 }
 0x12c   : > { %539 = vst [vmem:[#allocation2 + $0x42c] sm:$0xf] %v13031_v0 }
 0x12d   : > { %540 = vst [vmem:[#allocation2 + $0x430] sm:$0xf] %v13031_v0 }
 0x12e   : > { %541 = vst [vmem:[#allocation2 + $0x434] sm:$0xf] %v13031_v0 }
 0x12f   : > { %542 = vst [vmem:[#allocation2 + $0x438] sm:$0xf] %v13031_v0 }
 0x130   : > { %543 = vst [vmem:[#allocation2 + $0x43c] sm:$0xf] %v13031_v0 }
 0x131   : > { %544 = vst [vmem:[#allocation2 + $0x440] sm:$0xf] %v13031_v0 }
 0x132   : > { %545 = vst [vmem:[#allocation2 + $0x444] sm:$0xf] %v13031_v0 }
 0x133   : > { %546 = vst [vmem:[#allocation2 + $0x448] sm:$0xf] %v13031_v0 }
 0x134   : > { %547 = vst [vmem:[#allocation2 + $0x44c] sm:$0xf] %v13031_v0 }
 0x135   : > { %548 = vst [vmem:[#allocation2 + $0x450] sm:$0xf] %v13031_v0 }
 0x136   : > { %549 = vst [vmem:[#allocation2 + $0x454] sm:$0xf] %v13031_v0 }
 0x137   : > { %550 = vst [vmem:[#allocation2 + $0x458] sm:$0xf] %v13031_v0 }
 0x138   : > { %551 = vst [vmem:[#allocation2 + $0x45c] sm:$0xf] %v13031_v0 }
 0x139   : > { %552 = vst [vmem:[#allocation2 + $0x460] sm:$0xf] %v13031_v0 }
 0x13a   : > { %553 = vst [vmem:[#allocation2 + $0x464] sm:$0xf] %v13031_v0 }
 0x13b   : > { %554 = vst [vmem:[#allocation2 + $0x468] sm:$0xf] %v13031_v0 }
 0x13c   : > { %555 = vst [vmem:[#allocation2 + $0x46c] sm:$0xf] %v13031_v0 }
 0x13d   : > { %556 = vst [vmem:[#allocation2 + $0x470] sm:$0xf] %v13031_v0 }
 0x13e   : > { %557 = vst [vmem:[#allocation2 + $0x474] sm:$0xf] %v13031_v0 }
 0x13f   : > { %558 = vst [vmem:[#allocation2 + $0x478] sm:$0xf] %v13031_v0 }
 0x140   : > { %559 = vst [vmem:[#allocation2 + $0x47c] sm:$0xf] %v13031_v0  ;;  %v13445_v0 = vld [vmem:[#allocation2 + $0x64] sm:$0x8] }
 0x141   : > { %593 = vst [vmem:[#allocation2 + $0x188] sm:$0xff] %v560_v1   ;;  %v13447_v1 = vld [vmem:[#allocation2 + $0x68] sm:$0xf] }
 0x142   : > { %595 = vst [vmem:[#allocation2 + $0x1a0] sm:$0xff] %v562_v2   ;;  %v1518_v2 = vld [vmem:[#allocation2 + $0x380] sm:$0xff]  }
 0x143   : > { %597 = vst [vmem:[#allocation2 + $0x1b8] sm:$0xff] %v564_v3   ;;  %v10632_v3 = vrot.slane %v13431_v53, 11  ;;  %v13553_v53 = vld [vmem:[#allocation2 + $0x1b4] sm:$0x8] }
 0x144   : > { %599 = vst [vmem:[#allocation2 + $0x1d0] sm:$0xff] %v566_v4   ;;  %v13450_v4 = vld [vmem:[#allocation2 + $0x7c] sm:$0x8] }
 0x145   : > { %601 = vst [vmem:[#allocation2 + $0x1e8] sm:$0xff] %v568_v5   ;;  %v13452_v5 = vld [vmem:[#allocation2 + $0x80] sm:$0xf] }
 0x146   : > { %603 = vst [vmem:[#allocation2 + $0x200] sm:$0xff] %v570_v6   ;;  %v1520_v6 = vld [vmem:[#allocation2 + $0x398] sm:$0xff]  }
 0x147   : > { %605 = vst [vmem:[#allocation2 + $0x218] sm:$0xff] %v572_v7   ;;  %v17085_v7 = vrot.slane %v13433_v54, 7 }
 0x148   : > { %607 = vst [vmem:[#allocation2 + $0x230] sm:$0xff] %v574_v8   ;;  %v1476_v33 = vld [vmem:[#allocation2 + $0x188] sm:$0xff]   ;;  %v10633_v8 = vrot.slane %v13435_v56, 11 }
 0x149   : > { %609 = vst [vmem:[#allocation2 + $0x248] sm:$0xff] %v576_v9   ;;  %v1478_v34 = vld [vmem:[#allocation2 + $0x1a0] sm:$0xff]   ;;  %v17082_v9 = vrot.slane %v13437_v57, 7  ;;  %v926_v52 = vsel %vm13501_vm2, %v10632_v3, %v17085_v7  ;;  %v736_v7 = vld [vmem:[#allocation2 + $0x37c] sm:$0x8] }
 0x14a   : > { %611 = vst [vmem:[#allocation2 + $0x260] sm:$0xff] %v578_v10   ;;  %v1480_v35 = vld [vmem:[#allocation2 + $0x1b8] sm:$0xff]   ;;  %v13457_v10 = vld [vmem:[#allocation2 + $0x94] sm:$0x8] }
 0x14b   : > { %613 = vst [vmem:[#allocation2 + $0x278] sm:$0xff] %v580_v11   ;;  %v1482_v36 = vld [vmem:[#allocation2 + $0x1d0] sm:$0xff]  }
 0x14c   : > { %615 = vst [vmem:[#allocation2 + $0x290] sm:$0xff] %v582_v12   ;;  %v1484_v37 = vld [vmem:[#allocation2 + $0x1e8] sm:$0xff]   ;;  %v1522_v11 = vld [vmem:[#allocation2 + $0x3b0] sm:$0xff]   ;;  %v10634_v12 = vrot.slane %v13440_v60, 11 }
 0x14d   : > { %617 = vst [vmem:[#allocation2 + $0x2a8] sm:$0xff] %v584_v13   ;;  %v1486_v38 = vld [vmem:[#allocation2 + $0x200] sm:$0xff]   ;;  %v17075_v13 = vrot.slane %v13442_v61, 7  ;;  %v13565_v56 = vld [vmem:[#allocation2 + $0x1d0] sm:$0xf] }
 0x14e   : > { %619 = vst [vmem:[#allocation2 + $0x2c0] sm:$0xff] %v586_v14   ;;  %v1488_v39 = vld [vmem:[#allocation2 + $0x218] sm:$0xff]   ;;  %v10635_v14 = vrot.slane %v13445_v0, 11 }
 0x14f   : > { %621 = vst [vmem:[#allocation2 + $0x2d8] sm:$0xff] %v588_v15   ;;  %v1490_v40 = vld [vmem:[#allocation2 + $0x230] sm:$0xff]   ;;  %v13462_v15 = vld [vmem:[#allocation2 + $0x98] sm:$0xf]  ;;  %v940_v3 = vsel %vm13501_vm2, %v10634_v12, %v17075_v13  ;;  %v718_v13 = vld [vmem:[#allocation2 + $0x2ec] sm:$0x8] }
 0x150   : > { %623 = vst [vmem:[#allocation2 + $0x2f0] sm:$0xff] %v590_v16   ;;  %v1492_v41 = vld [vmem:[#allocation2 + $0x248] sm:$0xff]  }
 0x151   : > { %1541 = vst [vmem:[#allocation3 + $0x180] sm:$0xff] %v1444_v17   ;;  %v1494_v42 = vld [vmem:[#allocation2 + $0x260] sm:$0xff]   ;;  %v1524_v16 = vld [vmem:[#allocation2 + $0x3c8] sm:$0xff]   ;;  %v17073_v17 = vrot.slane %v13447_v1, 7 }
 0x152   : > { %1543 = vst [vmem:[#allocation3 + $0x188] sm:$0xff] %v1446_v18   ;;  %v1496_v43 = vld [vmem:[#allocation2 + $0x278] sm:$0xff]   ;;  %v10636_v18 = vrot.slane %v13450_v4, 11 }
 0x153   : > { %1545 = vst [vmem:[#allocation3 + $0x190] sm:$0xff] %v1448_v19   ;;  %v1498_v44 = vld [vmem:[#allocation2 + $0x290] sm:$0xff]   ;;  %v17066_v19 = vrot.slane %v13452_v5, 7 }
 0x154   : > { %1547 = vst [vmem:[#allocation3 + $0x198] sm:$0xff] %v1450_v20   ;;  %v1500_v45 = vld [vmem:[#allocation2 + $0x2a8] sm:$0xff]  }
 0x155   : > { %1549 = vst [vmem:[#allocation3 + $0x1a0] sm:$0xff] %v1452_v21   ;;  %v1502_v46 = vld [vmem:[#allocation2 + $0x2c0] sm:$0xff]   ;;  %v13467_v20 = vld [vmem:[#allocation2 + $0xac] sm:$0x8]  ;;  %v954_v60 = vsel %vm13501_vm2, %v10636_v18, %v17066_v19  ;;  %v13613_v19 = vld [vmem:[#allocation2 + $0x218] sm:$0xf] }
 0x156   : > { %1551 = vst [vmem:[#allocation3 + $0x1a8] sm:$0xff] %v1454_v22   ;;  %v1504_v47 = vld [vmem:[#allocation2 + $0x2d8] sm:$0xff]   ;;  %v1526_v21 = vld [vmem:[#allocation2 + $0x3e0] sm:$0xff]   ;;  %v10637_v22 = vrot.slane %v13457_v10, 11 }
 0x157   : > { %1553 = vst [vmem:[#allocation3 + $0x1b0] sm:$0xff] %v1456_v23   ;;  %v1506_v50 = vld [vmem:[#allocation2 + $0x2f0] sm:$0xff]  }
 0x158   : > { %1555 = vst [vmem:[#allocation3 + $0x1b8] sm:$0xff] %v1458_v24   ;;  %v13470_v23 = vld [vmem:[#allocation2 + $0xb0] sm:$0xf]  ;;  %v13472_v24 = vld [vmem:[#allocation2 + $0xc4] sm:$0x8] }
 0x159   : > { %1557 = vst [vmem:[#allocation3 + $0x1c0] sm:$0xff] %v1460_v25   ;;  %v1528_v25 = vld [vmem:[#allocation2 + $0x3f8] sm:$0xff]  }
 0x15a   : > { %1559 = vst [vmem:[#allocation3 + $0x1c8] sm:$0xff] %v1462_v26   ;;  %v17065_v26 = vrot.slane %v13462_v15, 7 }
 0x15b   : > { %1561 = vst [vmem:[#allocation3 + $0x1d0] sm:$0xff] %v1464_v27   ;;  %v13475_v27 = vld [vmem:[#allocation2 + $0xc8] sm:$0xf] }
 0x15c   : > { %1563 = vst [vmem:[#allocation3 + $0x1d8] sm:$0xff] %v1466_v28   ;;  %v13477_v28 = vld [vmem:[#allocation2 + $0xdc] sm:$0x8]  ;;  %v961_v12 = vsel %vm13501_vm2, %v10637_v22, %v17065_v26 }
 0x15d   : > { %1565 = vst [vmem:[#allocation3 + $0x1e0] sm:$0xff] %v1468_v29   ;;  %v1530_v29 = vld [vmem:[#allocation2 + $0x410] sm:$0xff]  }
 0x15e   : > { %1567 = vst [vmem:[#allocation3 + $0x1e8] sm:$0xff] %v1470_v30   ;;  %v10638_v30 = vrot.slane %v13467_v20, 11  ;;  %v13518_v20 = vld [vmem:[#allocation2 + $0x158] sm:$0xf] }
 0x15f   : > { %1569 = vst [vmem:[#allocation3 + $0x1f0] sm:$0xff] %v1472_v31   ;;  %v13480_v31 = vld [vmem:[#allocation2 + $0xe0] sm:$0xf] }
 0x160   : > { %1571 = vst [vmem:[#allocation3 + $0x1f8] sm:$0xff] %v1474_v32   ;;  %v13482_v32 = vld [vmem:[#allocation2 + $0xf4] sm:$0x8] }
 0x161   : > { %1573 = vst [vmem:[#allocation3 + $0x200] sm:$0xff] %v1476_v33   ;;  %v1532_v33 = vld [vmem:[#allocation2 + $0x428] sm:$0xff]  }
 0x162   : > { %1575 = vst [vmem:[#allocation3 + $0x208] sm:$0xff] %v1478_v34   ;;  %v17064_v34 = vrot.slane %v13470_v23, 7 }
 0x163   : > { %1577 = vst [vmem:[#allocation3 + $0x210] sm:$0xff] %v1480_v35   ;;  %v13485_v35 = vld [vmem:[#allocation2 + $0xf8] sm:$0xf] }
 0x164   : > { %1579 = vst [vmem:[#allocation3 + $0x218] sm:$0xff] %v1482_v36   ;;  %v13487_v36 = vld [vmem:[#allocation2 + $0x10c] sm:$0x8]  ;;  %v968_v0 = vsel %vm13501_vm2, %v10638_v30, %v17064_v34  ;;  %v10649_v30 = vrot.slane %v13553_v53, 11  ;;  %v688_v53 = vld [vmem:[#allocation2 + $0x1fc] sm:$0x8] }
 0x165   : > { %1581 = vst [vmem:[#allocation3 + $0x220] sm:$0xff] %v1484_v37   ;;  %v1534_v37 = vld [vmem:[#allocation2 + $0x440] sm:$0xff]  }
 0x166   : > { %1583 = vst [vmem:[#allocation3 + $0x228] sm:$0xff] %v1486_v38   ;;  %v10639_v38 = vrot.slane %v13472_v24, 11 }
 0x167   : > { %1585 = vst [vmem:[#allocation3 + $0x230] sm:$0xff] %v1488_v39   ;;  %v13490_v39 = vld [vmem:[#allocation2 + $0x110] sm:$0xf] }
 0x168   : > { %1587 = vst [vmem:[#allocation3 + $0x238] sm:$0xff] %v1490_v40   ;;  %v13492_v40 = vld [vmem:[#allocation2 + $0x124] sm:$0x8] }
 0x169   : > { %1589 = vst [vmem:[#allocation3 + $0x240] sm:$0xff] %v1492_v41   ;;  %v1536_v41 = vld [vmem:[#allocation2 + $0x458] sm:$0xff]  }
 0x16a   : > { %1591 = vst [vmem:[#allocation3 + $0x248] sm:$0xff] %v1494_v42   ;;  %v17071_v42 = vrot.slane %v13475_v27, 7 }
 0x16b   : > { %1593 = vst [vmem:[#allocation3 + $0x250] sm:$0xff] %v1496_v43   ;;  %v13495_v43 = vld [vmem:[#allocation2 + $0x128] sm:$0xf] }
 0x16c   : > { %1595 = vst [vmem:[#allocation3 + $0x258] sm:$0xff] %v1498_v44   ;;  %v13497_v44 = vld [vmem:[#allocation2 + $0x13c] sm:$0x8] }
 0x16d   : > { %1597 = vst [vmem:[#allocation3 + $0x260] sm:$0xff] %v1500_v45   ;;  %v1538_v45 = vld [vmem:[#allocation2 + $0x470] sm:$0xff]  }
 0x16e   : > { %1599 = vst [vmem:[#allocation3 + $0x268] sm:$0xff] %v1502_v46  }
 0x16f   : > { %1601 = vst [vmem:[#allocation3 + $0x270] sm:$0xff] %v1504_v47   ;;  %v10640_v47 = vrot.slane %v13477_v28, 11 }
 0x170   : > { %1603 = vst [vmem:[#allocation3 + $0x278] sm:$0xff] %v1506_v50   ;;  %v10641_v50 = vrot.slane %v13482_v32, 11  ;;  %v17223_v32 = vrot.slane %v13495_v43, 7 }
 0x171   : > { %1605 = vst [vmem:[#allocation3 + $0x280] sm:$0xff] %v1508_v48   ;;  %v17068_v48 = vrot.slane %v13480_v31, 7 }
 0x172   : > { %1607 = vst [vmem:[#allocation3 + $0x288] sm:$0xff] %v1510_v51   ;;  %v13508_v51 = vld [vmem:[#allocation2 + $0x140] sm:$0xf] }
 0x173   : > { %1609 = vst [vmem:[#allocation3 + $0x290] sm:$0xff] %v1512_v55   ;;  %v17067_v55 = vrot.slane %v13485_v35, 7 }
 0x174   : > { %1611 = vst [vmem:[#allocation3 + $0x298] sm:$0xff] %v1514_v58   ;;  %v10642_v58 = vrot.slane %v13487_v36, 11 }
 0x175   : > { %1613 = vst [vmem:[#allocation3 + $0x2a0] sm:$0xff] %v1516_v62   ;;  %v17069_v62 = vrot.slane %v13490_v39, 7  ;;  %v989_v24 = vsel %vm13501_vm2, %v10641_v50, %v17067_v55  ;;  %v17224_v50 = vrot.slane %v13492_v40, 11 }
 0x176   : > { %1615 = vst [vmem:[#allocation3 + $0x2a8] sm:$0xff] %v1518_v2   ;;  %v13513_v2 = vld [vmem:[#allocation2 + $0x154] sm:$0x8] }
 0x177   : > { %1617 = vst [vmem:[#allocation3 + $0x2b0] sm:$0xff] %v1520_v6   ;;  %v13531_v6 = vld [vmem:[#allocation2 + $0x184] sm:$0x8]  ;;  %v996_v28 = vsel %vm13501_vm2, %v10642_v58, %v17069_v62  ;;  %v1003_v55 = vsel %vm13501_vm2, %v17224_v50, %v17223_v32  ;;  %v13665_v32 = vld [vmem:[#allocation2 + $0x278] sm:$0xf]  ;;  %v10652_v50 = vrot.slane %v688_v53, 11 }
 0x178   : > { %1619 = vst [vmem:[#allocation3 + $0x2b8] sm:$0xff] %v1522_v11   ;;  %v13533_v11 = vld [vmem:[#allocation2 + $0x188] sm:$0xf] }
 0x179   : > { %1621 = vst [vmem:[#allocation3 + $0x2c0] sm:$0xff] %v1524_v16   ;;  %v17070_v16 = vrot.slane %v13518_v20, 7  ;;  %v17074_v10 = vrot.slane %v13533_v11, 7 }
 0x17a   : > { %1623 = vst [vmem:[#allocation3 + $0x2c8] sm:$0xff] %v1526_v21   ;;  %v919_v21 = vsel %vm13501_vm2, %v10631_v63, %v17063_v59  ;;  %v10645_v63 = vrot.slane %v13513_v2, 11  ;;  %v13544_v59 = vld [vmem:[#allocation2 + $0x1a0] sm:$0xf]  ;;  %v13591_v2 = vld [vmem:[#allocation2 + $0x1e8] sm:$0xf] }
 0x17b   : > { %1625 = vst [vmem:[#allocation3 + $0x2d0] sm:$0xff] %v1528_v25   ;;  %v13555_v25 = vld [vmem:[#allocation2 + $0x1b8] sm:$0xf] }
 0x17c   : > { %1627 = vst [vmem:[#allocation3 + $0x2d8] sm:$0xff] %v1530_v29   ;;  %v13527_v29 = vld [vmem:[#allocation2 + $0x16c] sm:$0x8]  ;;  %v17078_v34 = vrot.slane %v13555_v25, 7  ;;  %v1017_v58 = vsel %vm13501_vm2, %v10645_v63, %v17070_v16 }
 0x17d   : > { %1629 = vst [vmem:[#allocation3 + $0x2e0] sm:$0xff] %v1532_v33   ;;  %v13529_v33 = vld [vmem:[#allocation2 + $0x170] sm:$0xf]  ;;  %v10646_v4 = vrot.slane %v13527_v29, 11  ;;  %v17076_v29 = vrot.slane %v13565_v56, 7 }
 0x17e   : > { %1631 = vst [vmem:[#allocation3 + $0x2e8] sm:$0xff] %v1534_v37   ;;  %v13542_v37 = vld [vmem:[#allocation2 + $0x19c] sm:$0x8]  ;;  %v17072_v18 = vrot.slane %v13529_v33, 7 }
 0x17f   : > { %1633 = vst [vmem:[#allocation3 + $0x2f0] sm:$0xff] %v1536_v41   ;;  %v933_v41 = vsel %vm13501_vm2, %v10633_v8, %v17082_v9  ;;  %v947_v8 = vsel %vm13501_vm2, %v10635_v14, %v17073_v17  ;;  %v13589_v14 = vld [vmem:[#allocation2 + $0x1e4] sm:$0x8]  ;;  %v10648_v22 = vrot.slane %v13542_v37, 11  ;;  %v975_v37 = vsel %vm13501_vm2, %v10639_v38, %v17071_v42  ;;  %v13682_v17 = vld [vmem:[#allocation2 + $0x2a8] sm:$0xf] }
 0x180   : > { %1635 = vst [vmem:[#allocation3 + $0x2f8] sm:$0xff] %v1538_v45   ;;  %v13563_v45 = vld [vmem:[#allocation2 + $0x1cc] sm:$0x8]  ;;  %v10651_v26 = vrot.slane %v13589_v14, 11  ;;  %v13621_v14 = vld [vmem:[#allocation2 + $0x230] sm:$0xf]  ;;  %v1024_v40 = vsel %vm13501_vm2, %v10646_v4, %v17072_v18 }
 0x181   : > { %1348 = vst [vmem:[#allocation3] sm:$0xf] %v919_v21  ;;  %v10647_v21 = vrot.slane %v13531_v6, 11  ;;  %v17077_v6 = vrot.slane %v13591_v2, 7  ;;  %v13629_v38 = vld [vmem:[#allocation2 + $0x244] sm:$0x8] }
 0x182   : > { %1350 = vst [vmem:[#allocation3 + $0x8] sm:$0xf] %v926_v52  ;;  %v17080_v52 = vrot.slane %v13544_v59, 7  ;;  %v17083_v63 = vrot.slane %v13621_v14, 7  ;;  %v10655_v16 = vrot.slane %v13629_v38, 11  ;;  %v10662_v9 = vrot.slane %v718_v13, 11 }
 0x183   : > { %1352 = vst [vmem:[#allocation3 + $0x10] sm:$0xf] %v933_v41  ;;  %v10650_v41 = vrot.slane %v13563_v45, 11  ;;  %v982_v45 = vsel %vm13501_vm2, %v10640_v47, %v17068_v48  ;;  %v13639_v47 = vld [vmem:[#allocation2 + $0x25c] sm:$0x8]  ;;  %v17226_v48 = vrot.slane %v13497_v44, 11 }
 0x184   : > { %1354 = vst [vmem:[#allocation3 + $0x18] sm:$0xf] %v940_v3  ;;  %v13611_v3 = vld [vmem:[#allocation2 + $0x200] sm:$0xf]  ;;  %v10656_v4 = vrot.slane %v13639_v47, 11 }
 0x185   : > { %1356 = vst [vmem:[#allocation3 + $0x20] sm:$0xf] %v947_v8  ;;  %v691_v8 = vld [vmem:[#allocation2 + $0x214] sm:$0x8]  ;;  %v17079_v44 = vrot.slane %v13611_v3, 7 }
 0x186   : > { %1358 = vst [vmem:[#allocation3 + $0x28] sm:$0xf] %v954_v60  ;;  %v694_v60 = vld [vmem:[#allocation2 + $0x22c] sm:$0x8]  ;;  %v10653_v62 = vrot.slane %v691_v8, 11  ;;  %v1031_v8 = vsel %vm13501_vm2, %v10647_v21, %v17074_v10  ;;  %v1045_v21 = vsel %vm13501_vm2, %v10649_v30, %v17078_v34 }
 0x187   : > { %1360 = vst [vmem:[#allocation3 + $0x30] sm:$0xf] %v961_v12  ;;  %v13631_v12 = vld [vmem:[#allocation2 + $0x248] sm:$0xf]  ;;  %v709_v38 = vld [vmem:[#allocation2 + $0x2a4] sm:$0x8]  ;;  %v1066_v30 = vsel %vm13501_vm2, %v10652_v50, %v17079_v44 }
 0x188   : > { %1362 = vst [vmem:[#allocation3 + $0x38] sm:$0xf] %v968_v0  ;;  %v13641_v0 = vld [vmem:[#allocation2 + $0x260] sm:$0xf]  ;;  %v17084_v42 = vrot.slane %v13631_v12, 7  ;;  %v10659_v34 = vrot.slane %v709_v38, 11 }
 0x189   : > { %1364 = vst [vmem:[#allocation3 + $0x40] sm:$0xf] %v975_v37  ;;  %v17225_v37 = vrot.slane %v13508_v51, 7  ;;  %v17090_v18 = vrot.slane %v13641_v0, 7  ;;  %v712_v47 = vld [vmem:[#allocation2 + $0x2bc] sm:$0x8] }
 0x18a   : > { %1366 = vst [vmem:[#allocation3 + $0x48] sm:$0xf] %v982_v45  ;;  %v13663_v45 = vld [vmem:[#allocation2 + $0x274] sm:$0x8]  ;;  %v13694_v10 = vld [vmem:[#allocation2 + $0x2d8] sm:$0xf] }
 0x18b   : > { %v1010_v36 = vsel %vm13501_vm2, %v17226_v48, %v17225_v37  ;;  %1368 = vst [vmem:[#allocation3 + $0x50] sm:$0xf] %v989_v24  ;;  %v17081_v48 = vrot.slane %v13613_v19, 7  ;;  %v10654_v37 = vrot.slane %v694_v60, 11  ;;  %v10657_v53 = vrot.slane %v13663_v45, 11 }
 0x18c   : > { %1370 = vst [vmem:[#allocation3 + $0x58] sm:$0xf] %v996_v28  ;;  %v17088_v24 = vrot.slane %v13665_v32, 7  ;;  %v706_v60 = vld [vmem:[#allocation2 + $0x28c] sm:$0x8]  ;;  %v17087_v50 = vrot.slane %v13682_v17, 7  ;;  %v1094_v13 = vsel %vm13501_vm2, %v10656_v4, %v17090_v18 }
 0x18d   : > { %1372 = vst [vmem:[#allocation3 + $0x60] sm:$0xf] %v1003_v55  ;;  %v13680_v28 = vld [vmem:[#allocation2 + $0x290] sm:$0xf]  ;;  %v1038_v55 = vsel %vm13501_vm2, %v10648_v22, %v17080_v52  ;;  %v13688_v45 = vld [vmem:[#allocation2 + $0x2c0] sm:$0xf] }
 0x18e   : > { %1374 = vst [vmem:[#allocation3 + $0x68] sm:$0xf] %v1010_v36  ;;  %v715_v36 = vld [vmem:[#allocation2 + $0x2d4] sm:$0x8]  ;;  %v13700_v22 = vld [vmem:[#allocation2 + $0x2f0] sm:$0xf] }
 0x18f   : > { %1376 = vst [vmem:[#allocation3 + $0x70] sm:$0xf] %v1017_v58  ;;  %v1052_v58 = vsel %vm13501_vm2, %v10650_v41, %v17076_v29  ;;  %v1080_v41 = vsel %vm13501_vm2, %v10654_v37, %v17083_v63  ;;  %v13718_v29 = vld [vmem:[#allocation2 + $0x308] sm:$0xf]  ;;  %v10660_v44 = vrot.slane %v712_v47, 11  ;;  %v17089_v52 = vrot.slane %v13688_v45, 7 }
 0x190   : > { %17227 = vst [vmem:[#allocation7_spill] sm:$0xff] %v13688_v45  ;;  %v17092_v37 = vrot.slane %v13700_v22, 7  ;;  %v724_v38 = vld [vmem:[#allocation2 + $0x31c] sm:$0x8]  ;;  %v13730_v47 = vld [vmem:[#allocation2 + $0x320] sm:$0xf] }
 0x191   : > { %1378 = vst [vmem:[#allocation3 + $0x78] sm:$0xf] %v1024_v40  ;;  %v1059_v40 = vsel %vm13501_vm2, %v10651_v26, %v17077_v6  ;;  %v10658_v26 = vrot.slane %v706_v60, 11  ;;  %v17086_v6 = vrot.slane %v13680_v28, 7  ;;  %v1087_v60 = vsel %vm13501_vm2, %v10655_v16, %v17084_v42  ;;  %v13744_v42 = vld [vmem:[#allocation2 + $0x368] sm:$0xf] }
 0x192   : > { %17228 = vst [vmem:[#allocation8_spill] sm:$0xff] %v13694_v10  ;;  %v1101_v16 = vsel %vm13501_vm2, %v10657_v53, %v17088_v24  ;;  %v13750_v4 = vld [vmem:[#allocation2 + $0x380] sm:$0xf]  ;;  %v1122_v53 = vsel %vm13501_vm2, %v10660_v44, %v17089_v52 }
 0x193   : > { %1380 = vst [vmem:[#allocation3 + $0x80] sm:$0xf] %v1031_v8  ;;  %v1073_v8 = vsel %vm13501_vm2, %v10653_v62, %v17081_v48  ;;  %v10661_v62 = vrot.slane %v715_v36, 11  ;;  %v17091_v48 = vrot.slane %v13694_v10, 7  ;;  %v13732_v36 = vld [vmem:[#allocation2 + $0x338] sm:$0xf] }
 0x194   : > { %17229 = vst [vmem:[#allocation9_spill] sm:$0xff] %v13700_v22  ;;  %v17094_v44 = vrot.slane %v13732_v36, 7  ;;  %v1649_v22 = vld [vmem:[#allocation2 + $0x68] sm:$0xe]  ;;  %v1652_v10 = vld [vmem:[#allocation2 + $0x80] sm:$0xe] }
 0x195   : > { %1382 = vst [vmem:[#allocation3 + $0x88] sm:$0xf] %v1038_v55  ;;  %v721_v55 = vld [vmem:[#allocation2 + $0x304] sm:$0x8] }
 0x196   : > { %1384 = vst [vmem:[#allocation3 + $0x90] sm:$0xf] %v1045_v21  ;;  %v10663_v63 = vrot.slane %v721_v55, 11  ;;  %v13738_v55 = vld [vmem:[#allocation2 + $0x350] sm:$0xf]  ;;  %v10668_v21 = vrot.slane %v736_v7, 11 }
 0x197   : > { %1386 = vst [vmem:[#allocation3 + $0x98] sm:$0xf] %v1052_v58  ;;  %v727_v58 = vld [vmem:[#allocation2 + $0x334] sm:$0x8]  ;;  %v17095_v18 = vrot.slane %v13738_v55, 7 }
 0x198   : > { %1388 = vst [vmem:[#allocation3 + $0xa0] sm:$0xf] %v1059_v40  ;;  %v730_v40 = vld [vmem:[#allocation2 + $0x34c] sm:$0x8]  ;;  %v10665_v24 = vrot.slane %v727_v58, 11 }
 0x199   : > { %1390 = vst [vmem:[#allocation3 + $0xa8] sm:$0xf] %v1066_v30  ;;  %v733_v30 = vld [vmem:[#allocation2 + $0x364] sm:$0x8]  ;;  %v10666_v52 = vrot.slane %v730_v40, 11 }
 0x19a   : > { %1392 = vst [vmem:[#allocation3 + $0xb0] sm:$0xf] %v1073_v8  ;;  %v1108_v8 = vsel %vm13501_vm2, %v10658_v26, %v17086_v6  ;;  %v1136_v26 = vsel %vm13501_vm2, %v10662_v9, %v17092_v37  ;;  %v13768_v6 = vld [vmem:[#allocation2 + $0x398] sm:$0xf]  ;;  %v17097_v9 = vrot.slane %v13750_v4, 7 }
 0x19b   : > { %1394 = vst [vmem:[#allocation3 + $0xb8] sm:$0xf] %v1080_v41  ;;  %v1115_v41 = vsel %vm13501_vm2, %v10659_v34, %v17087_v50  ;;  %v10664_v34 = vrot.slane %v724_v38, 11  ;;  %v17093_v50 = vrot.slane %v13730_v47, 7  ;;  %v17230_v38 = vrot.slane %v13718_v29, 7 }
 0x19c   : > { %1396 = vst [vmem:[#allocation3 + $0xc0] sm:$0xf] %v1087_v60  ;;  %v1129_v60 = vsel %vm13501_vm2, %v10661_v62, %v17091_v48  ;;  %v10667_v62 = vrot.slane %v733_v30, 11  ;;  %v17096_v48 = vrot.slane %v13744_v42, 7  ;;  %v13780_v40 = vld [vmem:[#allocation2 + $0x3b0] sm:$0xf] }
 0x19d   : > { %1398 = vst [vmem:[#allocation3 + $0xc8] sm:$0xf] %v1094_v13  ;;  %v739_v13 = vld [vmem:[#allocation2 + $0x394] sm:$0x8]  ;;  %v1143_v58 = vsel %vm13501_vm2, %v10663_v63, %v17230_v38  ;;  %v1150_v7 = vsel %vm13501_vm2, %v10664_v34, %v17093_v50  ;;  %v745_v30 = vld [vmem:[#allocation2 + $0x3c4] sm:$0x8] }
 0x19e   : > { %1400 = vst [vmem:[#allocation3 + $0xd0] sm:$0xf] %v1101_v16  ;;  %v10669_v37 = vrot.slane %v739_v13, 11  ;;  %v748_v13 = vld [vmem:[#allocation2 + $0x3dc] sm:$0x8]  ;;  %v17098_v34 = vrot.slane %v13780_v40, 7 }
 0x19f   : > { %1402 = vst [vmem:[#allocation3 + $0xd8] sm:$0xf] %v1108_v8  ;;  %v742_v8 = vld [vmem:[#allocation2 + $0x3ac] sm:$0x8]  ;;  %v13792_v63 = vld [vmem:[#allocation2 + $0x3e0] sm:$0xf] }
 0x1a0   : > { %1404 = vst [vmem:[#allocation3 + $0xe0] sm:$0xf] %v1115_v41  ;;  %v13786_v41 = vld [vmem:[#allocation2 + $0x3c8] sm:$0xf]  ;;  %v10670_v38 = vrot.slane %v742_v8, 11  ;;  %v17104_v8 = vrot.slane %v13792_v63, 7 }
 0x1a1   : > { %1406 = vst [vmem:[#allocation3 + $0xe8] sm:$0xf] %v1122_v53  ;;  %v1157_v53 = vsel %vm13501_vm2, %v10665_v24, %v17094_v44  ;;  %v751_v50 = vld [vmem:[#allocation2 + $0x3f4] sm:$0x8]  ;;  %v10671_v24 = vrot.slane %v745_v30, 11 }
 0x1a2   : > { %1408 = vst [vmem:[#allocation3 + $0xf0] sm:$0xf] %v1129_v60  ;;  %v1164_v60 = vsel %vm13501_vm2, %v10666_v52, %v17095_v18  ;;  %v13804_v16 = vld [vmem:[#allocation2 + $0x3f8] sm:$0xf]  ;;  %v1178_v52 = vsel %vm13501_vm2, %v10668_v21, %v17097_v9  ;;  %v17231_v18 = vrot.slane %v13768_v6, 7  ;;  %v10673_v30 = vrot.slane %v751_v50, 11 }
 0x1a3   : > { %1410 = vst [vmem:[#allocation3 + $0xf8] sm:$0xf] %v1136_v26  ;;  %v1171_v26 = vsel %vm13501_vm2, %v10667_v62, %v17096_v48  ;;  %v17103_v48 = vrot.slane %v13804_v16, 7  ;;  %v13816_v44 = vld [vmem:[#allocation2 + $0x410] sm:$0xf]  ;;  %v1192_v21 = vsel %vm13501_vm2, %v10670_v38, %v17098_v34  ;;  %v17232_v9 = vrot.slane %v13786_v41, 7 }
 0x1a4   : > { %1412 = vst [vmem:[#allocation3 + $0x100] sm:$0xf] %v1143_v58  ;;  %v10672_v58 = vrot.slane %v748_v13, 11  ;;  %v1185_v62 = vsel %vm13501_vm2, %v10669_v37, %v17231_v18  ;;  %v17099_v13 = vrot.slane %v13816_v44, 7  ;;  %v13827_v50 = vld [vmem:[#allocation2 + $0x428] sm:$0xf] }
 0x1a5   : > { %1414 = vst [vmem:[#allocation3 + $0x108] sm:$0xf] %v1150_v7  ;;  %v754_v7 = vld [vmem:[#allocation2 + $0x40c] sm:$0x8]  ;;  %v1199_v18 = vsel %vm13501_vm2, %v10671_v24, %v17232_v9  ;;  %v17100_v38 = vrot.slane %v13827_v50, 7 }
 0x1a6   : > { %1416 = vst [vmem:[#allocation3 + $0x110] sm:$0xf] %v1157_v53  ;;  %v10674_v53 = vrot.slane %v754_v7, 11  ;;  %v760_v7 = vld [vmem:[#allocation2 + $0x43c] sm:$0x8] }
 0x1a7   : > { %1418 = vst [vmem:[#allocation3 + $0x118] sm:$0xf] %v1164_v60  ;;  %v757_v60 = vld [vmem:[#allocation2 + $0x424] sm:$0x8]  ;;  %v13838_v34 = vld [vmem:[#allocation2 + $0x440] sm:$0xf] }
 0x1a8   : > { %1420 = vst [vmem:[#allocation3 + $0x120] sm:$0xf] %v1171_v26  ;;  %v10675_v37 = vrot.slane %v757_v60, 11  ;;  %v1206_v26 = vsel %vm13501_vm2, %v10672_v58, %v17104_v8  ;;  %v10676_v9 = vrot.slane %v760_v7, 11  ;;  %v1220_v24 = vsel %vm13501_vm2, %v10674_v53, %v17099_v13  ;;  %v13849_v60 = vld [vmem:[#allocation2 + $0x458] sm:$0xf] }
 0x1a9   : > { %1422 = vst [vmem:[#allocation3 + $0x128] sm:$0xf] %v1178_v52  ;;  %v1213_v52 = vsel %vm13501_vm2, %v10673_v30, %v17103_v48  ;;  %v17102_v58 = vrot.slane %v13838_v34, 7  ;;  %v17101_v53 = vrot.slane %v13849_v60, 7  ;;  %v766_v7 = vld [vmem:[#allocation2 + $0x46c] sm:$0x8] }
 0x1aa   : > { %1424 = vst [vmem:[#allocation3 + $0x130] sm:$0xf] %v1185_v62  ;;  %v763_v62 = vld [vmem:[#allocation2 + $0x454] sm:$0x8]  ;;  %v10678_v13 = vrot.slane %v766_v7, 11 }
 0x1ab   : > { %1426 = vst [vmem:[#allocation3 + $0x138] sm:$0xf] %v1192_v21  ;;  %v1227_v21 = vsel %vm13501_vm2, %v10675_v37, %v17100_v38  ;;  %v10677_v30 = vrot.slane %v763_v62, 11  ;;  %v1637_v62 = vld [vmem:[#allocation2 + $0x8] sm:$0xe] }
 0x1ac   : > { %1428 = vst [vmem:[#allocation3 + $0x140] sm:$0xf] %v1199_v18  ;;  %v1234_v18 = vsel %vm13501_vm2, %v10676_v9, %v17102_v58  ;;  %v13863_v38 = vld [vmem:[#allocation2 + $0xc] sm:$0xf]  ;;  %v1640_v7 = vld [vmem:[#allocation2 + $0x20] sm:$0xe] }
 0x1ad   : > { %1430 = vst [vmem:[#allocation3 + $0x148] sm:$0xf] %v1206_v26  ;;  %v13856_v26 = vld [vmem:[#allocation2 + $0x470] sm:$0xf]  ;;  %v1241_v37 = vsel %vm13501_vm2, %v10677_v30, %v17101_v53  ;;  %v17108_v30 = vrot.slane %v13863_v38, 5 }
 0x1ae   : > { %1432 = vst [vmem:[#allocation3 + $0x150] sm:$0xf] %v1213_v52  ;;  %v17105_v52 = vrot.slane %v13856_v26, 7  ;;  %v13875_v53 = vld [vmem:[#allocation2 + $0x24] sm:$0xf] }
 0x1af   : > { %1434 = vst [vmem:[#allocation3 + $0x158] sm:$0xf] %v1220_v24  ;;  %v10679_v24 = vrot.slane %v1637_v62, 9  ;;  %v17111_v62 = vrot.slane %v13875_v53, 5  ;;  %v13882_v48 = vld [vmem:[#allocation2 + $0x3c] sm:$0xf] }
 0x1b0   : > { %1436 = vst [vmem:[#allocation3 + $0x160] sm:$0xf] %v1227_v21  ;;  %v1248_v21 = vsel %vm13501_vm2, %v10678_v13, %v17105_v52  ;;  %v17112_v13 = vrot.slane %v13882_v48, 5  ;;  %v1646_v52 = vld [vmem:[#allocation2 + $0x50] sm:$0xe] }
 0x1b1   : > { %1438 = vst [vmem:[#allocation3 + $0x168] sm:$0xf] %v1234_v18  ;;  %v10680_v18 = vrot.slane %v1640_v7, 9  ;;  %v1931_v58 = vsel %vm13866_vm5, %v10679_v24, %v17108_v30  ;;  %v13889_v7 = vld [vmem:[#allocation2 + $0x54] sm:$0xf]  ;;  %v10683_v30 = vrot.slane %v1649_v22, 9 }
 0x1b2   : > { %17233 = vst [vmem:[#allocation10_spill] sm:$0xff] %v13863_v38  ;;  %v10682_v38 = vrot.slane %v1646_v52, 9 }
 0x1b3   : > { %1440 = vst [vmem:[#allocation3 + $0x170] sm:$0xf] %v1241_v37  ;;  %v1643_v37 = vld [vmem:[#allocation2 + $0x38] sm:$0xe] }
 0x1b4   : > { %1442 = vst [vmem:[#allocation3 + $0x178] sm:$0xf] %v1248_v21  ;;  %v10681_v8 = vrot.slane %v1643_v37, 9  ;;  %v1938_v21 = vsel %vm13866_vm5, %v10680_v18, %v17111_v62  ;;  %v13896_v37 = vld [vmem:[#allocation2 + $0x6c] sm:$0xf] }
 0x1b5   : > { %17236 = vst [vmem:[#allocation11_spill] sm:$0xff] %v13875_v53  ;;  %v17116_v53 = vrot.slane %v13896_v37, 5  ;;  %v13903_v18 = vld [vmem:[#allocation2 + $0x84] sm:$0xf]  ;;  %v1655_v62 = vld [vmem:[#allocation2 + $0x98] sm:$0xe] }
 0x1b6   : > { %17237 = vst [vmem:[#allocation12_spill] sm:$0xff] %v13882_v48  ;;  %v1945_v24 = vsel %vm13866_vm5, %v10681_v8, %v17112_v13  ;;  %v17119_v22 = vrot.slane %v13903_v18, 5  ;;  %v10685_v13 = vrot.slane %v1655_v62, 9  ;;  %v1658_v48 = vld [vmem:[#allocation2 + $0xb0] sm:$0xe] }
 0x1b7   : > { %2361 = vst [vmem:[#allocation3 + $0x300] sm:$0xf] %v1931_v58  ;;  %v17115_v58 = vrot.slane %v13889_v7, 5  ;;  %v1959_v8 = vsel %vm13866_vm5, %v10683_v30, %v17116_v53 }
 0x1b8   : > { %17238 = vst [vmem:[#allocation13_spill] sm:$0xff] %v13889_v7 }
 0x1b9   : > { %2363 = vst [vmem:[#allocation3 + $0x308] sm:$0xf] %v1938_v21  ;;  %v1952_v52 = vsel %vm13866_vm5, %v10682_v38, %v17115_v58  ;;  %v10684_v21 = vrot.slane %v1652_v10, 9  ;;  %v13917_v38 = vld [vmem:[#allocation2 + $0xb4] sm:$0xf] }
 0x1ba   : > { %17239 = vst [vmem:[#allocation14_spill] sm:$0xff] %v13896_v37  ;;  %v1661_v58 = vld [vmem:[#allocation2 + $0xc8] sm:$0xe]  ;;  %v17123_v62 = vrot.slane %v13917_v38, 5  ;;  %v1664_v37 = vld [vmem:[#allocation2 + $0xe0] sm:$0xe] }
 0x1bb   : > { %2365 = vst [vmem:[#allocation3 + $0x310] sm:$0xf] %v1945_v24  ;;  %v13910_v24 = vld [vmem:[#allocation2 + $0x9c] sm:$0xf]  ;;  %v1966_v10 = vsel %vm13866_vm5, %v10684_v21, %v17119_v22  ;;  %v10687_v53 = vrot.slane %v1661_v58, 9 }
 0x1bc   : > { %17240 = vst [vmem:[#allocation15_spill] sm:$0xff] %v13903_v18  ;;  %v17120_v7 = vrot.slane %v13910_v24, 5  ;;  %v13931_v21 = vld [vmem:[#allocation2 + $0xe4] sm:$0xf]  ;;  %v1667_v22 = vld [vmem:[#allocation2 + $0xf8] sm:$0xe] }
 0x1bd   : > { %2367 = vst [vmem:[#allocation3 + $0x318] sm:$0xf] %v1952_v52  ;;  %v10686_v52 = vrot.slane %v1658_v48, 9  ;;  %v17127_v58 = vrot.slane %v13931_v21, 5 }
 0x1be   : > { %17241 = vst [vmem:[#allocation16_spill] sm:$0xff] %v13910_v24  ;;  %v1973_v30 = vsel %vm13866_vm5, %v10685_v13, %v17120_v7  ;;  %v10689_v7 = vrot.slane %v1667_v22, 9  ;;  %v1670_v24 = vld [vmem:[#allocation2 + $0x110] sm:$0xe] }
 0x1bf   : > { %2369 = vst [vmem:[#allocation3 + $0x320] sm:$0xf] %v1959_v8  ;;  %v13924_v8 = vld [vmem:[#allocation2 + $0xcc] sm:$0xf]  ;;  %v1980_v48 = vsel %vm13866_vm5, %v10686_v52, %v17123_v62  ;;  %v13945_v52 = vld [vmem:[#allocation2 + $0x114] sm:$0xf] }
 0x1c0   : > { %17242 = vst [vmem:[#allocation17_spill] sm:$0xff] %v13917_v38  ;;  %v17124_v18 = vrot.slane %v13924_v8, 5  ;;  %v1673_v62 = vld [vmem:[#allocation2 + $0x128] sm:$0xe]  ;;  %v17131_v22 = vrot.slane %v13945_v52, 5 }
 0x1c1   : > { %2371 = vst [vmem:[#allocation3 + $0x328] sm:$0xf] %v1966_v10  ;;  %v10688_v10 = vrot.slane %v1664_v37, 9 }
 0x1c2   : > { %17243 = vst [vmem:[#allocation18_spill] sm:$0xff] %v13924_v8  ;;  %v1987_v13 = vsel %vm13866_vm5, %v10687_v53, %v17124_v18  ;;  %v10691_v18 = vrot.slane %v1673_v62, 9  ;;  %v1676_v8 = vld [vmem:[#allocation2 + $0x140] sm:$0xe] }
 0x1c3   : > { %2373 = vst [vmem:[#allocation3 + $0x330] sm:$0xf] %v1973_v30  ;;  %v13938_v30 = vld [vmem:[#allocation2 + $0xfc] sm:$0xf]  ;;  %v1994_v37 = vsel %vm13866_vm5, %v10688_v10, %v17127_v58  ;;  %v13959_v10 = vld [vmem:[#allocation2 + $0x144] sm:$0xf] }
 0x1c4   : > { %17244 = vst [vmem:[#allocation19_spill] sm:$0xff] %v13931_v21  ;;  %v17128_v38 = vrot.slane %v13938_v30, 5  ;;  %v1679_v58 = vld [vmem:[#allocation2 + $0x158] sm:$0xe]  ;;  %v17135_v62 = vrot.slane %v13959_v10, 5 }
 0x1c5   : > { %2375 = vst [vmem:[#allocation3 + $0x338] sm:$0xf] %v1980_v48  ;;  %v10690_v48 = vrot.slane %v1670_v24, 9 }
 0x1c6   : > { %17245 = vst [vmem:[#allocation20_spill] sm:$0xff] %v13938_v30  ;;  %v2001_v53 = vsel %vm13866_vm5, %v10689_v7, %v17128_v38  ;;  %v10693_v38 = vrot.slane %v1679_v58, 9  ;;  %v1682_v30 = vld [vmem:[#allocation2 + $0x170] sm:$0xe] }
 0x1c7   : > { %2377 = vst [vmem:[#allocation3 + $0x340] sm:$0xf] %v1987_v13  ;;  %v13952_v13 = vld [vmem:[#allocation2 + $0x12c] sm:$0xf]  ;;  %v2008_v24 = vsel %vm13866_vm5, %v10690_v48, %v17131_v22  ;;  %v13973_v48 = vld [vmem:[#allocation2 + $0x174] sm:$0xf] }
 0x1c8   : > { %17246 = vst [vmem:[#allocation21_spill] sm:$0xff] %v13945_v52  ;;  %v17132_v21 = vrot.slane %v13952_v13, 5  ;;  %v1685_v22 = vld [vmem:[#allocation2 + $0x188] sm:$0xe]  ;;  %v17139_v58 = vrot.slane %v13973_v48, 5 }
 0x1c9   : > { %2379 = vst [vmem:[#allocation3 + $0x348] sm:$0xf] %v1994_v37  ;;  %v10692_v37 = vrot.slane %v1676_v8, 9 }
 0x1ca   : > { %17247 = vst [vmem:[#allocation22_spill] sm:$0xff] %v13952_v13  ;;  %v2015_v7 = vsel %vm13866_vm5, %v10691_v18, %v17132_v21  ;;  %v10695_v21 = vrot.slane %v1685_v22, 9  ;;  %v1688_v13 = vld [vmem:[#allocation2 + $0x1a0] sm:$0xe] }
 0x1cb   : > { %2381 = vst [vmem:[#allocation3 + $0x350] sm:$0xf] %v2001_v53  ;;  %v13966_v53 = vld [vmem:[#allocation2 + $0x15c] sm:$0xf]  ;;  %v2022_v8 = vsel %vm13866_vm5, %v10692_v37, %v17135_v62  ;;  %v13987_v37 = vld [vmem:[#allocation2 + $0x1a4] sm:$0xf] }
 0x1cc   : > { %17248 = vst [vmem:[#allocation23_spill] sm:$0xff] %v13959_v10  ;;  %v17136_v52 = vrot.slane %v13966_v53, 5  ;;  %v1691_v62 = vld [vmem:[#allocation2 + $0x1b8] sm:$0xe]  ;;  %v17143_v22 = vrot.slane %v13987_v37, 5 }
 0x1cd   : > { %2383 = vst [vmem:[#allocation3 + $0x358] sm:$0xf] %v2008_v24  ;;  %v10694_v24 = vrot.slane %v1682_v30, 9 }
 0x1ce   : > { %17249 = vst [vmem:[#allocation24_spill] sm:$0xff] %v13966_v53  ;;  %v2029_v18 = vsel %vm13866_vm5, %v10693_v38, %v17136_v52  ;;  %v10697_v52 = vrot.slane %v1691_v62, 9  ;;  %v1694_v53 = vld [vmem:[#allocation2 + $0x1d0] sm:$0xe] }
 0x1cf   : > { %2385 = vst [vmem:[#allocation3 + $0x360] sm:$0xf] %v2015_v7  ;;  %v13980_v7 = vld [vmem:[#allocation2 + $0x18c] sm:$0xf]  ;;  %v2036_v30 = vsel %vm13866_vm5, %v10694_v24, %v17139_v58  ;;  %v14001_v24 = vld [vmem:[#allocation2 + $0x1d4] sm:$0xf] }
 0x1d0   : > { %17250 = vst [vmem:[#allocation25_spill] sm:$0xff] %v13973_v48  ;;  %v17140_v10 = vrot.slane %v13980_v7, 5  ;;  %v1697_v58 = vld [vmem:[#allocation2 + $0x1e8] sm:$0xe]  ;;  %v17147_v62 = vrot.slane %v14001_v24, 5 }
 0x1d1   : > { %2387 = vst [vmem:[#allocation3 + $0x368] sm:$0xf] %v2022_v8  ;;  %v10696_v8 = vrot.slane %v1688_v13, 9 }
 0x1d2   : > { %17251 = vst [vmem:[#allocation26_spill] sm:$0xff] %v13980_v7  ;;  %v2043_v38 = vsel %vm13866_vm5, %v10695_v21, %v17140_v10  ;;  %v10699_v10 = vrot.slane %v1697_v58, 9  ;;  %v1700_v7 = vld [vmem:[#allocation2 + $0x200] sm:$0xe] }
 0x1d3   : > { %2389 = vst [vmem:[#allocation3 + $0x370] sm:$0xf] %v2029_v18  ;;  %v13994_v18 = vld [vmem:[#allocation2 + $0x1bc] sm:$0xf]  ;;  %v2050_v13 = vsel %vm13866_vm5, %v10696_v8, %v17143_v22  ;;  %v14015_v8 = vld [vmem:[#allocation2 + $0x204] sm:$0xf] }
 0x1d4   : > { %17252 = vst [vmem:[#allocation27_spill] sm:$0xff] %v13987_v37  ;;  %v17144_v48 = vrot.slane %v13994_v18, 5  ;;  %v1703_v22 = vld [vmem:[#allocation2 + $0x218] sm:$0xe]  ;;  %v17151_v58 = vrot.slane %v14015_v8, 5 }
 0x1d5   : > { %2391 = vst [vmem:[#allocation3 + $0x378] sm:$0xf] %v2036_v30  ;;  %v10698_v30 = vrot.slane %v1694_v53, 9 }
 0x1d6   : > { %17253 = vst [vmem:[#allocation28_spill] sm:$0xff] %v13994_v18  ;;  %v2057_v21 = vsel %vm13866_vm5, %v10697_v52, %v17144_v48  ;;  %v10701_v48 = vrot.slane %v1703_v22, 9  ;;  %v1706_v18 = vld [vmem:[#allocation2 + $0x230] sm:$0xe] }
 0x1d7   : > { %2393 = vst [vmem:[#allocation3 + $0x380] sm:$0xf] %v2043_v38  ;;  %v14008_v38 = vld [vmem:[#allocation2 + $0x1ec] sm:$0xf]  ;;  %v2064_v53 = vsel %vm13866_vm5, %v10698_v30, %v17147_v62  ;;  %v14029_v30 = vld [vmem:[#allocation2 + $0x234] sm:$0xf] }
 0x1d8   : > { %17254 = vst [vmem:[#allocation29_spill] sm:$0xff] %v14001_v24  ;;  %v17148_v37 = vrot.slane %v14008_v38, 5  ;;  %v1709_v62 = vld [vmem:[#allocation2 + $0x248] sm:$0xe]  ;;  %v17155_v22 = vrot.slane %v14029_v30, 5 }
 0x1d9   : > { %2395 = vst [vmem:[#allocation3 + $0x388] sm:$0xf] %v2050_v13  ;;  %v10700_v13 = vrot.slane %v1700_v7, 9 }
 0x1da   : > { %17255 = vst [vmem:[#allocation30_spill] sm:$0xff] %v14008_v38  ;;  %v2071_v52 = vsel %vm13866_vm5, %v10699_v10, %v17148_v37  ;;  %v10703_v37 = vrot.slane %v1709_v62, 9  ;;  %v1712_v38 = vld [vmem:[#allocation2 + $0x260] sm:$0xe] }
 0x1db   : > { %2397 = vst [vmem:[#allocation3 + $0x390] sm:$0xf] %v2057_v21  ;;  %v14022_v21 = vld [vmem:[#allocation2 + $0x21c] sm:$0xf]  ;;  %v2078_v7 = vsel %vm13866_vm5, %v10700_v13, %v17151_v58  ;;  %v14043_v13 = vld [vmem:[#allocation2 + $0x264] sm:$0xf] }
 0x1dc   : > { %17256 = vst [vmem:[#allocation31_spill] sm:$0xff] %v14015_v8  ;;  %v17152_v24 = vrot.slane %v14022_v21, 5  ;;  %v1715_v58 = vld [vmem:[#allocation2 + $0x278] sm:$0xe]  ;;  %v17159_v62 = vrot.slane %v14043_v13, 5 }
 0x1dd   : > { %2399 = vst [vmem:[#allocation3 + $0x398] sm:$0xf] %v2064_v53  ;;  %v10702_v53 = vrot.slane %v1706_v18, 9 }
 0x1de   : > { %17257 = vst [vmem:[#allocation32_spill] sm:$0xff] %v14022_v21  ;;  %v2085_v10 = vsel %vm13866_vm5, %v10701_v48, %v17152_v24  ;;  %v10705_v24 = vrot.slane %v1715_v58, 9  ;;  %v1718_v21 = vld [vmem:[#allocation2 + $0x290] sm:$0xe] }
 0x1df   : > { %2401 = vst [vmem:[#allocation3 + $0x3a0] sm:$0xf] %v2071_v52  ;;  %v14036_v52 = vld [vmem:[#allocation2 + $0x24c] sm:$0xf]  ;;  %v2092_v18 = vsel %vm13866_vm5, %v10702_v53, %v17155_v22  ;;  %v14057_v53 = vld [vmem:[#allocation2 + $0x294] sm:$0xf] }
 0x1e0   : > { %17258 = vst [vmem:[#allocation33_spill] sm:$0xff] %v14029_v30  ;;  %v17156_v8 = vrot.slane %v14036_v52, 5  ;;  %v1721_v22 = vld [vmem:[#allocation2 + $0x2a8] sm:$0xe]  ;;  %v17163_v58 = vrot.slane %v14057_v53, 5 }
 0x1e1   : > { %2403 = vst [vmem:[#allocation3 + $0x3a8] sm:$0xf] %v2078_v7  ;;  %v10704_v7 = vrot.slane %v1712_v38, 9 }
 0x1e2   : > { %17259 = vst [vmem:[#allocation34_spill] sm:$0xff] %v14036_v52  ;;  %v2099_v48 = vsel %vm13866_vm5, %v10703_v37, %v17156_v8  ;;  %v10707_v8 = vrot.slane %v1721_v22, 9  ;;  %v1724_v52 = vld [vmem:[#allocation2 + $0x2c0] sm:$0xe] }
 0x1e3   : > { %2405 = vst [vmem:[#allocation3 + $0x3b0] sm:$0xf] %v2085_v10  ;;  %v14050_v10 = vld [vmem:[#allocation2 + $0x27c] sm:$0xf]  ;;  %v2106_v38 = vsel %vm13866_vm5, %v10704_v7, %v17159_v62  ;;  %v14071_v7 = vld [vmem:[#allocation2 + $0x2c4] sm:$0xf] }
 0x1e4   : > { %17260 = vst [vmem:[#allocation35_spill] sm:$0xff] %v14043_v13  ;;  %v17160_v30 = vrot.slane %v14050_v10, 5  ;;  %v1727_v62 = vld [vmem:[#allocation2 + $0x2d8] sm:$0xe]  ;;  %v17167_v22 = vrot.slane %v14071_v7, 5 }
 0x1e5   : > { %2407 = vst [vmem:[#allocation3 + $0x3b8] sm:$0xf] %v2092_v18  ;;  %v10706_v18 = vrot.slane %v1718_v21, 9 }
 0x1e6   : > { %17261 = vst [vmem:[#allocation36_spill] sm:$0xff] %v14050_v10  ;;  %v2113_v37 = vsel %vm13866_vm5, %v10705_v24, %v17160_v30  ;;  %v10709_v30 = vrot.slane %v1727_v62, 9  ;;  %v1730_v10 = vld [vmem:[#allocation2 + $0x2f0] sm:$0xe] }
 0x1e7   : > { %2409 = vst [vmem:[#allocation3 + $0x3c0] sm:$0xf] %v2099_v48  ;;  %v14064_v48 = vld [vmem:[#allocation2 + $0x2ac] sm:$0xf]  ;;  %v2120_v21 = vsel %vm13866_vm5, %v10706_v18, %v17163_v58  ;;  %v14085_v18 = vld [vmem:[#allocation2 + $0x2f4] sm:$0xf] }
 0x1e8   : > { %17262 = vst [vmem:[#allocation37_spill] sm:$0xff] %v14057_v53  ;;  %v17164_v13 = vrot.slane %v14064_v48, 5  ;;  %v1733_v58 = vld [vmem:[#allocation2 + $0x308] sm:$0xe]  ;;  %v17171_v62 = vrot.slane %v14085_v18, 5 }
 0x1e9   : > { %2411 = vst [vmem:[#allocation3 + $0x3c8] sm:$0xf] %v2106_v38  ;;  %v10708_v38 = vrot.slane %v1724_v52, 9 }
 0x1ea   : > { %17263 = vst [vmem:[#allocation38_spill] sm:$0xff] %v14064_v48  ;;  %v2127_v24 = vsel %vm13866_vm5, %v10707_v8, %v17164_v13  ;;  %v10711_v13 = vrot.slane %v1733_v58, 9  ;;  %v1736_v48 = vld [vmem:[#allocation2 + $0x320] sm:$0xe] }
 0x1eb   : > { %2413 = vst [vmem:[#allocation3 + $0x3d0] sm:$0xf] %v2113_v37  ;;  %v14078_v37 = vld [vmem:[#allocation2 + $0x2dc] sm:$0xf]  ;;  %v2134_v52 = vsel %vm13866_vm5, %v10708_v38, %v17167_v22  ;;  %v14099_v38 = vld [vmem:[#allocation2 + $0x324] sm:$0xf] }
 0x1ec   : > { %17264 = vst [vmem:[#allocation39_spill] sm:$0xff] %v14071_v7  ;;  %v17168_v53 = vrot.slane %v14078_v37, 5  ;;  %v1739_v22 = vld [vmem:[#allocation2 + $0x338] sm:$0xe]  ;;  %v17175_v58 = vrot.slane %v14099_v38, 5 }
 0x1ed   : > { %2415 = vst [vmem:[#allocation3 + $0x3d8] sm:$0xf] %v2120_v21  ;;  %v10710_v21 = vrot.slane %v1730_v10, 9 }
 0x1ee   : > { %17265 = vst [vmem:[#allocation40_spill] sm:$0xff] %v14078_v37  ;;  %v2141_v8 = vsel %vm13866_vm5, %v10709_v30, %v17168_v53  ;;  %v10713_v53 = vrot.slane %v1739_v22, 9  ;;  %v1742_v37 = vld [vmem:[#allocation2 + $0x350] sm:$0xe] }
 0x1ef   : > { %2417 = vst [vmem:[#allocation3 + $0x3e0] sm:$0xf] %v2127_v24  ;;  %v14092_v24 = vld [vmem:[#allocation2 + $0x30c] sm:$0xf]  ;;  %v2148_v10 = vsel %vm13866_vm5, %v10710_v21, %v17171_v62  ;;  %v14113_v21 = vld [vmem:[#allocation2 + $0x354] sm:$0xf] }
 0x1f0   : > { %17266 = vst [vmem:[#allocation41_spill] sm:$0xff] %v14085_v18  ;;  %v17172_v7 = vrot.slane %v14092_v24, 5  ;;  %v1745_v62 = vld [vmem:[#allocation2 + $0x368] sm:$0xe]  ;;  %v17179_v22 = vrot.slane %v14113_v21, 5 }
 0x1f1   : > { %2419 = vst [vmem:[#allocation3 + $0x3e8] sm:$0xf] %v2134_v52  ;;  %v10712_v52 = vrot.slane %v1736_v48, 9 }
 0x1f2   : > { %17267 = vst [vmem:[#allocation42_spill] sm:$0xff] %v14092_v24  ;;  %v2155_v30 = vsel %vm13866_vm5, %v10711_v13, %v17172_v7  ;;  %v10715_v7 = vrot.slane %v1745_v62, 9  ;;  %v1748_v24 = vld [vmem:[#allocation2 + $0x380] sm:$0xe] }
 0x1f3   : > { %2421 = vst [vmem:[#allocation3 + $0x3f0] sm:$0xf] %v2141_v8  ;;  %v14106_v8 = vld [vmem:[#allocation2 + $0x33c] sm:$0xf]  ;;  %v2162_v48 = vsel %vm13866_vm5, %v10712_v52, %v17175_v58  ;;  %v14127_v52 = vld [vmem:[#allocation2 + $0x384] sm:$0xf] }
 0x1f4   : > { %17268 = vst [vmem:[#allocation43_spill] sm:$0xff] %v14099_v38  ;;  %v17176_v18 = vrot.slane %v14106_v8, 5  ;;  %v1751_v58 = vld [vmem:[#allocation2 + $0x398] sm:$0xe]  ;;  %v17183_v62 = vrot.slane %v14127_v52, 5 }
 0x1f5   : > { %2423 = vst [vmem:[#allocation3 + $0x3f8] sm:$0xf] %v2148_v10  ;;  %v10714_v10 = vrot.slane %v1742_v37, 9 }
 0x1f6   : > { %17269 = vst [vmem:[#allocation44_spill] sm:$0xff] %v14106_v8  ;;  %v2169_v13 = vsel %vm13866_vm5, %v10713_v53, %v17176_v18  ;;  %v10717_v18 = vrot.slane %v1751_v58, 9  ;;  %v1754_v8 = vld [vmem:[#allocation2 + $0x3b0] sm:$0xe] }
 0x1f7   : > { %2425 = vst [vmem:[#allocation3 + $0x400] sm:$0xf] %v2155_v30  ;;  %v14120_v30 = vld [vmem:[#allocation2 + $0x36c] sm:$0xf]  ;;  %v2176_v37 = vsel %vm13866_vm5, %v10714_v10, %v17179_v22  ;;  %v14141_v10 = vld [vmem:[#allocation2 + $0x3b4] sm:$0xf] }
 0x1f8   : > { %17270 = vst [vmem:[#allocation45_spill] sm:$0xff] %v14113_v21  ;;  %v17180_v38 = vrot.slane %v14120_v30, 5  ;;  %v1757_v22 = vld [vmem:[#allocation2 + $0x3c8] sm:$0xe]  ;;  %v17187_v58 = vrot.slane %v14141_v10, 5 }
 0x1f9   : > { %2427 = vst [vmem:[#allocation3 + $0x408] sm:$0xf] %v2162_v48  ;;  %v10716_v48 = vrot.slane %v1748_v24, 9 }
 0x1fa   : > { %17271 = vst [vmem:[#allocation46_spill] sm:$0xff] %v14120_v30  ;;  %v2183_v53 = vsel %vm13866_vm5, %v10715_v7, %v17180_v38  ;;  %v10719_v38 = vrot.slane %v1757_v22, 9  ;;  %v1760_v30 = vld [vmem:[#allocation2 + $0x3e0] sm:$0xe] }
 0x1fb   : > { %2429 = vst [vmem:[#allocation3 + $0x410] sm:$0xf] %v2169_v13  ;;  %v14134_v13 = vld [vmem:[#allocation2 + $0x39c] sm:$0xf]  ;;  %v2190_v24 = vsel %vm13866_vm5, %v10716_v48, %v17183_v62  ;;  %v14155_v48 = vld [vmem:[#allocation2 + $0x3e4] sm:$0xf] }
 0x1fc   : > { %17272 = vst [vmem:[#allocation47_spill] sm:$0xff] %v14127_v52  ;;  %v17184_v21 = vrot.slane %v14134_v13, 5  ;;  %v1763_v62 = vld [vmem:[#allocation2 + $0x3f8] sm:$0xe]  ;;  %v17191_v22 = vrot.slane %v14155_v48, 5 }
 0x1fd   : > { %2431 = vst [vmem:[#allocation3 + $0x418] sm:$0xf] %v2176_v37  ;;  %v10718_v37 = vrot.slane %v1754_v8, 9 }
 0x1fe   : > { %17273 = vst [vmem:[#allocation48_spill] sm:$0xff] %v14134_v13  ;;  %v2197_v7 = vsel %vm13866_vm5, %v10717_v18, %v17184_v21  ;;  %v10721_v21 = vrot.slane %v1763_v62, 9  ;;  %v1766_v13 = vld [vmem:[#allocation2 + $0x410] sm:$0xe] }
 0x1ff   : > { %2433 = vst [vmem:[#allocation3 + $0x420] sm:$0xf] %v2183_v53  ;;  %v14148_v53 = vld [vmem:[#allocation2 + $0x3cc] sm:$0xf]  ;;  %v2204_v8 = vsel %vm13866_vm5, %v10718_v37, %v17187_v58  ;;  %v14169_v37 = vld [vmem:[#allocation2 + $0x414] sm:$0xf] }
 0x200   : > { %17274 = vst [vmem:[#allocation49_spill] sm:$0xff] %v14141_v10  ;;  %v17188_v52 = vrot.slane %v14148_v53, 5  ;;  %v1769_v58 = vld [vmem:[#allocation2 + $0x428] sm:$0xe] }
 0x201   : > { %2435 = vst [vmem:[#allocation3 + $0x428] sm:$0xf] %v2190_v24  ;;  %v10720_v24 = vrot.slane %v1760_v30, 9 }
 0x202   : > { %17275 = vst [vmem:[#allocation50_spill] sm:$0xff] %v14148_v53  ;;  %v2211_v18 = vsel %vm13866_vm5, %v10719_v38, %v17188_v52  ;;  %v17279_v38 = vrot.slane %v13427_v49, 7  ;;  %v14178_v53 = vld [vmem:[#allocation2 + $0x42c] sm:$0xf] }
 0x203   : > { %2437 = vst [vmem:[#allocation3 + $0x430] sm:$0xf] %v2197_v7  ;;  %v14162_v7 = vld [vmem:[#allocation2 + $0x3fc] sm:$0xf]  ;;  %v2218_v30 = vsel %vm13866_vm5, %v10720_v24, %v17191_v22  ;;  %v17197_v24 = vrot.slane %v14178_v53, 5 }
 0x204   : > { %17276 = vst [vmem:[#allocation51_spill] sm:$0xff] %v14155_v48  ;;  %v17193_v10 = vrot.slane %v14162_v7, 5  ;;  %v920_v52 = vrot.slane %v17279_v38, 4  ;;  %v10723_v48 = vrot.slane %v1769_v58, 9  ;;  %v1772_v22 = vld [vmem:[#allocation2 + $0x440] sm:$0xe] }
 0x205   : > { %2439 = vst [vmem:[#allocation3 + $0x438] sm:$0xf] %v2204_v8  ;;  %v10722_v8 = vrot.slane %v1766_v13, 9  ;;  %v17281_v13 = vrot.slane %v13433_v54, 7  ;;  %v1775_v38 = vld [vmem:[#allocation2 + $0x458] sm:$0xe] }
 0x206   : > { %17277 = vst [vmem:[#allocation52_spill] sm:$0xff] %v14162_v7  ;;  %v2225_v62 = vsel %vm13866_vm5, %v10721_v21, %v17193_v10  ;;  %v10724_v21 = vrot.slane %v1772_v22, 9  ;;  %v17283_v10 = vrot.slane %v13437_v57, 7  ;;  %v2239_v58 = vsel %vm13866_vm5, %v10723_v48, %v17197_v24 }
 0x207   : > { %2441 = vst [vmem:[#allocation3 + $0x440] sm:$0xf] %v2211_v18  ;;  %v17195_v18 = vrot.slane %v14169_v37, 5  ;;  %v927_v45 = vrot.slane %v17281_v13, 4  ;;  %v10725_v13 = vrot.slane %v1775_v38, 9  ;;  %v17285_v22 = vrot.slane %v13442_v61, 7 }
 0x208   : > { %17278 = vst [vmem:[#allocation53_spill] sm:$0xff] %v14169_v37  ;;  %v934_v7 = vrot.slane %v17283_v10, 4  ;;  %v14205_v10 = vld [vmem:[#allocation2 + $0x474] sm:$0xf]  ;;  %v17287_v24 = vrot.slane %v13447_v1, 7 }
 0x209   : > { %2443 = vst [vmem:[#allocation3 + $0x448] sm:$0xf] %v2218_v30  ;;  %v2232_v49 = vsel %vm13866_vm5, %v10722_v8, %v17195_v18  ;;  %v14187_v30 = vld [vmem:[#allocation2 + $0x444] sm:$0xf]  ;;  %v1778_v18 = vld [vmem:[#allocation2 + $0x470] sm:$0xe] }
 0x20a   : > { %17280 = vst [vmem:[#allocation54_spill] sm:$0xff] %v14178_v53  ;;  %v17200_v54 = vrot.slane %v14187_v30, 5  ;;  %v941_v37 = vrot.slane %v17285_v22, 4  ;;  %v10726_v48 = vrot.slane %v1778_v18, 9  ;;  %v948_v53 = vrot.slane %v17287_v24, 4 }
 0x20b   : > { %2445 = vst [vmem:[#allocation3 + $0x450] sm:$0xf] %v2225_v62  ;;  %v14196_v62 = vld [vmem:[#allocation2 + $0x45c] sm:$0xf]  ;;  %v17203_v61 = vrot.slane %v14205_v10, 5 }
 0x20c   : > { %17282 = vst [vmem:[#allocation55_spill] sm:$0xff] %v14187_v30  ;;  %v17201_v8 = vrot.slane %v14196_v62, 5  ;;  %v2246_v57 = vsel %vm13866_vm5, %v10724_v21, %v17200_v54  ;;  %v630_v22 = vld [vmem:[#allocation2 + $0x24] sm:$0x7]  ;;  %v633_v21 = vld [vmem:[#allocation2 + $0x3c] sm:$0x7] }
 0x20d   : > { %2447 = vst [vmem:[#allocation3 + $0x458] sm:$0xf] %v2232_v49  ;;  %v627_v49 = vld [vmem:[#allocation2 + $0xc] sm:$0x7]  ;;  %v928_v30 = vrot.slane %v630_v22, 7  ;;  %v17288_v54 = vrot.slane %v13452_v5, 7  ;;  %v2260_v1 = vsel %vm13866_vm5, %v10726_v48, %v17203_v61 }
 0x20e   : > { %17284 = vst [vmem:[#allocation56_spill] sm:$0xff] %v14196_v62  ;;  %v2253_v38 = vsel %vm13866_vm5, %v10725_v13, %v17201_v8  ;;  %v636_v13 = vld [vmem:[#allocation2 + $0x54] sm:$0x7]  ;;  %v639_v8 = vld [vmem:[#allocation2 + $0x6c] sm:$0x7] }
 0x20f   : > { %2449 = vst [vmem:[#allocation3 + $0x460] sm:$0xf] %v2239_v58  ;;  %v921_v58 = vrot.slane %v627_v49, 7  ;;  %v955_v18 = vrot.slane %v17288_v54, 4  ;;  %v17289_v49 = vrot.slane %v13462_v15, 7  ;;  %v942_v5 = vrot.slane %v636_v13, 7 }
 0x210   : > { %17286 = vst [vmem:[#allocation57_spill] sm:$0xff] %v14205_v10  ;;  %v949_v54 = vrot.slane %v639_v8, 7  ;;  %v642_v22 = vld [vmem:[#allocation2 + $0x84] sm:$0x7]  ;;  %v645_v10 = vld [vmem:[#allocation2 + $0x9c] sm:$0x7] }
 0x211   : > { %2451 = vst [vmem:[#allocation3 + $0x468] sm:$0xf] %v2246_v57  ;;  %v922_v24 = vsel %vm13501_vm2, %v920_v52, %v921_v58  ;;  %v935_v57 = vrot.slane %v633_v21, 7  ;;  %v962_v62 = vrot.slane %v17289_v49, 4  ;;  %v956_v61 = vrot.slane %v642_v22, 7 }
 0x212   : > { %2453 = vst [vmem:[#allocation3 + $0x470] sm:$0xf] %v2253_v38  ;;  %v929_v38 = vsel %vm13501_vm2, %v927_v45, %v928_v30  ;;  %v17290_v52 = vrot.slane %v13470_v23, 7  ;;  %v943_v15 = vsel %vm13501_vm2, %v941_v37, %v942_v5  ;;  %v950_v21 = vsel %vm13501_vm2, %v948_v53, %v949_v54  ;;  %v648_v30 = vld [vmem:[#allocation2 + $0xb4] sm:$0x7] }
 0x213   : > { %2455 = vst [vmem:[#allocation3 + $0x478] sm:$0xf] %v2260_v1  ;;  %v936_v48 = vsel %vm13501_vm2, %v934_v7, %v935_v57  ;;  %v963_v45 = vrot.slane %v645_v10, 7  ;;  %v17291_v8 = vrot.slane %v13475_v27, 7  ;;  %v957_v7 = vsel %vm13501_vm2, %v955_v18, %v956_v61  ;;  %v651_v57 = vld [vmem:[#allocation2 + $0xcc] sm:$0x7] }
 0x214   : > { %1349 = vst [vmem:[#allocation3 + $0x4] sm:$0xf] %v922_v24  ;;  %v969_v58 = vrot.slane %v17290_v52, 4  ;;  %v970_v24 = vrot.slane %v648_v30, 7  ;;  %v17292_v23 = vrot.slane %v13480_v31, 7  ;;  %v977_v49 = vrot.slane %v651_v57, 7 }
 0x215   : > { %1351 = vst [vmem:[#allocation3 + $0xc] sm:$0xf] %v929_v38  ;;  %v976_v1 = vrot.slane %v17291_v8, 4  ;;  %v964_v37 = vsel %vm13501_vm2, %v962_v62, %v963_v45  ;;  %v654_v53 = vld [vmem:[#allocation2 + $0xe4] sm:$0x7]  ;;  %v17293_v10 = vrot.slane %v13485_v35, 7 }
 0x216   : > { %1353 = vst [vmem:[#allocation3 + $0x14] sm:$0xf] %v936_v48  ;;  %v983_v13 = vrot.slane %v17292_v23, 4  ;;  %v971_v27 = vsel %vm13501_vm2, %v969_v58, %v970_v24  ;;  %v984_v5 = vrot.slane %v654_v53, 7  ;;  %v657_v61 = vld [vmem:[#allocation2 + $0xfc] sm:$0x7] }
 0x217   : > { %1355 = vst [vmem:[#allocation3 + $0x1c] sm:$0xf] %v943_v15  ;;  %v990_v38 = vrot.slane %v17293_v10, 4  ;;  %v17294_v18 = vrot.slane %v13490_v39, 7  ;;  %v978_v31 = vsel %vm13501_vm2, %v976_v1, %v977_v49  ;;  %v991_v22 = vrot.slane %v657_v61, 7 }
 0x218   : > { %1357 = vst [vmem:[#allocation3 + $0x24] sm:$0xf] %v950_v21  ;;  %v660_v62 = vld [vmem:[#allocation2 + $0x114] sm:$0x7]  ;;  %v17295_v48 = vrot.slane %v13495_v43, 7  ;;  %v985_v35 = vsel %vm13501_vm2, %v983_v13, %v984_v5  ;;  %v17296_v21 = vrot.slane %v13508_v51, 7 }
 0x219   : > { %v997_v54 = vrot.slane %v17294_v18, 4  ;;  %1359 = vst [vmem:[#allocation3 + $0x2c] sm:$0xf] %v957_v7  ;;  %v998_v15 = vrot.slane %v660_v62, 7  ;;  %v663_v58 = vld [vmem:[#allocation2 + $0x12c] sm:$0x7]  ;;  %v992_v39 = vsel %vm13501_vm2, %v990_v38, %v991_v22 }
 0x21a   : > { %v1004_v52 = vrot.slane %v17295_v48, 4  ;;  %1361 = vst [vmem:[#allocation3 + $0x34] sm:$0xf] %v964_v37  ;;  %v1011_v45 = vrot.slane %v17296_v21, 4  ;;  %v1005_v30 = vrot.slane %v663_v58, 7  ;;  %v17297_v1 = vrot.slane %v13518_v20, 7 }
 0x21b   : > { %1363 = vst [vmem:[#allocation3 + $0x3c] sm:$0xf] %v971_v27  ;;  %v666_v8 = vld [vmem:[#allocation2 + $0x144] sm:$0x7]  ;;  %v999_v43 = vsel %vm13501_vm2, %v997_v54, %v998_v15  ;;  %v669_v57 = vld [vmem:[#allocation2 + $0x15c] sm:$0x7] }
 0x21c   : > { %v1018_v7 = vrot.slane %v17297_v1, 4  ;;  %1365 = vst [vmem:[#allocation3 + $0x44] sm:$0xf] %v978_v31  ;;  %v1012_v24 = vrot.slane %v666_v8, 7  ;;  %v17298_v23 = vrot.slane %v13529_v33, 7  ;;  %v1006_v51 = vsel %vm13501_vm2, %v1004_v52, %v1005_v30 }
 0x21d   : > { %1367 = vst [vmem:[#allocation3 + $0x4c] sm:$0xf] %v985_v35  ;;  %v1019_v37 = vrot.slane %v669_v57, 7  ;;  %v672_v49 = vld [vmem:[#allocation2 + $0x174] sm:$0x7]  ;;  %v17299_v53 = vrot.slane %v13718_v29, 7 }
 0x21e   : > { %v1025_v13 = vrot.slane %v17298_v23, 4  ;;  %1369 = vst [vmem:[#allocation3 + $0x54] sm:$0xf] %v992_v39  ;;  %v1013_v20 = vsel %vm13501_vm2, %v1011_v45, %v1012_v24  ;;  %v1026_v38 = vrot.slane %v672_v49, 7  ;;  %v723_v27 = vld [vmem:[#allocation2 + $0x30c] sm:$0x7] }
 0x21f   : > { %v1144_v10 = vrot.slane %v17299_v53, 4  ;;  %v17300_v5 = vrot.slane %v13730_v47, 7  ;;  %1371 = vst [vmem:[#allocation3 + $0x5c] sm:$0xf] %v999_v43  ;;  %v1020_v33 = vsel %vm13501_vm2, %v1018_v7, %v1019_v37  ;;  %v1145_v18 = vrot.slane %v723_v27, 7 }
 0x220   : > { %v726_v54 = vld [vmem:[#allocation2 + $0x324] sm:$0x7]  ;;  %v17301_v31 = vrot.slane %v13732_v36, 7  ;;  %1373 = vst [vmem:[#allocation3 + $0x64] sm:$0xf] %v1006_v51  ;;  %v1027_v29 = vsel %vm13501_vm2, %v1025_v13, %v1026_v38  ;;  %v17302_v52 = vrot.slane %v13738_v55, 7 }
 0x221   : > { %v1151_v61 = vrot.slane %v17300_v5, 4  ;;  %v1152_v62 = vrot.slane %v726_v54, 7  ;;  %v729_v48 = vld [vmem:[#allocation2 + $0x33c] sm:$0x7]  ;;  %1375 = vst [vmem:[#allocation3 + $0x6c] sm:$0xf] %v1013_v20  ;;  %v1146_v47 = vsel %vm13501_vm2, %v1144_v10, %v1145_v18 }
 0x222   : > { %v1158_v22 = vrot.slane %v17301_v31, 4  ;;  %v1165_v35 = vrot.slane %v17302_v52, 4  ;;  %v1159_v15 = vrot.slane %v729_v48, 7  ;;  %v732_v58 = vld [vmem:[#allocation2 + $0x354] sm:$0x7]  ;;  %v17303_v21 = vrot.slane %v13744_v42, 7 }
 0x223   : > { %1377 = vst [vmem:[#allocation3 + $0x74] sm:$0xf] %v1020_v33  ;;  %v1153_v36 = vsel %vm13501_vm2, %v1151_v61, %v1152_v62  ;;  %v1166_v39 = vrot.slane %v732_v58, 7  ;;  %v735_v30 = vld [vmem:[#allocation2 + $0x36c] sm:$0x7]  ;;  %v17304_v8 = vrot.slane %v13750_v4, 7 }
 0x224   : > { %v1172_v45 = vrot.slane %v17303_v21, 4  ;;  %1379 = vst [vmem:[#allocation3 + $0x7c] sm:$0xf] %v1027_v29  ;;  %v1160_v55 = vsel %vm13501_vm2, %v1158_v22, %v1159_v15  ;;  %v1173_v7 = vrot.slane %v735_v30, 7  ;;  %v738_v43 = vld [vmem:[#allocation2 + $0x384] sm:$0x7] }
 0x225   : > { %v1179_v1 = vrot.slane %v17304_v8, 4  ;;  %v17305_v24 = vrot.slane %v13768_v6, 7  ;;  %1413 = vst [vmem:[#allocation3 + $0x104] sm:$0xf] %v1146_v47  ;;  %v1167_v42 = vsel %vm13501_vm2, %v1165_v35, %v1166_v39  ;;  %v1180_v23 = vrot.slane %v738_v43, 7 }
 0x226   : > { %v741_v13 = vld [vmem:[#allocation2 + $0x39c] sm:$0x7]  ;;  %v17306_v51 = vrot.slane %v13780_v40, 7  ;;  %1415 = vst [vmem:[#allocation3 + $0x10c] sm:$0xf] %v1153_v36  ;;  %v1174_v4 = vsel %vm13501_vm2, %v1172_v45, %v1173_v7  ;;  %v17307_v10 = vrot.slane %v13786_v41, 7 }
 0x227   : > { %v1186_v57 = vrot.slane %v17305_v24, 4  ;;  %v1187_v49 = vrot.slane %v741_v13, 7  ;;  %v744_v53 = vld [vmem:[#allocation2 + $0x3b4] sm:$0x7]  ;;  %1417 = vst [vmem:[#allocation3 + $0x114] sm:$0xf] %v1160_v55  ;;  %v1181_v6 = vsel %vm13501_vm2, %v1179_v1, %v1180_v23 }
 0x228   : > { %v1193_v37 = vrot.slane %v17306_v51, 4  ;;  %v1200_v20 = vrot.slane %v17307_v10, 4  ;;  %v1194_v38 = vrot.slane %v744_v53, 7  ;;  %v747_v27 = vld [vmem:[#allocation2 + $0x3cc] sm:$0x7]  ;;  %v17308_v5 = vrot.slane %v13792_v63, 7 }
 0x229   : > { %1419 = vst [vmem:[#allocation3 + $0x11c] sm:$0xf] %v1167_v42  ;;  %v1188_v40 = vsel %vm13501_vm2, %v1186_v57, %v1187_v49  ;;  %v1201_v33 = vrot.slane %v747_v27, 7  ;;  %v750_v18 = vld [vmem:[#allocation2 + $0x3e4] sm:$0x7]  ;;  %v17309_v54 = vrot.slane %v13804_v16, 7 }
 0x22a   : > { %v1207_v61 = vrot.slane %v17308_v5, 4  ;;  %1421 = vst [vmem:[#allocation3 + $0x124] sm:$0xf] %v1174_v4  ;;  %v1195_v41 = vsel %vm13501_vm2, %v1193_v37, %v1194_v38  ;;  %v1208_v22 = vrot.slane %v750_v18, 7  ;;  %v753_v29 = vld [vmem:[#allocation2 + $0x3fc] sm:$0x7] }
 0x22b   : > { %v1214_v31 = vrot.slane %v17309_v54, 4  ;;  %v17310_v62 = vrot.slane %v13816_v44, 7  ;;  %1423 = vst [vmem:[#allocation3 + $0x12c] sm:$0xf] %v1181_v6  ;;  %v1202_v63 = vsel %vm13501_vm2, %v1200_v20, %v1201_v33  ;;  %v1215_v52 = vrot.slane %v753_v29, 7 }
 0x22c   : > { %v756_v35 = vld [vmem:[#allocation2 + $0x414] sm:$0x7]  ;;  %v17311_v47 = vrot.slane %v13827_v50, 7  ;;  %1425 = vst [vmem:[#allocation3 + $0x134] sm:$0xf] %v1188_v40  ;;  %v1209_v16 = vsel %vm13501_vm2, %v1207_v61, %v1208_v22  ;;  %v17312_v45 = vrot.slane %v13838_v34, 7 }
 0x22d   : > { %v1221_v48 = vrot.slane %v17310_v62, 4  ;;  %v1222_v58 = vrot.slane %v756_v35, 7  ;;  %v759_v21 = vld [vmem:[#allocation2 + $0x42c] sm:$0x7]  ;;  %1427 = vst [vmem:[#allocation3 + $0x13c] sm:$0xf] %v1195_v41  ;;  %v1216_v44 = vsel %vm13501_vm2, %v1214_v31, %v1215_v52 }
 0x22e   : > { %v1228_v15 = vrot.slane %v17311_v47, 4  ;;  %v1235_v36 = vrot.slane %v17312_v45, 4  ;;  %v1229_v39 = vrot.slane %v759_v21, 7  ;;  %v762_v30 = vld [vmem:[#allocation2 + $0x444] sm:$0x7]  ;;  %v17313_v8 = vrot.slane %v13849_v60, 7 }
 0x22f   : > { %1429 = vst [vmem:[#allocation3 + $0x144] sm:$0xf] %v1202_v63  ;;  %v1223_v50 = vsel %vm13501_vm2, %v1221_v48, %v1222_v58  ;;  %v1236_v55 = vrot.slane %v762_v30, 7  ;;  %v765_v7 = vld [vmem:[#allocation2 + $0x45c] sm:$0x7]  ;;  %v17314_v43 = vrot.slane %v13856_v26, 7 }
 0x230   : > { %v1242_v1 = vrot.slane %v17313_v8, 4  ;;  %1431 = vst [vmem:[#allocation3 + $0x14c] sm:$0xf] %v1209_v16  ;;  %v1230_v34 = vsel %vm13501_vm2, %v1228_v15, %v1229_v39  ;;  %v1243_v57 = vrot.slane %v765_v7, 7  ;;  %v768_v42 = vld [vmem:[#allocation2 + $0x474] sm:$0x7] }
 0x231   : > { %v1249_v24 = vrot.slane %v17314_v43, 4  ;;  %v17315_v23 = vrot.slane %v13533_v11, 7  ;;  %1433 = vst [vmem:[#allocation3 + $0x154] sm:$0xf] %v1216_v44  ;;  %v1237_v60 = vsel %vm13501_vm2, %v1235_v36, %v1236_v55  ;;  %v1250_v51 = vrot.slane %v768_v42, 7 }
 0x232   : > { %v675_v37 = vld [vmem:[#allocation2 + $0x18c] sm:$0x7]  ;;  %v17316_v4 = vrot.slane %v13544_v59, 7  ;;  %1435 = vst [vmem:[#allocation3 + $0x15c] sm:$0xf] %v1223_v50  ;;  %v1244_v26 = vsel %vm13501_vm2, %v1242_v1, %v1243_v57  ;;  %v17317_v20 = vrot.slane %v13555_v25, 7 }
 0x233   : > { %v1032_v13 = vrot.slane %v17315_v23, 4  ;;  %v1033_v53 = vrot.slane %v675_v37, 7  ;;  %v678_v10 = vld [vmem:[#allocation2 + $0x1a4] sm:$0x7]  ;;  %1437 = vst [vmem:[#allocation3 + $0x164] sm:$0xf] %v1230_v34  ;;  %v1251_v11 = vsel %vm13501_vm2, %v1249_v24, %v1250_v51 }
 0x234   : > { %v1039_v49 = vrot.slane %v17316_v4, 4  ;;  %v1046_v6 = vrot.slane %v17317_v20, 4  ;;  %v1040_v38 = vrot.slane %v678_v10, 7  ;;  %v681_v27 = vld [vmem:[#allocation2 + $0x1bc] sm:$0x7]  ;;  %v17318_v5 = vrot.slane %v13565_v56, 7 }
 0x235   : > { %1439 = vst [vmem:[#allocation3 + $0x16c] sm:$0xf] %v1237_v60  ;;  %v1034_v59 = vsel %vm13501_vm2, %v1032_v13, %v1033_v53  ;;  %v1047_v40 = vrot.slane %v681_v27, 7  ;;  %v684_v33 = vld [vmem:[#allocation2 + $0x1d4] sm:$0x7]  ;;  %v17319_v18 = vrot.slane %v13591_v2, 7 }
 0x236   : > { %v1053_v61 = vrot.slane %v17318_v5, 4  ;;  %1441 = vst [vmem:[#allocation3 + $0x174] sm:$0xf] %v1244_v26  ;;  %v1041_v25 = vsel %vm13501_vm2, %v1039_v49, %v1040_v38  ;;  %v1054_v31 = vrot.slane %v684_v33, 7  ;;  %v687_v41 = vld [vmem:[#allocation2 + $0x1ec] sm:$0x7] }
 0x237   : > { %v1060_v54 = vrot.slane %v17319_v18, 4  ;;  %v17320_v22 = vrot.slane %v13611_v3, 7  ;;  %1443 = vst [vmem:[#allocation3 + $0x17c] sm:$0xf] %v1251_v11  ;;  %v1048_v56 = vsel %vm13501_vm2, %v1046_v6, %v1047_v40  ;;  %v1061_v62 = vrot.slane %v687_v41, 7  ;;  %v17328_v4 = vld [vmem:[#allocation7_spill] sm:$0xff] }
 0x238   : > { %v690_v48 = vld [vmem:[#allocation2 + $0x204] sm:$0x7]  ;;  %v17321_v63 = vrot.slane %v13613_v19, 7  ;;  %1381 = vst [vmem:[#allocation3 + $0x84] sm:$0xf] %v1034_v59  ;;  %v1055_v2 = vsel %vm13501_vm2, %v1053_v61, %v1054_v31  ;;  %v17322_v15 = vrot.slane %v13621_v14, 7 }
 0x239   : > { %v1067_v29 = vrot.slane %v17320_v22, 4  ;;  %v1068_v35 = vrot.slane %v690_v48, 7  ;;  %v693_v47 = vld [vmem:[#allocation2 + $0x21c] sm:$0x7]  ;;  %1383 = vst [vmem:[#allocation3 + $0x8c] sm:$0xf] %v1041_v25  ;;  %v1062_v3 = vsel %vm13501_vm2, %v1060_v54, %v1061_v62 }
 0x23a   : > { %v1074_v52 = vrot.slane %v17321_v63, 4  ;;  %v1081_v16 = vrot.slane %v17322_v15, 4  ;;  %v1075_v58 = vrot.slane %v693_v47, 7  ;;  %v696_v21 = vld [vmem:[#allocation2 + $0x234] sm:$0x7]  ;;  %v17323_v45 = vrot.slane %v13631_v12, 7 }
 0x23b   : > { %1385 = vst [vmem:[#allocation3 + $0x94] sm:$0xf] %v1048_v56  ;;  %v1069_v19 = vsel %vm13501_vm2, %v1067_v29, %v1068_v35  ;;  %v1082_v44 = vrot.slane %v696_v21, 7  ;;  %v699_v39 = vld [vmem:[#allocation2 + $0x24c] sm:$0x7]  ;;  %v17324_v30 = vrot.slane %v13641_v0, 7 }
 0x23c   : > { %v1088_v36 = vrot.slane %v17323_v45, 4  ;;  %1387 = vst [vmem:[#allocation3 + $0x9c] sm:$0xf] %v1055_v2  ;;  %v1076_v14 = vsel %vm13501_vm2, %v1074_v52, %v1075_v58  ;;  %v1089_v1 = vrot.slane %v699_v39, 7  ;;  %v702_v50 = vld [vmem:[#allocation2 + $0x264] sm:$0x7] }
 0x23d   : > { %v1095_v8 = vrot.slane %v17324_v30, 4  ;;  %v17325_v55 = vrot.slane %v13665_v32, 7  ;;  %1389 = vst [vmem:[#allocation3 + $0xa4] sm:$0xf] %v1062_v3  ;;  %v1083_v12 = vsel %vm13501_vm2, %v1081_v16, %v1082_v44  ;;  %v1096_v43 = vrot.slane %v702_v50, 7  ;;  %v17330_v20 = vld [vmem:[#allocation8_spill] sm:$0xff] }
 0x23e   : > { %v705_v24 = vld [vmem:[#allocation2 + $0x27c] sm:$0x7]  ;;  %v17326_v34 = vrot.slane %v13680_v28, 7  ;;  %1391 = vst [vmem:[#allocation3 + $0xac] sm:$0xf] %v1069_v19  ;;  %v1090_v0 = vsel %vm13501_vm2, %v1088_v36, %v1089_v1  ;;  %v17327_v13 = vrot.slane %v13682_v17, 7 }
 0x23f   : > { %v1102_v7 = vrot.slane %v17325_v55, 4  ;;  %v1103_v42 = vrot.slane %v705_v24, 7  ;;  %v708_v23 = vld [vmem:[#allocation2 + $0x294] sm:$0x7]  ;;  %1393 = vst [vmem:[#allocation3 + $0xb4] sm:$0xf] %v1076_v14  ;;  %v1097_v32 = vsel %vm13501_vm2, %v1095_v8, %v1096_v43 }
 0x240   : > { %v1109_v57 = vrot.slane %v17326_v34, 4  ;;  %v1116_v60 = vrot.slane %v17327_v13, 4  ;;  %v1110_v51 = vrot.slane %v708_v23, 7  ;;  %v711_v37 = vld [vmem:[#allocation2 + $0x2ac] sm:$0x7]  ;;  %v17329_v49 = vrot.slane %v17328_v4, 7 }
 0x241   : > { %1395 = vst [vmem:[#allocation3 + $0xbc] sm:$0xf] %v1083_v12  ;;  %v1104_v28 = vsel %vm13501_vm2, %v1102_v7, %v1103_v42  ;;  %v1117_v53 = vrot.slane %v711_v37, 7  ;;  %v714_v10 = vld [vmem:[#allocation2 + $0x2c4] sm:$0x7]  ;;  %v17331_v6 = vrot.slane %v17330_v20, 7 }
 0x242   : > { %v1123_v26 = vrot.slane %v17329_v49, 4  ;;  %1397 = vst [vmem:[#allocation3 + $0xc4] sm:$0xf] %v1090_v0  ;;  %v1111_v17 = vsel %vm13501_vm2, %v1109_v57, %v1110_v51  ;;  %v1124_v38 = vrot.slane %v714_v10, 7  ;;  %v717_v27 = vld [vmem:[#allocation2 + $0x2dc] sm:$0x7] }
 0x243   : > { %v1130_v11 = vrot.slane %v17331_v6, 4  ;;  %v17332_v5 = vld [vmem:[#allocation9_spill] sm:$0xff]  ;;  %1399 = vst [vmem:[#allocation3 + $0xcc] sm:$0xf] %v1097_v32  ;;  %v1118_v40 = vsel %vm13501_vm2, %v1116_v60, %v1117_v53  ;;  %v1131_v33 = vrot.slane %v717_v27, 7  ;;  %v17334_v54 = vld [vmem:[#allocation10_spill] sm:$0xff] }
 0x244   : > { %v17333_v61 = vrot.slane %v17332_v5, 7  ;;  %v720_v18 = vld [vmem:[#allocation2 + $0x2f4] sm:$0x7]  ;;  %v17335_v25 = vrot.slane %v17334_v54, 5  ;;  %1401 = vst [vmem:[#allocation3 + $0xd4] sm:$0xf] %v1104_v28  ;;  %v1125_v41 = vsel %vm13501_vm2, %v1123_v26, %v1124_v38 }
 0x245   : > { %v1138_v22 = vrot.slane %v720_v18, 7  ;;  %v1639_v29 = vld [vmem:[#allocation2 + $0x10] sm:$0x1]  ;;  %v17336_v56 = vld [vmem:[#allocation11_spill] sm:$0xff]  ;;  %1403 = vst [vmem:[#allocation3 + $0xdc] sm:$0xf] %v1111_v17  ;;  %v1132_v63 = vsel %vm13501_vm2, %v1130_v11, %v1131_v33 }
 0x246   : > { %v1137_v59 = vrot.slane %v17333_v61, 4  ;;  %v1932_v31 = vrot.slane %v17335_v25, 4  ;;  %v17337_v62 = vrot.slane %v17336_v56, 5  ;;  %v1933_v52 = vrot.slane %v1639_v29, 5  ;;  %v1642_v2 = vld [vmem:[#allocation2 + $0x28] sm:$0x1] }
 0x247   : > { %v17338_v35 = vld [vmem:[#allocation12_spill] sm:$0xff]  ;;  %1405 = vst [vmem:[#allocation3 + $0xe4] sm:$0xf] %v1118_v40  ;;  %v1940_v3 = vrot.slane %v1642_v2, 5  ;;  %v1645_v58 = vld [vmem:[#allocation2 + $0x40] sm:$0x1] }
 0x248   : > { %v1939_v48 = vrot.slane %v17337_v62, 4  ;;  %v17339_v47 = vrot.slane %v17338_v35, 5  ;;  %v1139_v16 = vsel %vm13501_vm2, %v1137_v59, %v1138_v22  ;;  %v17340_v21 = vld [vmem:[#allocation13_spill] sm:$0xff]  ;;  %1407 = vst [vmem:[#allocation3 + $0xec] sm:$0xf] %v1125_v41  ;;  %v1934_v19 = vsel %vm13866_vm5, %v1932_v31, %v1933_v52  ;;  %v17342_v30 = vld [vmem:[#allocation14_spill] sm:$0xff] }
 0x249   : > { %v17341_v45 = vrot.slane %v17340_v21, 5  ;;  %v1947_v44 = vrot.slane %v1645_v58, 5  ;;  %v1648_v39 = vld [vmem:[#allocation2 + $0x58] sm:$0x1]  ;;  %v17343_v8 = vrot.slane %v17342_v30, 5  ;;  %v17344_v55 = vld [vmem:[#allocation15_spill] sm:$0xff] }
 0x24a   : > { %v1946_v15 = vrot.slane %v17339_v47, 4  ;;  %1409 = vst [vmem:[#allocation3 + $0xf4] sm:$0xf] %v1132_v63  ;;  %v1941_v1 = vsel %vm13866_vm5, %v1939_v48, %v1940_v3  ;;  %v1954_v46 = vrot.slane %v1648_v39, 5  ;;  %v1651_v50 = vld [vmem:[#allocation2 + $0x70] sm:$0x1] }
 0x24b   : > { %v1953_v36 = vrot.slane %v17341_v45, 4  ;;  %v1960_v14 = vrot.slane %v17343_v8, 4  ;;  %v17345_v7 = vrot.slane %v17344_v55, 5  ;;  %1411 = vst [vmem:[#allocation3 + $0xfc] sm:$0xf] %v1139_v16  ;;  %v1961_v24 = vrot.slane %v1651_v50, 5 }
 0x24c   : > { %v1948_v43 = vsel %vm13866_vm5, %v1946_v15, %v1947_v44  ;;  %v1654_v34 = vld [vmem:[#allocation2 + $0x88] sm:$0x1]  ;;  %2362 = vst [vmem:[#allocation3 + $0x304] sm:$0xf] %v1934_v19  ;;  %v1657_v60 = vld [vmem:[#allocation2 + $0xa0] sm:$0x1] }
 0x24d   : > { %v1967_v12 = vrot.slane %v17345_v7, 4  ;;  %v17346_v57 = vld [vmem:[#allocation16_spill] sm:$0xff]  ;;  %v1955_v23 = vsel %vm13866_vm5, %v1953_v36, %v1954_v46  ;;  %v1968_v13 = vrot.slane %v1654_v34, 5  ;;  %v17348_v32 = vld [vmem:[#allocation17_spill] sm:$0xff]  ;;  %2364 = vst [vmem:[#allocation3 + $0x30c] sm:$0xf] %v1941_v1  ;;  %v1962_v4 = vsel %vm13866_vm5, %v1960_v14, %v1961_v24 }
 0x24e   : > { %v17347_v0 = vrot.slane %v17346_v57, 5  ;;  %v17349_v51 = vrot.slane %v17348_v32, 5  ;;  %v1975_v49 = vrot.slane %v1657_v60, 5  ;;  %v1660_v26 = vld [vmem:[#allocation2 + $0xb8] sm:$0x1]  ;;  %v17352_v17 = vld [vmem:[#allocation19_spill] sm:$0xff] }
 0x24f   : > { %v17350_v28 = vld [vmem:[#allocation18_spill] sm:$0xff]  ;;  %2366 = vst [vmem:[#allocation3 + $0x314] sm:$0xf] %v1948_v43  ;;  %v1969_v20 = vsel %vm13866_vm5, %v1967_v12, %v1968_v13  ;;  %v1982_v6 = vrot.slane %v1660_v26, 5  ;;  %v1663_v11 = vld [vmem:[#allocation2 + $0xd0] sm:$0x1] }
 0x250   : > { %v1974_v42 = vrot.slane %v17347_v0, 4  ;;  %v1981_v37 = vrot.slane %v17349_v51, 4  ;;  %v17351_v53 = vrot.slane %v17350_v28, 5  ;;  %v17353_v38 = vrot.slane %v17352_v17, 5  ;;  %2368 = vst [vmem:[#allocation3 + $0x31c] sm:$0xf] %v1955_v23 }
 0x251   : > { %v1989_v61 = vrot.slane %v1663_v11, 5  ;;  %v1666_v59 = vld [vmem:[#allocation2 + $0xe8] sm:$0x1]  ;;  %2370 = vst [vmem:[#allocation3 + $0x324] sm:$0xf] %v1962_v4  ;;  %v17356_v41 = vld [vmem:[#allocation21_spill] sm:$0xff] }
 0x252   : > { %v1988_v10 = vrot.slane %v17351_v53, 4  ;;  %v1995_v27 = vrot.slane %v17353_v38, 4  ;;  %v1976_v5 = vsel %vm13866_vm5, %v1974_v42, %v1975_v49  ;;  %v17354_v40 = vld [vmem:[#allocation20_spill] sm:$0xff]  ;;  %v1983_v54 = vsel %vm13866_vm5, %v1981_v37, %v1982_v6  ;;  %v1669_v31 = vld [vmem:[#allocation2 + $0x100] sm:$0x1]  ;;  %v17358_v63 = vld [vmem:[#allocation22_spill] sm:$0xff] }
 0x253   : > { %v17355_v33 = vrot.slane %v17354_v40, 5  ;;  %v1996_v25 = vrot.slane %v1666_v59, 5  ;;  %v17357_v22 = vrot.slane %v17356_v41, 5  ;;  %2372 = vst [vmem:[#allocation3 + $0x32c] sm:$0xf] %v1969_v20  ;;  %v2003_v62 = vrot.slane %v1669_v31, 5 }
 0x254   : > { %v1990_v56 = vsel %vm13866_vm5, %v1988_v10, %v1989_v61  ;;  %v1672_v48 = vld [vmem:[#allocation2 + $0x118] sm:$0x1]  ;;  %v17359_v52 = vrot.slane %v17358_v63, 5  ;;  %2374 = vst [vmem:[#allocation3 + $0x334] sm:$0xf] %v1976_v5  ;;  %v17360_v16 = vld [vmem:[#allocation23_spill] sm:$0xff] }
 0x255   : > { %v2002_v18 = vrot.slane %v17355_v33, 4  ;;  %v2009_v29 = vrot.slane %v17357_v22, 4  ;;  %v1997_v35 = vsel %vm13866_vm5, %v1995_v27, %v1996_v25  ;;  %v2010_v47 = vrot.slane %v1672_v48, 5  ;;  %v1675_v15 = vld [vmem:[#allocation2 + $0x130] sm:$0x1]  ;;  %v17362_v19 = vld [vmem:[#allocation24_spill] sm:$0xff] }
 0x256   : > { %v2016_v2 = vrot.slane %v17359_v52, 4  ;;  %v17361_v3 = vrot.slane %v17360_v16, 5  ;;  %2376 = vst [vmem:[#allocation3 + $0x33c] sm:$0xf] %v1983_v54  ;;  %v2017_v45 = vrot.slane %v1675_v15, 5  ;;  %v17363_v44 = vrot.slane %v17362_v19, 5 }
 0x257   : > { %v2004_v21 = vsel %vm13866_vm5, %v2002_v18, %v2003_v62  ;;  %v1678_v36 = vld [vmem:[#allocation2 + $0x148] sm:$0x1]  ;;  %2378 = vst [vmem:[#allocation3 + $0x344] sm:$0xf] %v1990_v56  ;;  %v2011_v30 = vsel %vm13866_vm5, %v2009_v29, %v2010_v47  ;;  %v1681_v14 = vld [vmem:[#allocation2 + $0x160] sm:$0x1] }
 0x258   : > { %v2023_v58 = vrot.slane %v17361_v3, 4  ;;  %v2030_v39 = vrot.slane %v17363_v44, 4  ;;  %v2024_v8 = vrot.slane %v1678_v36, 5  ;;  %v17364_v1 = vld [vmem:[#allocation25_spill] sm:$0xff]  ;;  %2380 = vst [vmem:[#allocation3 + $0x34c] sm:$0xf] %v1997_v35  ;;  %v2018_v55 = vsel %vm13866_vm5, %v2016_v2, %v2017_v45 }
 0x259   : > { %v17365_v46 = vrot.slane %v17364_v1, 5  ;;  %v2031_v7 = vrot.slane %v1681_v14, 5  ;;  %v1684_v12 = vld [vmem:[#allocation2 + $0x178] sm:$0x1]  ;;  %2382 = vst [vmem:[#allocation3 + $0x354] sm:$0xf] %v2004_v21 }
 0x25a   : > { %v17366_v43 = vld [vmem:[#allocation26_spill] sm:$0xff]  ;;  %v2025_v57 = vsel %vm13866_vm5, %v2023_v58, %v2024_v8  ;;  %v2038_v0 = vrot.slane %v1684_v12, 5  ;;  %v1687_v42 = vld [vmem:[#allocation2 + $0x190] sm:$0x1]  ;;  %v17368_v23 = vld [vmem:[#allocation27_spill] sm:$0xff] }
 0x25b   : > { %v2037_v50 = vrot.slane %v17365_v46, 4  ;;  %v17367_v24 = vrot.slane %v17366_v43, 5  ;;  %v17369_v13 = vrot.slane %v17368_v23, 5  ;;  %2384 = vst [vmem:[#allocation3 + $0x35c] sm:$0xf] %v2011_v30  ;;  %v2032_v32 = vsel %vm13866_vm5, %v2030_v39, %v2031_v7  ;;  %v17370_v4 = vld [vmem:[#allocation28_spill] sm:$0xff] }
 0x25c   : > { %v2045_v51 = vrot.slane %v1687_v42, 5  ;;  %v1690_v37 = vld [vmem:[#allocation2 + $0x1a8] sm:$0x1]  ;;  %v17371_v49 = vrot.slane %v17370_v4, 5  ;;  %2386 = vst [vmem:[#allocation3 + $0x364] sm:$0xf] %v2018_v55 }
 0x25d   : > { %v2044_v34 = vrot.slane %v17367_v24, 4  ;;  %v2051_v60 = vrot.slane %v17369_v13, 4  ;;  %v2039_v28 = vsel %vm13866_vm5, %v2037_v50, %v2038_v0  ;;  %v2052_v53 = vrot.slane %v1690_v37, 5  ;;  %v1693_v10 = vld [vmem:[#allocation2 + $0x1c0] sm:$0x1]  ;;  %v17372_v20 = vld [vmem:[#allocation29_spill] sm:$0xff] }
 0x25e   : > { %v2058_v26 = vrot.slane %v17371_v49, 4  ;;  %v17373_v6 = vrot.slane %v17372_v20, 5  ;;  %2388 = vst [vmem:[#allocation3 + $0x36c] sm:$0xf] %v2025_v57  ;;  %v2059_v38 = vrot.slane %v1693_v10, 5  ;;  %v17374_v5 = vld [vmem:[#allocation30_spill] sm:$0xff] }
 0x25f   : > { %v2046_v17 = vsel %vm13866_vm5, %v2044_v34, %v2045_v51  ;;  %v1696_v27 = vld [vmem:[#allocation2 + $0x1d8] sm:$0x1]  ;;  %v17375_v61 = vrot.slane %v17374_v5, 5  ;;  %2390 = vst [vmem:[#allocation3 + $0x374] sm:$0xf] %v2032_v32  ;;  %v2053_v40 = vsel %vm13866_vm5, %v2051_v60, %v2052_v53  ;;  %v17376_v54 = vld [vmem:[#allocation31_spill] sm:$0xff] }
 0x260   : > { %v2065_v11 = vrot.slane %v17373_v6, 4  ;;  %v2066_v33 = vrot.slane %v1696_v27, 5  ;;  %v1699_v18 = vld [vmem:[#allocation2 + $0x1f0] sm:$0x1]  ;;  %v17377_v25 = vrot.slane %v17376_v54, 5  ;;  %v2060_v41 = vsel %vm13866_vm5, %v2058_v26, %v2059_v38  ;;  %v17378_v56 = vld [vmem:[#allocation32_spill] sm:$0xff] }
 0x261   : > { %v2072_v59 = vrot.slane %v17375_v61, 4  ;;  %2392 = vst [vmem:[#allocation3 + $0x37c] sm:$0xf] %v2039_v28  ;;  %v2073_v22 = vrot.slane %v1699_v18, 5  ;;  %v1702_v29 = vld [vmem:[#allocation2 + $0x208] sm:$0x1] }
 0x262   : > { %v2079_v31 = vrot.slane %v17377_v25, 4  ;;  %v17379_v62 = vrot.slane %v17378_v56, 5  ;;  %2394 = vst [vmem:[#allocation3 + $0x384] sm:$0xf] %v2046_v17  ;;  %v2067_v63 = vsel %vm13866_vm5, %v2065_v11, %v2066_v33  ;;  %v2080_v52 = vrot.slane %v1702_v29, 5  ;;  %v17380_v35 = vld [vmem:[#allocation33_spill] sm:$0xff] }
 0x263   : > { %v1705_v2 = vld [vmem:[#allocation2 + $0x220] sm:$0x1]  ;;  %v17381_v47 = vrot.slane %v17380_v35, 5  ;;  %2396 = vst [vmem:[#allocation3 + $0x38c] sm:$0xf] %v2053_v40  ;;  %v2074_v16 = vsel %vm13866_vm5, %v2072_v59, %v2073_v22  ;;  %v17382_v21 = vld [vmem:[#allocation34_spill] sm:$0xff] }
 0x264   : > { %v2086_v48 = vrot.slane %v17379_v62, 4  ;;  %v2087_v3 = vrot.slane %v1705_v2, 5  ;;  %v1708_v58 = vld [vmem:[#allocation2 + $0x238] sm:$0x1]  ;;  %v17383_v45 = vrot.slane %v17382_v21, 5  ;;  %v2081_v19 = vsel %vm13866_vm5, %v2079_v31, %v2080_v52  ;;  %v17384_v30 = vld [vmem:[#allocation35_spill] sm:$0xff] }
 0x265   : > { %v2093_v15 = vrot.slane %v17381_v47, 4  ;;  %2398 = vst [vmem:[#allocation3 + $0x394] sm:$0xf] %v2060_v41  ;;  %v2094_v44 = vrot.slane %v1708_v58, 5  ;;  %v1711_v39 = vld [vmem:[#allocation2 + $0x250] sm:$0x1] }
 0x266   : > { %v2100_v36 = vrot.slane %v17383_v45, 4  ;;  %v17385_v8 = vrot.slane %v17384_v30, 5  ;;  %2400 = vst [vmem:[#allocation3 + $0x39c] sm:$0xf] %v2067_v63  ;;  %v2088_v1 = vsel %vm13866_vm5, %v2086_v48, %v2087_v3  ;;  %v2101_v46 = vrot.slane %v1711_v39, 5  ;;  %v17386_v55 = vld [vmem:[#allocation36_spill] sm:$0xff] }
 0x267   : > { %v1714_v50 = vld [vmem:[#allocation2 + $0x268] sm:$0x1]  ;;  %v17387_v7 = vrot.slane %v17386_v55, 5  ;;  %2402 = vst [vmem:[#allocation3 + $0x3a4] sm:$0xf] %v2074_v16  ;;  %v2095_v43 = vsel %vm13866_vm5, %v2093_v15, %v2094_v44  ;;  %v17388_v57 = vld [vmem:[#allocation37_spill] sm:$0xff] }
 0x268   : > { %v2107_v14 = vrot.slane %v17385_v8, 4  ;;  %v2108_v24 = vrot.slane %v1714_v50, 5  ;;  %v1717_v34 = vld [vmem:[#allocation2 + $0x280] sm:$0x1]  ;;  %v17389_v0 = vrot.slane %v17388_v57, 5  ;;  %v2102_v23 = vsel %vm13866_vm5, %v2100_v36, %v2101_v46  ;;  %v17390_v32 = vld [vmem:[#allocation38_spill] sm:$0xff] }
 0x269   : > { %v2114_v12 = vrot.slane %v17387_v7, 4  ;;  %2404 = vst [vmem:[#allocation3 + $0x3ac] sm:$0xf] %v2081_v19  ;;  %v2115_v13 = vrot.slane %v1717_v34, 5  ;;  %v1720_v60 = vld [vmem:[#allocation2 + $0x298] sm:$0x1] }
 0x26a   : > { %v2121_v42 = vrot.slane %v17389_v0, 4  ;;  %v17391_v51 = vrot.slane %v17390_v32, 5  ;;  %2406 = vst [vmem:[#allocation3 + $0x3b4] sm:$0xf] %v2088_v1  ;;  %v2109_v4 = vsel %vm13866_vm5, %v2107_v14, %v2108_v24  ;;  %v2122_v49 = vrot.slane %v1720_v60, 5  ;;  %v17392_v28 = vld [vmem:[#allocation39_spill] sm:$0xff] }
 0x26b   : > { %v1723_v26 = vld [vmem:[#allocation2 + $0x2b0] sm:$0x1]  ;;  %v17393_v53 = vrot.slane %v17392_v28, 5  ;;  %2408 = vst [vmem:[#allocation3 + $0x3bc] sm:$0xf] %v2095_v43  ;;  %v2116_v20 = vsel %vm13866_vm5, %v2114_v12, %v2115_v13  ;;  %v17394_v17 = vld [vmem:[#allocation40_spill] sm:$0xff] }
 0x26c   : > { %v2128_v37 = vrot.slane %v17391_v51, 4  ;;  %v2129_v6 = vrot.slane %v1723_v26, 5  ;;  %v1726_v11 = vld [vmem:[#allocation2 + $0x2c8] sm:$0x1]  ;;  %v17395_v38 = vrot.slane %v17394_v17, 5  ;;  %v2123_v5 = vsel %vm13866_vm5, %v2121_v42, %v2122_v49  ;;  %v17396_v40 = vld [vmem:[#allocation41_spill] sm:$0xff] }
 0x26d   : > { %v2135_v10 = vrot.slane %v17393_v53, 4  ;;  %2410 = vst [vmem:[#allocation3 + $0x3c4] sm:$0xf] %v2102_v23  ;;  %v2136_v61 = vrot.slane %v1726_v11, 5  ;;  %v1729_v59 = vld [vmem:[#allocation2 + $0x2e0] sm:$0x1] }
 0x26e   : > { %v2142_v27 = vrot.slane %v17395_v38, 4  ;;  %v17397_v33 = vrot.slane %v17396_v40, 5  ;;  %2412 = vst [vmem:[#allocation3 + $0x3cc] sm:$0xf] %v2109_v4  ;;  %v2130_v54 = vsel %vm13866_vm5, %v2128_v37, %v2129_v6  ;;  %v2143_v25 = vrot.slane %v1729_v59, 5  ;;  %v17398_v41 = vld [vmem:[#allocation42_spill] sm:$0xff] }
 0x26f   : > { %v1732_v31 = vld [vmem:[#allocation2 + $0x2f8] sm:$0x1]  ;;  %v17399_v22 = vrot.slane %v17398_v41, 5  ;;  %2414 = vst [vmem:[#allocation3 + $0x3d4] sm:$0xf] %v2116_v20  ;;  %v2137_v56 = vsel %vm13866_vm5, %v2135_v10, %v2136_v61  ;;  %v17400_v63 = vld [vmem:[#allocation43_spill] sm:$0xff] }
 0x270   : > { %v2149_v18 = vrot.slane %v17397_v33, 4  ;;  %v2150_v62 = vrot.slane %v1732_v31, 5  ;;  %v1735_v48 = vld [vmem:[#allocation2 + $0x310] sm:$0x1]  ;;  %v17401_v52 = vrot.slane %v17400_v63, 5  ;;  %v2144_v35 = vsel %vm13866_vm5, %v2142_v27, %v2143_v25  ;;  %v17402_v16 = vld [vmem:[#allocation44_spill] sm:$0xff] }
 0x271   : > { %v2156_v29 = vrot.slane %v17399_v22, 4  ;;  %2416 = vst [vmem:[#allocation3 + $0x3dc] sm:$0xf] %v2123_v5  ;;  %v2157_v47 = vrot.slane %v1735_v48, 5  ;;  %v1738_v15 = vld [vmem:[#allocation2 + $0x328] sm:$0x1] }
 0x272   : > { %v2163_v2 = vrot.slane %v17401_v52, 4  ;;  %v17403_v3 = vrot.slane %v17402_v16, 5  ;;  %2418 = vst [vmem:[#allocation3 + $0x3e4] sm:$0xf] %v2130_v54  ;;  %v2151_v21 = vsel %vm13866_vm5, %v2149_v18, %v2150_v62  ;;  %v2164_v45 = vrot.slane %v1738_v15, 5  ;;  %v17404_v19 = vld [vmem:[#allocation45_spill] sm:$0xff] }
 0x273   : > { %v1741_v36 = vld [vmem:[#allocation2 + $0x340] sm:$0x1]  ;;  %v17405_v44 = vrot.slane %v17404_v19, 5  ;;  %2420 = vst [vmem:[#allocation3 + $0x3ec] sm:$0xf] %v2137_v56  ;;  %v2158_v30 = vsel %vm13866_vm5, %v2156_v29, %v2157_v47  ;;  %v17406_v1 = vld [vmem:[#allocation46_spill] sm:$0xff] }
 0x274   : > { %v2170_v58 = vrot.slane %v17403_v3, 4  ;;  %v2171_v8 = vrot.slane %v1741_v36, 5  ;;  %v1744_v14 = vld [vmem:[#allocation2 + $0x358] sm:$0x1]  ;;  %v17407_v46 = vrot.slane %v17406_v1, 5  ;;  %v2165_v55 = vsel %vm13866_vm5, %v2163_v2, %v2164_v45  ;;  %v17408_v43 = vld [vmem:[#allocation47_spill] sm:$0xff] }
 0x275   : > { %v2177_v39 = vrot.slane %v17405_v44, 4  ;;  %2422 = vst [vmem:[#allocation3 + $0x3f4] sm:$0xf] %v2144_v35  ;;  %v2178_v7 = vrot.slane %v1744_v14, 5  ;;  %v1747_v12 = vld [vmem:[#allocation2 + $0x370] sm:$0x1] }
 0x276   : > { %v2184_v50 = vrot.slane %v17407_v46, 4  ;;  %v17409_v24 = vrot.slane %v17408_v43, 5  ;;  %2424 = vst [vmem:[#allocation3 + $0x3fc] sm:$0xf] %v2151_v21  ;;  %v2172_v57 = vsel %vm13866_vm5, %v2170_v58, %v2171_v8  ;;  %v2185_v0 = vrot.slane %v1747_v12, 5  ;;  %v17410_v23 = vld [vmem:[#allocation48_spill] sm:$0xff] }
 0x277   : > { %v1750_v42 = vld [vmem:[#allocation2 + $0x388] sm:$0x1]  ;;  %v17411_v13 = vrot.slane %v17410_v23, 5  ;;  %2426 = vst [vmem:[#allocation3 + $0x404] sm:$0xf] %v2158_v30  ;;  %v2179_v32 = vsel %vm13866_vm5, %v2177_v39, %v2178_v7  ;;  %v17412_v4 = vld [vmem:[#allocation49_spill] sm:$0xff] }
 0x278   : > { %v2191_v34 = vrot.slane %v17409_v24, 4  ;;  %v2192_v51 = vrot.slane %v1750_v42, 5  ;;  %v1753_v37 = vld [vmem:[#allocation2 + $0x3a0] sm:$0x1]  ;;  %v17413_v49 = vrot.slane %v17412_v4, 5  ;;  %v2186_v28 = vsel %vm13866_vm5, %v2184_v50, %v2185_v0  ;;  %v17414_v20 = vld [vmem:[#allocation50_spill] sm:$0xff] }
 0x279   : > { %v2198_v60 = vrot.slane %v17411_v13, 4  ;;  %2428 = vst [vmem:[#allocation3 + $0x40c] sm:$0xf] %v2165_v55  ;;  %v2199_v53 = vrot.slane %v1753_v37, 5  ;;  %v1756_v10 = vld [vmem:[#allocation2 + $0x3b8] sm:$0x1] }
 0x27a   : > { %v2205_v26 = vrot.slane %v17413_v49, 4  ;;  %v17415_v6 = vrot.slane %v17414_v20, 5  ;;  %2430 = vst [vmem:[#allocation3 + $0x414] sm:$0xf] %v2172_v57  ;;  %v2193_v17 = vsel %vm13866_vm5, %v2191_v34, %v2192_v51  ;;  %v2206_v38 = vrot.slane %v1756_v10, 5  ;;  %v17416_v5 = vld [vmem:[#allocation51_spill] sm:$0xff] }
 0x27b   : > { %v1759_v27 = vld [vmem:[#allocation2 + $0x3d0] sm:$0x1]  ;;  %v17417_v61 = vrot.slane %v17416_v5, 5  ;;  %2432 = vst [vmem:[#allocation3 + $0x41c] sm:$0xf] %v2179_v32  ;;  %v2200_v40 = vsel %vm13866_vm5, %v2198_v60, %v2199_v53  ;;  %v17418_v54 = vld [vmem:[#allocation52_spill] sm:$0xff] }
 0x27c   : > { %v2212_v11 = vrot.slane %v17415_v6, 4  ;;  %v2213_v33 = vrot.slane %v1759_v27, 5  ;;  %v1762_v18 = vld [vmem:[#allocation2 + $0x3e8] sm:$0x1]  ;;  %v17419_v25 = vrot.slane %v17418_v54, 5  ;;  %v2207_v41 = vsel %vm13866_vm5, %v2205_v26, %v2206_v38  ;;  %v17420_v56 = vld [vmem:[#allocation53_spill] sm:$0xff] }
 0x27d   : > { %v2219_v59 = vrot.slane %v17417_v61, 4  ;;  %2434 = vst [vmem:[#allocation3 + $0x424] sm:$0xf] %v2186_v28  ;;  %v2220_v22 = vrot.slane %v1762_v18, 5  ;;  %v1765_v29 = vld [vmem:[#allocation2 + $0x400] sm:$0x1] }
 0x27e   : > { %v2226_v31 = vrot.slane %v17419_v25, 4  ;;  %v17421_v62 = vrot.slane %v17420_v56, 5  ;;  %2436 = vst [vmem:[#allocation3 + $0x42c] sm:$0xf] %v2193_v17  ;;  %v2214_v63 = vsel %vm13866_vm5, %v2212_v11, %v2213_v33  ;;  %v2227_v52 = vrot.slane %v1765_v29, 5  ;;  %v17422_v35 = vld [vmem:[#allocation54_spill] sm:$0xff] }
 0x27f   : > { %v1768_v2 = vld [vmem:[#allocation2 + $0x418] sm:$0x1]  ;;  %v17423_v47 = vrot.slane %v17422_v35, 5  ;;  %2438 = vst [vmem:[#allocation3 + $0x434] sm:$0xf] %v2200_v40  ;;  %v2221_v16 = vsel %vm13866_vm5, %v2219_v59, %v2220_v22  ;;  %v17424_v21 = vld [vmem:[#allocation55_spill] sm:$0xff] }
 0x280   : > { %v2233_v48 = vrot.slane %v17421_v62, 4  ;;  %v2234_v3 = vrot.slane %v1768_v2, 5  ;;  %v1771_v58 = vld [vmem:[#allocation2 + $0x430] sm:$0x1]  ;;  %v17425_v45 = vrot.slane %v17424_v21, 5  ;;  %v2228_v19 = vsel %vm13866_vm5, %v2226_v31, %v2227_v52  ;;  %v17426_v30 = vld [vmem:[#allocation56_spill] sm:$0xff] }
 0x281   : > { %v2240_v15 = vrot.slane %v17423_v47, 4  ;;  %2440 = vst [vmem:[#allocation3 + $0x43c] sm:$0xf] %v2207_v41  ;;  %v2241_v44 = vrot.slane %v1771_v58, 5  ;;  %v1774_v39 = vld [vmem:[#allocation2 + $0x448] sm:$0x1] }
 0x282   : > { %v2247_v36 = vrot.slane %v17425_v45, 4  ;;  %v17427_v8 = vrot.slane %v17426_v30, 5  ;;  %2442 = vst [vmem:[#allocation3 + $0x444] sm:$0xf] %v2214_v63  ;;  %v2235_v1 = vsel %vm13866_vm5, %v2233_v48, %v2234_v3  ;;  %v2248_v46 = vrot.slane %v1774_v39, 5  ;;  %v17428_v55 = vld [vmem:[#allocation57_spill] sm:$0xff] }
 0x283   : > { %v1777_v50 = vld [vmem:[#allocation2 + $0x460] sm:$0x1]  ;;  %v17429_v7 = vrot.slane %v17428_v55, 5  ;;  %2444 = vst [vmem:[#allocation3 + $0x44c] sm:$0xf] %v2221_v16  ;;  %v2242_v43 = vsel %vm13866_vm5, %v2240_v15, %v2241_v44 }
 0x284   : > { %v2254_v14 = vrot.slane %v17427_v8, 4  ;;  %v2255_v24 = vrot.slane %v1777_v50, 5  ;;  %v1780_v34 = vld [vmem:[#allocation2 + $0x478] sm:$0x1]  ;;  %2446 = vst [vmem:[#allocation3 + $0x454] sm:$0xf] %v2228_v19  ;;  %v2249_v57 = vsel %vm13866_vm5, %v2247_v36, %v2248_v46 }
 0x285   : > { %v2261_v12 = vrot.slane %v17429_v7, 4  ;;  %v2262_v0 = vrot.slane %v1780_v34, 5  ;;  %2448 = vst [vmem:[#allocation3 + $0x45c] sm:$0xf] %v2235_v1 }
 0x286   : > { %v2256_v42 = vsel %vm13866_vm5, %v2254_v14, %v2255_v24  ;;  %2450 = vst [vmem:[#allocation3 + $0x464] sm:$0xf] %v2242_v43 }
 0x287   : > { %v2263_v23 = vsel %vm13866_vm5, %v2261_v12, %v2262_v0  ;;  %2452 = vst [vmem:[#allocation3 + $0x46c] sm:$0xf] %v2249_v57 }
 0x288   : > { %2454 = vst [vmem:[#allocation3 + $0x474] sm:$0xf] %v2256_v42 }
 0x289   : > { %2456 = vst [vmem:[#allocation3 + $0x47c] sm:$0xf] %v2263_v23 }
 0x28a PF: > { %p10727_p8 = scmp.ne.s32.totalorder %s13012_s22, 1 }
 0x28c   : > { %2460 = sbr.rel (%p10727_p8) target bundleno = 925 (0x39d), region = 36 }
 0x291   : > { %v2461_v13 = vld [vmem:[#allocation2 + $0x4] sm:$0xc]  ;;  %v2462_v60 = vld [vmem:[#allocation2 + $0x8] sm:$0xf]  ;;  %vm2749_vm6 = vcmask 1041408   ;;  %vm2750_vm7 = vcmask 1045508  }
 0x292   : > { %vm14593_vm8 = vmor %vm2749_vm6, %vm2750_vm7  ;;  %v10728_v51 = vrot.slane %v2461_v13, 10  ;;  %v2754_v37 = vrot.slane %v2462_v60, 6  ;;  %v2463_v4 = vld [vmem:[#allocation2 + $0xc] sm:$0x3]  ;;  %v2464_v9 = vld [vmem:[#allocation2 + $0x1c] sm:$0xc] }
 0x293   : > { %v2757_v49 = vrot.slane %v2463_v4, 6  ;;  %v2465_v26 = vld [vmem:[#allocation2 + $0x20] sm:$0xf]  ;;  %v10729_v28 = vrot.slane %v2464_v9, 10  ;;  %v2466_v53 = vld [vmem:[#allocation2 + $0x24] sm:$0x3] }
 0x294   : > { %v2755_v10 = vsel %vm14593_vm8, %v10728_v51, %v2754_v37  ;;  %v2756_v20 = vrot.slane %v2754_v37, 4  ;;  %v2761_v6 = vrot.slane %v2465_v26, 6  ;;  %v2764_v11 = vrot.slane %v2466_v53, 6  ;;  %v2467_v17 = vld [vmem:[#allocation2 + $0x34] sm:$0xc] }
 0x295   : > { %3184 = vst [vmem:[#allocation3] sm:$0xf] %v2755_v10  ;;  %v2468_v38 = vld [vmem:[#allocation2 + $0x38] sm:$0xf]  ;;  %v10730_v27 = vrot.slane %v2467_v17, 10 }
 0x296   : > { %v2758_v5 = vsel %vm14593_vm8, %v2756_v20, %v2757_v49  ;;  %v2762_v61 = vsel %vm14593_vm8, %v10729_v28, %v2761_v6  ;;  %v2763_v59 = vrot.slane %v2761_v6, 4  ;;  %v2768_v40 = vrot.slane %v2468_v38, 6  ;;  %v2469_v33 = vld [vmem:[#allocation2 + $0x3c] sm:$0x3]  ;;  %v2470_v18 = vld [vmem:[#allocation2 + $0x4c] sm:$0xc] }
 0x297   : > { %3185 = vst [vmem:[#allocation3 + $0x4] sm:$0xf] %v2758_v5  ;;  %v2771_v54 = vrot.slane %v2469_v33, 6  ;;  %v2471_v25 = vld [vmem:[#allocation2 + $0x50] sm:$0xf]  ;;  %v10731_v31 = vrot.slane %v2470_v18, 10 }
 0x298   : > { %3186 = vst [vmem:[#allocation3 + $0x8] sm:$0xf] %v2762_v61  ;;  %v2765_v41 = vsel %vm14593_vm8, %v2763_v59, %v2764_v11  ;;  %v2769_v22 = vsel %vm14593_vm8, %v10730_v27, %v2768_v40  ;;  %v2770_v29 = vrot.slane %v2768_v40, 4  ;;  %v2775_v56 = vrot.slane %v2471_v25, 6  ;;  %v2472_v62 = vld [vmem:[#allocation2 + $0x54] sm:$0x3] }
 0x299   : > { %3187 = vst [vmem:[#allocation3 + $0xc] sm:$0xf] %v2765_v41  ;;  %v2778_v48 = vrot.slane %v2472_v62, 6  ;;  %v2473_v63 = vld [vmem:[#allocation2 + $0x64] sm:$0xc] }
 0x29a   : > { %3188 = vst [vmem:[#allocation3 + $0x10] sm:$0xf] %v2769_v22  ;;  %v2772_v52 = vsel %vm14593_vm8, %v2770_v29, %v2771_v54  ;;  %v2776_v2 = vsel %vm14593_vm8, %v10731_v31, %v2775_v56  ;;  %v2777_v35 = vrot.slane %v2775_v56, 4  ;;  %v2474_v47 = vld [vmem:[#allocation2 + $0x68] sm:$0xf]  ;;  %v10732_v15 = vrot.slane %v2473_v63, 10 }
 0x29b   : > { %3189 = vst [vmem:[#allocation3 + $0x14] sm:$0xf] %v2772_v52  ;;  %v2782_v16 = vrot.slane %v2474_v47, 6  ;;  %v2475_v3 = vld [vmem:[#allocation2 + $0x6c] sm:$0x3] }
 0x29c   : > { %3190 = vst [vmem:[#allocation3 + $0x18] sm:$0xf] %v2776_v2  ;;  %v2779_v58 = vsel %vm14593_vm8, %v2777_v35, %v2778_v48  ;;  %v2785_v21 = vrot.slane %v2475_v3, 6  ;;  %v2476_v45 = vld [vmem:[#allocation2 + $0x7c] sm:$0xc] }
 0x29d   : > { %3191 = vst [vmem:[#allocation3 + $0x1c] sm:$0xf] %v2779_v58  ;;  %v2783_v36 = vsel %vm14593_vm8, %v10732_v15, %v2782_v16  ;;  %v2784_v19 = vrot.slane %v2782_v16, 4  ;;  %v2477_v44 = vld [vmem:[#allocation2 + $0x80] sm:$0xf]  ;;  %v10733_v39 = vrot.slane %v2476_v45, 10 }
 0x29e   : > { %3192 = vst [vmem:[#allocation3 + $0x20] sm:$0xf] %v2783_v36  ;;  %v2789_v30 = vrot.slane %v2477_v44, 6  ;;  %v2478_v8 = vld [vmem:[#allocation2 + $0x84] sm:$0x3] }
 0x29f   : > { %v2786_v14 = vsel %vm14593_vm8, %v2784_v19, %v2785_v21  ;;  %v2792_v1 = vrot.slane %v2478_v8, 6  ;;  %v2479_v46 = vld [vmem:[#allocation2 + $0x94] sm:$0xc]  ;;  %v2480_v50 = vld [vmem:[#allocation2 + $0x98] sm:$0xf] }
 0x2a0   : > { %3193 = vst [vmem:[#allocation3 + $0x24] sm:$0xf] %v2786_v14  ;;  %v2790_v55 = vsel %vm14593_vm8, %v10733_v39, %v2789_v30  ;;  %v2791_v7 = vrot.slane %v2789_v30, 4  ;;  %v10734_v12 = vrot.slane %v2479_v46, 10  ;;  %v2796_v43 = vrot.slane %v2480_v50, 6 }
 0x2a1   : > { %3194 = vst [vmem:[#allocation3 + $0x28] sm:$0xf] %v2790_v55  ;;  %v2481_v24 = vld [vmem:[#allocation2 + $0x9c] sm:$0x3]  ;;  %v2482_v34 = vld [vmem:[#allocation2 + $0xac] sm:$0xc] }
 0x2a2   : > { %v2793_v57 = vsel %vm14593_vm8, %v2791_v7, %v2792_v1  ;;  %v2797_v0 = vsel %vm14593_vm8, %v10734_v12, %v2796_v43  ;;  %v2798_v42 = vrot.slane %v2796_v43, 4  ;;  %v2799_v23 = vrot.slane %v2481_v24, 6  ;;  %v2483_v13 = vld [vmem:[#allocation2 + $0xb0] sm:$0xf]  ;;  %v2484_v60 = vld [vmem:[#allocation2 + $0xb4] sm:$0x3] }
 0x2a3   : > { %3195 = vst [vmem:[#allocation3 + $0x2c] sm:$0xf] %v2793_v57  ;;  %v10735_v51 = vrot.slane %v2482_v34, 10  ;;  %v2803_v37 = vrot.slane %v2483_v13, 6  ;;  %v2806_v4 = vrot.slane %v2484_v60, 6 }
 0x2a4   : > { %3196 = vst [vmem:[#allocation3 + $0x30] sm:$0xf] %v2797_v0  ;;  %v2800_v9 = vsel %vm14593_vm8, %v2798_v42, %v2799_v23  ;;  %v2485_v49 = vld [vmem:[#allocation2 + $0xc4] sm:$0xc]  ;;  %v2486_v26 = vld [vmem:[#allocation2 + $0xc8] sm:$0xf] }
 0x2a5   : > { %3197 = vst [vmem:[#allocation3 + $0x34] sm:$0xf] %v2800_v9  ;;  %v2804_v28 = vsel %vm14593_vm8, %v10735_v51, %v2803_v37  ;;  %v2805_v53 = vrot.slane %v2803_v37, 4  ;;  %v10736_v10 = vrot.slane %v2485_v49, 10  ;;  %v2810_v20 = vrot.slane %v2486_v26, 6 }
 0x2a6   : > { %3198 = vst [vmem:[#allocation3 + $0x38] sm:$0xf] %v2804_v28  ;;  %v2487_v6 = vld [vmem:[#allocation2 + $0xcc] sm:$0x3]  ;;  %v2488_v11 = vld [vmem:[#allocation2 + $0xdc] sm:$0xc] }
 0x2a7   : > { %v2807_v17 = vsel %vm14593_vm8, %v2805_v53, %v2806_v4  ;;  %v2811_v38 = vsel %vm14593_vm8, %v10736_v10, %v2810_v20  ;;  %v2812_v27 = vrot.slane %v2810_v20, 4  ;;  %v2813_v5 = vrot.slane %v2487_v6, 6  ;;  %v2489_v61 = vld [vmem:[#allocation2 + $0xe0] sm:$0xf]  ;;  %v2490_v59 = vld [vmem:[#allocation2 + $0xe4] sm:$0x3] }
 0x2a8   : > { %3199 = vst [vmem:[#allocation3 + $0x3c] sm:$0xf] %v2807_v17  ;;  %v10737_v40 = vrot.slane %v2488_v11, 10  ;;  %v2817_v33 = vrot.slane %v2489_v61, 6  ;;  %v2820_v18 = vrot.slane %v2490_v59, 6 }
 0x2a9   : > { %3200 = vst [vmem:[#allocation3 + $0x40] sm:$0xf] %v2811_v38  ;;  %v2814_v54 = vsel %vm14593_vm8, %v2812_v27, %v2813_v5  ;;  %v2491_v25 = vld [vmem:[#allocation2 + $0xf4] sm:$0xc]  ;;  %v2492_v31 = vld [vmem:[#allocation2 + $0xf8] sm:$0xf] }
 0x2aa   : > { %3201 = vst [vmem:[#allocation3 + $0x44] sm:$0xf] %v2814_v54  ;;  %v2818_v41 = vsel %vm14593_vm8, %v10737_v40, %v2817_v33  ;;  %v2819_v22 = vrot.slane %v2817_v33, 4  ;;  %v10738_v29 = vrot.slane %v2491_v25, 10  ;;  %v2824_v56 = vrot.slane %v2492_v31, 6 }
 0x2ab   : > { %3202 = vst [vmem:[#allocation3 + $0x48] sm:$0xf] %v2818_v41  ;;  %v2493_v62 = vld [vmem:[#allocation2 + $0xfc] sm:$0x3]  ;;  %v2494_v48 = vld [vmem:[#allocation2 + $0x10c] sm:$0xc] }
 0x2ac   : > { %v2821_v63 = vsel %vm14593_vm8, %v2819_v22, %v2820_v18  ;;  %v2825_v52 = vsel %vm14593_vm8, %v10738_v29, %v2824_v56  ;;  %v2826_v2 = vrot.slane %v2824_v56, 4  ;;  %v2827_v35 = vrot.slane %v2493_v62, 6  ;;  %v2495_v47 = vld [vmem:[#allocation2 + $0x110] sm:$0xf]  ;;  %v2496_v15 = vld [vmem:[#allocation2 + $0x114] sm:$0x3] }
 0x2ad   : > { %3203 = vst [vmem:[#allocation3 + $0x4c] sm:$0xf] %v2821_v63  ;;  %v10739_v16 = vrot.slane %v2494_v48, 10  ;;  %v2831_v3 = vrot.slane %v2495_v47, 6  ;;  %v2834_v58 = vrot.slane %v2496_v15, 6 }
 0x2ae   : > { %3204 = vst [vmem:[#allocation3 + $0x50] sm:$0xf] %v2825_v52  ;;  %v2828_v21 = vsel %vm14593_vm8, %v2826_v2, %v2827_v35  ;;  %v2497_v45 = vld [vmem:[#allocation2 + $0x124] sm:$0xc]  ;;  %v2498_v36 = vld [vmem:[#allocation2 + $0x128] sm:$0xf] }
 0x2af   : > { %3205 = vst [vmem:[#allocation3 + $0x54] sm:$0xf] %v2828_v21  ;;  %v2832_v19 = vsel %vm14593_vm8, %v10739_v16, %v2831_v3  ;;  %v2833_v44 = vrot.slane %v2831_v3, 4  ;;  %v10740_v39 = vrot.slane %v2497_v45, 10  ;;  %v2838_v30 = vrot.slane %v2498_v36, 6 }
 0x2b0   : > { %3206 = vst [vmem:[#allocation3 + $0x58] sm:$0xf] %v2832_v19  ;;  %v2499_v8 = vld [vmem:[#allocation2 + $0x12c] sm:$0x3]  ;;  %v2500_v14 = vld [vmem:[#allocation2 + $0x13c] sm:$0xc] }
 0x2b1   : > { %v2835_v1 = vsel %vm14593_vm8, %v2833_v44, %v2834_v58  ;;  %v2839_v46 = vsel %vm14593_vm8, %v10740_v39, %v2838_v30  ;;  %v2840_v50 = vrot.slane %v2838_v30, 4  ;;  %v2841_v55 = vrot.slane %v2499_v8, 6  ;;  %v2501_v7 = vld [vmem:[#allocation2 + $0x140] sm:$0xf]  ;;  %v2502_v12 = vld [vmem:[#allocation2 + $0x144] sm:$0x3] }
 0x2b2   : > { %3207 = vst [vmem:[#allocation3 + $0x5c] sm:$0xf] %v2835_v1  ;;  %v10741_v43 = vrot.slane %v2500_v14, 10  ;;  %v2845_v24 = vrot.slane %v2501_v7, 6  ;;  %v2848_v34 = vrot.slane %v2502_v12, 6 }
 0x2b3   : > { %3208 = vst [vmem:[#allocation3 + $0x60] sm:$0xf] %v2839_v46  ;;  %v2842_v57 = vsel %vm14593_vm8, %v2840_v50, %v2841_v55  ;;  %v2503_v0 = vld [vmem:[#allocation2 + $0x154] sm:$0xc]  ;;  %v2504_v42 = vld [vmem:[#allocation2 + $0x158] sm:$0xf] }
 0x2b4   : > { %3209 = vst [vmem:[#allocation3 + $0x64] sm:$0xf] %v2842_v57  ;;  %v2846_v23 = vsel %vm14593_vm8, %v10741_v43, %v2845_v24  ;;  %v2847_v13 = vrot.slane %v2845_v24, 4  ;;  %v10742_v60 = vrot.slane %v2503_v0, 10  ;;  %v2852_v51 = vrot.slane %v2504_v42, 6 }
 0x2b5   : > { %3210 = vst [vmem:[#allocation3 + $0x68] sm:$0xf] %v2846_v23  ;;  %v2505_v37 = vld [vmem:[#allocation2 + $0x15c] sm:$0x3]  ;;  %v2506_v4 = vld [vmem:[#allocation2 + $0x16c] sm:$0xc] }
 0x2b6   : > { %v2849_v9 = vsel %vm14593_vm8, %v2847_v13, %v2848_v34  ;;  %v2853_v49 = vsel %vm14593_vm8, %v10742_v60, %v2852_v51  ;;  %v2854_v26 = vrot.slane %v2852_v51, 4  ;;  %v2855_v28 = vrot.slane %v2505_v37, 6  ;;  %v2507_v53 = vld [vmem:[#allocation2 + $0x170] sm:$0xf]  ;;  %v2508_v10 = vld [vmem:[#allocation2 + $0x174] sm:$0x3] }
 0x2b7   : > { %3211 = vst [vmem:[#allocation3 + $0x6c] sm:$0xf] %v2849_v9  ;;  %v10743_v20 = vrot.slane %v2506_v4, 10  ;;  %v2859_v6 = vrot.slane %v2507_v53, 6  ;;  %v2862_v11 = vrot.slane %v2508_v10, 6 }
 0x2b8   : > { %3212 = vst [vmem:[#allocation3 + $0x70] sm:$0xf] %v2853_v49  ;;  %v2856_v17 = vsel %vm14593_vm8, %v2854_v26, %v2855_v28  ;;  %v2509_v38 = vld [vmem:[#allocation2 + $0x184] sm:$0xc]  ;;  %v2510_v27 = vld [vmem:[#allocation2 + $0x188] sm:$0xf] }
 0x2b9   : > { %3213 = vst [vmem:[#allocation3 + $0x74] sm:$0xf] %v2856_v17  ;;  %v2860_v5 = vsel %vm14593_vm8, %v10743_v20, %v2859_v6  ;;  %v2861_v61 = vrot.slane %v2859_v6, 4  ;;  %v10744_v59 = vrot.slane %v2509_v38, 10  ;;  %v2866_v40 = vrot.slane %v2510_v27, 6 }
 0x2ba   : > { %3214 = vst [vmem:[#allocation3 + $0x78] sm:$0xf] %v2860_v5  ;;  %v2511_v33 = vld [vmem:[#allocation2 + $0x18c] sm:$0x3]  ;;  %v2512_v18 = vld [vmem:[#allocation2 + $0x19c] sm:$0xc] }
 0x2bb   : > { %v2863_v54 = vsel %vm14593_vm8, %v2861_v61, %v2862_v11  ;;  %v2867_v25 = vsel %vm14593_vm8, %v10744_v59, %v2866_v40  ;;  %v2868_v31 = vrot.slane %v2866_v40, 4  ;;  %v2869_v41 = vrot.slane %v2511_v33, 6  ;;  %v2513_v22 = vld [vmem:[#allocation2 + $0x1a0] sm:$0xf]  ;;  %v2514_v29 = vld [vmem:[#allocation2 + $0x1a4] sm:$0x3] }
 0x2bc   : > { %3215 = vst [vmem:[#allocation3 + $0x7c] sm:$0xf] %v2863_v54  ;;  %v10745_v56 = vrot.slane %v2512_v18, 10  ;;  %v2873_v62 = vrot.slane %v2513_v22, 6  ;;  %v2876_v48 = vrot.slane %v2514_v29, 6 }
 0x2bd   : > { %3216 = vst [vmem:[#allocation3 + $0x80] sm:$0xf] %v2867_v25  ;;  %v2870_v63 = vsel %vm14593_vm8, %v2868_v31, %v2869_v41  ;;  %v2515_v52 = vld [vmem:[#allocation2 + $0x1b4] sm:$0xc]  ;;  %v2516_v2 = vld [vmem:[#allocation2 + $0x1b8] sm:$0xf] }
 0x2be   : > { %3217 = vst [vmem:[#allocation3 + $0x84] sm:$0xf] %v2870_v63  ;;  %v2874_v35 = vsel %vm14593_vm8, %v10745_v56, %v2873_v62  ;;  %v2875_v47 = vrot.slane %v2873_v62, 4  ;;  %v10746_v15 = vrot.slane %v2515_v52, 10  ;;  %v2880_v16 = vrot.slane %v2516_v2, 6 }
 0x2bf   : > { %3218 = vst [vmem:[#allocation3 + $0x88] sm:$0xf] %v2874_v35  ;;  %v2517_v3 = vld [vmem:[#allocation2 + $0x1bc] sm:$0x3]  ;;  %v2518_v58 = vld [vmem:[#allocation2 + $0x1cc] sm:$0xc] }
 0x2c0   : > { %v2877_v21 = vsel %vm14593_vm8, %v2875_v47, %v2876_v48  ;;  %v2881_v45 = vsel %vm14593_vm8, %v10746_v15, %v2880_v16  ;;  %v2882_v36 = vrot.slane %v2880_v16, 4  ;;  %v2883_v19 = vrot.slane %v2517_v3, 6  ;;  %v2519_v44 = vld [vmem:[#allocation2 + $0x1d0] sm:$0xf]  ;;  %v2520_v39 = vld [vmem:[#allocation2 + $0x1d4] sm:$0x3] }
 0x2c1   : > { %3219 = vst [vmem:[#allocation3 + $0x8c] sm:$0xf] %v2877_v21  ;;  %v10747_v30 = vrot.slane %v2518_v58, 10  ;;  %v2887_v8 = vrot.slane %v2519_v44, 6  ;;  %v2890_v14 = vrot.slane %v2520_v39, 6 }
 0x2c2   : > { %3220 = vst [vmem:[#allocation3 + $0x90] sm:$0xf] %v2881_v45  ;;  %v2884_v1 = vsel %vm14593_vm8, %v2882_v36, %v2883_v19  ;;  %v2521_v46 = vld [vmem:[#allocation2 + $0x1e4] sm:$0xc]  ;;  %v2522_v50 = vld [vmem:[#allocation2 + $0x1e8] sm:$0xf] }
 0x2c3   : > { %3221 = vst [vmem:[#allocation3 + $0x94] sm:$0xf] %v2884_v1  ;;  %v2888_v55 = vsel %vm14593_vm8, %v10747_v30, %v2887_v8  ;;  %v2889_v7 = vrot.slane %v2887_v8, 4  ;;  %v10748_v12 = vrot.slane %v2521_v46, 10  ;;  %v2894_v43 = vrot.slane %v2522_v50, 6 }
 0x2c4   : > { %3222 = vst [vmem:[#allocation3 + $0x98] sm:$0xf] %v2888_v55  ;;  %v2523_v24 = vld [vmem:[#allocation2 + $0x1ec] sm:$0x3]  ;;  %v2524_v34 = vld [vmem:[#allocation2 + $0x1fc] sm:$0xc] }
 0x2c5   : > { %v2891_v57 = vsel %vm14593_vm8, %v2889_v7, %v2890_v14  ;;  %v2895_v0 = vsel %vm14593_vm8, %v10748_v12, %v2894_v43  ;;  %v2896_v42 = vrot.slane %v2894_v43, 4  ;;  %v2897_v23 = vrot.slane %v2523_v24, 6  ;;  %v2525_v13 = vld [vmem:[#allocation2 + $0x200] sm:$0xf]  ;;  %v2526_v60 = vld [vmem:[#allocation2 + $0x204] sm:$0x3] }
 0x2c6   : > { %3223 = vst [vmem:[#allocation3 + $0x9c] sm:$0xf] %v2891_v57  ;;  %v10749_v51 = vrot.slane %v2524_v34, 10  ;;  %v2901_v37 = vrot.slane %v2525_v13, 6  ;;  %v2904_v4 = vrot.slane %v2526_v60, 6 }
 0x2c7   : > { %3224 = vst [vmem:[#allocation3 + $0xa0] sm:$0xf] %v2895_v0  ;;  %v2898_v9 = vsel %vm14593_vm8, %v2896_v42, %v2897_v23  ;;  %v2527_v49 = vld [vmem:[#allocation2 + $0x214] sm:$0xc]  ;;  %v2528_v26 = vld [vmem:[#allocation2 + $0x218] sm:$0xf] }
 0x2c8   : > { %3225 = vst [vmem:[#allocation3 + $0xa4] sm:$0xf] %v2898_v9  ;;  %v2902_v28 = vsel %vm14593_vm8, %v10749_v51, %v2901_v37  ;;  %v2903_v53 = vrot.slane %v2901_v37, 4  ;;  %v10750_v10 = vrot.slane %v2527_v49, 10  ;;  %v2908_v20 = vrot.slane %v2528_v26, 6 }
 0x2c9   : > { %3226 = vst [vmem:[#allocation3 + $0xa8] sm:$0xf] %v2902_v28  ;;  %v2529_v6 = vld [vmem:[#allocation2 + $0x21c] sm:$0x3]  ;;  %v2530_v11 = vld [vmem:[#allocation2 + $0x22c] sm:$0xc] }
 0x2ca   : > { %v2905_v17 = vsel %vm14593_vm8, %v2903_v53, %v2904_v4  ;;  %v2909_v38 = vsel %vm14593_vm8, %v10750_v10, %v2908_v20  ;;  %v2910_v27 = vrot.slane %v2908_v20, 4  ;;  %v2911_v5 = vrot.slane %v2529_v6, 6  ;;  %v2531_v61 = vld [vmem:[#allocation2 + $0x230] sm:$0xf]  ;;  %v2532_v59 = vld [vmem:[#allocation2 + $0x234] sm:$0x3] }
 0x2cb   : > { %3227 = vst [vmem:[#allocation3 + $0xac] sm:$0xf] %v2905_v17  ;;  %v10751_v40 = vrot.slane %v2530_v11, 10  ;;  %v2915_v33 = vrot.slane %v2531_v61, 6  ;;  %v2918_v18 = vrot.slane %v2532_v59, 6 }
 0x2cc   : > { %3228 = vst [vmem:[#allocation3 + $0xb0] sm:$0xf] %v2909_v38  ;;  %v2912_v54 = vsel %vm14593_vm8, %v2910_v27, %v2911_v5  ;;  %v2533_v25 = vld [vmem:[#allocation2 + $0x244] sm:$0xc]  ;;  %v2534_v31 = vld [vmem:[#allocation2 + $0x248] sm:$0xf] }
 0x2cd   : > { %3229 = vst [vmem:[#allocation3 + $0xb4] sm:$0xf] %v2912_v54  ;;  %v2916_v41 = vsel %vm14593_vm8, %v10751_v40, %v2915_v33  ;;  %v2917_v22 = vrot.slane %v2915_v33, 4  ;;  %v10752_v29 = vrot.slane %v2533_v25, 10  ;;  %v2922_v56 = vrot.slane %v2534_v31, 6 }
 0x2ce   : > { %3230 = vst [vmem:[#allocation3 + $0xb8] sm:$0xf] %v2916_v41  ;;  %v2535_v62 = vld [vmem:[#allocation2 + $0x24c] sm:$0x3]  ;;  %v2536_v48 = vld [vmem:[#allocation2 + $0x25c] sm:$0xc] }
 0x2cf   : > { %v2919_v63 = vsel %vm14593_vm8, %v2917_v22, %v2918_v18  ;;  %v2923_v52 = vsel %vm14593_vm8, %v10752_v29, %v2922_v56  ;;  %v2924_v2 = vrot.slane %v2922_v56, 4  ;;  %v2925_v35 = vrot.slane %v2535_v62, 6  ;;  %v2537_v47 = vld [vmem:[#allocation2 + $0x260] sm:$0xf]  ;;  %v2538_v15 = vld [vmem:[#allocation2 + $0x264] sm:$0x3] }
 0x2d0   : > { %3231 = vst [vmem:[#allocation3 + $0xbc] sm:$0xf] %v2919_v63  ;;  %v10753_v16 = vrot.slane %v2536_v48, 10  ;;  %v2929_v3 = vrot.slane %v2537_v47, 6  ;;  %v2932_v58 = vrot.slane %v2538_v15, 6 }
 0x2d1   : > { %3232 = vst [vmem:[#allocation3 + $0xc0] sm:$0xf] %v2923_v52  ;;  %v2926_v21 = vsel %vm14593_vm8, %v2924_v2, %v2925_v35  ;;  %v2539_v45 = vld [vmem:[#allocation2 + $0x274] sm:$0xc]  ;;  %v2540_v36 = vld [vmem:[#allocation2 + $0x278] sm:$0xf] }
 0x2d2   : > { %3233 = vst [vmem:[#allocation3 + $0xc4] sm:$0xf] %v2926_v21  ;;  %v2930_v19 = vsel %vm14593_vm8, %v10753_v16, %v2929_v3  ;;  %v2931_v44 = vrot.slane %v2929_v3, 4  ;;  %v10754_v39 = vrot.slane %v2539_v45, 10  ;;  %v2936_v30 = vrot.slane %v2540_v36, 6 }
 0x2d3   : > { %3234 = vst [vmem:[#allocation3 + $0xc8] sm:$0xf] %v2930_v19  ;;  %v2541_v8 = vld [vmem:[#allocation2 + $0x27c] sm:$0x3]  ;;  %v2542_v14 = vld [vmem:[#allocation2 + $0x28c] sm:$0xc] }
 0x2d4   : > { %v2933_v1 = vsel %vm14593_vm8, %v2931_v44, %v2932_v58  ;;  %v2937_v46 = vsel %vm14593_vm8, %v10754_v39, %v2936_v30  ;;  %v2938_v50 = vrot.slane %v2936_v30, 4  ;;  %v2939_v55 = vrot.slane %v2541_v8, 6  ;;  %v2543_v7 = vld [vmem:[#allocation2 + $0x290] sm:$0xf]  ;;  %v2544_v12 = vld [vmem:[#allocation2 + $0x294] sm:$0x3] }
 0x2d5   : > { %3235 = vst [vmem:[#allocation3 + $0xcc] sm:$0xf] %v2933_v1  ;;  %v10755_v43 = vrot.slane %v2542_v14, 10  ;;  %v2943_v24 = vrot.slane %v2543_v7, 6  ;;  %v2946_v34 = vrot.slane %v2544_v12, 6 }
 0x2d6   : > { %3236 = vst [vmem:[#allocation3 + $0xd0] sm:$0xf] %v2937_v46  ;;  %v2940_v57 = vsel %vm14593_vm8, %v2938_v50, %v2939_v55  ;;  %v2545_v0 = vld [vmem:[#allocation2 + $0x2a4] sm:$0xc]  ;;  %v2546_v42 = vld [vmem:[#allocation2 + $0x2a8] sm:$0xf] }
 0x2d7   : > { %3237 = vst [vmem:[#allocation3 + $0xd4] sm:$0xf] %v2940_v57  ;;  %v2944_v23 = vsel %vm14593_vm8, %v10755_v43, %v2943_v24  ;;  %v2945_v13 = vrot.slane %v2943_v24, 4  ;;  %v10756_v60 = vrot.slane %v2545_v0, 10  ;;  %v2950_v51 = vrot.slane %v2546_v42, 6 }
 0x2d8   : > { %3238 = vst [vmem:[#allocation3 + $0xd8] sm:$0xf] %v2944_v23  ;;  %v2547_v37 = vld [vmem:[#allocation2 + $0x2ac] sm:$0x3]  ;;  %v2548_v4 = vld [vmem:[#allocation2 + $0x2bc] sm:$0xc] }
 0x2d9   : > { %v2947_v9 = vsel %vm14593_vm8, %v2945_v13, %v2946_v34  ;;  %v2951_v49 = vsel %vm14593_vm8, %v10756_v60, %v2950_v51  ;;  %v2952_v26 = vrot.slane %v2950_v51, 4  ;;  %v2953_v28 = vrot.slane %v2547_v37, 6  ;;  %v2549_v53 = vld [vmem:[#allocation2 + $0x2c0] sm:$0xf]  ;;  %v2550_v10 = vld [vmem:[#allocation2 + $0x2c4] sm:$0x3] }
 0x2da   : > { %3239 = vst [vmem:[#allocation3 + $0xdc] sm:$0xf] %v2947_v9  ;;  %v10757_v20 = vrot.slane %v2548_v4, 10  ;;  %v2957_v6 = vrot.slane %v2549_v53, 6  ;;  %v2960_v11 = vrot.slane %v2550_v10, 6 }
 0x2db   : > { %3240 = vst [vmem:[#allocation3 + $0xe0] sm:$0xf] %v2951_v49  ;;  %v2954_v17 = vsel %vm14593_vm8, %v2952_v26, %v2953_v28  ;;  %v2551_v38 = vld [vmem:[#allocation2 + $0x2d4] sm:$0xc]  ;;  %v2552_v27 = vld [vmem:[#allocation2 + $0x2d8] sm:$0xf] }
 0x2dc   : > { %3241 = vst [vmem:[#allocation3 + $0xe4] sm:$0xf] %v2954_v17  ;;  %v2958_v5 = vsel %vm14593_vm8, %v10757_v20, %v2957_v6  ;;  %v2959_v61 = vrot.slane %v2957_v6, 4  ;;  %v10758_v59 = vrot.slane %v2551_v38, 10  ;;  %v2964_v40 = vrot.slane %v2552_v27, 6 }
 0x2dd   : > { %3242 = vst [vmem:[#allocation3 + $0xe8] sm:$0xf] %v2958_v5  ;;  %v2553_v33 = vld [vmem:[#allocation2 + $0x2dc] sm:$0x3]  ;;  %v2554_v18 = vld [vmem:[#allocation2 + $0x2ec] sm:$0xc] }
 0x2de   : > { %v2961_v54 = vsel %vm14593_vm8, %v2959_v61, %v2960_v11  ;;  %v2965_v25 = vsel %vm14593_vm8, %v10758_v59, %v2964_v40  ;;  %v2966_v31 = vrot.slane %v2964_v40, 4  ;;  %v2967_v41 = vrot.slane %v2553_v33, 6  ;;  %v2555_v22 = vld [vmem:[#allocation2 + $0x2f0] sm:$0xf]  ;;  %v2556_v29 = vld [vmem:[#allocation2 + $0x2f4] sm:$0x3] }
 0x2df   : > { %3243 = vst [vmem:[#allocation3 + $0xec] sm:$0xf] %v2961_v54  ;;  %v10759_v56 = vrot.slane %v2554_v18, 10  ;;  %v2971_v62 = vrot.slane %v2555_v22, 6  ;;  %v2974_v48 = vrot.slane %v2556_v29, 6 }
 0x2e0   : > { %3244 = vst [vmem:[#allocation3 + $0xf0] sm:$0xf] %v2965_v25  ;;  %v2968_v63 = vsel %vm14593_vm8, %v2966_v31, %v2967_v41  ;;  %v2557_v52 = vld [vmem:[#allocation2 + $0x304] sm:$0xc]  ;;  %v2558_v2 = vld [vmem:[#allocation2 + $0x308] sm:$0xf] }
 0x2e1   : > { %3245 = vst [vmem:[#allocation3 + $0xf4] sm:$0xf] %v2968_v63  ;;  %v2972_v35 = vsel %vm14593_vm8, %v10759_v56, %v2971_v62  ;;  %v2973_v47 = vrot.slane %v2971_v62, 4  ;;  %v10760_v15 = vrot.slane %v2557_v52, 10  ;;  %v2978_v16 = vrot.slane %v2558_v2, 6 }
 0x2e2   : > { %3246 = vst [vmem:[#allocation3 + $0xf8] sm:$0xf] %v2972_v35  ;;  %v2559_v3 = vld [vmem:[#allocation2 + $0x30c] sm:$0x3]  ;;  %v2560_v58 = vld [vmem:[#allocation2 + $0x31c] sm:$0xc] }
 0x2e3   : > { %v2975_v21 = vsel %vm14593_vm8, %v2973_v47, %v2974_v48  ;;  %v2979_v45 = vsel %vm14593_vm8, %v10760_v15, %v2978_v16  ;;  %v2980_v36 = vrot.slane %v2978_v16, 4  ;;  %v2981_v19 = vrot.slane %v2559_v3, 6  ;;  %v2561_v44 = vld [vmem:[#allocation2 + $0x320] sm:$0xf]  ;;  %v2562_v39 = vld [vmem:[#allocation2 + $0x324] sm:$0x3] }
 0x2e4   : > { %3247 = vst [vmem:[#allocation3 + $0xfc] sm:$0xf] %v2975_v21  ;;  %v10761_v30 = vrot.slane %v2560_v58, 10  ;;  %v2985_v8 = vrot.slane %v2561_v44, 6  ;;  %v2988_v14 = vrot.slane %v2562_v39, 6 }
 0x2e5   : > { %3248 = vst [vmem:[#allocation3 + $0x100] sm:$0xf] %v2979_v45  ;;  %v2982_v1 = vsel %vm14593_vm8, %v2980_v36, %v2981_v19  ;;  %v2563_v46 = vld [vmem:[#allocation2 + $0x334] sm:$0xc]  ;;  %v2564_v50 = vld [vmem:[#allocation2 + $0x338] sm:$0xf] }
 0x2e6   : > { %3249 = vst [vmem:[#allocation3 + $0x104] sm:$0xf] %v2982_v1  ;;  %v2986_v55 = vsel %vm14593_vm8, %v10761_v30, %v2985_v8  ;;  %v2987_v7 = vrot.slane %v2985_v8, 4  ;;  %v10762_v12 = vrot.slane %v2563_v46, 10  ;;  %v2992_v43 = vrot.slane %v2564_v50, 6 }
 0x2e7   : > { %3250 = vst [vmem:[#allocation3 + $0x108] sm:$0xf] %v2986_v55  ;;  %v2565_v24 = vld [vmem:[#allocation2 + $0x33c] sm:$0x3]  ;;  %v2566_v34 = vld [vmem:[#allocation2 + $0x34c] sm:$0xc] }
 0x2e8   : > { %v2989_v57 = vsel %vm14593_vm8, %v2987_v7, %v2988_v14  ;;  %v2993_v0 = vsel %vm14593_vm8, %v10762_v12, %v2992_v43  ;;  %v2994_v42 = vrot.slane %v2992_v43, 4  ;;  %v2995_v23 = vrot.slane %v2565_v24, 6  ;;  %v2567_v13 = vld [vmem:[#allocation2 + $0x350] sm:$0xf]  ;;  %v2568_v60 = vld [vmem:[#allocation2 + $0x354] sm:$0x3] }
 0x2e9   : > { %3251 = vst [vmem:[#allocation3 + $0x10c] sm:$0xf] %v2989_v57  ;;  %v10763_v51 = vrot.slane %v2566_v34, 10  ;;  %v2999_v37 = vrot.slane %v2567_v13, 6  ;;  %v3002_v4 = vrot.slane %v2568_v60, 6 }
 0x2ea   : > { %3252 = vst [vmem:[#allocation3 + $0x110] sm:$0xf] %v2993_v0  ;;  %v2996_v9 = vsel %vm14593_vm8, %v2994_v42, %v2995_v23  ;;  %v2569_v49 = vld [vmem:[#allocation2 + $0x364] sm:$0xc]  ;;  %v2570_v26 = vld [vmem:[#allocation2 + $0x368] sm:$0xf] }
 0x2eb   : > { %3253 = vst [vmem:[#allocation3 + $0x114] sm:$0xf] %v2996_v9  ;;  %v3000_v28 = vsel %vm14593_vm8, %v10763_v51, %v2999_v37  ;;  %v3001_v53 = vrot.slane %v2999_v37, 4  ;;  %v10764_v10 = vrot.slane %v2569_v49, 10  ;;  %v3006_v20 = vrot.slane %v2570_v26, 6 }
 0x2ec   : > { %3254 = vst [vmem:[#allocation3 + $0x118] sm:$0xf] %v3000_v28  ;;  %v2571_v6 = vld [vmem:[#allocation2 + $0x36c] sm:$0x3]  ;;  %v2572_v11 = vld [vmem:[#allocation2 + $0x37c] sm:$0xc] }
 0x2ed   : > { %v3003_v17 = vsel %vm14593_vm8, %v3001_v53, %v3002_v4  ;;  %v3007_v38 = vsel %vm14593_vm8, %v10764_v10, %v3006_v20  ;;  %v3008_v27 = vrot.slane %v3006_v20, 4  ;;  %v3009_v5 = vrot.slane %v2571_v6, 6  ;;  %v2573_v61 = vld [vmem:[#allocation2 + $0x380] sm:$0xf]  ;;  %v2574_v59 = vld [vmem:[#allocation2 + $0x384] sm:$0x3] }
 0x2ee   : > { %3255 = vst [vmem:[#allocation3 + $0x11c] sm:$0xf] %v3003_v17  ;;  %v10765_v40 = vrot.slane %v2572_v11, 10  ;;  %v3013_v33 = vrot.slane %v2573_v61, 6  ;;  %v3016_v18 = vrot.slane %v2574_v59, 6 }
 0x2ef   : > { %3256 = vst [vmem:[#allocation3 + $0x120] sm:$0xf] %v3007_v38  ;;  %v3010_v54 = vsel %vm14593_vm8, %v3008_v27, %v3009_v5  ;;  %v2575_v25 = vld [vmem:[#allocation2 + $0x394] sm:$0xc]  ;;  %v2576_v31 = vld [vmem:[#allocation2 + $0x398] sm:$0xf] }
 0x2f0   : > { %3257 = vst [vmem:[#allocation3 + $0x124] sm:$0xf] %v3010_v54  ;;  %v3014_v41 = vsel %vm14593_vm8, %v10765_v40, %v3013_v33  ;;  %v3015_v22 = vrot.slane %v3013_v33, 4  ;;  %v10766_v29 = vrot.slane %v2575_v25, 10  ;;  %v3020_v56 = vrot.slane %v2576_v31, 6 }
 0x2f1   : > { %3258 = vst [vmem:[#allocation3 + $0x128] sm:$0xf] %v3014_v41  ;;  %v2577_v62 = vld [vmem:[#allocation2 + $0x39c] sm:$0x3]  ;;  %v2578_v48 = vld [vmem:[#allocation2 + $0x3ac] sm:$0xc] }
 0x2f2   : > { %v3017_v63 = vsel %vm14593_vm8, %v3015_v22, %v3016_v18  ;;  %v3021_v52 = vsel %vm14593_vm8, %v10766_v29, %v3020_v56  ;;  %v3022_v2 = vrot.slane %v3020_v56, 4  ;;  %v3023_v35 = vrot.slane %v2577_v62, 6  ;;  %v2579_v47 = vld [vmem:[#allocation2 + $0x3b0] sm:$0xf]  ;;  %v2580_v15 = vld [vmem:[#allocation2 + $0x3b4] sm:$0x3] }
 0x2f3   : > { %3259 = vst [vmem:[#allocation3 + $0x12c] sm:$0xf] %v3017_v63  ;;  %v10767_v16 = vrot.slane %v2578_v48, 10  ;;  %v3027_v3 = vrot.slane %v2579_v47, 6  ;;  %v3030_v58 = vrot.slane %v2580_v15, 6 }
 0x2f4   : > { %3260 = vst [vmem:[#allocation3 + $0x130] sm:$0xf] %v3021_v52  ;;  %v3024_v21 = vsel %vm14593_vm8, %v3022_v2, %v3023_v35  ;;  %v2581_v45 = vld [vmem:[#allocation2 + $0x3c4] sm:$0xc]  ;;  %v2582_v36 = vld [vmem:[#allocation2 + $0x3c8] sm:$0xf] }
 0x2f5   : > { %3261 = vst [vmem:[#allocation3 + $0x134] sm:$0xf] %v3024_v21  ;;  %v3028_v19 = vsel %vm14593_vm8, %v10767_v16, %v3027_v3  ;;  %v3029_v44 = vrot.slane %v3027_v3, 4  ;;  %v10768_v39 = vrot.slane %v2581_v45, 10  ;;  %v3034_v30 = vrot.slane %v2582_v36, 6 }
 0x2f6   : > { %3262 = vst [vmem:[#allocation3 + $0x138] sm:$0xf] %v3028_v19  ;;  %v2583_v8 = vld [vmem:[#allocation2 + $0x3cc] sm:$0x3]  ;;  %v2584_v14 = vld [vmem:[#allocation2 + $0x3dc] sm:$0xc] }
 0x2f7   : > { %v3031_v1 = vsel %vm14593_vm8, %v3029_v44, %v3030_v58  ;;  %v3035_v46 = vsel %vm14593_vm8, %v10768_v39, %v3034_v30  ;;  %v3036_v50 = vrot.slane %v3034_v30, 4  ;;  %v3037_v55 = vrot.slane %v2583_v8, 6  ;;  %v2585_v7 = vld [vmem:[#allocation2 + $0x3e0] sm:$0xf]  ;;  %v2586_v12 = vld [vmem:[#allocation2 + $0x3e4] sm:$0x3] }
 0x2f8   : > { %3263 = vst [vmem:[#allocation3 + $0x13c] sm:$0xf] %v3031_v1  ;;  %v10769_v43 = vrot.slane %v2584_v14, 10  ;;  %v3041_v24 = vrot.slane %v2585_v7, 6  ;;  %v3044_v34 = vrot.slane %v2586_v12, 6  ;;  %v3282_v7 = vld [vmem:[#allocation2 + $0x20] sm:$0xff]  }
 0x2f9   : > { %3264 = vst [vmem:[#allocation3 + $0x140] sm:$0xf] %v3035_v46  ;;  %v3038_v57 = vsel %vm14593_vm8, %v3036_v50, %v3037_v55  ;;  %v2587_v0 = vld [vmem:[#allocation2 + $0x3f4] sm:$0xc]  ;;  %v2588_v42 = vld [vmem:[#allocation2 + $0x3f8] sm:$0xf] }
 0x2fa   : > { %3265 = vst [vmem:[#allocation3 + $0x144] sm:$0xf] %v3038_v57  ;;  %v3042_v23 = vsel %vm14593_vm8, %v10769_v43, %v3041_v24  ;;  %v3043_v13 = vrot.slane %v3041_v24, 4  ;;  %v10770_v60 = vrot.slane %v2587_v0, 10  ;;  %v3048_v51 = vrot.slane %v2588_v42, 6  ;;  %v3280_v46 = vld [vmem:[#allocation2 + $0x8] sm:$0xff]  }
 0x2fb   : > { %3266 = vst [vmem:[#allocation3 + $0x148] sm:$0xf] %v3042_v23  ;;  %v2589_v37 = vld [vmem:[#allocation2 + $0x3fc] sm:$0x3]  ;;  %v2590_v4 = vld [vmem:[#allocation2 + $0x40c] sm:$0xc] }
 0x2fc   : > { %v3045_v9 = vsel %vm14593_vm8, %v3043_v13, %v3044_v34  ;;  %v3049_v49 = vsel %vm14593_vm8, %v10770_v60, %v3048_v51  ;;  %v3050_v26 = vrot.slane %v3048_v51, 4  ;;  %v3051_v28 = vrot.slane %v2589_v37, 6  ;;  %v2591_v53 = vld [vmem:[#allocation2 + $0x410] sm:$0xf]  ;;  %v2592_v10 = vld [vmem:[#allocation2 + $0x414] sm:$0x3] }
 0x2fd   : > { %3267 = vst [vmem:[#allocation3 + $0x14c] sm:$0xf] %v3045_v9  ;;  %v10771_v20 = vrot.slane %v2590_v4, 10  ;;  %v3055_v6 = vrot.slane %v2591_v53, 6  ;;  %v3058_v11 = vrot.slane %v2592_v10, 6  ;;  %v3284_v43 = vld [vmem:[#allocation2 + $0x38] sm:$0xff]  }
 0x2fe   : > { %3268 = vst [vmem:[#allocation3 + $0x150] sm:$0xf] %v3049_v49  ;;  %v3052_v17 = vsel %vm14593_vm8, %v3050_v26, %v3051_v28  ;;  %v2593_v38 = vld [vmem:[#allocation2 + $0x424] sm:$0xc]  ;;  %v2594_v27 = vld [vmem:[#allocation2 + $0x428] sm:$0xf] }
 0x2ff   : > { %3269 = vst [vmem:[#allocation3 + $0x154] sm:$0xf] %v3052_v17  ;;  %v3056_v5 = vsel %vm14593_vm8, %v10771_v20, %v3055_v6  ;;  %v3057_v61 = vrot.slane %v3055_v6, 4  ;;  %v10772_v59 = vrot.slane %v2593_v38, 10  ;;  %v3062_v40 = vrot.slane %v2594_v27, 6  ;;  %v3286_v24 = vld [vmem:[#allocation2 + $0x50] sm:$0xff]  }
 0x300   : > { %3270 = vst [vmem:[#allocation3 + $0x158] sm:$0xf] %v3056_v5  ;;  %v2595_v33 = vld [vmem:[#allocation2 + $0x42c] sm:$0x3]  ;;  %v2596_v18 = vld [vmem:[#allocation2 + $0x43c] sm:$0xc] }
 0x301   : > { %v3059_v54 = vsel %vm14593_vm8, %v3057_v61, %v3058_v11  ;;  %v3063_v25 = vsel %vm14593_vm8, %v10772_v59, %v3062_v40  ;;  %v3064_v31 = vrot.slane %v3062_v40, 4  ;;  %v3065_v41 = vrot.slane %v2595_v33, 6  ;;  %v2597_v22 = vld [vmem:[#allocation2 + $0x440] sm:$0xf]  ;;  %v2598_v29 = vld [vmem:[#allocation2 + $0x444] sm:$0x3] }
 0x302   : > { %3271 = vst [vmem:[#allocation3 + $0x15c] sm:$0xf] %v3059_v54  ;;  %v10773_v56 = vrot.slane %v2596_v18, 10  ;;  %v3069_v62 = vrot.slane %v2597_v22, 6  ;;  %v3072_v48 = vrot.slane %v2598_v29, 6  ;;  %v3288_v34 = vld [vmem:[#allocation2 + $0x68] sm:$0xff]  }
 0x303   : > { %3272 = vst [vmem:[#allocation3 + $0x160] sm:$0xf] %v3063_v25  ;;  %v3066_v63 = vsel %vm14593_vm8, %v3064_v31, %v3065_v41  ;;  %v2599_v52 = vld [vmem:[#allocation2 + $0x454] sm:$0xc]  ;;  %v2600_v2 = vld [vmem:[#allocation2 + $0x458] sm:$0xf] }
 0x304   : > { %3273 = vst [vmem:[#allocation3 + $0x164] sm:$0xf] %v3066_v63  ;;  %v3070_v35 = vsel %vm14593_vm8, %v10773_v56, %v3069_v62  ;;  %v3071_v47 = vrot.slane %v3069_v62, 4  ;;  %v10774_v15 = vrot.slane %v2599_v52, 10  ;;  %v3076_v16 = vrot.slane %v2600_v2, 6  ;;  %v3290_v57 = vld [vmem:[#allocation2 + $0x80] sm:$0xff]  }
 0x305   : > { %3274 = vst [vmem:[#allocation3 + $0x168] sm:$0xf] %v3070_v35  ;;  %v2601_v3 = vld [vmem:[#allocation2 + $0x45c] sm:$0x3]  ;;  %v2602_v58 = vld [vmem:[#allocation2 + $0x46c] sm:$0xc] }
 0x306   : > { %v3073_v21 = vsel %vm14593_vm8, %v3071_v47, %v3072_v48  ;;  %v3077_v45 = vsel %vm14593_vm8, %v10774_v15, %v3076_v16  ;;  %v3078_v36 = vrot.slane %v3076_v16, 4  ;;  %v3079_v19 = vrot.slane %v2601_v3, 6  ;;  %v2603_v44 = vld [vmem:[#allocation2 + $0x470] sm:$0xf]  ;;  %v2604_v39 = vld [vmem:[#allocation2 + $0x474] sm:$0x3] }
 0x307   : > { %3275 = vst [vmem:[#allocation3 + $0x16c] sm:$0xf] %v3073_v21  ;;  %v10775_v30 = vrot.slane %v2602_v58, 10  ;;  %v3083_v8 = vrot.slane %v2603_v44, 6  ;;  %v3086_v14 = vrot.slane %v2604_v39, 6  ;;  %v3292_v0 = vld [vmem:[#allocation2 + $0x98] sm:$0xff]  }
 0x308   : > { %3276 = vst [vmem:[#allocation3 + $0x170] sm:$0xf] %v3077_v45  ;;  %v3080_v1 = vsel %vm14593_vm8, %v3078_v36, %v3079_v19  ;;  %v3294_v42 = vld [vmem:[#allocation2 + $0xb0] sm:$0xff]   ;;  %v3296_v23 = vld [vmem:[#allocation2 + $0xc8] sm:$0xff]   ;;  %v3298_v13 = vld [vmem:[#allocation2 + $0xe0] sm:$0xff]  }
 0x309   : > { %3277 = vst [vmem:[#allocation3 + $0x174] sm:$0xf] %v3080_v1  ;;  %v3084_v50 = vsel %vm14593_vm8, %v10775_v30, %v3083_v8  ;;  %v3085_v55 = vrot.slane %v3083_v8, 4  ;;  %v3300_v60 = vld [vmem:[#allocation2 + $0xf8] sm:$0xff]   ;;  %v3302_v51 = vld [vmem:[#allocation2 + $0x110] sm:$0xff]   ;;  %v3304_v37 = vld [vmem:[#allocation2 + $0x128] sm:$0xff]  }
 0x30a   : > { %3278 = vst [vmem:[#allocation3 + $0x178] sm:$0xf] %v3084_v50  ;;  %v3306_v4 = vld [vmem:[#allocation2 + $0x140] sm:$0xff]   ;;  %v3308_v9 = vld [vmem:[#allocation2 + $0x158] sm:$0xff]   ;;  %v3310_v49 = vld [vmem:[#allocation2 + $0x170] sm:$0xff]  }
 0x30b   : > { %v3087_v12 = vsel %vm14593_vm8, %v3085_v55, %v3086_v14  ;;  %3377 = vst [vmem:[#allocation3 + $0x180] sm:$0xff] %v3280_v46   ;;  %v3312_v26 = vld [vmem:[#allocation2 + $0x188] sm:$0xff]   ;;  %v3314_v28 = vld [vmem:[#allocation2 + $0x1a0] sm:$0xff]   ;;  %v3316_v53 = vld [vmem:[#allocation2 + $0x1b8] sm:$0xff]  }
 0x30c   : > { %3279 = vst [vmem:[#allocation3 + $0x17c] sm:$0xf] %v3087_v12  ;;  %v3318_v10 = vld [vmem:[#allocation2 + $0x1d0] sm:$0xff]   ;;  %v3320_v20 = vld [vmem:[#allocation2 + $0x1e8] sm:$0xff]   ;;  %v3322_v6 = vld [vmem:[#allocation2 + $0x200] sm:$0xff]  }
 0x30d   : > { %3379 = vst [vmem:[#allocation3 + $0x188] sm:$0xff] %v3282_v7   ;;  %v3324_v11 = vld [vmem:[#allocation2 + $0x218] sm:$0xff]   ;;  %v14789_v17 = vld [vmem:[#allocation2 + $0xc] sm:$0xf]  ;;  %v3326_v38 = vld [vmem:[#allocation2 + $0x230] sm:$0xff]  }
 0x30e   : > { %3381 = vst [vmem:[#allocation3 + $0x190] sm:$0xff] %v3284_v43   ;;  %v14791_v27 = vld [vmem:[#allocation2 + $0x24] sm:$0xf]  ;;  %v3328_v5 = vld [vmem:[#allocation2 + $0x248] sm:$0xff]   ;;  %v3332_v59 = vld [vmem:[#allocation2 + $0x278] sm:$0xff]   ;;  %v3763_v33 = vrot.slane %v14789_v17, 6 }
 0x30f   : > { %3383 = vst [vmem:[#allocation3 + $0x198] sm:$0xff] %v3286_v24   ;;  %v3330_v61 = vld [vmem:[#allocation2 + $0x260] sm:$0xff]   ;;  %v3334_v40 = vld [vmem:[#allocation2 + $0x290] sm:$0xff]   ;;  %v14794_v18 = vld [vmem:[#allocation2 + $0x8] sm:$0xc]  ;;  %v3770_v25 = vrot.slane %v14791_v27, 6 }
 0x310   : > { %3385 = vst [vmem:[#allocation3 + $0x1a0] sm:$0xff] %v3288_v34   ;;  %v14796_v54 = vld [vmem:[#allocation2 + $0x10] sm:$0x3]  ;;  %v3336_v31 = vld [vmem:[#allocation2 + $0x2a8] sm:$0xff]   ;;  %v14799_v41 = vld [vmem:[#allocation2 + $0x20] sm:$0xc] }
 0x311   : > { %3387 = vst [vmem:[#allocation3 + $0x1a8] sm:$0xff] %v3290_v57   ;;  %v14801_v22 = vld [vmem:[#allocation2 + $0x3c] sm:$0xf]  ;;  %v3338_v29 = vld [vmem:[#allocation2 + $0x2c0] sm:$0xff]   ;;  %v14803_v62 = vld [vmem:[#allocation2 + $0x54] sm:$0xf] }
 0x312   : > { %3389 = vst [vmem:[#allocation3 + $0x1b0] sm:$0xff] %v3292_v0   ;;  %v3340_v56 = vld [vmem:[#allocation2 + $0x2d8] sm:$0xff]   ;;  %v3342_v48 = vld [vmem:[#allocation2 + $0x2f0] sm:$0xff]   ;;  %v10776_v63 = vrot.slane %v14794_v18, 10  ;;  %v14808_v52 = vrot.slane %v3763_v33, 4  ;;  %v3766_v2 = vrot.slane %v14796_v54, 6 }
 0x313   : > { %3391 = vst [vmem:[#allocation3 + $0x1b8] sm:$0xff] %v3294_v42   ;;  %v14811_v35 = vld [vmem:[#allocation2 + $0x6c] sm:$0xf]  ;;  %v10777_v15 = vrot.slane %v14799_v41, 10  ;;  %v14814_v16 = vld [vmem:[#allocation2 + $0x28] sm:$0x3] }
 0x314   : > { %3393 = vst [vmem:[#allocation3 + $0x1c0] sm:$0xff] %v3296_v23   ;;  %v3344_v47 = vld [vmem:[#allocation2 + $0x308] sm:$0xff]   ;;  %v14818_v3 = vrot.slane %v3770_v25, 4  ;;  %v3777_v58 = vrot.slane %v14801_v22, 6  ;;  %v3346_v21 = vld [vmem:[#allocation2 + $0x320] sm:$0xff]   ;;  %v17209_v19 = vrot.slane %v14803_v62, 6 }
 0x315   : > { %3395 = vst [vmem:[#allocation3 + $0x1c8] sm:$0xff] %v3298_v13   ;;  %v14821_v45 = vld [vmem:[#allocation2 + $0x38] sm:$0xc]  ;;  %v14823_v36 = vld [vmem:[#allocation2 + $0x40] sm:$0x3]  ;;  %v17208_v8 = vrot.slane %v14811_v35, 6  ;;  %v3771_v54 = vsel %vm14593_vm8, %v10777_v15, %v3770_v25 }
 0x316   : > { %3397 = vst [vmem:[#allocation3 + $0x1d0] sm:$0xff] %v3300_v60   ;;  %v3348_v44 = vld [vmem:[#allocation2 + $0x338] sm:$0xff]   ;;  %v14826_v39 = vld [vmem:[#allocation2 + $0x50] sm:$0xc]  ;;  %v3773_v1 = vrot.slane %v14814_v16, 6  ;;  %v3352_v55 = vld [vmem:[#allocation2 + $0x368] sm:$0xff]  }
 0x317   : > { %3399 = vst [vmem:[#allocation3 + $0x1d8] sm:$0xff] %v3302_v51   ;;  %v14828_v30 = vld [vmem:[#allocation2 + $0x58] sm:$0x3]  ;;  %v3350_v14 = vld [vmem:[#allocation2 + $0x350] sm:$0xff]   ;;  %v14832_v46 = vld [vmem:[#allocation2 + $0x68] sm:$0xc] }
 0x318   : > { %3401 = vst [vmem:[#allocation3 + $0x1e0] sm:$0xff] %v3304_v37   ;;  %v14834_v50 = vld [vmem:[#allocation2 + $0x84] sm:$0xf]  ;;  %v10778_v7 = vrot.slane %v14821_v45, 10  ;;  %v14839_v12 = vrot.slane %v3777_v58, 4  ;;  %v14847_v0 = vrot.slane %v17209_v19, 4 }
 0x319   : > { %3403 = vst [vmem:[#allocation3 + $0x1e8] sm:$0xff] %v3306_v4   ;;  %v14842_v24 = vld [vmem:[#allocation2 + $0x9c] sm:$0xf]  ;;  %v3354_v34 = vld [vmem:[#allocation2 + $0x380] sm:$0xff]   ;;  %v14850_v23 = vld [vmem:[#allocation2 + $0xb4] sm:$0xf] }
 0x31a   : > { %3405 = vst [vmem:[#allocation3 + $0x1f0] sm:$0xff] %v3308_v9   ;;  %v3356_v13 = vld [vmem:[#allocation2 + $0x398] sm:$0xff]   ;;  %v14853_v51 = vld [vmem:[#allocation2 + $0x70] sm:$0x3]  ;;  %v14857_v37 = vrot.slane %v17208_v8, 4  ;;  %v17206_v4 = vrot.slane %v14834_v50, 6  ;;  %v3778_v25 = vsel %vm14593_vm8, %v10778_v7, %v3777_v58 }
 0x31b   : > { %3407 = vst [vmem:[#allocation3 + $0x1f8] sm:$0xff] %v3310_v49   ;;  %v3358_v9 = vld [vmem:[#allocation2 + $0x3b0] sm:$0xff]   ;;  %v14860_v49 = vld [vmem:[#allocation2 + $0x80] sm:$0xc]  ;;  %v14909_v60 = vld [vmem:[#allocation2 + $0xf8] sm:$0xc] }
 0x31c   : > { %3409 = vst [vmem:[#allocation3 + $0x200] sm:$0xff] %v3312_v26   ;;  %v14862_v26 = vld [vmem:[#allocation2 + $0x88] sm:$0x3]  ;;  %v14912_v8 = vld [vmem:[#allocation2 + $0x114] sm:$0xf]  ;;  %v10786_v18 = vrot.slane %v14909_v60, 10 }
 0x31d   : > { %3411 = vst [vmem:[#allocation3 + $0x208] sm:$0xff] %v3314_v28   ;;  %v17205_v28 = vrot.slane %v14842_v24, 6  ;;  %v14915_v57 = vld [vmem:[#allocation2 + $0x100] sm:$0x3]  ;;  %v14931_v43 = vld [vmem:[#allocation2 + $0x12c] sm:$0xf] }
 0x31e   : > { %3413 = vst [vmem:[#allocation3 + $0x210] sm:$0xff] %v3316_v53   ;;  %v3360_v53 = vld [vmem:[#allocation2 + $0x3c8] sm:$0xff]   ;;  %v3836_v42 = vrot.slane %v14915_v57, 6  ;;  %v14951_v17 = vld [vmem:[#allocation2 + $0x144] sm:$0xf]  ;;  %v17433_v7 = vrot.slane %v14803_v62, 6 }
 0x31f   : > { %3415 = vst [vmem:[#allocation3 + $0x218] sm:$0xff] %v3318_v10   ;;  %v14865_v10 = vld [vmem:[#allocation2 + $0x98] sm:$0xc]  ;;  %v14971_v27 = vld [vmem:[#allocation2 + $0x140] sm:$0xc]  ;;  %v17211_v15 = vrot.slane %v14951_v17, 6 }
 0x320   : > { %3417 = vst [vmem:[#allocation3 + $0x220] sm:$0xff] %v3320_v20   ;;  %v14867_v20 = vld [vmem:[#allocation2 + $0xa0] sm:$0x3]  ;;  %v14984_v16 = vld [vmem:[#allocation2 + $0x15c] sm:$0xf] }
 0x321   : > { %3419 = vst [vmem:[#allocation3 + $0x228] sm:$0xff] %v3322_v6   ;;  %v17207_v6 = vrot.slane %v14850_v23, 6  ;;  %v14993_v58 = vld [vmem:[#allocation2 + $0x148] sm:$0x3] }
 0x322   : > { %3421 = vst [vmem:[#allocation3 + $0x230] sm:$0xff] %v3324_v11   ;;  %v3362_v11 = vld [vmem:[#allocation2 + $0x3e0] sm:$0xff]  }
 0x323   : > { %3423 = vst [vmem:[#allocation3 + $0x238] sm:$0xff] %v3326_v38   ;;  %v14904_v38 = vld [vmem:[#allocation2 + $0xe0] sm:$0xc] }
 0x324   : > { %3425 = vst [vmem:[#allocation3 + $0x240] sm:$0xff] %v3328_v5   ;;  %v14871_v5 = vld [vmem:[#allocation2 + $0xb0] sm:$0xc] }
 0x325   : > { %3427 = vst [vmem:[#allocation3 + $0x248] sm:$0xff] %v3330_v61   ;;  %v14873_v61 = vld [vmem:[#allocation2 + $0xb8] sm:$0x3] }
 0x326   : > { %3429 = vst [vmem:[#allocation3 + $0x250] sm:$0xff] %v3332_v59   ;;  %v3364_v59 = vld [vmem:[#allocation2 + $0x3f8] sm:$0xff]  }
 0x327   : > { %3431 = vst [vmem:[#allocation3 + $0x258] sm:$0xff] %v3334_v40   ;;  %v14897_v40 = vld [vmem:[#allocation2 + $0xfc] sm:$0xf] }
 0x328   : > { %3433 = vst [vmem:[#allocation3 + $0x260] sm:$0xff] %v3336_v31   ;;  %v14878_v31 = vrot.slane %v17206_v4, 4  ;;  %v14902_v4 = vld [vmem:[#allocation2 + $0xd0] sm:$0x3] }
 0x329   : > { %3435 = vst [vmem:[#allocation3 + $0x268] sm:$0xff] %v3338_v29   ;;  %v14894_v29 = vrot.slane %v17207_v6, 4  ;;  %v14907_v6 = vld [vmem:[#allocation2 + $0xe8] sm:$0x3] }
 0x32a   : > { %3437 = vst [vmem:[#allocation3 + $0x270] sm:$0xff] %v3340_v56   ;;  %v14881_v56 = vld [vmem:[#allocation2 + $0xcc] sm:$0xf] }
 0x32b   : > { %3439 = vst [vmem:[#allocation3 + $0x278] sm:$0xff] %v3342_v48   ;;  %v3366_v48 = vld [vmem:[#allocation2 + $0x410] sm:$0xff]  }
 0x32c   : > { %3441 = vst [vmem:[#allocation3 + $0x280] sm:$0xff] %v3344_v47   ;;  %v3370_v47 = vld [vmem:[#allocation2 + $0x440] sm:$0xff]  }
 0x32d   : > { %3443 = vst [vmem:[#allocation3 + $0x288] sm:$0xff] %v3346_v21   ;;  %v14886_v21 = vrot.slane %v17205_v28, 4  ;;  %v14899_v28 = vld [vmem:[#allocation2 + $0xc8] sm:$0xc] }
 0x32e   : > { %3445 = vst [vmem:[#allocation3 + $0x290] sm:$0xff] %v3348_v44   ;;  %v3819_v44 = vrot.slane %v14881_v56, 6 }
 0x32f   : > { %3447 = vst [vmem:[#allocation3 + $0x298] sm:$0xff] %v3350_v14   ;;  %v14889_v14 = vld [vmem:[#allocation2 + $0xe4] sm:$0xf] }
 0x330   : > { %3449 = vst [vmem:[#allocation3 + $0x2a0] sm:$0xff] %v3352_v55   ;;  %v3368_v55 = vld [vmem:[#allocation2 + $0x428] sm:$0xff]   ;;  %v14927_v19 = vrot.slane %v3819_v44, 4 }
 0x331   : > { %3451 = vst [vmem:[#allocation3 + $0x2a8] sm:$0xff] %v3354_v34   ;;  %v17210_v34 = vrot.slane %v14889_v14, 6 }
 0x332   : > { %3453 = vst [vmem:[#allocation3 + $0x2b0] sm:$0xff] %v3356_v13   ;;  %v3374_v13 = vld [vmem:[#allocation2 + $0x470] sm:$0xff]  }
 0x333   : > { %3455 = vst [vmem:[#allocation3 + $0x2b8] sm:$0xff] %v3358_v9   ;;  %v3372_v9 = vld [vmem:[#allocation2 + $0x458] sm:$0xff]  }
 0x334   : > { %3457 = vst [vmem:[#allocation3 + $0x2c0] sm:$0xff] %v3360_v53   ;;  %v3833_v53 = vrot.slane %v14897_v40, 6 }
 0x335   : > { %3459 = vst [vmem:[#allocation3 + $0x2c8] sm:$0xff] %v3362_v11   ;;  %v14917_v11 = vld [vmem:[#allocation2 + $0x110] sm:$0xc] }
 0x336   : > { %3461 = vst [vmem:[#allocation3 + $0x2d0] sm:$0xff] %v3364_v59   ;;  %v3764_v59 = vsel %vm14593_vm8, %v10776_v63, %v3763_v33  ;;  %v3840_v33 = vrot.slane %v14912_v8, 6  ;;  %v3767_v63 = vsel %vm14593_vm8, %v14808_v52, %v3766_v2  ;;  %v14961_v52 = vld [vmem:[#allocation2 + $0x128] sm:$0xc]  ;;  %v3847_v2 = vrot.slane %v14931_v43, 6 }
 0x337   : > { %3463 = vst [vmem:[#allocation3 + $0x2d8] sm:$0xff] %v3366_v48   ;;  %v3822_v48 = vrot.slane %v14902_v4, 6  ;;  %v15134_v4 = vld [vmem:[#allocation2 + $0x1ec] sm:$0xf]  ;;  %v17452_v57 = vrot.slane %v14917_v11, 10 }
 0x338   : > { %3465 = vst [vmem:[#allocation3 + $0x2e0] sm:$0xff] %v3368_v55   ;;  %v14935_v55 = vrot.slane %v17210_v34, 4  ;;  %v14969_v34 = vld [vmem:[#allocation2 + $0x130] sm:$0x3]  ;;  %v14981_v41 = vrot.slane %v3840_v33, 4 }
 0x339   : > { %3467 = vst [vmem:[#allocation3 + $0x2e8] sm:$0xff] %v3370_v47   ;;  %v14947_v47 = vrot.slane %v3833_v53, 4  ;;  %v3850_v62 = vrot.slane %v14969_v34, 6  ;;  %v15231_v43 = vld [vmem:[#allocation2 + $0x220] sm:$0x3] }
 0x33a   : > { %3469 = vst [vmem:[#allocation3 + $0x2f0] sm:$0xff] %v3372_v9   ;;  %v14959_v9 = vld [vmem:[#allocation2 + $0x118] sm:$0x3] }
 0x33b   : > { %3471 = vst [vmem:[#allocation3 + $0x2f8] sm:$0xff] %v3374_v13   ;;  %v3774_v13 = vsel %vm14593_vm8, %v14818_v3, %v3773_v1  ;;  %v17432_v3 = vrot.slane %v14823_v36, 6  ;;  %v3843_v45 = vrot.slane %v14959_v9, 6  ;;  %v17435_v36 = vrot.slane %v14828_v30, 6  ;;  %v15028_v1 = vld [vmem:[#allocation2 + $0x18c] sm:$0xf] }
 0x33c   : > { %4194 = vst [vmem:[#allocation3 + $0x300] sm:$0xf] %v3764_v59  ;;  %v17434_v59 = vrot.slane %v14826_v39, 10  ;;  %v17436_v30 = vrot.slane %v14811_v35, 6  ;;  %v17438_v39 = vrot.slane %v14853_v51, 6 }
 0x33d   : > { %4195 = vst [vmem:[#allocation3 + $0x304] sm:$0xf] %v3767_v63  ;;  %v3781_v22 = vsel %vm14593_vm8, %v14839_v12, %v17432_v3  ;;  %v3788_v12 = vsel %vm14593_vm8, %v14847_v0, %v17435_v36  ;;  %v15008_v3 = vld [vmem:[#allocation2 + $0x174] sm:$0xf]  ;;  %v17437_v0 = vrot.slane %v14832_v46, 10  ;;  %v17440_v36 = vrot.slane %v14860_v49, 10 }
 0x33e   : > { %4196 = vst [vmem:[#allocation3 + $0x308] sm:$0xf] %v3771_v54  ;;  %v3785_v63 = vsel %vm14593_vm8, %v17434_v59, %v17433_v7  ;;  %v15006_v54 = vld [vmem:[#allocation2 + $0x158] sm:$0xc]  ;;  %v3861_v7 = vrot.slane %v14984_v16, 6  ;;  %v3795_v35 = vsel %vm14593_vm8, %v14857_v37, %v17438_v39  ;;  %v17441_v37 = vrot.slane %v14862_v26, 6 }
 0x33f   : > { %4197 = vst [vmem:[#allocation3 + $0x30c] sm:$0xf] %v3774_v13  ;;  %v15012_v13 = vrot.slane %v3847_v2, 4  ;;  %v3792_v59 = vsel %vm14593_vm8, %v17437_v0, %v17436_v30  ;;  %v17212_v30 = vrot.slane %v15008_v3, 6  ;;  %v17439_v0 = vrot.slane %v14834_v50, 6 }
 0x340   : > { %4198 = vst [vmem:[#allocation3 + $0x310] sm:$0xf] %v3778_v25  ;;  %v15025_v25 = vrot.slane %v17211_v15, 4  ;;  %v15045_v15 = vld [vmem:[#allocation2 + $0x170] sm:$0xc]  ;;  %v3802_v39 = vsel %vm14593_vm8, %v14878_v31, %v17441_v37  ;;  %v3875_v49 = vrot.slane %v15028_v1, 6 }
 0x341   : > { %4199 = vst [vmem:[#allocation3 + $0x314] sm:$0xf] %v3781_v22  ;;  %v15036_v22 = vld [vmem:[#allocation2 + $0x160] sm:$0x3]  ;;  %v15047_v51 = vld [vmem:[#allocation2 + $0x178] sm:$0x3] }
 0x342   : > { %4200 = vst [vmem:[#allocation3 + $0x318] sm:$0xf] %v3785_v63  ;;  %v3799_v63 = vsel %vm14593_vm8, %v17440_v36, %v17439_v0  ;;  %v15058_v50 = vld [vmem:[#allocation2 + $0x188] sm:$0xc]  ;;  %v17442_v36 = vrot.slane %v14842_v24, 6  ;;  %v17443_v0 = vrot.slane %v14865_v10, 10 }
 0x343   : > { %4201 = vst [vmem:[#allocation3 + $0x31c] sm:$0xf] %v3788_v12  ;;  %v15056_v12 = vrot.slane %v3861_v7, 4  ;;  %v15072_v37 = vld [vmem:[#allocation2 + $0x190] sm:$0x3]  ;;  %v15080_v10 = vrot.slane %v17212_v30, 4 }
 0x344   : > { %4202 = vst [vmem:[#allocation3 + $0x320] sm:$0xf] %v3792_v59  ;;  %v3806_v26 = vsel %vm14593_vm8, %v17443_v0, %v17442_v36  ;;  %v17444_v59 = vrot.slane %v14867_v20, 6  ;;  %v15074_v46 = vld [vmem:[#allocation2 + $0x1a4] sm:$0xf]  ;;  %v3871_v36 = vrot.slane %v15047_v51, 6 }
 0x345   : > { %4203 = vst [vmem:[#allocation3 + $0x324] sm:$0xf] %v3795_v35  ;;  %v3864_v35 = vrot.slane %v15036_v22, 6  ;;  %v17445_v20 = vrot.slane %v14850_v23, 6  ;;  %v15094_v24 = vld [vmem:[#allocation2 + $0x1a0] sm:$0xc] }
 0x346   : > { %v3809_v31 = vsel %vm14593_vm8, %v14886_v21, %v17444_v59  ;;  %4204 = vst [vmem:[#allocation3 + $0x328] sm:$0xf] %v3799_v63  ;;  %v17446_v21 = vrot.slane %v14871_v5, 10  ;;  %v17447_v63 = vrot.slane %v14873_v61, 6  ;;  %v15096_v30 = vld [vmem:[#allocation2 + $0x1bc] sm:$0xf]  ;;  %v3872_v22 = vsel %vm14593_vm8, %v15080_v10, %v3871_v36 }
 0x347   : > { %4205 = vst [vmem:[#allocation3 + $0x32c] sm:$0xf] %v3802_v39  ;;  %v15101_v23 = vrot.slane %v3875_v49, 4  ;;  %v17448_v61 = vrot.slane %v14899_v28, 10  ;;  %v10793_v56 = vrot.slane %v15094_v24, 10  ;;  %v3889_v28 = vrot.slane %v15096_v30, 6 }
 0x348   : > { %v3813_v0 = vsel %vm14593_vm8, %v17446_v21, %v17445_v20  ;;  %v3816_v59 = vsel %vm14593_vm8, %v14894_v29, %v17447_v63  ;;  %4206 = vst [vmem:[#allocation3 + $0x330] sm:$0xf] %v3806_v26  ;;  %v3882_v20 = vrot.slane %v15074_v46, 6  ;;  %v15111_v21 = vld [vmem:[#allocation2 + $0x1a8] sm:$0x3]  ;;  %v17460_v51 = vrot.slane %v15058_v50, 10 }
 0x349   : > { %4207 = vst [vmem:[#allocation3 + $0x334] sm:$0xf] %v3809_v31  ;;  %v3820_v29 = vsel %vm14593_vm8, %v17448_v61, %v3819_v44  ;;  %v15113_v26 = vld [vmem:[#allocation2 + $0x1b8] sm:$0xc]  ;;  %v15115_v63 = vld [vmem:[#allocation2 + $0x1d4] sm:$0xf]  ;;  %v3823_v31 = vsel %vm14593_vm8, %v14927_v19, %v3822_v48 }
 0x34a   : > { %4208 = vst [vmem:[#allocation3 + $0x338] sm:$0xf] %v3813_v0  ;;  %v15124_v5 = vld [vmem:[#allocation2 + $0x1c0] sm:$0x3]  ;;  %v17449_v44 = vrot.slane %v14889_v14, 6  ;;  %v17450_v61 = vrot.slane %v14904_v38, 10  ;;  %v3876_v10 = vsel %vm14593_vm8, %v17460_v51, %v3875_v49 }
 0x34b   : > { %4209 = vst [vmem:[#allocation3 + $0x33c] sm:$0xf] %v3816_v59  ;;  %v15132_v39 = vld [vmem:[#allocation2 + $0x1d0] sm:$0xc]  ;;  %v17451_v19 = vrot.slane %v14907_v6, 6  ;;  %v15143_v59 = vrot.slane %v3882_v20, 4  ;;  %v3834_v6 = vsel %vm14593_vm8, %v10786_v18, %v3833_v53  ;;  %v3844_v18 = vsel %vm14593_vm8, %v14981_v41, %v3843_v45 }
 0x34c   : > { %v3827_v0 = vsel %vm14593_vm8, %v17450_v61, %v17449_v44  ;;  %4210 = vst [vmem:[#allocation3 + $0x340] sm:$0xf] %v3820_v29  ;;  %v3896_v38 = vrot.slane %v15115_v63, 6  ;;  %v15146_v14 = vld [vmem:[#allocation2 + $0x1d8] sm:$0x3]  ;;  %v10794_v40 = vrot.slane %v15113_v26, 10 }
 0x34d   : > { %v3830_v48 = vsel %vm14593_vm8, %v14935_v55, %v17451_v19  ;;  %4211 = vst [vmem:[#allocation3 + $0x344] sm:$0xf] %v3823_v31  ;;  %v3837_v55 = vsel %vm14593_vm8, %v14947_v47, %v3836_v42  ;;  %v15159_v29 = vld [vmem:[#allocation2 + $0x1e8] sm:$0xc]  ;;  %v15161_v44 = vld [vmem:[#allocation2 + $0x1f0] sm:$0x3]  ;;  %v3841_v42 = vsel %vm14593_vm8, %v17452_v57, %v3840_v33 }
 0x34e   : > { %4212 = vst [vmem:[#allocation3 + $0x348] sm:$0xf] %v3827_v0  ;;  %v3885_v31 = vrot.slane %v15111_v21, 6  ;;  %v15167_v60 = vrot.slane %v3889_v28, 4  ;;  %v3903_v53 = vrot.slane %v15134_v4, 6  ;;  %v3892_v47 = vrot.slane %v15124_v5, 6 }
 0x34f   : > { %4213 = vst [vmem:[#allocation3 + $0x34c] sm:$0xf] %v3830_v48  ;;  %v10795_v61 = vrot.slane %v15132_v39, 10  ;;  %v15183_v0 = vld [vmem:[#allocation2 + $0x200] sm:$0xc]  ;;  %v15187_v8 = vrot.slane %v3896_v38, 4 }
 0x350   : > { %4214 = vst [vmem:[#allocation3 + $0x350] sm:$0xf] %v3834_v6  ;;  %v3899_v11 = vrot.slane %v15146_v14, 6  ;;  %v10796_v33 = vrot.slane %v15159_v29, 10  ;;  %v3906_v9 = vrot.slane %v15161_v44, 6  ;;  %v17453_v41 = vrot.slane %v14961_v52, 10 }
 0x351   : > { %4215 = vst [vmem:[#allocation3 + $0x354] sm:$0xf] %v3837_v55  ;;  %v15198_v19 = vld [vmem:[#allocation2 + $0x204] sm:$0xf]  ;;  %v15200_v48 = vld [vmem:[#allocation2 + $0x21c] sm:$0xf]  ;;  %v3851_v6 = vsel %vm14593_vm8, %v15012_v13, %v3850_v62  ;;  %v3886_v51 = vsel %vm14593_vm8, %v15143_v59, %v3885_v31  ;;  %v3893_v59 = vsel %vm14593_vm8, %v15167_v60, %v3892_v47  ;;  %v3897_v26 = vsel %vm14593_vm8, %v10795_v61, %v3896_v38 }
 0x352   : > { %v3848_v45 = vsel %vm14593_vm8, %v17453_v41, %v3847_v2  ;;  %4216 = vst [vmem:[#allocation3 + $0x358] sm:$0xf] %v3841_v42  ;;  %v15209_v55 = vrot.slane %v3903_v53, 4  ;;  %v15212_v52 = vld [vmem:[#allocation2 + $0x208] sm:$0x3]  ;;  %v17454_v2 = vrot.slane %v14951_v17, 6  ;;  %v3904_v39 = vsel %vm14593_vm8, %v10796_v33, %v3903_v53 }
 0x353   : > { %4217 = vst [vmem:[#allocation3 + $0x35c] sm:$0xf] %v3844_v18  ;;  %v17455_v57 = vrot.slane %v14971_v27, 10  ;;  %v15220_v42 = vld [vmem:[#allocation2 + $0x218] sm:$0xc]  ;;  %v17456_v13 = vrot.slane %v14993_v58, 6 }
 0x354   : > { %v15222_v41 = vld [vmem:[#allocation2 + $0x234] sm:$0xf]  ;;  %4218 = vst [vmem:[#allocation3 + $0x360] sm:$0xf] %v3848_v45  ;;  %v3910_v18 = vrot.slane %v15198_v19, 6  ;;  %v3917_v17 = vrot.slane %v15200_v48, 6  ;;  %v3907_v38 = vsel %vm14593_vm8, %v15209_v55, %v3906_v9 }
 0x355   : > { %v3855_v34 = vsel %vm14593_vm8, %v17455_v57, %v17454_v2  ;;  %v3858_v62 = vsel %vm14593_vm8, %v15025_v25, %v17456_v13  ;;  %4219 = vst [vmem:[#allocation3 + $0x364] sm:$0xf] %v3851_v6  ;;  %v17457_v27 = vrot.slane %v15006_v54, 10  ;;  %v15239_v2 = vld [vmem:[#allocation2 + $0x230] sm:$0xc]  ;;  %v3865_v25 = vsel %vm14593_vm8, %v15056_v12, %v3864_v35 }
 0x356   : > { %v15241_v58 = vld [vmem:[#allocation2 + $0x24c] sm:$0xf]  ;;  %4220 = vst [vmem:[#allocation3 + $0x368] sm:$0xf] %v3855_v34  ;;  %v3913_v6 = vrot.slane %v15212_v52, 6  ;;  %v3924_v16 = vrot.slane %v15222_v41, 6 }
 0x357   : > { %v3862_v45 = vsel %vm14593_vm8, %v17457_v27, %v3861_v7  ;;  %v15250_v57 = vld [vmem:[#allocation2 + $0x238] sm:$0x3]  ;;  %4221 = vst [vmem:[#allocation3 + $0x36c] sm:$0xf] %v3858_v62  ;;  %v17458_v54 = vrot.slane %v15008_v3, 6  ;;  %v17459_v7 = vrot.slane %v15045_v15, 10 }
 0x358   : > { %v15263_v12 = vld [vmem:[#allocation2 + $0x248] sm:$0xc]  ;;  %v15265_v35 = vld [vmem:[#allocation2 + $0x250] sm:$0x3]  ;;  %4222 = vst [vmem:[#allocation3 + $0x370] sm:$0xf] %v3862_v45 }
 0x359   : > { %v3869_v34 = vsel %vm14593_vm8, %v17459_v7, %v17458_v54  ;;  %v3912_v13 = vrot.slane %v3910_v18, 4  ;;  %v10798_v3 = vrot.slane %v15220_v42, 10  ;;  %v3920_v15 = vrot.slane %v15231_v43, 6  ;;  %4223 = vst [vmem:[#allocation3 + $0x374] sm:$0xf] %v3865_v25 }
 0x35a   : > { %v3931_v62 = vrot.slane %v15241_v58, 6  ;;  %v17461_v36 = vrot.slane %v15072_v37, 6  ;;  %v3919_v45 = vrot.slane %v3917_v17, 4  ;;  %v10799_v54 = vrot.slane %v15239_v2, 10  ;;  %v15286_v7 = vld [vmem:[#allocation2 + $0x260] sm:$0xc] }
 0x35b   : > { %4224 = vst [vmem:[#allocation3 + $0x378] sm:$0xf] %v3869_v34  ;;  %v15290_v1 = vrot.slane %v3924_v16, 4  ;;  %v3927_v50 = vrot.slane %v15250_v57, 6  ;;  %v10800_v49 = vrot.slane %v15263_v12, 10  ;;  %v3934_v37 = vrot.slane %v15265_v35, 6 }
 0x35c   : > { %v3879_v27 = vsel %vm14593_vm8, %v15101_v23, %v17461_v36  ;;  %4225 = vst [vmem:[#allocation3 + $0x37c] sm:$0xf] %v3872_v22  ;;  %v3883_v23 = vsel %vm14593_vm8, %v10793_v56, %v3882_v20  ;;  %v15301_v25 = vld [vmem:[#allocation2 + $0x264] sm:$0xf]  ;;  %v15303_v34 = vld [vmem:[#allocation2 + $0x27c] sm:$0xf]  ;;  %v3890_v20 = vsel %vm14593_vm8, %v10794_v40, %v3889_v28  ;;  %v3900_v40 = vsel %vm14593_vm8, %v15187_v8, %v3899_v11 }
 0x35d   : > { %4226 = vst [vmem:[#allocation3 + $0x380] sm:$0xf] %v3876_v10  ;;  %v15312_v22 = vrot.slane %v3931_v62, 4  ;;  %v10801_v46 = vrot.slane %v15286_v7, 10  ;;  %v15315_v24 = vld [vmem:[#allocation2 + $0x268] sm:$0x3]  ;;  %v3914_v33 = vsel %vm14593_vm8, %v3912_v13, %v3913_v6  ;;  %v3918_v6 = vsel %vm14593_vm8, %v10798_v3, %v3917_v17 }
 0x35e   : > { %4227 = vst [vmem:[#allocation3 + $0x384] sm:$0xf] %v3879_v27  ;;  %v15323_v21 = vld [vmem:[#allocation2 + $0x278] sm:$0xc]  ;;  %v15325_v56 = vld [vmem:[#allocation2 + $0x294] sm:$0xf]  ;;  %v3925_v42 = vsel %vm14593_vm8, %v10799_v54, %v3924_v16  ;;  %v3928_v3 = vsel %vm14593_vm8, %v15290_v1, %v3927_v50  ;;  %v3932_v2 = vsel %vm14593_vm8, %v10800_v49, %v3931_v62 }
 0x35f   : > { %4228 = vst [vmem:[#allocation3 + $0x388] sm:$0xf] %v3883_v23  ;;  %v3938_v31 = vrot.slane %v15301_v25, 6  ;;  %v3945_v30 = vrot.slane %v15303_v34, 6  ;;  %v15334_v10 = vld [vmem:[#allocation2 + $0x280] sm:$0x3]  ;;  %v3921_v23 = vsel %vm14593_vm8, %v3919_v45, %v3920_v15  ;;  %v3935_v54 = vsel %vm14593_vm8, %v15312_v22, %v3934_v37 }
 0x360   : > { %4229 = vst [vmem:[#allocation3 + $0x38c] sm:$0xf] %v3886_v51  ;;  %v15342_v28 = vld [vmem:[#allocation2 + $0x290] sm:$0xc]  ;;  %v15344_v5 = vld [vmem:[#allocation2 + $0x2ac] sm:$0xf] }
 0x361   : > { %4230 = vst [vmem:[#allocation3 + $0x390] sm:$0xf] %v3890_v20  ;;  %v3941_v60 = vrot.slane %v15315_v24, 6  ;;  %v3952_v63 = vrot.slane %v15325_v56, 6  ;;  %v15353_v47 = vld [vmem:[#allocation2 + $0x298] sm:$0x3]  ;;  %v3939_v12 = vsel %vm14593_vm8, %v10801_v46, %v3938_v31 }
 0x362   : > { %4231 = vst [vmem:[#allocation3 + $0x394] sm:$0xf] %v3893_v59  ;;  %v15366_v14 = vld [vmem:[#allocation2 + $0x2a8] sm:$0xc]  ;;  %v15368_v61 = vld [vmem:[#allocation2 + $0x2b0] sm:$0x3] }
 0x363   : > { %4232 = vst [vmem:[#allocation3 + $0x398] sm:$0xf] %v3897_v26  ;;  %v3940_v8 = vrot.slane %v3938_v31, 4  ;;  %v10802_v11 = vrot.slane %v15323_v21, 10  ;;  %v3948_v4 = vrot.slane %v15334_v10, 6  ;;  %v3959_v29 = vrot.slane %v15344_v5, 6 }
 0x364   : > { %4233 = vst [vmem:[#allocation3 + $0x39c] sm:$0xf] %v3900_v40  ;;  %v17462_v44 = vrot.slane %v15183_v0, 10  ;;  %v3947_v9 = vrot.slane %v3945_v30, 4  ;;  %v10803_v55 = vrot.slane %v15342_v28, 10  ;;  %v3954_v19 = vrot.slane %v3952_v63, 4 }
 0x365   : > { %v15386_v36 = vld [vmem:[#allocation2 + $0x2c0] sm:$0xc]  ;;  %4234 = vst [vmem:[#allocation3 + $0x3a0] sm:$0xf] %v3904_v39  ;;  %v3955_v0 = vrot.slane %v15353_v47, 6  ;;  %v3962_v52 = vrot.slane %v15368_v61, 6  ;;  %v3942_v62 = vsel %vm14593_vm8, %v3940_v8, %v3941_v60  ;;  %v3946_v7 = vsel %vm14593_vm8, %v10802_v11, %v3945_v30 }
 0x366   : > { %v3911_v53 = vsel %vm14593_vm8, %v17462_v44, %v3910_v18  ;;  %v10804_v18 = vrot.slane %v15366_v14, 10  ;;  %4235 = vst [vmem:[#allocation3 + $0x3a4] sm:$0xf] %v3907_v38  ;;  %v15399_v13 = vld [vmem:[#allocation2 + $0x2c4] sm:$0xf]  ;;  %v3961_v25 = vrot.slane %v3959_v29, 4  ;;  %v3949_v46 = vsel %vm14593_vm8, %v3947_v9, %v3948_v4 }
 0x367   : > { %v15401_v27 = vld [vmem:[#allocation2 + $0x2dc] sm:$0xf]  ;;  %4236 = vst [vmem:[#allocation3 + $0x3a8] sm:$0xf] %v3911_v53  ;;  %v10805_v48 = vrot.slane %v15386_v36, 10  ;;  %v3966_v15 = vrot.slane %v15399_v13, 6  ;;  %v3953_v30 = vsel %vm14593_vm8, %v10803_v55, %v3952_v63  ;;  %v3956_v47 = vsel %vm14593_vm8, %v3954_v19, %v3955_v0 }
 0x368   : > { %v3562_v51 = vld [vmem:[#allocation2 + $0x2c8] sm:$0x3]  ;;  %4237 = vst [vmem:[#allocation3 + $0x3ac] sm:$0xf] %v3914_v33  ;;  %v15416_v17 = vld [vmem:[#allocation2 + $0x2d8] sm:$0xc]  ;;  %v3960_v56 = vsel %vm14593_vm8, %v10804_v18, %v3959_v29  ;;  %v3963_v63 = vsel %vm14593_vm8, %v3961_v25, %v3962_v52 }
 0x369   : > { %v15418_v43 = vld [vmem:[#allocation2 + $0x2f4] sm:$0xf]  ;;  %4238 = vst [vmem:[#allocation3 + $0x3b0] sm:$0xf] %v3918_v6  ;;  %v3973_v41 = vrot.slane %v15401_v27, 6  ;;  %v3969_v1 = vrot.slane %v3562_v51, 6  ;;  %v3967_v33 = vsel %vm14593_vm8, %v10805_v48, %v3966_v15 }
 0x36a   : > { %v15427_v45 = vld [vmem:[#allocation2 + $0x2e0] sm:$0x3]  ;;  %4239 = vst [vmem:[#allocation3 + $0x3b4] sm:$0xf] %v3921_v23  ;;  %v15435_v16 = vld [vmem:[#allocation2 + $0x2f0] sm:$0xc] }
 0x36b   : > { %v15437_v57 = vld [vmem:[#allocation2 + $0x30c] sm:$0xf]  ;;  %4240 = vst [vmem:[#allocation3 + $0x3b8] sm:$0xf] %v3925_v42  ;;  %v3980_v50 = vrot.slane %v15418_v43, 6  ;;  %v3968_v37 = vrot.slane %v3966_v15, 4 }
 0x36c   : > { %v15445_v58 = vld [vmem:[#allocation2 + $0x2f8] sm:$0x3]  ;;  %4241 = vst [vmem:[#allocation3 + $0x3bc] sm:$0xf] %v3928_v3  ;;  %v15453_v49 = vld [vmem:[#allocation2 + $0x308] sm:$0xc] }
 0x36d   : > { %v15455_v35 = vld [vmem:[#allocation2 + $0x310] sm:$0x3]  ;;  %4242 = vst [vmem:[#allocation3 + $0x3c0] sm:$0xf] %v3932_v2  ;;  %v10806_v22 = vrot.slane %v15416_v17, 10  ;;  %v3976_v24 = vrot.slane %v15427_v45, 6  ;;  %v3970_v5 = vsel %vm14593_vm8, %v3968_v37, %v3969_v1 }
 0x36e   : > { %v3987_v20 = vrot.slane %v15437_v57, 6  ;;  %4243 = vst [vmem:[#allocation3 + $0x3c4] sm:$0xf] %v3935_v54  ;;  %v3975_v21 = vrot.slane %v3973_v41, 4  ;;  %v10807_v59 = vrot.slane %v15435_v16, 10  ;;  %v3982_v10 = vrot.slane %v3980_v50, 4 }
 0x36f   : > { %v15467_v31 = vld [vmem:[#allocation2 + $0x324] sm:$0xf]  ;;  %4244 = vst [vmem:[#allocation3 + $0x3c8] sm:$0xf] %v3939_v12  ;;  %v3983_v26 = vrot.slane %v15445_v58, 6  ;;  %v10808_v28 = vrot.slane %v15453_v49, 10  ;;  %v3974_v0 = vsel %vm14593_vm8, %v10806_v22, %v3973_v41 }
 0x370   : > { %v3990_v34 = vrot.slane %v15455_v35, 6  ;;  %4245 = vst [vmem:[#allocation3 + $0x3cc] sm:$0xf] %v3942_v62  ;;  %v3572_v40 = vld [vmem:[#allocation2 + $0x320] sm:$0xc]  ;;  %v3989_v39 = vrot.slane %v3987_v20, 4  ;;  %v3977_v18 = vsel %vm14593_vm8, %v3975_v21, %v3976_v24  ;;  %v3981_v48 = vsel %vm14593_vm8, %v10807_v59, %v3980_v50 }
 0x371   : > { %v15478_v60 = vld [vmem:[#allocation2 + $0x33c] sm:$0xf]  ;;  %4246 = vst [vmem:[#allocation3 + $0x3d0] sm:$0xf] %v3946_v7  ;;  %v3994_v38 = vrot.slane %v15467_v31, 6  ;;  %v10809_v4 = vrot.slane %v3572_v40, 10  ;;  %v3984_v17 = vsel %vm14593_vm8, %v3982_v10, %v3983_v26  ;;  %v3988_v45 = vsel %vm14593_vm8, %v10808_v28, %v3987_v20 }
 0x372   : > { %v3574_v14 = vld [vmem:[#allocation2 + $0x328] sm:$0x3]  ;;  %4247 = vst [vmem:[#allocation3 + $0x3d4] sm:$0xf] %v3949_v46  ;;  %v3575_v8 = vld [vmem:[#allocation2 + $0x338] sm:$0xc]  ;;  %v3991_v43 = vsel %vm14593_vm8, %v3989_v39, %v3990_v34 }
 0x373   : > { %v3577_v11 = vld [vmem:[#allocation2 + $0x340] sm:$0x3]  ;;  %4248 = vst [vmem:[#allocation3 + $0x3d8] sm:$0xf] %v3953_v30  ;;  %v4001_v44 = vrot.slane %v15478_v60, 6  ;;  %v3996_v55 = vrot.slane %v3994_v38, 4  ;;  %v3995_v58 = vsel %vm14593_vm8, %v10809_v4, %v3994_v38 }
 0x374   : > { %v3578_v53 = vld [vmem:[#allocation2 + $0x350] sm:$0xc]  ;;  %4249 = vst [vmem:[#allocation3 + $0x3dc] sm:$0xf] %v3956_v47  ;;  %v3579_v29 = vld [vmem:[#allocation2 + $0x354] sm:$0xf] }
 0x375   : > { %v15496_v9 = vld [vmem:[#allocation2 + $0x36c] sm:$0xf]  ;;  %4250 = vst [vmem:[#allocation3 + $0x3e0] sm:$0xf] %v3960_v56  ;;  %v3997_v61 = vrot.slane %v3574_v14, 6  ;;  %v10810_v36 = vrot.slane %v3575_v8, 10 }
 0x376   : > { %v4004_v19 = vrot.slane %v3577_v11, 6  ;;  %4251 = vst [vmem:[#allocation3 + $0x3e4] sm:$0xf] %v3963_v63  ;;  %v3580_v52 = vld [vmem:[#allocation2 + $0x358] sm:$0x3]  ;;  %v4003_v13 = vrot.slane %v4001_v44, 4 }
 0x377   : > { %v15502_v6 = vld [vmem:[#allocation2 + $0x384] sm:$0xf]  ;;  %4252 = vst [vmem:[#allocation3 + $0x3e8] sm:$0xf] %v3967_v33  ;;  %v10811_v27 = vrot.slane %v3578_v53, 10  ;;  %v4008_v23 = vrot.slane %v3579_v29, 6  ;;  %v3998_v12 = vsel %vm14593_vm8, %v3996_v55, %v3997_v61  ;;  %v4002_v20 = vsel %vm14593_vm8, %v10810_v36, %v4001_v44 }
 0x378   : > { %v4015_v25 = vrot.slane %v15496_v9, 6  ;;  %4253 = vst [vmem:[#allocation3 + $0x3ec] sm:$0xf] %v3970_v5  ;;  %v3581_v51 = vld [vmem:[#allocation2 + $0x368] sm:$0xc]  ;;  %v4011_v3 = vrot.slane %v3580_v52, 6  ;;  %v4005_v21 = vsel %vm14593_vm8, %v4003_v13, %v4004_v19 }
 0x379   : > { %v3583_v42 = vld [vmem:[#allocation2 + $0x370] sm:$0x3]  ;;  %4254 = vst [vmem:[#allocation3 + $0x3f0] sm:$0xf] %v3974_v0  ;;  %v3584_v15 = vld [vmem:[#allocation2 + $0x380] sm:$0xc]  ;;  %v4009_v26 = vsel %vm14593_vm8, %v10811_v27, %v4008_v23 }
 0x37a   : > { %v4022_v41 = vrot.slane %v15502_v6, 6  ;;  %4255 = vst [vmem:[#allocation3 + $0x3f4] sm:$0xf] %v3977_v18  ;;  %v3586_v2 = vld [vmem:[#allocation2 + $0x388] sm:$0x3]  ;;  %v4010_v57 = vrot.slane %v4008_v23, 4 }
 0x37b   : > { %v3588_v16 = vld [vmem:[#allocation2 + $0x39c] sm:$0xf]  ;;  %4256 = vst [vmem:[#allocation3 + $0x3f8] sm:$0xf] %v3981_v48  ;;  %v10812_v54 = vrot.slane %v3581_v51, 10  ;;  %v4017_v1 = vrot.slane %v4015_v25, 4 }
 0x37c   : > { %v4018_v50 = vrot.slane %v3583_v42, 6  ;;  %4257 = vst [vmem:[#allocation3 + $0x3fc] sm:$0xf] %v3984_v17  ;;  %v3587_v62 = vld [vmem:[#allocation2 + $0x398] sm:$0xc]  ;;  %v10813_v35 = vrot.slane %v3584_v15, 10  ;;  %v4012_v30 = vsel %vm14593_vm8, %v4010_v57, %v4011_v3 }
 0x37d   : > { %v3591_v49 = vld [vmem:[#allocation2 + $0x3b4] sm:$0xf]  ;;  %4258 = vst [vmem:[#allocation3 + $0x400] sm:$0xf] %v3988_v45  ;;  %v4024_v37 = vrot.slane %v4022_v41, 4  ;;  %v4025_v22 = vrot.slane %v3586_v2, 6  ;;  %v4016_v39 = vsel %vm14593_vm8, %v10812_v54, %v4015_v25 }
 0x37e   : > { %v4029_v24 = vrot.slane %v3588_v16, 6  ;;  %4259 = vst [vmem:[#allocation3 + $0x404] sm:$0xf] %v3991_v43  ;;  %v3589_v7 = vld [vmem:[#allocation2 + $0x3a0] sm:$0x3]  ;;  %v10814_v59 = vrot.slane %v3587_v62, 10  ;;  %v4019_v8 = vsel %vm14593_vm8, %v4017_v1, %v4018_v50  ;;  %v4023_v44 = vsel %vm14593_vm8, %v10813_v35, %v4022_v41 }
 0x37f   : > { %v3594_v46 = vld [vmem:[#allocation2 + $0x3cc] sm:$0xf]  ;;  %4260 = vst [vmem:[#allocation3 + $0x408] sm:$0xf] %v3995_v58  ;;  %v3590_v31 = vld [vmem:[#allocation2 + $0x3b0] sm:$0xc]  ;;  %v4026_v29 = vsel %vm14593_vm8, %v4024_v37, %v4025_v22 }
 0x380   : > { %v4036_v10 = vrot.slane %v3591_v49, 6  ;;  %4261 = vst [vmem:[#allocation3 + $0x40c] sm:$0xf] %v3998_v12  ;;  %v3592_v28 = vld [vmem:[#allocation2 + $0x3b8] sm:$0x3]  ;;  %v4032_v40 = vrot.slane %v3589_v7, 6  ;;  %v4030_v36 = vsel %vm14593_vm8, %v10814_v59, %v4029_v24 }
 0x381   : > { %v3593_v34 = vld [vmem:[#allocation2 + $0x3c8] sm:$0xc]  ;;  %4262 = vst [vmem:[#allocation3 + $0x410] sm:$0xf] %v4002_v20  ;;  %v4043_v60 = vrot.slane %v3594_v46, 6  ;;  %v4031_v38 = vrot.slane %v4029_v24, 4 }
 0x382   : > { %v3595_v47 = vld [vmem:[#allocation2 + $0x3d0] sm:$0x3]  ;;  %4263 = vst [vmem:[#allocation3 + $0x414] sm:$0xf] %v4005_v21  ;;  %v10815_v14 = vrot.slane %v3590_v31, 10  ;;  %v4038_v11 = vrot.slane %v4036_v10, 4 }
 0x383   : > { %v3597_v56 = vld [vmem:[#allocation2 + $0x3e4] sm:$0xf]  ;;  %4264 = vst [vmem:[#allocation3 + $0x418] sm:$0xf] %v4009_v26  ;;  %v4039_v63 = vrot.slane %v3592_v28, 6  ;;  %v10816_v53 = vrot.slane %v3593_v34, 10  ;;  %v4033_v52 = vsel %vm14593_vm8, %v4031_v38, %v4032_v40 }
 0x384   : > { %v3596_v4 = vld [vmem:[#allocation2 + $0x3e0] sm:$0xc]  ;;  %4265 = vst [vmem:[#allocation3 + $0x41c] sm:$0xf] %v4012_v30  ;;  %v4046_v33 = vrot.slane %v3595_v47, 6  ;;  %v4045_v9 = vrot.slane %v4043_v60, 4  ;;  %v4037_v27 = vsel %vm14593_vm8, %v10815_v14, %v4036_v10 }
 0x385   : > { %v3600_v5 = vld [vmem:[#allocation2 + $0x3fc] sm:$0xf]  ;;  %4266 = vst [vmem:[#allocation3 + $0x420] sm:$0xf] %v4016_v39  ;;  %v4050_v55 = vrot.slane %v3597_v56, 6  ;;  %v10817_v19 = vrot.slane %v3596_v4, 10  ;;  %v4040_v51 = vsel %vm14593_vm8, %v4038_v11, %v4039_v63  ;;  %v4044_v15 = vsel %vm14593_vm8, %v10816_v53, %v4043_v60 }
 0x386   : > { %v3598_v61 = vld [vmem:[#allocation2 + $0x3e8] sm:$0x3]  ;;  %4267 = vst [vmem:[#allocation3 + $0x424] sm:$0xf] %v4019_v8  ;;  %v3599_v0 = vld [vmem:[#allocation2 + $0x3f8] sm:$0xc]  ;;  %v4047_v2 = vsel %vm14593_vm8, %v4045_v9, %v4046_v33 }
 0x387   : > { %v4057_v18 = vrot.slane %v3600_v5, 6  ;;  %4268 = vst [vmem:[#allocation3 + $0x428] sm:$0xf] %v4023_v44  ;;  %v3601_v6 = vld [vmem:[#allocation2 + $0x400] sm:$0x3]  ;;  %v4053_v23 = vrot.slane %v3598_v61, 6  ;;  %v4051_v1 = vsel %vm14593_vm8, %v10817_v19, %v4050_v55 }
 0x388   : > { %v3603_v13 = vld [vmem:[#allocation2 + $0x414] sm:$0xf]  ;;  %4269 = vst [vmem:[#allocation3 + $0x42c] sm:$0xf] %v4026_v29  ;;  %v3602_v25 = vld [vmem:[#allocation2 + $0x410] sm:$0xc] }
 0x389   : > { %v4064_v48 = vrot.slane %v3603_v13, 6  ;;  %4270 = vst [vmem:[#allocation3 + $0x430] sm:$0xf] %v4030_v36  ;;  %v4052_v42 = vrot.slane %v4050_v55, 4  ;;  %v10818_v17 = vrot.slane %v3599_v0, 10  ;;  %v4059_v41 = vrot.slane %v4057_v18, 4 }
 0x38a   : > { %v3604_v3 = vld [vmem:[#allocation2 + $0x418] sm:$0x3]  ;;  %4271 = vst [vmem:[#allocation3 + $0x434] sm:$0xf] %v4033_v52  ;;  %v4060_v45 = vrot.slane %v3601_v6, 6  ;;  %v10819_v16 = vrot.slane %v3602_v25, 10 }
 0x38b   : > { %v3606_v43 = vld [vmem:[#allocation2 + $0x42c] sm:$0xf]  ;;  %4272 = vst [vmem:[#allocation3 + $0x438] sm:$0xf] %v4037_v27  ;;  %v3605_v57 = vld [vmem:[#allocation2 + $0x428] sm:$0xc]  ;;  %v4054_v62 = vsel %vm14593_vm8, %v4052_v42, %v4053_v23  ;;  %v4058_v37 = vsel %vm14593_vm8, %v10818_v17, %v4057_v18 }
 0x38c   : > { %v4071_v54 = vrot.slane %v3606_v43, 6  ;;  %4273 = vst [vmem:[#allocation3 + $0x43c] sm:$0xf] %v4040_v51  ;;  %v4066_v50 = vrot.slane %v4064_v48, 4  ;;  %v4067_v58 = vrot.slane %v3604_v3, 6  ;;  %v10820_v22 = vrot.slane %v3605_v57, 10 }
 0x38d   : > { %v3607_v12 = vld [vmem:[#allocation2 + $0x430] sm:$0x3]  ;;  %4274 = vst [vmem:[#allocation3 + $0x440] sm:$0xf] %v4044_v15  ;;  %v3608_v49 = vld [vmem:[#allocation2 + $0x440] sm:$0xc]  ;;  %v4061_v7 = vsel %vm14593_vm8, %v4059_v41, %v4060_v45  ;;  %v4065_v31 = vsel %vm14593_vm8, %v10819_v16, %v4064_v48 }
 0x38e   : > { %v3609_v35 = vld [vmem:[#allocation2 + $0x444] sm:$0xf]  ;;  %4275 = vst [vmem:[#allocation3 + $0x444] sm:$0xf] %v4047_v2  ;;  %v3610_v20 = vld [vmem:[#allocation2 + $0x448] sm:$0x3]  ;;  %v4068_v34 = vsel %vm14593_vm8, %v4066_v50, %v4067_v58  ;;  %v4072_v47 = vsel %vm14593_vm8, %v10820_v22, %v4071_v54 }
 0x38f   : > { %v4078_v24 = vrot.slane %v3609_v35, 6  ;;  %4276 = vst [vmem:[#allocation3 + $0x448] sm:$0xf] %v4051_v1  ;;  %v4073_v46 = vrot.slane %v4071_v54, 4  ;;  %v4074_v21 = vrot.slane %v3607_v12, 6  ;;  %v10821_v10 = vrot.slane %v3608_v49, 10 }
 0x390   : > { %v3611_v59 = vld [vmem:[#allocation2 + $0x458] sm:$0xc]  ;;  %4277 = vst [vmem:[#allocation3 + $0x44c] sm:$0xf] %v4054_v62  ;;  %v4081_v26 = vrot.slane %v3610_v20, 6 }
 0x391   : > { %v3612_v28 = vld [vmem:[#allocation2 + $0x45c] sm:$0xf]  ;;  %4278 = vst [vmem:[#allocation3 + $0x450] sm:$0xf] %v4058_v37  ;;  %v4080_v30 = vrot.slane %v4078_v24, 4  ;;  %v10822_v39 = vrot.slane %v3611_v59, 10  ;;  %v4075_v14 = vsel %vm14593_vm8, %v4073_v46, %v4074_v21  ;;  %v4079_v63 = vsel %vm14593_vm8, %v10821_v10, %v4078_v24 }
 0x392   : > { %v4085_v40 = vrot.slane %v3612_v28, 6  ;;  %v3613_v60 = vld [vmem:[#allocation2 + $0x460] sm:$0x3]  ;;  %4279 = vst [vmem:[#allocation3 + $0x454] sm:$0xf] %v4061_v7 }
 0x393   : > { %v3614_v38 = vld [vmem:[#allocation2 + $0x470] sm:$0xc]  ;;  %4280 = vst [vmem:[#allocation3 + $0x458] sm:$0xf] %v4065_v31  ;;  %v4088_v8 = vrot.slane %v3613_v60, 6  ;;  %v4082_v33 = vsel %vm14593_vm8, %v4080_v30, %v4081_v26 }
 0x394   : > { %v4087_v56 = vrot.slane %v4085_v40, 4  ;;  %v3615_v11 = vld [vmem:[#allocation2 + $0x474] sm:$0xf]  ;;  %4281 = vst [vmem:[#allocation3 + $0x45c] sm:$0xf] %v4068_v34  ;;  %v10823_v4 = vrot.slane %v3614_v38, 10  ;;  %v4086_v29 = vsel %vm14593_vm8, %v10822_v39, %v4085_v40 }
 0x395   : > { %v4092_v44 = vrot.slane %v3615_v11, 6  ;;  %v3616_v53 = vld [vmem:[#allocation2 + $0x478] sm:$0x3]  ;;  %4282 = vst [vmem:[#allocation3 + $0x460] sm:$0xf] %v4072_v47 }
 0x396   : > { %v4095_v5 = vrot.slane %v3616_v53, 6  ;;  %4283 = vst [vmem:[#allocation3 + $0x464] sm:$0xf] %v4075_v14  ;;  %v4089_v55 = vsel %vm14593_vm8, %v4087_v56, %v4088_v8 }
 0x397   : > { %v4094_v9 = vrot.slane %v4092_v44, 4  ;;  %4284 = vst [vmem:[#allocation3 + $0x468] sm:$0xf] %v4079_v63  ;;  %v4093_v61 = vsel %vm14593_vm8, %v10823_v4, %v4092_v44 }
 0x398   : > { %4285 = vst [vmem:[#allocation3 + $0x46c] sm:$0xf] %v4082_v33 }
 0x399   : > { %4286 = vst [vmem:[#allocation3 + $0x470] sm:$0xf] %v4086_v29  ;;  %v4096_v36 = vsel %vm14593_vm8, %v4094_v9, %v4095_v5 }
 0x39a   : > { %4287 = vst [vmem:[#allocation3 + $0x474] sm:$0xf] %v4089_v55 }
 0x39b   : > { %4288 = vst [vmem:[#allocation3 + $0x478] sm:$0xf] %v4093_v61 }
 0x39c   : > { %4289 = vst [vmem:[#allocation3 + $0x47c] sm:$0xf] %v4096_v36 }
 0x39d PF: > { %p10824_p9 = scmp.ne.s32.totalorder %s13012_s22, 2 }
 0x39f   : > { %4293 = sbr.rel (%p10824_p9) target bundleno = 1077 (0x435), region = 40 }
 0x3a4   : > { %v4294_v19 = vld [vmem:[#allocation2 + $0x4] sm:$0xff]   ;;  %v4296_v0 = vld [vmem:[#allocation2 + $0x1c] sm:$0xff]   ;;  %v4298_v18 = vld [vmem:[#allocation2 + $0x34] sm:$0xff]  }
 0x3a5   : > { %4390 = vst [vmem:[#allocation3] sm:$0xff] %v4294_v19   ;;  %v4300_v52 = vld [vmem:[#allocation2 + $0x4c] sm:$0xff]   ;;  %v4302_v6 = vld [vmem:[#allocation2 + $0x64] sm:$0xff]   ;;  %v4304_v13 = vld [vmem:[#allocation2 + $0x7c] sm:$0xff]  }
 0x3a6   : > { %4392 = vst [vmem:[#allocation3 + $0x8] sm:$0xff] %v4296_v0   ;;  %v4306_v27 = vld [vmem:[#allocation2 + $0x94] sm:$0xff]   ;;  %v4308_v32 = vld [vmem:[#allocation2 + $0xac] sm:$0xff]   ;;  %v4310_v23 = vld [vmem:[#allocation2 + $0xc4] sm:$0xff]  }
 0x3a7   : > { %4394 = vst [vmem:[#allocation3 + $0x10] sm:$0xff] %v4298_v18   ;;  %v4312_v25 = vld [vmem:[#allocation2 + $0xdc] sm:$0xff]   ;;  %v4314_v48 = vld [vmem:[#allocation2 + $0xf4] sm:$0xff]   ;;  %v4316_v51 = vld [vmem:[#allocation2 + $0x10c] sm:$0xff]  }
 0x3a8   : > { %4396 = vst [vmem:[#allocation3 + $0x18] sm:$0xff] %v4300_v52   ;;  %v4318_v42 = vld [vmem:[#allocation2 + $0x124] sm:$0xff]   ;;  %v4320_v17 = vld [vmem:[#allocation2 + $0x13c] sm:$0xff]   ;;  %v4322_v3 = vld [vmem:[#allocation2 + $0x154] sm:$0xff]  }
 0x3a9   : > { %4398 = vst [vmem:[#allocation3 + $0x20] sm:$0xff] %v4302_v6   ;;  %v4324_v15 = vld [vmem:[#allocation2 + $0x16c] sm:$0xff]   ;;  %v4326_v41 = vld [vmem:[#allocation2 + $0x184] sm:$0xff]   ;;  %v4328_v45 = vld [vmem:[#allocation2 + $0x19c] sm:$0xff]  }
 0x3aa   : > { %4400 = vst [vmem:[#allocation3 + $0x28] sm:$0xff] %v4304_v13   ;;  %v4330_v43 = vld [vmem:[#allocation2 + $0x1b4] sm:$0xff]   ;;  %v4332_v2 = vld [vmem:[#allocation2 + $0x1cc] sm:$0xff]   ;;  %v4334_v16 = vld [vmem:[#allocation2 + $0x1e4] sm:$0xff]  }
 0x3ab   : > { %4402 = vst [vmem:[#allocation3 + $0x30] sm:$0xff] %v4306_v27   ;;  %v4336_v57 = vld [vmem:[#allocation2 + $0x1fc] sm:$0xff]   ;;  %v4338_v54 = vld [vmem:[#allocation2 + $0x214] sm:$0xff]   ;;  %v4340_v1 = vld [vmem:[#allocation2 + $0x22c] sm:$0xff]  }
 0x3ac   : > { %4404 = vst [vmem:[#allocation3 + $0x38] sm:$0xff] %v4308_v32   ;;  %v4342_v50 = vld [vmem:[#allocation2 + $0x244] sm:$0xff]   ;;  %v4344_v58 = vld [vmem:[#allocation2 + $0x25c] sm:$0xff]   ;;  %v4346_v12 = vld [vmem:[#allocation2 + $0x274] sm:$0xff]  }
 0x3ad   : > { %4406 = vst [vmem:[#allocation3 + $0x40] sm:$0xff] %v4310_v23   ;;  %v4348_v62 = vld [vmem:[#allocation2 + $0x28c] sm:$0xff]   ;;  %v4350_v49 = vld [vmem:[#allocation2 + $0x2a4] sm:$0xff]   ;;  %v4352_v35 = vld [vmem:[#allocation2 + $0x2bc] sm:$0xff]  }
 0x3ae   : > { %4408 = vst [vmem:[#allocation3 + $0x48] sm:$0xff] %v4312_v25   ;;  %v4354_v37 = vld [vmem:[#allocation2 + $0x2d4] sm:$0xff]   ;;  %v4356_v22 = vld [vmem:[#allocation2 + $0x2ec] sm:$0xff]   ;;  %v4358_v24 = vld [vmem:[#allocation2 + $0x304] sm:$0xff]  }
 0x3af   : > { %4410 = vst [vmem:[#allocation3 + $0x50] sm:$0xff] %v4314_v48   ;;  %v4360_v20 = vld [vmem:[#allocation2 + $0x31c] sm:$0xff]   ;;  %v4362_v7 = vld [vmem:[#allocation2 + $0x334] sm:$0xff]   ;;  %v4364_v46 = vld [vmem:[#allocation2 + $0x34c] sm:$0xff]  }
 0x3b0   : > { %4412 = vst [vmem:[#allocation3 + $0x58] sm:$0xff] %v4316_v51   ;;  %v4366_v21 = vld [vmem:[#allocation2 + $0x364] sm:$0xff]   ;;  %v4368_v59 = vld [vmem:[#allocation2 + $0x37c] sm:$0xff]   ;;  %v4370_v31 = vld [vmem:[#allocation2 + $0x394] sm:$0xff]  }
 0x3b1   : > { %4414 = vst [vmem:[#allocation3 + $0x60] sm:$0xff] %v4318_v42   ;;  %v4372_v10 = vld [vmem:[#allocation2 + $0x3ac] sm:$0xff]   ;;  %v4374_v26 = vld [vmem:[#allocation2 + $0x3c4] sm:$0xff]   ;;  %v4376_v28 = vld [vmem:[#allocation2 + $0x3dc] sm:$0xff]  }
 0x3b2   : > { %4416 = vst [vmem:[#allocation3 + $0x68] sm:$0xff] %v4320_v17   ;;  %v4378_v34 = vld [vmem:[#allocation2 + $0x3f4] sm:$0xff]   ;;  %v4380_v30 = vld [vmem:[#allocation2 + $0x40c] sm:$0xff]   ;;  %v4382_v40 = vld [vmem:[#allocation2 + $0x424] sm:$0xff]  }
 0x3b3   : > { %4418 = vst [vmem:[#allocation3 + $0x70] sm:$0xff] %v4322_v3   ;;  %v4384_v60 = vld [vmem:[#allocation2 + $0x43c] sm:$0xff]   ;;  %v4386_v47 = vld [vmem:[#allocation2 + $0x454] sm:$0xff]   ;;  %v4388_v39 = vld [vmem:[#allocation2 + $0x46c] sm:$0xff]  }
 0x3b4   : > { %4420 = vst [vmem:[#allocation3 + $0x78] sm:$0xff] %v4324_v15   ;;  %v4486_v38 = vld [vmem:[#allocation2 + $0x8] sm:$0xff]   ;;  %v4488_v14 = vld [vmem:[#allocation2 + $0x20] sm:$0xff]   ;;  %v4490_v56 = vld [vmem:[#allocation2 + $0x38] sm:$0xff]  }
 0x3b5   : > { %4422 = vst [vmem:[#allocation3 + $0x80] sm:$0xff] %v4326_v41   ;;  %v4492_v8 = vld [vmem:[#allocation2 + $0x50] sm:$0xff]   ;;  %v4494_v11 = vld [vmem:[#allocation2 + $0x68] sm:$0xff]   ;;  %v4496_v63 = vld [vmem:[#allocation2 + $0x80] sm:$0xff]  }
 0x3b6   : > { %4424 = vst [vmem:[#allocation3 + $0x88] sm:$0xff] %v4328_v45   ;;  %v4498_v4 = vld [vmem:[#allocation2 + $0x98] sm:$0xff]   ;;  %v4500_v44 = vld [vmem:[#allocation2 + $0xb0] sm:$0xff]   ;;  %v4502_v53 = vld [vmem:[#allocation2 + $0xc8] sm:$0xff]  }
 0x3b7   : > { %4426 = vst [vmem:[#allocation3 + $0x90] sm:$0xff] %v4330_v43   ;;  %v4504_v33 = vld [vmem:[#allocation2 + $0xe0] sm:$0xff]   ;;  %v4506_v5 = vld [vmem:[#allocation2 + $0xf8] sm:$0xff]   ;;  %v4508_v29 = vld [vmem:[#allocation2 + $0x110] sm:$0xff]  }
 0x3b8   : > { %4428 = vst [vmem:[#allocation3 + $0x98] sm:$0xff] %v4332_v2   ;;  %v4510_v9 = vld [vmem:[#allocation2 + $0x128] sm:$0xff]   ;;  %v4512_v55 = vld [vmem:[#allocation2 + $0x140] sm:$0xff]   ;;  %v4514_v61 = vld [vmem:[#allocation2 + $0x158] sm:$0xff]  }
 0x3b9   : > { %4430 = vst [vmem:[#allocation3 + $0xa0] sm:$0xff] %v4334_v16   ;;  %v4516_v36 = vld [vmem:[#allocation2 + $0x170] sm:$0xff]   ;;  %v4518_v19 = vld [vmem:[#allocation2 + $0x188] sm:$0xff]   ;;  %v4520_v0 = vld [vmem:[#allocation2 + $0x1a0] sm:$0xff]  }
 0x3ba   : > { %4432 = vst [vmem:[#allocation3 + $0xa8] sm:$0xff] %v4336_v57   ;;  %v4522_v18 = vld [vmem:[#allocation2 + $0x1b8] sm:$0xff]   ;;  %v4524_v52 = vld [vmem:[#allocation2 + $0x1d0] sm:$0xff]   ;;  %v4526_v6 = vld [vmem:[#allocation2 + $0x1e8] sm:$0xff]  }
 0x3bb   : > { %4434 = vst [vmem:[#allocation3 + $0xb0] sm:$0xff] %v4338_v54   ;;  %v4528_v13 = vld [vmem:[#allocation2 + $0x200] sm:$0xff]   ;;  %v4530_v27 = vld [vmem:[#allocation2 + $0x218] sm:$0xff]   ;;  %v4532_v32 = vld [vmem:[#allocation2 + $0x230] sm:$0xff]  }
 0x3bc   : > { %4436 = vst [vmem:[#allocation3 + $0xb8] sm:$0xff] %v4340_v1   ;;  %v4534_v23 = vld [vmem:[#allocation2 + $0x248] sm:$0xff]   ;;  %v4536_v25 = vld [vmem:[#allocation2 + $0x260] sm:$0xff]   ;;  %v4538_v48 = vld [vmem:[#allocation2 + $0x278] sm:$0xff]  }
 0x3bd   : > { %4438 = vst [vmem:[#allocation3 + $0xc0] sm:$0xff] %v4342_v50   ;;  %v4540_v51 = vld [vmem:[#allocation2 + $0x290] sm:$0xff]   ;;  %v4542_v42 = vld [vmem:[#allocation2 + $0x2a8] sm:$0xff]   ;;  %v4544_v17 = vld [vmem:[#allocation2 + $0x2c0] sm:$0xff]  }
 0x3be   : > { %4440 = vst [vmem:[#allocation3 + $0xc8] sm:$0xff] %v4344_v58   ;;  %v4546_v3 = vld [vmem:[#allocation2 + $0x2d8] sm:$0xff]   ;;  %v4548_v15 = vld [vmem:[#allocation2 + $0x2f0] sm:$0xff]   ;;  %v4550_v41 = vld [vmem:[#allocation2 + $0x308] sm:$0xff]  }
 0x3bf   : > { %4442 = vst [vmem:[#allocation3 + $0xd0] sm:$0xff] %v4346_v12   ;;  %v4552_v45 = vld [vmem:[#allocation2 + $0x320] sm:$0xff]   ;;  %v4554_v43 = vld [vmem:[#allocation2 + $0x338] sm:$0xff]   ;;  %v4556_v2 = vld [vmem:[#allocation2 + $0x350] sm:$0xff]  }
 0x3c0   : > { %4444 = vst [vmem:[#allocation3 + $0xd8] sm:$0xff] %v4348_v62   ;;  %v4558_v16 = vld [vmem:[#allocation2 + $0x368] sm:$0xff]   ;;  %v4560_v57 = vld [vmem:[#allocation2 + $0x380] sm:$0xff]   ;;  %v4562_v54 = vld [vmem:[#allocation2 + $0x398] sm:$0xff]  }
 0x3c1   : > { %4446 = vst [vmem:[#allocation3 + $0xe0] sm:$0xff] %v4350_v49   ;;  %v4564_v1 = vld [vmem:[#allocation2 + $0x3b0] sm:$0xff]   ;;  %v4566_v50 = vld [vmem:[#allocation2 + $0x3c8] sm:$0xff]   ;;  %v4568_v58 = vld [vmem:[#allocation2 + $0x3e0] sm:$0xff]  }
 0x3c2   : > { %4448 = vst [vmem:[#allocation3 + $0xe8] sm:$0xff] %v4352_v35   ;;  %v4570_v12 = vld [vmem:[#allocation2 + $0x3f8] sm:$0xff]   ;;  %v4572_v62 = vld [vmem:[#allocation2 + $0x410] sm:$0xff]   ;;  %v4574_v49 = vld [vmem:[#allocation2 + $0x428] sm:$0xff]  }
 0x3c3   : > { %4450 = vst [vmem:[#allocation3 + $0xf0] sm:$0xff] %v4354_v37   ;;  %v4576_v35 = vld [vmem:[#allocation2 + $0x440] sm:$0xff]   ;;  %v4578_v37 = vld [vmem:[#allocation2 + $0x458] sm:$0xff]  }
 0x3c4   : > { %4452 = vst [vmem:[#allocation3 + $0xf8] sm:$0xff] %v4356_v22   ;;  %v4580_v22 = vld [vmem:[#allocation2 + $0x470] sm:$0xff]  }
 0x3c5   : > { %4454 = vst [vmem:[#allocation3 + $0x100] sm:$0xff] %v4358_v24   ;;  %v4679_v24 = vld [vmem:[#allocation2 + $0xc] sm:$0xff]  }
 0x3c6   : > { %4456 = vst [vmem:[#allocation3 + $0x108] sm:$0xff] %v4360_v20   ;;  %v4681_v20 = vld [vmem:[#allocation2 + $0x24] sm:$0xff]  }
 0x3c7   : > { %4458 = vst [vmem:[#allocation3 + $0x110] sm:$0xff] %v4362_v7   ;;  %v4683_v7 = vld [vmem:[#allocation2 + $0x3c] sm:$0xff]  }
 0x3c8   : > { %4460 = vst [vmem:[#allocation3 + $0x118] sm:$0xff] %v4364_v46   ;;  %v4685_v46 = vld [vmem:[#allocation2 + $0x54] sm:$0xff]  }
 0x3c9   : > { %4462 = vst [vmem:[#allocation3 + $0x120] sm:$0xff] %v4366_v21   ;;  %v4687_v21 = vld [vmem:[#allocation2 + $0x6c] sm:$0xff]  }
 0x3ca   : > { %4464 = vst [vmem:[#allocation3 + $0x128] sm:$0xff] %v4368_v59   ;;  %v4689_v59 = vld [vmem:[#allocation2 + $0x84] sm:$0xff]  }
 0x3cb   : > { %4466 = vst [vmem:[#allocation3 + $0x130] sm:$0xff] %v4370_v31   ;;  %v4691_v31 = vld [vmem:[#allocation2 + $0x9c] sm:$0xff]  }
 0x3cc   : > { %4468 = vst [vmem:[#allocation3 + $0x138] sm:$0xff] %v4372_v10   ;;  %v4693_v10 = vld [vmem:[#allocation2 + $0xb4] sm:$0xff]  }
 0x3cd   : > { %4470 = vst [vmem:[#allocation3 + $0x140] sm:$0xff] %v4374_v26   ;;  %v4695_v26 = vld [vmem:[#allocation2 + $0xcc] sm:$0xff]  }
 0x3ce   : > { %4472 = vst [vmem:[#allocation3 + $0x148] sm:$0xff] %v4376_v28   ;;  %v4697_v28 = vld [vmem:[#allocation2 + $0xe4] sm:$0xff]  }
 0x3cf   : > { %4474 = vst [vmem:[#allocation3 + $0x150] sm:$0xff] %v4378_v34   ;;  %v4699_v34 = vld [vmem:[#allocation2 + $0xfc] sm:$0xff]  }
 0x3d0   : > { %4476 = vst [vmem:[#allocation3 + $0x158] sm:$0xff] %v4380_v30   ;;  %v4701_v30 = vld [vmem:[#allocation2 + $0x114] sm:$0xff]  }
 0x3d1   : > { %4478 = vst [vmem:[#allocation3 + $0x160] sm:$0xff] %v4382_v40   ;;  %v4703_v40 = vld [vmem:[#allocation2 + $0x12c] sm:$0xff]  }
 0x3d2   : > { %4480 = vst [vmem:[#allocation3 + $0x168] sm:$0xff] %v4384_v60   ;;  %v4705_v60 = vld [vmem:[#allocation2 + $0x144] sm:$0xff]  }
 0x3d3   : > { %4482 = vst [vmem:[#allocation3 + $0x170] sm:$0xff] %v4386_v47   ;;  %v4707_v47 = vld [vmem:[#allocation2 + $0x15c] sm:$0xff]  }
 0x3d4   : > { %4484 = vst [vmem:[#allocation3 + $0x178] sm:$0xff] %v4388_v39   ;;  %v4709_v39 = vld [vmem:[#allocation2 + $0x174] sm:$0xff]  }
 0x3d5   : > { %4583 = vst [vmem:[#allocation3 + $0x180] sm:$0xff] %v4486_v38   ;;  %v4711_v38 = vld [vmem:[#allocation2 + $0x18c] sm:$0xff]  }
 0x3d6   : > { %4585 = vst [vmem:[#allocation3 + $0x188] sm:$0xff] %v4488_v14   ;;  %v4713_v14 = vld [vmem:[#allocation2 + $0x1a4] sm:$0xff]  }
 0x3d7   : > { %4587 = vst [vmem:[#allocation3 + $0x190] sm:$0xff] %v4490_v56   ;;  %v4715_v56 = vld [vmem:[#allocation2 + $0x1bc] sm:$0xff]  }
 0x3d8   : > { %4589 = vst [vmem:[#allocation3 + $0x198] sm:$0xff] %v4492_v8   ;;  %v4717_v8 = vld [vmem:[#allocation2 + $0x1d4] sm:$0xff]  }
 0x3d9   : > { %4591 = vst [vmem:[#allocation3 + $0x1a0] sm:$0xff] %v4494_v11   ;;  %v4719_v11 = vld [vmem:[#allocation2 + $0x1ec] sm:$0xff]  }
 0x3da   : > { %4593 = vst [vmem:[#allocation3 + $0x1a8] sm:$0xff] %v4496_v63   ;;  %v4721_v63 = vld [vmem:[#allocation2 + $0x204] sm:$0xff]  }
 0x3db   : > { %4595 = vst [vmem:[#allocation3 + $0x1b0] sm:$0xff] %v4498_v4   ;;  %v4723_v4 = vld [vmem:[#allocation2 + $0x21c] sm:$0xff]  }
 0x3dc   : > { %4597 = vst [vmem:[#allocation3 + $0x1b8] sm:$0xff] %v4500_v44   ;;  %v4725_v44 = vld [vmem:[#allocation2 + $0x234] sm:$0xff]  }
 0x3dd   : > { %4599 = vst [vmem:[#allocation3 + $0x1c0] sm:$0xff] %v4502_v53   ;;  %v4727_v53 = vld [vmem:[#allocation2 + $0x24c] sm:$0xff]  }
 0x3de   : > { %4601 = vst [vmem:[#allocation3 + $0x1c8] sm:$0xff] %v4504_v33   ;;  %v4729_v33 = vld [vmem:[#allocation2 + $0x264] sm:$0xff]  }
 0x3df   : > { %4603 = vst [vmem:[#allocation3 + $0x1d0] sm:$0xff] %v4506_v5   ;;  %v4731_v5 = vld [vmem:[#allocation2 + $0x27c] sm:$0xff]  }
 0x3e0   : > { %4605 = vst [vmem:[#allocation3 + $0x1d8] sm:$0xff] %v4508_v29   ;;  %v4733_v29 = vld [vmem:[#allocation2 + $0x294] sm:$0xff]  }
 0x3e1   : > { %4607 = vst [vmem:[#allocation3 + $0x1e0] sm:$0xff] %v4510_v9   ;;  %v4735_v9 = vld [vmem:[#allocation2 + $0x2ac] sm:$0xff]  }
 0x3e2   : > { %4609 = vst [vmem:[#allocation3 + $0x1e8] sm:$0xff] %v4512_v55   ;;  %v4737_v55 = vld [vmem:[#allocation2 + $0x2c4] sm:$0xff]  }
 0x3e3   : > { %4611 = vst [vmem:[#allocation3 + $0x1f0] sm:$0xff] %v4514_v61   ;;  %v4739_v61 = vld [vmem:[#allocation2 + $0x2dc] sm:$0xff]  }
 0x3e4   : > { %4613 = vst [vmem:[#allocation3 + $0x1f8] sm:$0xff] %v4516_v36   ;;  %v4741_v36 = vld [vmem:[#allocation2 + $0x2f4] sm:$0xff]  }
 0x3e5   : > { %4615 = vst [vmem:[#allocation3 + $0x200] sm:$0xff] %v4518_v19   ;;  %v4743_v19 = vld [vmem:[#allocation2 + $0x30c] sm:$0xff]  }
 0x3e6   : > { %4617 = vst [vmem:[#allocation3 + $0x208] sm:$0xff] %v4520_v0   ;;  %v4745_v0 = vld [vmem:[#allocation2 + $0x324] sm:$0xff]  }
 0x3e7   : > { %4619 = vst [vmem:[#allocation3 + $0x210] sm:$0xff] %v4522_v18   ;;  %v4747_v18 = vld [vmem:[#allocation2 + $0x33c] sm:$0xff]  }
 0x3e8   : > { %4621 = vst [vmem:[#allocation3 + $0x218] sm:$0xff] %v4524_v52   ;;  %v4749_v52 = vld [vmem:[#allocation2 + $0x354] sm:$0xff]  }
 0x3e9   : > { %4623 = vst [vmem:[#allocation3 + $0x220] sm:$0xff] %v4526_v6   ;;  %v4751_v6 = vld [vmem:[#allocation2 + $0x36c] sm:$0xff]  }
 0x3ea   : > { %4625 = vst [vmem:[#allocation3 + $0x228] sm:$0xff] %v4528_v13   ;;  %v4753_v13 = vld [vmem:[#allocation2 + $0x384] sm:$0xff]  }
 0x3eb   : > { %4627 = vst [vmem:[#allocation3 + $0x230] sm:$0xff] %v4530_v27   ;;  %v4755_v27 = vld [vmem:[#allocation2 + $0x39c] sm:$0xff]  }
 0x3ec   : > { %4629 = vst [vmem:[#allocation3 + $0x238] sm:$0xff] %v4532_v32   ;;  %v4757_v32 = vld [vmem:[#allocation2 + $0x3b4] sm:$0xff]  }
 0x3ed   : > { %4631 = vst [vmem:[#allocation3 + $0x240] sm:$0xff] %v4534_v23   ;;  %v4759_v23 = vld [vmem:[#allocation2 + $0x3cc] sm:$0xff]  }
 0x3ee   : > { %4633 = vst [vmem:[#allocation3 + $0x248] sm:$0xff] %v4536_v25   ;;  %v4761_v25 = vld [vmem:[#allocation2 + $0x3e4] sm:$0xff]  }
 0x3ef   : > { %4635 = vst [vmem:[#allocation3 + $0x250] sm:$0xff] %v4538_v48   ;;  %v4763_v48 = vld [vmem:[#allocation2 + $0x3fc] sm:$0xff]  }
 0x3f0   : > { %4637 = vst [vmem:[#allocation3 + $0x258] sm:$0xff] %v4540_v51   ;;  %v4765_v51 = vld [vmem:[#allocation2 + $0x414] sm:$0xff]  }
 0x3f1   : > { %4639 = vst [vmem:[#allocation3 + $0x260] sm:$0xff] %v4542_v42   ;;  %v4767_v42 = vld [vmem:[#allocation2 + $0x42c] sm:$0xff]  }
 0x3f2   : > { %4641 = vst [vmem:[#allocation3 + $0x268] sm:$0xff] %v4544_v17   ;;  %v4769_v17 = vld [vmem:[#allocation2 + $0x444] sm:$0xff]  }
 0x3f3   : > { %4643 = vst [vmem:[#allocation3 + $0x270] sm:$0xff] %v4546_v3   ;;  %v4771_v3 = vld [vmem:[#allocation2 + $0x45c] sm:$0xff]  }
 0x3f4   : > { %4645 = vst [vmem:[#allocation3 + $0x278] sm:$0xff] %v4548_v15   ;;  %v4773_v15 = vld [vmem:[#allocation2 + $0x474] sm:$0xff]  }
 0x3f5   : > { %4647 = vst [vmem:[#allocation3 + $0x280] sm:$0xff] %v4550_v41  }
 0x3f6   : > { %4649 = vst [vmem:[#allocation3 + $0x288] sm:$0xff] %v4552_v45  }
 0x3f7   : > { %4651 = vst [vmem:[#allocation3 + $0x290] sm:$0xff] %v4554_v43  }
 0x3f8   : > { %4653 = vst [vmem:[#allocation3 + $0x298] sm:$0xff] %v4556_v2  }
 0x3f9   : > { %4655 = vst [vmem:[#allocation3 + $0x2a0] sm:$0xff] %v4558_v16  }
 0x3fa   : > { %4657 = vst [vmem:[#allocation3 + $0x2a8] sm:$0xff] %v4560_v57  }
 0x3fb   : > { %4659 = vst [vmem:[#allocation3 + $0x2b0] sm:$0xff] %v4562_v54  }
 0x3fc   : > { %4661 = vst [vmem:[#allocation3 + $0x2b8] sm:$0xff] %v4564_v1  }
 0x3fd   : > { %4663 = vst [vmem:[#allocation3 + $0x2c0] sm:$0xff] %v4566_v50  }
 0x3fe   : > { %4665 = vst [vmem:[#allocation3 + $0x2c8] sm:$0xff] %v4568_v58  }
 0x3ff   : > { %4667 = vst [vmem:[#allocation3 + $0x2d0] sm:$0xff] %v4570_v12  }
 0x400   : > { %4669 = vst [vmem:[#allocation3 + $0x2d8] sm:$0xff] %v4572_v62  }
 0x401   : > { %4671 = vst [vmem:[#allocation3 + $0x2e0] sm:$0xff] %v4574_v49  }
 0x402   : > { %4673 = vst [vmem:[#allocation3 + $0x2e8] sm:$0xff] %v4576_v35  }
 0x403   : > { %4675 = vst [vmem:[#allocation3 + $0x2f0] sm:$0xff] %v4578_v37  }
 0x404   : > { %4677 = vst [vmem:[#allocation3 + $0x2f8] sm:$0xff] %v4580_v22  }
 0x405   : > { %4776 = vst [vmem:[#allocation3 + $0x300] sm:$0xff] %v4679_v24  }
 0x406   : > { %4778 = vst [vmem:[#allocation3 + $0x308] sm:$0xff] %v4681_v20  }
 0x407   : > { %4780 = vst [vmem:[#allocation3 + $0x310] sm:$0xff] %v4683_v7  }
 0x408   : > { %4782 = vst [vmem:[#allocation3 + $0x318] sm:$0xff] %v4685_v46  }
 0x409   : > { %4784 = vst [vmem:[#allocation3 + $0x320] sm:$0xff] %v4687_v21  }
 0x40a   : > { %4786 = vst [vmem:[#allocation3 + $0x328] sm:$0xff] %v4689_v59  }
 0x40b   : > { %4788 = vst [vmem:[#allocation3 + $0x330] sm:$0xff] %v4691_v31  }
 0x40c   : > { %4790 = vst [vmem:[#allocation3 + $0x338] sm:$0xff] %v4693_v10  }
 0x40d   : > { %4792 = vst [vmem:[#allocation3 + $0x340] sm:$0xff] %v4695_v26  }
 0x40e   : > { %4794 = vst [vmem:[#allocation3 + $0x348] sm:$0xff] %v4697_v28  }
 0x40f   : > { %4796 = vst [vmem:[#allocation3 + $0x350] sm:$0xff] %v4699_v34  }
 0x410   : > { %4798 = vst [vmem:[#allocation3 + $0x358] sm:$0xff] %v4701_v30  }
 0x411   : > { %4800 = vst [vmem:[#allocation3 + $0x360] sm:$0xff] %v4703_v40  }
 0x412   : > { %4802 = vst [vmem:[#allocation3 + $0x368] sm:$0xff] %v4705_v60  }
 0x413   : > { %4804 = vst [vmem:[#allocation3 + $0x370] sm:$0xff] %v4707_v47  }
 0x414   : > { %4806 = vst [vmem:[#allocation3 + $0x378] sm:$0xff] %v4709_v39  }
 0x415   : > { %4808 = vst [vmem:[#allocation3 + $0x380] sm:$0xff] %v4711_v38  }
 0x416   : > { %4810 = vst [vmem:[#allocation3 + $0x388] sm:$0xff] %v4713_v14  }
 0x417   : > { %4812 = vst [vmem:[#allocation3 + $0x390] sm:$0xff] %v4715_v56  }
 0x418   : > { %4814 = vst [vmem:[#allocation3 + $0x398] sm:$0xff] %v4717_v8  }
 0x419   : > { %4816 = vst [vmem:[#allocation3 + $0x3a0] sm:$0xff] %v4719_v11  }
 0x41a   : > { %4818 = vst [vmem:[#allocation3 + $0x3a8] sm:$0xff] %v4721_v63  }
 0x41b   : > { %4820 = vst [vmem:[#allocation3 + $0x3b0] sm:$0xff] %v4723_v4  }
 0x41c   : > { %4822 = vst [vmem:[#allocation3 + $0x3b8] sm:$0xff] %v4725_v44  }
 0x41d   : > { %4824 = vst [vmem:[#allocation3 + $0x3c0] sm:$0xff] %v4727_v53  }
 0x41e   : > { %4826 = vst [vmem:[#allocation3 + $0x3c8] sm:$0xff] %v4729_v33  }
 0x41f   : > { %4828 = vst [vmem:[#allocation3 + $0x3d0] sm:$0xff] %v4731_v5  }
 0x420   : > { %4830 = vst [vmem:[#allocation3 + $0x3d8] sm:$0xff] %v4733_v29  }
 0x421   : > { %4832 = vst [vmem:[#allocation3 + $0x3e0] sm:$0xff] %v4735_v9  }
 0x422   : > { %4834 = vst [vmem:[#allocation3 + $0x3e8] sm:$0xff] %v4737_v55  }
 0x423   : > { %4836 = vst [vmem:[#allocation3 + $0x3f0] sm:$0xff] %v4739_v61  }
 0x424   : > { %4838 = vst [vmem:[#allocation3 + $0x3f8] sm:$0xff] %v4741_v36  }
 0x425   : > { %4840 = vst [vmem:[#allocation3 + $0x400] sm:$0xff] %v4743_v19  }
 0x426   : > { %4842 = vst [vmem:[#allocation3 + $0x408] sm:$0xff] %v4745_v0  }
 0x427   : > { %4844 = vst [vmem:[#allocation3 + $0x410] sm:$0xff] %v4747_v18  }
 0x428   : > { %4846 = vst [vmem:[#allocation3 + $0x418] sm:$0xff] %v4749_v52  }
 0x429   : > { %4848 = vst [vmem:[#allocation3 + $0x420] sm:$0xff] %v4751_v6  }
 0x42a   : > { %4850 = vst [vmem:[#allocation3 + $0x428] sm:$0xff] %v4753_v13  }
 0x42b   : > { %4852 = vst [vmem:[#allocation3 + $0x430] sm:$0xff] %v4755_v27  }
 0x42c   : > { %4854 = vst [vmem:[#allocation3 + $0x438] sm:$0xff] %v4757_v32  }
 0x42d   : > { %4856 = vst [vmem:[#allocation3 + $0x440] sm:$0xff] %v4759_v23  }
 0x42e   : > { %4858 = vst [vmem:[#allocation3 + $0x448] sm:$0xff] %v4761_v25  }
 0x42f   : > { %4860 = vst [vmem:[#allocation3 + $0x450] sm:$0xff] %v4763_v48  }
 0x430   : > { %4862 = vst [vmem:[#allocation3 + $0x458] sm:$0xff] %v4765_v51  }
 0x431   : > { %4864 = vst [vmem:[#allocation3 + $0x460] sm:$0xff] %v4767_v42  }
 0x432   : > { %4866 = vst [vmem:[#allocation3 + $0x468] sm:$0xff] %v4769_v17  }
 0x433   : > { %4868 = vst [vmem:[#allocation3 + $0x470] sm:$0xff] %v4771_v3  }
 0x434   : > { %4870 = vst [vmem:[#allocation3 + $0x478] sm:$0xff] %v4773_v15  }
 0x435 PF: > { %p10825_p10 = scmp.ne.s32.totalorder %s13012_s22, 3 }
 0x437   : > { %4875 = sbr.rel (%p10825_p10) target bundleno = 1352 (0x548), region = 44 }
 0x43c   : > { %v4876_v41 = vld [vmem:[#allocation2] sm:$0xc]  ;;  %v4877_v45 = vld [vmem:[#allocation2 + $0x4] sm:$0xf]  ;;  %vm5164_vm9 = vcmask 1041408   ;;  %vm5165_vm10 = vcmask 1045508  }
 0x43d   : > { %vm15578_vm11 = vmor %vm5164_vm9, %vm5165_vm10  ;;  %v10826_v2 = vrot.slane %v4876_v41, 10  ;;  %v5169_v16 = vrot.slane %v4877_v45, 6  ;;  %v4878_v57 = vld [vmem:[#allocation2 + $0x8] sm:$0x3]  ;;  %v4879_v54 = vld [vmem:[#allocation2 + $0x18] sm:$0xc] }
 0x43e   : > { %v5172_v1 = vrot.slane %v4878_v57, 6  ;;  %v4880_v50 = vld [vmem:[#allocation2 + $0x1c] sm:$0xf]  ;;  %v10827_v58 = vrot.slane %v4879_v54, 10  ;;  %v4881_v12 = vld [vmem:[#allocation2 + $0x20] sm:$0x3] }
 0x43f   : > { %v5170_v62 = vsel %vm15578_vm11, %v10826_v2, %v5169_v16  ;;  %v5171_v49 = vrot.slane %v5169_v16, 4  ;;  %v5176_v35 = vrot.slane %v4880_v50, 6  ;;  %v5179_v37 = vrot.slane %v4881_v12, 6  ;;  %v4882_v22 = vld [vmem:[#allocation2 + $0x30] sm:$0xc] }
 0x440   : > { %5599 = vst [vmem:[#allocation3] sm:$0xf] %v5170_v62  ;;  %v4883_v24 = vld [vmem:[#allocation2 + $0x34] sm:$0xf]  ;;  %v10828_v20 = vrot.slane %v4882_v22, 10 }
 0x441   : > { %v5173_v7 = vsel %vm15578_vm11, %v5171_v49, %v5172_v1  ;;  %v5177_v46 = vsel %vm15578_vm11, %v10827_v58, %v5176_v35  ;;  %v5178_v21 = vrot.slane %v5176_v35, 4  ;;  %v5183_v59 = vrot.slane %v4883_v24, 6  ;;  %v4884_v31 = vld [vmem:[#allocation2 + $0x38] sm:$0x3]  ;;  %v4885_v10 = vld [vmem:[#allocation2 + $0x48] sm:$0xc] }
 0x442   : > { %5600 = vst [vmem:[#allocation3 + $0x4] sm:$0xf] %v5173_v7  ;;  %v5186_v26 = vrot.slane %v4884_v31, 6  ;;  %v4886_v28 = vld [vmem:[#allocation2 + $0x4c] sm:$0xf]  ;;  %v10829_v34 = vrot.slane %v4885_v10, 10 }
 0x443   : > { %5601 = vst [vmem:[#allocation3 + $0x8] sm:$0xf] %v5177_v46  ;;  %v5180_v30 = vsel %vm15578_vm11, %v5178_v21, %v5179_v37  ;;  %v5184_v40 = vsel %vm15578_vm11, %v10828_v20, %v5183_v59  ;;  %v5185_v60 = vrot.slane %v5183_v59, 4  ;;  %v5190_v47 = vrot.slane %v4886_v28, 6  ;;  %v4887_v39 = vld [vmem:[#allocation2 + $0x50] sm:$0x3] }
 0x444   : > { %5602 = vst [vmem:[#allocation3 + $0xc] sm:$0xf] %v5180_v30  ;;  %v5193_v38 = vrot.slane %v4887_v39, 6  ;;  %v4888_v14 = vld [vmem:[#allocation2 + $0x60] sm:$0xc] }
 0x445   : > { %5603 = vst [vmem:[#allocation3 + $0x10] sm:$0xf] %v5184_v40  ;;  %v5187_v56 = vsel %vm15578_vm11, %v5185_v60, %v5186_v26  ;;  %v5191_v8 = vsel %vm15578_vm11, %v10829_v34, %v5190_v47  ;;  %v5192_v11 = vrot.slane %v5190_v47, 4  ;;  %v4889_v63 = vld [vmem:[#allocation2 + $0x64] sm:$0xf]  ;;  %v10830_v4 = vrot.slane %v4888_v14, 10 }
 0x446   : > { %5604 = vst [vmem:[#allocation3 + $0x14] sm:$0xf] %v5187_v56  ;;  %v5197_v44 = vrot.slane %v4889_v63, 6  ;;  %v4890_v53 = vld [vmem:[#allocation2 + $0x68] sm:$0x3] }
 0x447   : > { %5605 = vst [vmem:[#allocation3 + $0x18] sm:$0xf] %v5191_v8  ;;  %v5194_v33 = vsel %vm15578_vm11, %v5192_v11, %v5193_v38  ;;  %v5200_v5 = vrot.slane %v4890_v53, 6  ;;  %v4891_v29 = vld [vmem:[#allocation2 + $0x78] sm:$0xc] }
 0x448   : > { %5606 = vst [vmem:[#allocation3 + $0x1c] sm:$0xf] %v5194_v33  ;;  %v5198_v9 = vsel %vm15578_vm11, %v10830_v4, %v5197_v44  ;;  %v5199_v55 = vrot.slane %v5197_v44, 4  ;;  %v4892_v61 = vld [vmem:[#allocation2 + $0x7c] sm:$0xf]  ;;  %v10831_v36 = vrot.slane %v4891_v29, 10 }
 0x449   : > { %5607 = vst [vmem:[#allocation3 + $0x20] sm:$0xf] %v5198_v9  ;;  %v5204_v19 = vrot.slane %v4892_v61, 6  ;;  %v4893_v0 = vld [vmem:[#allocation2 + $0x80] sm:$0x3] }
 0x44a   : > { %v5201_v18 = vsel %vm15578_vm11, %v5199_v55, %v5200_v5  ;;  %v5207_v52 = vrot.slane %v4893_v0, 6  ;;  %v4894_v6 = vld [vmem:[#allocation2 + $0x90] sm:$0xc]  ;;  %v4895_v13 = vld [vmem:[#allocation2 + $0x94] sm:$0xf] }
 0x44b   : > { %5608 = vst [vmem:[#allocation3 + $0x24] sm:$0xf] %v5201_v18  ;;  %v5205_v27 = vsel %vm15578_vm11, %v10831_v36, %v5204_v19  ;;  %v5206_v32 = vrot.slane %v5204_v19, 4  ;;  %v10832_v23 = vrot.slane %v4894_v6, 10  ;;  %v5211_v25 = vrot.slane %v4895_v13, 6 }
 0x44c   : > { %5609 = vst [vmem:[#allocation3 + $0x28] sm:$0xf] %v5205_v27  ;;  %v4896_v48 = vld [vmem:[#allocation2 + $0x98] sm:$0x3]  ;;  %v4897_v51 = vld [vmem:[#allocation2 + $0xa8] sm:$0xc] }
 0x44d   : > { %v5208_v42 = vsel %vm15578_vm11, %v5206_v32, %v5207_v52  ;;  %v5212_v17 = vsel %vm15578_vm11, %v10832_v23, %v5211_v25  ;;  %v5213_v3 = vrot.slane %v5211_v25, 4  ;;  %v5214_v15 = vrot.slane %v4896_v48, 6  ;;  %v4898_v41 = vld [vmem:[#allocation2 + $0xac] sm:$0xf]  ;;  %v4899_v45 = vld [vmem:[#allocation2 + $0xb0] sm:$0x3] }
 0x44e   : > { %5610 = vst [vmem:[#allocation3 + $0x2c] sm:$0xf] %v5208_v42  ;;  %v10833_v2 = vrot.slane %v4897_v51, 10  ;;  %v5218_v16 = vrot.slane %v4898_v41, 6  ;;  %v5221_v57 = vrot.slane %v4899_v45, 6 }
 0x44f   : > { %5611 = vst [vmem:[#allocation3 + $0x30] sm:$0xf] %v5212_v17  ;;  %v5215_v54 = vsel %vm15578_vm11, %v5213_v3, %v5214_v15  ;;  %v4900_v1 = vld [vmem:[#allocation2 + $0xc0] sm:$0xc]  ;;  %v4901_v50 = vld [vmem:[#allocation2 + $0xc4] sm:$0xf] }
 0x450   : > { %5612 = vst [vmem:[#allocation3 + $0x34] sm:$0xf] %v5215_v54  ;;  %v5219_v58 = vsel %vm15578_vm11, %v10833_v2, %v5218_v16  ;;  %v5220_v12 = vrot.slane %v5218_v16, 4  ;;  %v10834_v62 = vrot.slane %v4900_v1, 10  ;;  %v5225_v49 = vrot.slane %v4901_v50, 6 }
 0x451   : > { %5613 = vst [vmem:[#allocation3 + $0x38] sm:$0xf] %v5219_v58  ;;  %v4902_v35 = vld [vmem:[#allocation2 + $0xc8] sm:$0x3]  ;;  %v4903_v37 = vld [vmem:[#allocation2 + $0xd8] sm:$0xc] }
 0x452   : > { %v5222_v22 = vsel %vm15578_vm11, %v5220_v12, %v5221_v57  ;;  %v5226_v24 = vsel %vm15578_vm11, %v10834_v62, %v5225_v49  ;;  %v5227_v20 = vrot.slane %v5225_v49, 4  ;;  %v5228_v7 = vrot.slane %v4902_v35, 6  ;;  %v4904_v46 = vld [vmem:[#allocation2 + $0xdc] sm:$0xf]  ;;  %v4905_v21 = vld [vmem:[#allocation2 + $0xe0] sm:$0x3] }
 0x453   : > { %5614 = vst [vmem:[#allocation3 + $0x3c] sm:$0xf] %v5222_v22  ;;  %v10835_v59 = vrot.slane %v4903_v37, 10  ;;  %v5232_v31 = vrot.slane %v4904_v46, 6  ;;  %v5235_v10 = vrot.slane %v4905_v21, 6 }
 0x454   : > { %5615 = vst [vmem:[#allocation3 + $0x40] sm:$0xf] %v5226_v24  ;;  %v5229_v26 = vsel %vm15578_vm11, %v5227_v20, %v5228_v7  ;;  %v4906_v28 = vld [vmem:[#allocation2 + $0xf0] sm:$0xc]  ;;  %v4907_v34 = vld [vmem:[#allocation2 + $0xf4] sm:$0xf] }
 0x455   : > { %5616 = vst [vmem:[#allocation3 + $0x44] sm:$0xf] %v5229_v26  ;;  %v5233_v30 = vsel %vm15578_vm11, %v10835_v59, %v5232_v31  ;;  %v5234_v40 = vrot.slane %v5232_v31, 4  ;;  %v10836_v60 = vrot.slane %v4906_v28, 10  ;;  %v5239_v47 = vrot.slane %v4907_v34, 6 }
 0x456   : > { %5617 = vst [vmem:[#allocation3 + $0x48] sm:$0xf] %v5233_v30  ;;  %v4908_v39 = vld [vmem:[#allocation2 + $0xf8] sm:$0x3]  ;;  %v4909_v38 = vld [vmem:[#allocation2 + $0x108] sm:$0xc] }
 0x457   : > { %v5236_v14 = vsel %vm15578_vm11, %v5234_v40, %v5235_v10  ;;  %v5240_v56 = vsel %vm15578_vm11, %v10836_v60, %v5239_v47  ;;  %v5241_v8 = vrot.slane %v5239_v47, 4  ;;  %v5242_v11 = vrot.slane %v4908_v39, 6  ;;  %v4910_v63 = vld [vmem:[#allocation2 + $0x10c] sm:$0xf]  ;;  %v4911_v4 = vld [vmem:[#allocation2 + $0x110] sm:$0x3] }
 0x458   : > { %5618 = vst [vmem:[#allocation3 + $0x4c] sm:$0xf] %v5236_v14  ;;  %v10837_v44 = vrot.slane %v4909_v38, 10  ;;  %v5246_v53 = vrot.slane %v4910_v63, 6  ;;  %v5249_v33 = vrot.slane %v4911_v4, 6 }
 0x459   : > { %5619 = vst [vmem:[#allocation3 + $0x50] sm:$0xf] %v5240_v56  ;;  %v5243_v5 = vsel %vm15578_vm11, %v5241_v8, %v5242_v11  ;;  %v4912_v29 = vld [vmem:[#allocation2 + $0x120] sm:$0xc]  ;;  %v4913_v9 = vld [vmem:[#allocation2 + $0x124] sm:$0xf] }
 0x45a   : > { %5620 = vst [vmem:[#allocation3 + $0x54] sm:$0xf] %v5243_v5  ;;  %v5247_v55 = vsel %vm15578_vm11, %v10837_v44, %v5246_v53  ;;  %v5248_v61 = vrot.slane %v5246_v53, 4  ;;  %v10838_v36 = vrot.slane %v4912_v29, 10  ;;  %v5253_v19 = vrot.slane %v4913_v9, 6 }
 0x45b   : > { %5621 = vst [vmem:[#allocation3 + $0x58] sm:$0xf] %v5247_v55  ;;  %v4914_v0 = vld [vmem:[#allocation2 + $0x128] sm:$0x3]  ;;  %v4915_v18 = vld [vmem:[#allocation2 + $0x138] sm:$0xc] }
 0x45c   : > { %v5250_v52 = vsel %vm15578_vm11, %v5248_v61, %v5249_v33  ;;  %v5254_v6 = vsel %vm15578_vm11, %v10838_v36, %v5253_v19  ;;  %v5255_v13 = vrot.slane %v5253_v19, 4  ;;  %v5256_v27 = vrot.slane %v4914_v0, 6  ;;  %v4916_v32 = vld [vmem:[#allocation2 + $0x13c] sm:$0xf]  ;;  %v4917_v23 = vld [vmem:[#allocation2 + $0x140] sm:$0x3] }
 0x45d   : > { %5622 = vst [vmem:[#allocation3 + $0x5c] sm:$0xf] %v5250_v52  ;;  %v10839_v25 = vrot.slane %v4915_v18, 10  ;;  %v5260_v48 = vrot.slane %v4916_v32, 6  ;;  %v5263_v51 = vrot.slane %v4917_v23, 6 }
 0x45e   : > { %5623 = vst [vmem:[#allocation3 + $0x60] sm:$0xf] %v5254_v6  ;;  %v5257_v42 = vsel %vm15578_vm11, %v5255_v13, %v5256_v27  ;;  %v4918_v17 = vld [vmem:[#allocation2 + $0x150] sm:$0xc]  ;;  %v4919_v3 = vld [vmem:[#allocation2 + $0x154] sm:$0xf] }
 0x45f   : > { %5624 = vst [vmem:[#allocation3 + $0x64] sm:$0xf] %v5257_v42  ;;  %v5261_v15 = vsel %vm15578_vm11, %v10839_v25, %v5260_v48  ;;  %v5262_v41 = vrot.slane %v5260_v48, 4  ;;  %v10840_v45 = vrot.slane %v4918_v17, 10  ;;  %v5267_v2 = vrot.slane %v4919_v3, 6 }
 0x460   : > { %5625 = vst [vmem:[#allocation3 + $0x68] sm:$0xf] %v5261_v15  ;;  %v4920_v16 = vld [vmem:[#allocation2 + $0x158] sm:$0x3]  ;;  %v4921_v57 = vld [vmem:[#allocation2 + $0x168] sm:$0xc] }
 0x461   : > { %v5264_v54 = vsel %vm15578_vm11, %v5262_v41, %v5263_v51  ;;  %v5268_v1 = vsel %vm15578_vm11, %v10840_v45, %v5267_v2  ;;  %v5269_v50 = vrot.slane %v5267_v2, 4  ;;  %v5270_v58 = vrot.slane %v4920_v16, 6  ;;  %v4922_v12 = vld [vmem:[#allocation2 + $0x16c] sm:$0xf]  ;;  %v4923_v62 = vld [vmem:[#allocation2 + $0x170] sm:$0x3] }
 0x462   : > { %5626 = vst [vmem:[#allocation3 + $0x6c] sm:$0xf] %v5264_v54  ;;  %v10841_v49 = vrot.slane %v4921_v57, 10  ;;  %v5274_v35 = vrot.slane %v4922_v12, 6  ;;  %v5277_v37 = vrot.slane %v4923_v62, 6 }
 0x463   : > { %5627 = vst [vmem:[#allocation3 + $0x70] sm:$0xf] %v5268_v1  ;;  %v5271_v22 = vsel %vm15578_vm11, %v5269_v50, %v5270_v58  ;;  %v4924_v24 = vld [vmem:[#allocation2 + $0x180] sm:$0xc]  ;;  %v4925_v20 = vld [vmem:[#allocation2 + $0x184] sm:$0xf] }
 0x464   : > { %5628 = vst [vmem:[#allocation3 + $0x74] sm:$0xf] %v5271_v22  ;;  %v5275_v7 = vsel %vm15578_vm11, %v10841_v49, %v5274_v35  ;;  %v5276_v46 = vrot.slane %v5274_v35, 4  ;;  %v10842_v21 = vrot.slane %v4924_v24, 10  ;;  %v5281_v59 = vrot.slane %v4925_v20, 6 }
 0x465   : > { %5629 = vst [vmem:[#allocation3 + $0x78] sm:$0xf] %v5275_v7  ;;  %v4926_v31 = vld [vmem:[#allocation2 + $0x188] sm:$0x3]  ;;  %v4927_v10 = vld [vmem:[#allocation2 + $0x198] sm:$0xc] }
 0x466   : > { %v5278_v26 = vsel %vm15578_vm11, %v5276_v46, %v5277_v37  ;;  %v5282_v28 = vsel %vm15578_vm11, %v10842_v21, %v5281_v59  ;;  %v5283_v34 = vrot.slane %v5281_v59, 4  ;;  %v5284_v30 = vrot.slane %v4926_v31, 6  ;;  %v4928_v40 = vld [vmem:[#allocation2 + $0x19c] sm:$0xf]  ;;  %v4929_v60 = vld [vmem:[#allocation2 + $0x1a0] sm:$0x3] }
 0x467   : > { %5630 = vst [vmem:[#allocation3 + $0x7c] sm:$0xf] %v5278_v26  ;;  %v10843_v47 = vrot.slane %v4927_v10, 10  ;;  %v5288_v39 = vrot.slane %v4928_v40, 6  ;;  %v5291_v38 = vrot.slane %v4929_v60, 6 }
 0x468   : > { %5631 = vst [vmem:[#allocation3 + $0x80] sm:$0xf] %v5282_v28  ;;  %v5285_v14 = vsel %vm15578_vm11, %v5283_v34, %v5284_v30  ;;  %v4930_v56 = vld [vmem:[#allocation2 + $0x1b0] sm:$0xc]  ;;  %v4931_v8 = vld [vmem:[#allocation2 + $0x1b4] sm:$0xf] }
 0x469   : > { %5632 = vst [vmem:[#allocation3 + $0x84] sm:$0xf] %v5285_v14  ;;  %v5289_v11 = vsel %vm15578_vm11, %v10843_v47, %v5288_v39  ;;  %v5290_v63 = vrot.slane %v5288_v39, 4  ;;  %v10844_v4 = vrot.slane %v4930_v56, 10  ;;  %v5295_v44 = vrot.slane %v4931_v8, 6 }
 0x46a   : > { %5633 = vst [vmem:[#allocation3 + $0x88] sm:$0xf] %v5289_v11  ;;  %v4932_v53 = vld [vmem:[#allocation2 + $0x1b8] sm:$0x3]  ;;  %v4933_v33 = vld [vmem:[#allocation2 + $0x1c8] sm:$0xc] }
 0x46b   : > { %v5292_v5 = vsel %vm15578_vm11, %v5290_v63, %v5291_v38  ;;  %v5296_v29 = vsel %vm15578_vm11, %v10844_v4, %v5295_v44  ;;  %v5297_v9 = vrot.slane %v5295_v44, 4  ;;  %v5298_v55 = vrot.slane %v4932_v53, 6  ;;  %v4934_v61 = vld [vmem:[#allocation2 + $0x1cc] sm:$0xf]  ;;  %v4935_v36 = vld [vmem:[#allocation2 + $0x1d0] sm:$0x3] }
 0x46c   : > { %5634 = vst [vmem:[#allocation3 + $0x8c] sm:$0xf] %v5292_v5  ;;  %v10845_v19 = vrot.slane %v4933_v33, 10  ;;  %v5302_v0 = vrot.slane %v4934_v61, 6  ;;  %v5305_v18 = vrot.slane %v4935_v36, 6 }
 0x46d   : > { %5635 = vst [vmem:[#allocation3 + $0x90] sm:$0xf] %v5296_v29  ;;  %v5299_v52 = vsel %vm15578_vm11, %v5297_v9, %v5298_v55  ;;  %v4936_v6 = vld [vmem:[#allocation2 + $0x1e0] sm:$0xc]  ;;  %v4937_v13 = vld [vmem:[#allocation2 + $0x1e4] sm:$0xf] }
 0x46e   : > { %5636 = vst [vmem:[#allocation3 + $0x94] sm:$0xf] %v5299_v52  ;;  %v5303_v27 = vsel %vm15578_vm11, %v10845_v19, %v5302_v0  ;;  %v5304_v32 = vrot.slane %v5302_v0, 4  ;;  %v10846_v23 = vrot.slane %v4936_v6, 10  ;;  %v5309_v25 = vrot.slane %v4937_v13, 6 }
 0x46f   : > { %5637 = vst [vmem:[#allocation3 + $0x98] sm:$0xf] %v5303_v27  ;;  %v4938_v48 = vld [vmem:[#allocation2 + $0x1e8] sm:$0x3]  ;;  %v4939_v51 = vld [vmem:[#allocation2 + $0x1f8] sm:$0xc] }
 0x470   : > { %v5306_v42 = vsel %vm15578_vm11, %v5304_v32, %v5305_v18  ;;  %v5310_v17 = vsel %vm15578_vm11, %v10846_v23, %v5309_v25  ;;  %v5311_v3 = vrot.slane %v5309_v25, 4  ;;  %v5312_v15 = vrot.slane %v4938_v48, 6  ;;  %v4940_v41 = vld [vmem:[#allocation2 + $0x1fc] sm:$0xf]  ;;  %v4941_v45 = vld [vmem:[#allocation2 + $0x200] sm:$0x3] }
 0x471   : > { %5638 = vst [vmem:[#allocation3 + $0x9c] sm:$0xf] %v5306_v42  ;;  %v10847_v2 = vrot.slane %v4939_v51, 10  ;;  %v5316_v16 = vrot.slane %v4940_v41, 6  ;;  %v5319_v57 = vrot.slane %v4941_v45, 6 }
 0x472   : > { %5639 = vst [vmem:[#allocation3 + $0xa0] sm:$0xf] %v5310_v17  ;;  %v5313_v54 = vsel %vm15578_vm11, %v5311_v3, %v5312_v15  ;;  %v4942_v1 = vld [vmem:[#allocation2 + $0x210] sm:$0xc]  ;;  %v4943_v50 = vld [vmem:[#allocation2 + $0x214] sm:$0xf] }
 0x473   : > { %5640 = vst [vmem:[#allocation3 + $0xa4] sm:$0xf] %v5313_v54  ;;  %v5317_v58 = vsel %vm15578_vm11, %v10847_v2, %v5316_v16  ;;  %v5318_v12 = vrot.slane %v5316_v16, 4  ;;  %v10848_v62 = vrot.slane %v4942_v1, 10  ;;  %v5323_v49 = vrot.slane %v4943_v50, 6 }
 0x474   : > { %5641 = vst [vmem:[#allocation3 + $0xa8] sm:$0xf] %v5317_v58  ;;  %v4944_v35 = vld [vmem:[#allocation2 + $0x218] sm:$0x3]  ;;  %v4945_v37 = vld [vmem:[#allocation2 + $0x228] sm:$0xc] }
 0x475   : > { %v5320_v22 = vsel %vm15578_vm11, %v5318_v12, %v5319_v57  ;;  %v5324_v24 = vsel %vm15578_vm11, %v10848_v62, %v5323_v49  ;;  %v5325_v20 = vrot.slane %v5323_v49, 4  ;;  %v5326_v7 = vrot.slane %v4944_v35, 6  ;;  %v4946_v46 = vld [vmem:[#allocation2 + $0x22c] sm:$0xf]  ;;  %v4947_v21 = vld [vmem:[#allocation2 + $0x230] sm:$0x3] }
 0x476   : > { %5642 = vst [vmem:[#allocation3 + $0xac] sm:$0xf] %v5320_v22  ;;  %v10849_v59 = vrot.slane %v4945_v37, 10  ;;  %v5330_v31 = vrot.slane %v4946_v46, 6  ;;  %v5333_v10 = vrot.slane %v4947_v21, 6 }
 0x477   : > { %5643 = vst [vmem:[#allocation3 + $0xb0] sm:$0xf] %v5324_v24  ;;  %v5327_v26 = vsel %vm15578_vm11, %v5325_v20, %v5326_v7  ;;  %v4948_v28 = vld [vmem:[#allocation2 + $0x240] sm:$0xc]  ;;  %v4949_v34 = vld [vmem:[#allocation2 + $0x244] sm:$0xf] }
 0x478   : > { %5644 = vst [vmem:[#allocation3 + $0xb4] sm:$0xf] %v5327_v26  ;;  %v5331_v30 = vsel %vm15578_vm11, %v10849_v59, %v5330_v31  ;;  %v5332_v40 = vrot.slane %v5330_v31, 4  ;;  %v10850_v60 = vrot.slane %v4948_v28, 10  ;;  %v5337_v47 = vrot.slane %v4949_v34, 6 }
 0x479   : > { %5645 = vst [vmem:[#allocation3 + $0xb8] sm:$0xf] %v5331_v30  ;;  %v4950_v39 = vld [vmem:[#allocation2 + $0x248] sm:$0x3]  ;;  %v4951_v38 = vld [vmem:[#allocation2 + $0x258] sm:$0xc] }
 0x47a   : > { %v5334_v14 = vsel %vm15578_vm11, %v5332_v40, %v5333_v10  ;;  %v5338_v56 = vsel %vm15578_vm11, %v10850_v60, %v5337_v47  ;;  %v5339_v8 = vrot.slane %v5337_v47, 4  ;;  %v5340_v11 = vrot.slane %v4950_v39, 6  ;;  %v4952_v63 = vld [vmem:[#allocation2 + $0x25c] sm:$0xf]  ;;  %v4953_v4 = vld [vmem:[#allocation2 + $0x260] sm:$0x3] }
 0x47b   : > { %5646 = vst [vmem:[#allocation3 + $0xbc] sm:$0xf] %v5334_v14  ;;  %v10851_v44 = vrot.slane %v4951_v38, 10  ;;  %v5344_v53 = vrot.slane %v4952_v63, 6  ;;  %v5347_v33 = vrot.slane %v4953_v4, 6 }
 0x47c   : > { %5647 = vst [vmem:[#allocation3 + $0xc0] sm:$0xf] %v5338_v56  ;;  %v5341_v5 = vsel %vm15578_vm11, %v5339_v8, %v5340_v11  ;;  %v4954_v29 = vld [vmem:[#allocation2 + $0x270] sm:$0xc]  ;;  %v4955_v9 = vld [vmem:[#allocation2 + $0x274] sm:$0xf] }
 0x47d   : > { %5648 = vst [vmem:[#allocation3 + $0xc4] sm:$0xf] %v5341_v5  ;;  %v5345_v55 = vsel %vm15578_vm11, %v10851_v44, %v5344_v53  ;;  %v5346_v61 = vrot.slane %v5344_v53, 4  ;;  %v10852_v36 = vrot.slane %v4954_v29, 10  ;;  %v5351_v19 = vrot.slane %v4955_v9, 6 }
 0x47e   : > { %5649 = vst [vmem:[#allocation3 + $0xc8] sm:$0xf] %v5345_v55  ;;  %v4956_v0 = vld [vmem:[#allocation2 + $0x278] sm:$0x3]  ;;  %v4957_v18 = vld [vmem:[#allocation2 + $0x288] sm:$0xc] }
 0x47f   : > { %v5348_v52 = vsel %vm15578_vm11, %v5346_v61, %v5347_v33  ;;  %v5352_v6 = vsel %vm15578_vm11, %v10852_v36, %v5351_v19  ;;  %v5353_v13 = vrot.slane %v5351_v19, 4  ;;  %v5354_v27 = vrot.slane %v4956_v0, 6  ;;  %v4958_v32 = vld [vmem:[#allocation2 + $0x28c] sm:$0xf]  ;;  %v4959_v23 = vld [vmem:[#allocation2 + $0x290] sm:$0x3] }
 0x480   : > { %5650 = vst [vmem:[#allocation3 + $0xcc] sm:$0xf] %v5348_v52  ;;  %v10853_v25 = vrot.slane %v4957_v18, 10  ;;  %v5358_v48 = vrot.slane %v4958_v32, 6  ;;  %v5361_v51 = vrot.slane %v4959_v23, 6 }
 0x481   : > { %5651 = vst [vmem:[#allocation3 + $0xd0] sm:$0xf] %v5352_v6  ;;  %v5355_v42 = vsel %vm15578_vm11, %v5353_v13, %v5354_v27  ;;  %v4960_v17 = vld [vmem:[#allocation2 + $0x2a0] sm:$0xc]  ;;  %v4961_v3 = vld [vmem:[#allocation2 + $0x2a4] sm:$0xf] }
 0x482   : > { %5652 = vst [vmem:[#allocation3 + $0xd4] sm:$0xf] %v5355_v42  ;;  %v5359_v15 = vsel %vm15578_vm11, %v10853_v25, %v5358_v48  ;;  %v5360_v41 = vrot.slane %v5358_v48, 4  ;;  %v10854_v45 = vrot.slane %v4960_v17, 10  ;;  %v5365_v2 = vrot.slane %v4961_v3, 6 }
 0x483   : > { %5653 = vst [vmem:[#allocation3 + $0xd8] sm:$0xf] %v5359_v15  ;;  %v4962_v16 = vld [vmem:[#allocation2 + $0x2a8] sm:$0x3]  ;;  %v4963_v57 = vld [vmem:[#allocation2 + $0x2b8] sm:$0xc] }
 0x484   : > { %v5362_v54 = vsel %vm15578_vm11, %v5360_v41, %v5361_v51  ;;  %v5366_v1 = vsel %vm15578_vm11, %v10854_v45, %v5365_v2  ;;  %v5367_v50 = vrot.slane %v5365_v2, 4  ;;  %v5368_v58 = vrot.slane %v4962_v16, 6  ;;  %v4964_v12 = vld [vmem:[#allocation2 + $0x2bc] sm:$0xf]  ;;  %v4965_v62 = vld [vmem:[#allocation2 + $0x2c0] sm:$0x3] }
 0x485   : > { %5654 = vst [vmem:[#allocation3 + $0xdc] sm:$0xf] %v5362_v54  ;;  %v10855_v49 = vrot.slane %v4963_v57, 10  ;;  %v5372_v35 = vrot.slane %v4964_v12, 6  ;;  %v5375_v37 = vrot.slane %v4965_v62, 6 }
 0x486   : > { %5655 = vst [vmem:[#allocation3 + $0xe0] sm:$0xf] %v5366_v1  ;;  %v5369_v22 = vsel %vm15578_vm11, %v5367_v50, %v5368_v58  ;;  %v4966_v24 = vld [vmem:[#allocation2 + $0x2d0] sm:$0xc]  ;;  %v4967_v20 = vld [vmem:[#allocation2 + $0x2d4] sm:$0xf] }
 0x487   : > { %5656 = vst [vmem:[#allocation3 + $0xe4] sm:$0xf] %v5369_v22  ;;  %v5373_v7 = vsel %vm15578_vm11, %v10855_v49, %v5372_v35  ;;  %v5374_v46 = vrot.slane %v5372_v35, 4  ;;  %v10856_v21 = vrot.slane %v4966_v24, 10  ;;  %v5379_v59 = vrot.slane %v4967_v20, 6 }
 0x488   : > { %5657 = vst [vmem:[#allocation3 + $0xe8] sm:$0xf] %v5373_v7  ;;  %v4968_v31 = vld [vmem:[#allocation2 + $0x2d8] sm:$0x3]  ;;  %v4969_v10 = vld [vmem:[#allocation2 + $0x2e8] sm:$0xc] }
 0x489   : > { %v5376_v26 = vsel %vm15578_vm11, %v5374_v46, %v5375_v37  ;;  %v5380_v28 = vsel %vm15578_vm11, %v10856_v21, %v5379_v59  ;;  %v5381_v34 = vrot.slane %v5379_v59, 4  ;;  %v5382_v30 = vrot.slane %v4968_v31, 6  ;;  %v4970_v40 = vld [vmem:[#allocation2 + $0x2ec] sm:$0xf]  ;;  %v4971_v60 = vld [vmem:[#allocation2 + $0x2f0] sm:$0x3] }
 0x48a   : > { %5658 = vst [vmem:[#allocation3 + $0xec] sm:$0xf] %v5376_v26  ;;  %v10857_v47 = vrot.slane %v4969_v10, 10  ;;  %v5386_v39 = vrot.slane %v4970_v40, 6  ;;  %v5389_v38 = vrot.slane %v4971_v60, 6 }
 0x48b   : > { %5659 = vst [vmem:[#allocation3 + $0xf0] sm:$0xf] %v5380_v28  ;;  %v5383_v14 = vsel %vm15578_vm11, %v5381_v34, %v5382_v30  ;;  %v4972_v56 = vld [vmem:[#allocation2 + $0x300] sm:$0xc]  ;;  %v4973_v8 = vld [vmem:[#allocation2 + $0x304] sm:$0xf] }
 0x48c   : > { %5660 = vst [vmem:[#allocation3 + $0xf4] sm:$0xf] %v5383_v14  ;;  %v5387_v11 = vsel %vm15578_vm11, %v10857_v47, %v5386_v39  ;;  %v5388_v63 = vrot.slane %v5386_v39, 4  ;;  %v10858_v4 = vrot.slane %v4972_v56, 10  ;;  %v5393_v44 = vrot.slane %v4973_v8, 6 }
 0x48d   : > { %5661 = vst [vmem:[#allocation3 + $0xf8] sm:$0xf] %v5387_v11  ;;  %v4974_v53 = vld [vmem:[#allocation2 + $0x308] sm:$0x3]  ;;  %v4975_v33 = vld [vmem:[#allocation2 + $0x318] sm:$0xc] }
 0x48e   : > { %v5390_v5 = vsel %vm15578_vm11, %v5388_v63, %v5389_v38  ;;  %v5394_v29 = vsel %vm15578_vm11, %v10858_v4, %v5393_v44  ;;  %v5395_v9 = vrot.slane %v5393_v44, 4  ;;  %v5396_v55 = vrot.slane %v4974_v53, 6  ;;  %v4976_v61 = vld [vmem:[#allocation2 + $0x31c] sm:$0xf]  ;;  %v4977_v36 = vld [vmem:[#allocation2 + $0x320] sm:$0x3] }
 0x48f   : > { %5662 = vst [vmem:[#allocation3 + $0xfc] sm:$0xf] %v5390_v5  ;;  %v10859_v19 = vrot.slane %v4975_v33, 10  ;;  %v5400_v0 = vrot.slane %v4976_v61, 6  ;;  %v5403_v18 = vrot.slane %v4977_v36, 6 }
 0x490   : > { %5663 = vst [vmem:[#allocation3 + $0x100] sm:$0xf] %v5394_v29  ;;  %v5397_v52 = vsel %vm15578_vm11, %v5395_v9, %v5396_v55  ;;  %v4978_v6 = vld [vmem:[#allocation2 + $0x330] sm:$0xc]  ;;  %v4979_v13 = vld [vmem:[#allocation2 + $0x334] sm:$0xf] }
 0x491   : > { %5664 = vst [vmem:[#allocation3 + $0x104] sm:$0xf] %v5397_v52  ;;  %v5401_v27 = vsel %vm15578_vm11, %v10859_v19, %v5400_v0  ;;  %v5402_v32 = vrot.slane %v5400_v0, 4  ;;  %v10860_v23 = vrot.slane %v4978_v6, 10  ;;  %v5407_v25 = vrot.slane %v4979_v13, 6 }
 0x492   : > { %5665 = vst [vmem:[#allocation3 + $0x108] sm:$0xf] %v5401_v27  ;;  %v4980_v48 = vld [vmem:[#allocation2 + $0x338] sm:$0x3]  ;;  %v4981_v51 = vld [vmem:[#allocation2 + $0x348] sm:$0xc] }
 0x493   : > { %v5404_v42 = vsel %vm15578_vm11, %v5402_v32, %v5403_v18  ;;  %v5408_v17 = vsel %vm15578_vm11, %v10860_v23, %v5407_v25  ;;  %v5409_v3 = vrot.slane %v5407_v25, 4  ;;  %v5410_v15 = vrot.slane %v4980_v48, 6  ;;  %v4982_v41 = vld [vmem:[#allocation2 + $0x34c] sm:$0xf]  ;;  %v4983_v45 = vld [vmem:[#allocation2 + $0x350] sm:$0x3] }
 0x494   : > { %5666 = vst [vmem:[#allocation3 + $0x10c] sm:$0xf] %v5404_v42  ;;  %v10861_v2 = vrot.slane %v4981_v51, 10  ;;  %v5414_v16 = vrot.slane %v4982_v41, 6  ;;  %v5417_v57 = vrot.slane %v4983_v45, 6 }
 0x495   : > { %5667 = vst [vmem:[#allocation3 + $0x110] sm:$0xf] %v5408_v17  ;;  %v5411_v54 = vsel %vm15578_vm11, %v5409_v3, %v5410_v15  ;;  %v4984_v1 = vld [vmem:[#allocation2 + $0x360] sm:$0xc]  ;;  %v4985_v50 = vld [vmem:[#allocation2 + $0x364] sm:$0xf] }
 0x496   : > { %5668 = vst [vmem:[#allocation3 + $0x114] sm:$0xf] %v5411_v54  ;;  %v5415_v58 = vsel %vm15578_vm11, %v10861_v2, %v5414_v16  ;;  %v5416_v12 = vrot.slane %v5414_v16, 4  ;;  %v10862_v62 = vrot.slane %v4984_v1, 10  ;;  %v5421_v49 = vrot.slane %v4985_v50, 6 }
 0x497   : > { %5669 = vst [vmem:[#allocation3 + $0x118] sm:$0xf] %v5415_v58  ;;  %v4986_v35 = vld [vmem:[#allocation2 + $0x368] sm:$0x3]  ;;  %v4987_v37 = vld [vmem:[#allocation2 + $0x378] sm:$0xc] }
 0x498   : > { %v5418_v22 = vsel %vm15578_vm11, %v5416_v12, %v5417_v57  ;;  %v5422_v24 = vsel %vm15578_vm11, %v10862_v62, %v5421_v49  ;;  %v5423_v20 = vrot.slane %v5421_v49, 4  ;;  %v5424_v7 = vrot.slane %v4986_v35, 6  ;;  %v4988_v46 = vld [vmem:[#allocation2 + $0x37c] sm:$0xf]  ;;  %v4989_v21 = vld [vmem:[#allocation2 + $0x380] sm:$0x3] }
 0x499   : > { %5670 = vst [vmem:[#allocation3 + $0x11c] sm:$0xf] %v5418_v22  ;;  %v10863_v59 = vrot.slane %v4987_v37, 10  ;;  %v5428_v31 = vrot.slane %v4988_v46, 6  ;;  %v5431_v10 = vrot.slane %v4989_v21, 6 }
 0x49a   : > { %5671 = vst [vmem:[#allocation3 + $0x120] sm:$0xf] %v5422_v24  ;;  %v5425_v26 = vsel %vm15578_vm11, %v5423_v20, %v5424_v7  ;;  %v4990_v28 = vld [vmem:[#allocation2 + $0x390] sm:$0xc]  ;;  %v4991_v34 = vld [vmem:[#allocation2 + $0x394] sm:$0xf] }
 0x49b   : > { %5672 = vst [vmem:[#allocation3 + $0x124] sm:$0xf] %v5425_v26  ;;  %v5429_v30 = vsel %vm15578_vm11, %v10863_v59, %v5428_v31  ;;  %v5430_v40 = vrot.slane %v5428_v31, 4  ;;  %v10864_v60 = vrot.slane %v4990_v28, 10  ;;  %v5435_v47 = vrot.slane %v4991_v34, 6 }
 0x49c   : > { %5673 = vst [vmem:[#allocation3 + $0x128] sm:$0xf] %v5429_v30  ;;  %v4992_v39 = vld [vmem:[#allocation2 + $0x398] sm:$0x3]  ;;  %v4993_v38 = vld [vmem:[#allocation2 + $0x3a8] sm:$0xc] }
 0x49d   : > { %v5432_v14 = vsel %vm15578_vm11, %v5430_v40, %v5431_v10  ;;  %v5436_v56 = vsel %vm15578_vm11, %v10864_v60, %v5435_v47  ;;  %v5437_v8 = vrot.slane %v5435_v47, 4  ;;  %v5438_v11 = vrot.slane %v4992_v39, 6  ;;  %v4994_v63 = vld [vmem:[#allocation2 + $0x3ac] sm:$0xf]  ;;  %v4995_v4 = vld [vmem:[#allocation2 + $0x3b0] sm:$0x3] }
 0x49e   : > { %5674 = vst [vmem:[#allocation3 + $0x12c] sm:$0xf] %v5432_v14  ;;  %v10865_v44 = vrot.slane %v4993_v38, 10  ;;  %v5442_v53 = vrot.slane %v4994_v63, 6  ;;  %v5445_v33 = vrot.slane %v4995_v4, 6 }
 0x49f   : > { %5675 = vst [vmem:[#allocation3 + $0x130] sm:$0xf] %v5436_v56  ;;  %v5439_v5 = vsel %vm15578_vm11, %v5437_v8, %v5438_v11  ;;  %v4996_v29 = vld [vmem:[#allocation2 + $0x3c0] sm:$0xc]  ;;  %v4997_v9 = vld [vmem:[#allocation2 + $0x3c4] sm:$0xf] }
 0x4a0   : > { %5676 = vst [vmem:[#allocation3 + $0x134] sm:$0xf] %v5439_v5  ;;  %v5443_v55 = vsel %vm15578_vm11, %v10865_v44, %v5442_v53  ;;  %v5444_v61 = vrot.slane %v5442_v53, 4  ;;  %v10866_v36 = vrot.slane %v4996_v29, 10  ;;  %v5449_v19 = vrot.slane %v4997_v9, 6 }
 0x4a1   : > { %5677 = vst [vmem:[#allocation3 + $0x138] sm:$0xf] %v5443_v55  ;;  %v4998_v0 = vld [vmem:[#allocation2 + $0x3c8] sm:$0x3]  ;;  %v4999_v18 = vld [vmem:[#allocation2 + $0x3d8] sm:$0xc] }
 0x4a2   : > { %v5446_v52 = vsel %vm15578_vm11, %v5444_v61, %v5445_v33  ;;  %v5450_v6 = vsel %vm15578_vm11, %v10866_v36, %v5449_v19  ;;  %v5451_v13 = vrot.slane %v5449_v19, 4  ;;  %v5452_v27 = vrot.slane %v4998_v0, 6  ;;  %v5000_v32 = vld [vmem:[#allocation2 + $0x3dc] sm:$0xf]  ;;  %v5001_v23 = vld [vmem:[#allocation2 + $0x3e0] sm:$0x3] }
 0x4a3   : > { %5678 = vst [vmem:[#allocation3 + $0x13c] sm:$0xf] %v5446_v52  ;;  %v10867_v25 = vrot.slane %v4999_v18, 10  ;;  %v5456_v48 = vrot.slane %v5000_v32, 6  ;;  %v5459_v51 = vrot.slane %v5001_v23, 6  ;;  %v5697_v32 = vld [vmem:[#allocation2 + $0x20] sm:$0xff]  }
 0x4a4   : > { %5679 = vst [vmem:[#allocation3 + $0x140] sm:$0xf] %v5450_v6  ;;  %v5453_v42 = vsel %vm15578_vm11, %v5451_v13, %v5452_v27  ;;  %v5002_v17 = vld [vmem:[#allocation2 + $0x3f0] sm:$0xc]  ;;  %v5003_v3 = vld [vmem:[#allocation2 + $0x3f4] sm:$0xf] }
 0x4a5   : > { %5680 = vst [vmem:[#allocation3 + $0x144] sm:$0xf] %v5453_v42  ;;  %v5457_v15 = vsel %vm15578_vm11, %v10867_v25, %v5456_v48  ;;  %v5458_v41 = vrot.slane %v5456_v48, 4  ;;  %v10868_v45 = vrot.slane %v5002_v17, 10  ;;  %v5463_v2 = vrot.slane %v5003_v3, 6  ;;  %v5695_v6 = vld [vmem:[#allocation2 + $0x8] sm:$0xff]  }
 0x4a6   : > { %5681 = vst [vmem:[#allocation3 + $0x148] sm:$0xf] %v5457_v15  ;;  %v5004_v16 = vld [vmem:[#allocation2 + $0x3f8] sm:$0x3]  ;;  %v5005_v57 = vld [vmem:[#allocation2 + $0x408] sm:$0xc] }
 0x4a7   : > { %v5460_v54 = vsel %vm15578_vm11, %v5458_v41, %v5459_v51  ;;  %v5464_v1 = vsel %vm15578_vm11, %v10868_v45, %v5463_v2  ;;  %v5465_v50 = vrot.slane %v5463_v2, 4  ;;  %v5466_v58 = vrot.slane %v5004_v16, 6  ;;  %v5006_v12 = vld [vmem:[#allocation2 + $0x40c] sm:$0xf]  ;;  %v5007_v62 = vld [vmem:[#allocation2 + $0x410] sm:$0x3] }
 0x4a8   : > { %5682 = vst [vmem:[#allocation3 + $0x14c] sm:$0xf] %v5460_v54  ;;  %v10869_v49 = vrot.slane %v5005_v57, 10  ;;  %v5470_v35 = vrot.slane %v5006_v12, 6  ;;  %v5473_v37 = vrot.slane %v5007_v62, 6  ;;  %v5699_v25 = vld [vmem:[#allocation2 + $0x38] sm:$0xff]  }
 0x4a9   : > { %5683 = vst [vmem:[#allocation3 + $0x150] sm:$0xf] %v5464_v1  ;;  %v5467_v22 = vsel %vm15578_vm11, %v5465_v50, %v5466_v58  ;;  %v5008_v24 = vld [vmem:[#allocation2 + $0x420] sm:$0xc]  ;;  %v5009_v20 = vld [vmem:[#allocation2 + $0x424] sm:$0xf] }
 0x4aa   : > { %5684 = vst [vmem:[#allocation3 + $0x154] sm:$0xf] %v5467_v22  ;;  %v5471_v7 = vsel %vm15578_vm11, %v10869_v49, %v5470_v35  ;;  %v5472_v46 = vrot.slane %v5470_v35, 4  ;;  %v10870_v21 = vrot.slane %v5008_v24, 10  ;;  %v5477_v59 = vrot.slane %v5009_v20, 6  ;;  %v5701_v48 = vld [vmem:[#allocation2 + $0x50] sm:$0xff]  }
 0x4ab   : > { %5685 = vst [vmem:[#allocation3 + $0x158] sm:$0xf] %v5471_v7  ;;  %v5010_v31 = vld [vmem:[#allocation2 + $0x428] sm:$0x3]  ;;  %v5011_v10 = vld [vmem:[#allocation2 + $0x438] sm:$0xc] }
 0x4ac   : > { %v5474_v26 = vsel %vm15578_vm11, %v5472_v46, %v5473_v37  ;;  %v5478_v28 = vsel %vm15578_vm11, %v10870_v21, %v5477_v59  ;;  %v5479_v34 = vrot.slane %v5477_v59, 4  ;;  %v5480_v30 = vrot.slane %v5010_v31, 6  ;;  %v5012_v40 = vld [vmem:[#allocation2 + $0x43c] sm:$0xf]  ;;  %v5013_v60 = vld [vmem:[#allocation2 + $0x440] sm:$0x3] }
 0x4ad   : > { %5686 = vst [vmem:[#allocation3 + $0x15c] sm:$0xf] %v5474_v26  ;;  %v10871_v47 = vrot.slane %v5011_v10, 10  ;;  %v5484_v39 = vrot.slane %v5012_v40, 6  ;;  %v5487_v38 = vrot.slane %v5013_v60, 6  ;;  %v5703_v51 = vld [vmem:[#allocation2 + $0x68] sm:$0xff]  }
 0x4ae   : > { %5687 = vst [vmem:[#allocation3 + $0x160] sm:$0xf] %v5478_v28  ;;  %v5481_v14 = vsel %vm15578_vm11, %v5479_v34, %v5480_v30  ;;  %v5014_v56 = vld [vmem:[#allocation2 + $0x450] sm:$0xc]  ;;  %v5015_v8 = vld [vmem:[#allocation2 + $0x454] sm:$0xf] }
 0x4af   : > { %5688 = vst [vmem:[#allocation3 + $0x164] sm:$0xf] %v5481_v14  ;;  %v5485_v11 = vsel %vm15578_vm11, %v10871_v47, %v5484_v39  ;;  %v5486_v63 = vrot.slane %v5484_v39, 4  ;;  %v10872_v4 = vrot.slane %v5014_v56, 10  ;;  %v5491_v44 = vrot.slane %v5015_v8, 6  ;;  %v5705_v42 = vld [vmem:[#allocation2 + $0x80] sm:$0xff]  }
 0x4b0   : > { %5689 = vst [vmem:[#allocation3 + $0x168] sm:$0xf] %v5485_v11  ;;  %v5016_v53 = vld [vmem:[#allocation2 + $0x458] sm:$0x3]  ;;  %v5017_v33 = vld [vmem:[#allocation2 + $0x468] sm:$0xc] }
 0x4b1   : > { %v5488_v5 = vsel %vm15578_vm11, %v5486_v63, %v5487_v38  ;;  %v5492_v29 = vsel %vm15578_vm11, %v10872_v4, %v5491_v44  ;;  %v5493_v9 = vrot.slane %v5491_v44, 4  ;;  %v5494_v55 = vrot.slane %v5016_v53, 6  ;;  %v5018_v61 = vld [vmem:[#allocation2 + $0x46c] sm:$0xf]  ;;  %v5019_v36 = vld [vmem:[#allocation2 + $0x470] sm:$0x3] }
 0x4b2   : > { %5690 = vst [vmem:[#allocation3 + $0x16c] sm:$0xf] %v5488_v5  ;;  %v10873_v19 = vrot.slane %v5017_v33, 10  ;;  %v5498_v0 = vrot.slane %v5018_v61, 6  ;;  %v5501_v18 = vrot.slane %v5019_v36, 6  ;;  %v5707_v17 = vld [vmem:[#allocation2 + $0x98] sm:$0xff]  }
 0x4b3   : > { %5691 = vst [vmem:[#allocation3 + $0x170] sm:$0xf] %v5492_v29  ;;  %v5495_v52 = vsel %vm15578_vm11, %v5493_v9, %v5494_v55  ;;  %v5709_v3 = vld [vmem:[#allocation2 + $0xb0] sm:$0xff]   ;;  %v5711_v15 = vld [vmem:[#allocation2 + $0xc8] sm:$0xff]   ;;  %v5713_v41 = vld [vmem:[#allocation2 + $0xe0] sm:$0xff]  }
 0x4b4   : > { %5692 = vst [vmem:[#allocation3 + $0x174] sm:$0xf] %v5495_v52  ;;  %v5499_v13 = vsel %vm15578_vm11, %v10873_v19, %v5498_v0  ;;  %v5500_v27 = vrot.slane %v5498_v0, 4  ;;  %v5715_v45 = vld [vmem:[#allocation2 + $0xf8] sm:$0xff]   ;;  %v5717_v2 = vld [vmem:[#allocation2 + $0x110] sm:$0xff]   ;;  %v5719_v16 = vld [vmem:[#allocation2 + $0x128] sm:$0xff]  }
 0x4b5   : > { %5693 = vst [vmem:[#allocation3 + $0x178] sm:$0xf] %v5499_v13  ;;  %v5721_v57 = vld [vmem:[#allocation2 + $0x140] sm:$0xff]   ;;  %v5723_v54 = vld [vmem:[#allocation2 + $0x158] sm:$0xff]   ;;  %v5725_v1 = vld [vmem:[#allocation2 + $0x170] sm:$0xff]  }
 0x4b6   : > { %v5502_v23 = vsel %vm15578_vm11, %v5500_v27, %v5501_v18  ;;  %5792 = vst [vmem:[#allocation3 + $0x180] sm:$0xff] %v5695_v6   ;;  %v5727_v50 = vld [vmem:[#allocation2 + $0x188] sm:$0xff]   ;;  %v5729_v58 = vld [vmem:[#allocation2 + $0x1a0] sm:$0xff]   ;;  %v5731_v12 = vld [vmem:[#allocation2 + $0x1b8] sm:$0xff]  }
 0x4b7   : > { %5694 = vst [vmem:[#allocation3 + $0x17c] sm:$0xf] %v5502_v23  ;;  %v5733_v62 = vld [vmem:[#allocation2 + $0x1d0] sm:$0xff]   ;;  %v5735_v49 = vld [vmem:[#allocation2 + $0x1e8] sm:$0xff]   ;;  %v5737_v35 = vld [vmem:[#allocation2 + $0x200] sm:$0xff]  }
 0x4b8   : > { %5794 = vst [vmem:[#allocation3 + $0x188] sm:$0xff] %v5697_v32   ;;  %v5739_v37 = vld [vmem:[#allocation2 + $0x218] sm:$0xff]   ;;  %v15774_v22 = vld [vmem:[#allocation2 + $0x10] sm:$0xf]  ;;  %v15776_v20 = vld [vmem:[#allocation2 + $0x28] sm:$0xf] }
 0x4b9   : > { %5796 = vst [vmem:[#allocation3 + $0x190] sm:$0xff] %v5699_v25   ;;  %v5741_v24 = vld [vmem:[#allocation2 + $0x230] sm:$0xff]   ;;  %v5743_v7 = vld [vmem:[#allocation2 + $0x248] sm:$0xff]   ;;  %v5745_v46 = vld [vmem:[#allocation2 + $0x260] sm:$0xff]   ;;  %v6178_v31 = vrot.slane %v15774_v22, 6  ;;  %v6185_v28 = vrot.slane %v15776_v20, 6 }
 0x4ba   : > { %5798 = vst [vmem:[#allocation3 + $0x198] sm:$0xff] %v5701_v48   ;;  %v5747_v21 = vld [vmem:[#allocation2 + $0x278] sm:$0xff]   ;;  %v5749_v59 = vld [vmem:[#allocation2 + $0x290] sm:$0xff]   ;;  %v15779_v10 = vld [vmem:[#allocation2 + $0xc] sm:$0xc] }
 0x4bb   : > { %5800 = vst [vmem:[#allocation3 + $0x1a0] sm:$0xff] %v5703_v51   ;;  %v15781_v26 = vld [vmem:[#allocation2 + $0x14] sm:$0x3]  ;;  %v5751_v34 = vld [vmem:[#allocation2 + $0x2a8] sm:$0xff]   ;;  %v15784_v30 = vld [vmem:[#allocation2 + $0x24] sm:$0xc] }
 0x4bc   : > { %5802 = vst [vmem:[#allocation3 + $0x1a8] sm:$0xff] %v5705_v42   ;;  %v15786_v40 = vld [vmem:[#allocation2 + $0x40] sm:$0xf]  ;;  %v5755_v47 = vld [vmem:[#allocation2 + $0x2d8] sm:$0xff]   ;;  %v5757_v38 = vld [vmem:[#allocation2 + $0x2f0] sm:$0xff]   ;;  %v10874_v14 = vrot.slane %v15779_v10, 10 }
 0x4bd   : > { %5804 = vst [vmem:[#allocation3 + $0x1b0] sm:$0xff] %v5707_v17   ;;  %v5753_v60 = vld [vmem:[#allocation2 + $0x2c0] sm:$0xff]   ;;  %v15788_v39 = vld [vmem:[#allocation2 + $0x58] sm:$0xf]  ;;  %v15793_v56 = vrot.slane %v6178_v31, 4  ;;  %v6181_v8 = vrot.slane %v15781_v26, 6 }
 0x4be   : > { %5806 = vst [vmem:[#allocation3 + $0x1b8] sm:$0xff] %v5709_v3   ;;  %v15796_v11 = vld [vmem:[#allocation2 + $0x70] sm:$0xf]  ;;  %v5759_v63 = vld [vmem:[#allocation2 + $0x308] sm:$0xff]   ;;  %v10875_v4 = vrot.slane %v15784_v30, 10  ;;  %v15803_v53 = vrot.slane %v6185_v28, 4 }
 0x4bf   : > { %5808 = vst [vmem:[#allocation3 + $0x1c0] sm:$0xff] %v5711_v15   ;;  %v15799_v44 = vld [vmem:[#allocation2 + $0x2c] sm:$0x3]  ;;  %v6192_v33 = vrot.slane %v15786_v40, 6  ;;  %v5761_v5 = vld [vmem:[#allocation2 + $0x320] sm:$0xff]   ;;  %v17217_v55 = vrot.slane %v15788_v39, 6 }
 0x4c0   : > { %5810 = vst [vmem:[#allocation3 + $0x1c8] sm:$0xff] %v5713_v41   ;;  %v15806_v29 = vld [vmem:[#allocation2 + $0x3c] sm:$0xc]  ;;  %v15808_v9 = vld [vmem:[#allocation2 + $0x44] sm:$0x3]  ;;  %v17216_v0 = vrot.slane %v15796_v11, 6  ;;  %v6186_v26 = vsel %vm15578_vm11, %v10875_v4, %v6185_v28 }
 0x4c1   : > { %5812 = vst [vmem:[#allocation3 + $0x1d0] sm:$0xff] %v5715_v45   ;;  %v5763_v61 = vld [vmem:[#allocation2 + $0x338] sm:$0xff]   ;;  %v15811_v36 = vld [vmem:[#allocation2 + $0x54] sm:$0xc]  ;;  %v6188_v52 = vrot.slane %v15799_v44, 6  ;;  %v5767_v27 = vld [vmem:[#allocation2 + $0x368] sm:$0xff]  }
 0x4c2   : > { %5814 = vst [vmem:[#allocation3 + $0x1d8] sm:$0xff] %v5717_v2   ;;  %v15813_v19 = vld [vmem:[#allocation2 + $0x5c] sm:$0x3]  ;;  %v5765_v18 = vld [vmem:[#allocation2 + $0x350] sm:$0xff]   ;;  %v15817_v6 = vld [vmem:[#allocation2 + $0x6c] sm:$0xc] }
 0x4c3   : > { %5816 = vst [vmem:[#allocation3 + $0x1e0] sm:$0xff] %v5719_v16   ;;  %v15819_v13 = vld [vmem:[#allocation2 + $0x88] sm:$0xf]  ;;  %v10876_v32 = vrot.slane %v15806_v29, 10  ;;  %v15824_v23 = vrot.slane %v6192_v33, 4  ;;  %v5769_v51 = vld [vmem:[#allocation2 + $0x380] sm:$0xff]  }
 0x4c4   : > { %5818 = vst [vmem:[#allocation3 + $0x1e8] sm:$0xff] %v5721_v57   ;;  %v15827_v48 = vld [vmem:[#allocation2 + $0xa0] sm:$0xf]  ;;  %v15832_v17 = vrot.slane %v17217_v55, 4  ;;  %v15835_v15 = vld [vmem:[#allocation2 + $0xb8] sm:$0xf] }
 0x4c5   : > { %5820 = vst [vmem:[#allocation3 + $0x1f0] sm:$0xff] %v5723_v54   ;;  %v5771_v41 = vld [vmem:[#allocation2 + $0x398] sm:$0xff]   ;;  %v15838_v2 = vld [vmem:[#allocation2 + $0x74] sm:$0x3]  ;;  %v15842_v16 = vrot.slane %v17216_v0, 4  ;;  %v17214_v57 = vrot.slane %v15819_v13, 6  ;;  %v6193_v28 = vsel %vm15578_vm11, %v10876_v32, %v6192_v33 }
 0x4c6   : > { %5822 = vst [vmem:[#allocation3 + $0x1f8] sm:$0xff] %v5725_v1   ;;  %v5773_v54 = vld [vmem:[#allocation2 + $0x3b0] sm:$0xff]   ;;  %v15845_v1 = vld [vmem:[#allocation2 + $0x84] sm:$0xc]  ;;  %v15894_v45 = vld [vmem:[#allocation2 + $0xfc] sm:$0xc] }
 0x4c7   : > { %5824 = vst [vmem:[#allocation3 + $0x200] sm:$0xff] %v5727_v50   ;;  %v15847_v50 = vld [vmem:[#allocation2 + $0x8c] sm:$0x3]  ;;  %v15897_v0 = vld [vmem:[#allocation2 + $0x118] sm:$0xf]  ;;  %v10884_v10 = vrot.slane %v15894_v45, 10 }
 0x4c8   : > { %5826 = vst [vmem:[#allocation3 + $0x208] sm:$0xff] %v5729_v58   ;;  %v17213_v58 = vrot.slane %v15827_v48, 6  ;;  %v15900_v42 = vld [vmem:[#allocation2 + $0x104] sm:$0x3]  ;;  %v15916_v25 = vld [vmem:[#allocation2 + $0x130] sm:$0xf] }
 0x4c9   : > { %5828 = vst [vmem:[#allocation3 + $0x210] sm:$0xff] %v5731_v12   ;;  %v5775_v12 = vld [vmem:[#allocation2 + $0x3c8] sm:$0xff]   ;;  %v6251_v3 = vrot.slane %v15900_v42, 6  ;;  %v15956_v20 = vld [vmem:[#allocation2 + $0x144] sm:$0xc]  ;;  %v17466_v32 = vrot.slane %v15788_v39, 6 }
 0x4ca   : > { %5830 = vst [vmem:[#allocation3 + $0x218] sm:$0xff] %v5733_v62   ;;  %v15850_v62 = vld [vmem:[#allocation2 + $0x9c] sm:$0xc]  ;;  %v15936_v22 = vld [vmem:[#allocation2 + $0x148] sm:$0xf] }
 0x4cb   : > { %5832 = vst [vmem:[#allocation3 + $0x220] sm:$0xff] %v5735_v49   ;;  %v15852_v49 = vld [vmem:[#allocation2 + $0xa4] sm:$0x3]  ;;  %v17219_v4 = vrot.slane %v15936_v22, 6  ;;  %v15969_v44 = vld [vmem:[#allocation2 + $0x160] sm:$0xf] }
 0x4cc   : > { %5834 = vst [vmem:[#allocation3 + $0x228] sm:$0xff] %v5737_v35   ;;  %v17215_v35 = vrot.slane %v15835_v15, 6  ;;  %v15978_v33 = vld [vmem:[#allocation2 + $0x14c] sm:$0x3] }
 0x4cd   : > { %5836 = vst [vmem:[#allocation3 + $0x230] sm:$0xff] %v5739_v37   ;;  %v5777_v37 = vld [vmem:[#allocation2 + $0x3e0] sm:$0xff]  }
 0x4ce   : > { %5838 = vst [vmem:[#allocation3 + $0x238] sm:$0xff] %v5741_v24   ;;  %v15889_v24 = vld [vmem:[#allocation2 + $0xe4] sm:$0xc] }
 0x4cf   : > { %5840 = vst [vmem:[#allocation3 + $0x240] sm:$0xff] %v5743_v7   ;;  %v15856_v7 = vld [vmem:[#allocation2 + $0xb4] sm:$0xc] }
 0x4d0   : > { %5842 = vst [vmem:[#allocation3 + $0x248] sm:$0xff] %v5745_v46   ;;  %v15858_v46 = vld [vmem:[#allocation2 + $0xbc] sm:$0x3] }
 0x4d1   : > { %5844 = vst [vmem:[#allocation3 + $0x250] sm:$0xff] %v5747_v21   ;;  %v5779_v21 = vld [vmem:[#allocation2 + $0x3f8] sm:$0xff]  }
 0x4d2   : > { %5846 = vst [vmem:[#allocation3 + $0x258] sm:$0xff] %v5749_v59   ;;  %v15882_v59 = vld [vmem:[#allocation2 + $0x100] sm:$0xf] }
 0x4d3   : > { %5848 = vst [vmem:[#allocation3 + $0x260] sm:$0xff] %v5751_v34   ;;  %v15863_v34 = vrot.slane %v17214_v57, 4  ;;  %v15887_v57 = vld [vmem:[#allocation2 + $0xd4] sm:$0x3] }
 0x4d4   : > { %5850 = vst [vmem:[#allocation3 + $0x268] sm:$0xff] %v5753_v60   ;;  %v15879_v60 = vrot.slane %v17215_v35, 4  ;;  %v15892_v35 = vld [vmem:[#allocation2 + $0xec] sm:$0x3] }
 0x4d5   : > { %5852 = vst [vmem:[#allocation3 + $0x270] sm:$0xff] %v5755_v47   ;;  %v15866_v47 = vld [vmem:[#allocation2 + $0xd0] sm:$0xf] }
 0x4d6   : > { %5854 = vst [vmem:[#allocation3 + $0x278] sm:$0xff] %v5757_v38   ;;  %v5781_v38 = vld [vmem:[#allocation2 + $0x410] sm:$0xff]  }
 0x4d7   : > { %5856 = vst [vmem:[#allocation3 + $0x280] sm:$0xff] %v5759_v63   ;;  %v5785_v63 = vld [vmem:[#allocation2 + $0x440] sm:$0xff]  }
 0x4d8   : > { %5858 = vst [vmem:[#allocation3 + $0x288] sm:$0xff] %v5761_v5   ;;  %v15871_v5 = vrot.slane %v17213_v58, 4  ;;  %v15884_v58 = vld [vmem:[#allocation2 + $0xcc] sm:$0xc] }
 0x4d9   : > { %5860 = vst [vmem:[#allocation3 + $0x290] sm:$0xff] %v5763_v61   ;;  %v6234_v61 = vrot.slane %v15866_v47, 6 }
 0x4da   : > { %5862 = vst [vmem:[#allocation3 + $0x298] sm:$0xff] %v5765_v18   ;;  %v15874_v18 = vld [vmem:[#allocation2 + $0xe8] sm:$0xf] }
 0x4db   : > { %5864 = vst [vmem:[#allocation3 + $0x2a0] sm:$0xff] %v5767_v27   ;;  %v5783_v27 = vld [vmem:[#allocation2 + $0x428] sm:$0xff]   ;;  %v15912_v55 = vrot.slane %v6234_v61, 4 }
 0x4dc   : > { %5866 = vst [vmem:[#allocation3 + $0x2a8] sm:$0xff] %v5769_v51   ;;  %v17218_v51 = vrot.slane %v15874_v18, 6 }
 0x4dd   : > { %5868 = vst [vmem:[#allocation3 + $0x2b0] sm:$0xff] %v5771_v41   ;;  %v5789_v41 = vld [vmem:[#allocation2 + $0x470] sm:$0xff]  }
 0x4de   : > { %5870 = vst [vmem:[#allocation3 + $0x2b8] sm:$0xff] %v5773_v54   ;;  %v5787_v54 = vld [vmem:[#allocation2 + $0x458] sm:$0xff]  }
 0x4df   : > { %5872 = vst [vmem:[#allocation3 + $0x2c0] sm:$0xff] %v5775_v12   ;;  %v6248_v12 = vrot.slane %v15882_v59, 6 }
 0x4e0   : > { %5874 = vst [vmem:[#allocation3 + $0x2c8] sm:$0xff] %v5777_v37   ;;  %v15902_v37 = vld [vmem:[#allocation2 + $0x114] sm:$0xc] }
 0x4e1   : > { %5876 = vst [vmem:[#allocation3 + $0x2d0] sm:$0xff] %v5779_v21   ;;  %v6179_v21 = vsel %vm15578_vm11, %v10874_v14, %v6178_v31  ;;  %v6255_v31 = vrot.slane %v15897_v0, 6  ;;  %v6182_v14 = vsel %vm15578_vm11, %v15793_v56, %v6181_v8  ;;  %v15946_v56 = vld [vmem:[#allocation2 + $0x12c] sm:$0xc]  ;;  %v6262_v8 = vrot.slane %v15916_v25, 6 }
 0x4e2   : > { %5878 = vst [vmem:[#allocation3 + $0x2d8] sm:$0xff] %v5781_v38   ;;  %v6237_v38 = vrot.slane %v15887_v57, 6  ;;  %v16119_v57 = vld [vmem:[#allocation2 + $0x1f0] sm:$0xf]  ;;  %v17485_v42 = vrot.slane %v15902_v37, 10 }
 0x4e3   : > { %5880 = vst [vmem:[#allocation3 + $0x2e0] sm:$0xff] %v5783_v27   ;;  %v15920_v27 = vrot.slane %v17218_v51, 4  ;;  %v15954_v51 = vld [vmem:[#allocation2 + $0x134] sm:$0x3]  ;;  %v15966_v30 = vrot.slane %v6255_v31, 4 }
 0x4e4   : > { %5882 = vst [vmem:[#allocation3 + $0x2e8] sm:$0xff] %v5785_v63   ;;  %v15932_v63 = vrot.slane %v6248_v12, 4  ;;  %v6265_v39 = vrot.slane %v15954_v51, 6  ;;  %v16216_v25 = vld [vmem:[#allocation2 + $0x224] sm:$0x3] }
 0x4e5   : > { %5884 = vst [vmem:[#allocation3 + $0x2f0] sm:$0xff] %v5787_v54   ;;  %v15944_v54 = vld [vmem:[#allocation2 + $0x11c] sm:$0x3] }
 0x4e6   : > { %5886 = vst [vmem:[#allocation3 + $0x2f8] sm:$0xff] %v5789_v41   ;;  %v6189_v41 = vsel %vm15578_vm11, %v15803_v53, %v6188_v52  ;;  %v17465_v53 = vrot.slane %v15808_v9, 6  ;;  %v6258_v29 = vrot.slane %v15944_v54, 6  ;;  %v17468_v9 = vrot.slane %v15813_v19, 6  ;;  %v16013_v52 = vld [vmem:[#allocation2 + $0x190] sm:$0xf] }
 0x4e7   : > { %6609 = vst [vmem:[#allocation3 + $0x300] sm:$0xf] %v6179_v21  ;;  %v17467_v21 = vrot.slane %v15811_v36, 10  ;;  %v17469_v19 = vrot.slane %v15796_v11, 6  ;;  %v17471_v36 = vrot.slane %v15838_v2, 6 }
 0x4e8   : > { %6610 = vst [vmem:[#allocation3 + $0x304] sm:$0xf] %v6182_v14  ;;  %v6196_v40 = vsel %vm15578_vm11, %v15824_v23, %v17465_v53  ;;  %v6203_v23 = vsel %vm15578_vm11, %v15832_v17, %v17468_v9  ;;  %v15993_v53 = vld [vmem:[#allocation2 + $0x178] sm:$0xf]  ;;  %v17470_v17 = vrot.slane %v15817_v6, 10  ;;  %v17473_v9 = vrot.slane %v15845_v1, 10 }
 0x4e9   : > { %6611 = vst [vmem:[#allocation3 + $0x308] sm:$0xf] %v6186_v26  ;;  %v6200_v14 = vsel %vm15578_vm11, %v17467_v21, %v17466_v32  ;;  %v15991_v26 = vld [vmem:[#allocation2 + $0x15c] sm:$0xc]  ;;  %v6276_v32 = vrot.slane %v15969_v44, 6  ;;  %v6210_v11 = vsel %vm15578_vm11, %v15842_v16, %v17471_v36  ;;  %v17474_v16 = vrot.slane %v15847_v50, 6 }
 0x4ea   : > { %6612 = vst [vmem:[#allocation3 + $0x30c] sm:$0xf] %v6189_v41  ;;  %v15997_v41 = vrot.slane %v6262_v8, 4  ;;  %v6207_v21 = vsel %vm15578_vm11, %v17470_v17, %v17469_v19  ;;  %v17220_v19 = vrot.slane %v15993_v53, 6  ;;  %v17472_v17 = vrot.slane %v15819_v13, 6 }
 0x4eb   : > { %6613 = vst [vmem:[#allocation3 + $0x310] sm:$0xf] %v6193_v28  ;;  %v16010_v28 = vrot.slane %v17219_v4, 4  ;;  %v16030_v4 = vld [vmem:[#allocation2 + $0x174] sm:$0xc]  ;;  %v6217_v36 = vsel %vm15578_vm11, %v15863_v34, %v17474_v16  ;;  %v6290_v1 = vrot.slane %v16013_v52, 6 }
 0x4ec   : > { %6614 = vst [vmem:[#allocation3 + $0x314] sm:$0xf] %v6196_v40  ;;  %v16021_v40 = vld [vmem:[#allocation2 + $0x164] sm:$0x3]  ;;  %v16032_v2 = vld [vmem:[#allocation2 + $0x17c] sm:$0x3] }
 0x4ed   : > { %6615 = vst [vmem:[#allocation3 + $0x318] sm:$0xf] %v6200_v14  ;;  %v6214_v14 = vsel %vm15578_vm11, %v17473_v9, %v17472_v17  ;;  %v16043_v13 = vld [vmem:[#allocation2 + $0x18c] sm:$0xc]  ;;  %v17475_v9 = vrot.slane %v15827_v48, 6  ;;  %v17476_v17 = vrot.slane %v15850_v62, 10 }
 0x4ee   : > { %6616 = vst [vmem:[#allocation3 + $0x31c] sm:$0xf] %v6203_v23  ;;  %v16041_v23 = vrot.slane %v6276_v32, 4  ;;  %v16057_v16 = vld [vmem:[#allocation2 + $0x194] sm:$0x3]  ;;  %v16065_v62 = vrot.slane %v17220_v19, 4 }
 0x4ef   : > { %6617 = vst [vmem:[#allocation3 + $0x320] sm:$0xf] %v6207_v21  ;;  %v6221_v50 = vsel %vm15578_vm11, %v17476_v17, %v17475_v9  ;;  %v17477_v21 = vrot.slane %v15852_v49, 6  ;;  %v16059_v6 = vld [vmem:[#allocation2 + $0x1a8] sm:$0xf]  ;;  %v6286_v9 = vrot.slane %v16032_v2, 6 }
 0x4f0   : > { %6618 = vst [vmem:[#allocation3 + $0x324] sm:$0xf] %v6210_v11  ;;  %v6279_v11 = vrot.slane %v16021_v40, 6  ;;  %v17478_v49 = vrot.slane %v15835_v15, 6  ;;  %v16079_v48 = vld [vmem:[#allocation2 + $0x1a4] sm:$0xc] }
 0x4f1   : > { %v6224_v34 = vsel %vm15578_vm11, %v15871_v5, %v17477_v21  ;;  %6619 = vst [vmem:[#allocation3 + $0x328] sm:$0xf] %v6214_v14  ;;  %v17479_v5 = vrot.slane %v15856_v7, 10  ;;  %v17480_v14 = vrot.slane %v15858_v46, 6  ;;  %v16081_v19 = vld [vmem:[#allocation2 + $0x1c0] sm:$0xf]  ;;  %v6287_v40 = vsel %vm15578_vm11, %v16065_v62, %v6286_v9 }
 0x4f2   : > { %6620 = vst [vmem:[#allocation3 + $0x32c] sm:$0xf] %v6217_v36  ;;  %v16086_v15 = vrot.slane %v6290_v1, 4  ;;  %v17481_v46 = vrot.slane %v15884_v58, 10  ;;  %v10891_v47 = vrot.slane %v16079_v48, 10  ;;  %v6304_v58 = vrot.slane %v16081_v19, 6 }
 0x4f3   : > { %v6228_v17 = vsel %vm15578_vm11, %v17479_v5, %v17478_v49  ;;  %v6231_v21 = vsel %vm15578_vm11, %v15879_v60, %v17480_v14  ;;  %6621 = vst [vmem:[#allocation3 + $0x330] sm:$0xf] %v6221_v50  ;;  %v6297_v49 = vrot.slane %v16059_v6, 6  ;;  %v16096_v5 = vld [vmem:[#allocation2 + $0x1ac] sm:$0x3]  ;;  %v17493_v2 = vrot.slane %v16043_v13, 10 }
 0x4f4   : > { %6622 = vst [vmem:[#allocation3 + $0x334] sm:$0xf] %v6224_v34  ;;  %v6235_v60 = vsel %vm15578_vm11, %v17481_v46, %v6234_v61  ;;  %v16098_v50 = vld [vmem:[#allocation2 + $0x1bc] sm:$0xc]  ;;  %v16100_v14 = vld [vmem:[#allocation2 + $0x1d8] sm:$0xf]  ;;  %v6238_v34 = vsel %vm15578_vm11, %v15912_v55, %v6237_v38 }
 0x4f5   : > { %6623 = vst [vmem:[#allocation3 + $0x338] sm:$0xf] %v6228_v17  ;;  %v16109_v7 = vld [vmem:[#allocation2 + $0x1c4] sm:$0x3]  ;;  %v17482_v61 = vrot.slane %v15874_v18, 6  ;;  %v17483_v46 = vrot.slane %v15889_v24, 10  ;;  %v6291_v62 = vsel %vm15578_vm11, %v17493_v2, %v6290_v1 }
 0x4f6   : > { %6624 = vst [vmem:[#allocation3 + $0x33c] sm:$0xf] %v6231_v21  ;;  %v16117_v36 = vld [vmem:[#allocation2 + $0x1d4] sm:$0xc]  ;;  %v17484_v55 = vrot.slane %v15892_v35, 6  ;;  %v16128_v21 = vrot.slane %v6297_v49, 4  ;;  %v6249_v35 = vsel %vm15578_vm11, %v10884_v10, %v6248_v12  ;;  %v6259_v10 = vsel %vm15578_vm11, %v15966_v30, %v6258_v29 }
 0x4f7   : > { %v6242_v17 = vsel %vm15578_vm11, %v17483_v46, %v17482_v61  ;;  %6625 = vst [vmem:[#allocation3 + $0x340] sm:$0xf] %v6235_v60  ;;  %v6311_v24 = vrot.slane %v16100_v14, 6  ;;  %v16131_v18 = vld [vmem:[#allocation2 + $0x1dc] sm:$0x3]  ;;  %v10892_v59 = vrot.slane %v16098_v50, 10 }
 0x4f8   : > { %v6245_v38 = vsel %vm15578_vm11, %v15920_v27, %v17484_v55  ;;  %6626 = vst [vmem:[#allocation3 + $0x344] sm:$0xf] %v6238_v34  ;;  %v6252_v27 = vsel %vm15578_vm11, %v15932_v63, %v6251_v3  ;;  %v16144_v60 = vld [vmem:[#allocation2 + $0x1ec] sm:$0xc]  ;;  %v16146_v61 = vld [vmem:[#allocation2 + $0x1f4] sm:$0x3]  ;;  %v6256_v3 = vsel %vm15578_vm11, %v17485_v42, %v6255_v31 }
 0x4f9   : > { %6627 = vst [vmem:[#allocation3 + $0x348] sm:$0xf] %v6242_v17  ;;  %v6300_v34 = vrot.slane %v16096_v5, 6  ;;  %v16152_v45 = vrot.slane %v6304_v58, 4  ;;  %v6318_v12 = vrot.slane %v16119_v57, 6  ;;  %v6307_v63 = vrot.slane %v16109_v7, 6 }
 0x4fa   : > { %6628 = vst [vmem:[#allocation3 + $0x34c] sm:$0xf] %v6245_v38  ;;  %v10893_v46 = vrot.slane %v16117_v36, 10  ;;  %v16168_v17 = vld [vmem:[#allocation2 + $0x204] sm:$0xc]  ;;  %v16172_v0 = vrot.slane %v6311_v24, 4 }
 0x4fb   : > { %6629 = vst [vmem:[#allocation3 + $0x350] sm:$0xf] %v6249_v35  ;;  %v6314_v37 = vrot.slane %v16131_v18, 6  ;;  %v10894_v31 = vrot.slane %v16144_v60, 10  ;;  %v6321_v54 = vrot.slane %v16146_v61, 6  ;;  %v17486_v30 = vrot.slane %v15946_v56, 10 }
 0x4fc   : > { %6630 = vst [vmem:[#allocation3 + $0x354] sm:$0xf] %v6252_v27  ;;  %v16183_v55 = vld [vmem:[#allocation2 + $0x208] sm:$0xf]  ;;  %v16185_v38 = vld [vmem:[#allocation2 + $0x220] sm:$0xf]  ;;  %v6266_v35 = vsel %vm15578_vm11, %v15997_v41, %v6265_v39  ;;  %v6301_v2 = vsel %vm15578_vm11, %v16128_v21, %v6300_v34  ;;  %v6308_v21 = vsel %vm15578_vm11, %v16152_v45, %v6307_v63  ;;  %v6312_v50 = vsel %vm15578_vm11, %v10893_v46, %v6311_v24 }
 0x4fd   : > { %v6263_v29 = vsel %vm15578_vm11, %v17486_v30, %v6262_v8  ;;  %6631 = vst [vmem:[#allocation3 + $0x358] sm:$0xf] %v6256_v3  ;;  %v16194_v27 = vrot.slane %v6318_v12, 4  ;;  %v16197_v56 = vld [vmem:[#allocation2 + $0x20c] sm:$0x3]  ;;  %v17487_v8 = vrot.slane %v15936_v22, 6  ;;  %v6319_v36 = vsel %vm15578_vm11, %v10894_v31, %v6318_v12 }
 0x4fe   : > { %6632 = vst [vmem:[#allocation3 + $0x35c] sm:$0xf] %v6259_v10  ;;  %v17488_v42 = vrot.slane %v15956_v20, 10  ;;  %v16205_v3 = vld [vmem:[#allocation2 + $0x21c] sm:$0xc]  ;;  %v17489_v41 = vrot.slane %v15978_v33, 6 }
 0x4ff   : > { %v16207_v30 = vld [vmem:[#allocation2 + $0x238] sm:$0xf]  ;;  %6633 = vst [vmem:[#allocation3 + $0x360] sm:$0xf] %v6263_v29  ;;  %v6325_v10 = vrot.slane %v16183_v55, 6  ;;  %v6332_v22 = vrot.slane %v16185_v38, 6  ;;  %v6322_v24 = vsel %vm15578_vm11, %v16194_v27, %v6321_v54 }
 0x500   : > { %v6270_v51 = vsel %vm15578_vm11, %v17488_v42, %v17487_v8  ;;  %v6273_v39 = vsel %vm15578_vm11, %v16010_v28, %v17489_v41  ;;  %6634 = vst [vmem:[#allocation3 + $0x364] sm:$0xf] %v6266_v35  ;;  %v17490_v20 = vrot.slane %v15991_v26, 10  ;;  %v16224_v8 = vld [vmem:[#allocation2 + $0x234] sm:$0xc]  ;;  %v6280_v28 = vsel %vm15578_vm11, %v16041_v23, %v6279_v11 }
 0x501   : > { %v16226_v33 = vld [vmem:[#allocation2 + $0x250] sm:$0xf]  ;;  %6635 = vst [vmem:[#allocation3 + $0x368] sm:$0xf] %v6270_v51  ;;  %v6328_v35 = vrot.slane %v16197_v56, 6  ;;  %v6339_v44 = vrot.slane %v16207_v30, 6 }
 0x502   : > { %v6277_v29 = vsel %vm15578_vm11, %v17490_v20, %v6276_v32  ;;  %v16235_v42 = vld [vmem:[#allocation2 + $0x23c] sm:$0x3]  ;;  %6636 = vst [vmem:[#allocation3 + $0x36c] sm:$0xf] %v6273_v39  ;;  %v17491_v26 = vrot.slane %v15993_v53, 6  ;;  %v17492_v32 = vrot.slane %v16030_v4, 10 }
 0x503   : > { %v16248_v23 = vld [vmem:[#allocation2 + $0x24c] sm:$0xc]  ;;  %v16250_v11 = vld [vmem:[#allocation2 + $0x254] sm:$0x3]  ;;  %6637 = vst [vmem:[#allocation3 + $0x370] sm:$0xf] %v6277_v29 }
 0x504   : > { %v6284_v51 = vsel %vm15578_vm11, %v17492_v32, %v17491_v26  ;;  %v6327_v41 = vrot.slane %v6325_v10, 4  ;;  %v10896_v53 = vrot.slane %v16205_v3, 10  ;;  %v6335_v4 = vrot.slane %v16216_v25, 6  ;;  %6638 = vst [vmem:[#allocation3 + $0x374] sm:$0xf] %v6280_v28 }
 0x505   : > { %v6346_v39 = vrot.slane %v16226_v33, 6  ;;  %v17494_v9 = vrot.slane %v16057_v16, 6  ;;  %v6334_v29 = vrot.slane %v6332_v22, 4  ;;  %v10897_v26 = vrot.slane %v16224_v8, 10  ;;  %v16271_v32 = vld [vmem:[#allocation2 + $0x264] sm:$0xc] }
 0x506   : > { %6639 = vst [vmem:[#allocation3 + $0x378] sm:$0xf] %v6284_v51  ;;  %v16275_v52 = vrot.slane %v6339_v44, 4  ;;  %v6342_v13 = vrot.slane %v16235_v42, 6  ;;  %v10898_v1 = vrot.slane %v16248_v23, 10  ;;  %v6349_v16 = vrot.slane %v16250_v11, 6 }
 0x507   : > { %v6294_v20 = vsel %vm15578_vm11, %v16086_v15, %v17494_v9  ;;  %6640 = vst [vmem:[#allocation3 + $0x37c] sm:$0xf] %v6287_v40  ;;  %v6298_v15 = vsel %vm15578_vm11, %v10891_v47, %v6297_v49  ;;  %v16286_v28 = vld [vmem:[#allocation2 + $0x268] sm:$0xf]  ;;  %v16288_v51 = vld [vmem:[#allocation2 + $0x280] sm:$0xf]  ;;  %v6305_v49 = vsel %vm15578_vm11, %v10892_v59, %v6304_v58  ;;  %v6315_v59 = vsel %vm15578_vm11, %v16172_v0, %v6314_v37 }
 0x508   : > { %6641 = vst [vmem:[#allocation3 + $0x380] sm:$0xf] %v6291_v62  ;;  %v16297_v40 = vrot.slane %v6346_v39, 4  ;;  %v10899_v6 = vrot.slane %v16271_v32, 10  ;;  %v16300_v48 = vld [vmem:[#allocation2 + $0x26c] sm:$0x3]  ;;  %v6329_v31 = vsel %vm15578_vm11, %v6327_v41, %v6328_v35  ;;  %v6333_v35 = vsel %vm15578_vm11, %v10896_v53, %v6332_v22 }
 0x509   : > { %6642 = vst [vmem:[#allocation3 + $0x384] sm:$0xf] %v6294_v20  ;;  %v16308_v5 = vld [vmem:[#allocation2 + $0x27c] sm:$0xc]  ;;  %v16310_v47 = vld [vmem:[#allocation2 + $0x298] sm:$0xf]  ;;  %v6340_v3 = vsel %vm15578_vm11, %v10897_v26, %v6339_v44  ;;  %v6343_v53 = vsel %vm15578_vm11, %v16275_v52, %v6342_v13  ;;  %v6347_v8 = vsel %vm15578_vm11, %v10898_v1, %v6346_v39 }
 0x50a   : > { %6643 = vst [vmem:[#allocation3 + $0x388] sm:$0xf] %v6298_v15  ;;  %v6353_v34 = vrot.slane %v16286_v28, 6  ;;  %v6360_v19 = vrot.slane %v16288_v51, 6  ;;  %v16319_v62 = vld [vmem:[#allocation2 + $0x284] sm:$0x3]  ;;  %v6336_v15 = vsel %vm15578_vm11, %v6334_v29, %v6335_v4  ;;  %v6350_v26 = vsel %vm15578_vm11, %v16297_v40, %v6349_v16 }
 0x50b   : > { %6644 = vst [vmem:[#allocation3 + $0x38c] sm:$0xf] %v6301_v2  ;;  %v16327_v58 = vld [vmem:[#allocation2 + $0x294] sm:$0xc]  ;;  %v16329_v7 = vld [vmem:[#allocation2 + $0x2b0] sm:$0xf] }
 0x50c   : > { %6645 = vst [vmem:[#allocation3 + $0x390] sm:$0xf] %v6305_v49  ;;  %v6356_v45 = vrot.slane %v16300_v48, 6  ;;  %v6367_v14 = vrot.slane %v16310_v47, 6  ;;  %v16338_v63 = vld [vmem:[#allocation2 + $0x29c] sm:$0x3]  ;;  %v6354_v23 = vsel %vm15578_vm11, %v10899_v6, %v6353_v34 }
 0x50d   : > { %6646 = vst [vmem:[#allocation3 + $0x394] sm:$0xf] %v6308_v21  ;;  %v16351_v18 = vld [vmem:[#allocation2 + $0x2ac] sm:$0xc]  ;;  %v16353_v46 = vld [vmem:[#allocation2 + $0x2b4] sm:$0x3] }
 0x50e   : > { %6647 = vst [vmem:[#allocation3 + $0x398] sm:$0xf] %v6312_v50  ;;  %v6355_v0 = vrot.slane %v6353_v34, 4  ;;  %v10900_v37 = vrot.slane %v16308_v5, 10  ;;  %v6363_v57 = vrot.slane %v16319_v62, 6  ;;  %v6374_v60 = vrot.slane %v16329_v7, 6 }
 0x50f   : > { %6648 = vst [vmem:[#allocation3 + $0x39c] sm:$0xf] %v6315_v59  ;;  %v17495_v61 = vrot.slane %v16168_v17, 10  ;;  %v6362_v54 = vrot.slane %v6360_v19, 4  ;;  %v10901_v27 = vrot.slane %v16327_v58, 10  ;;  %v6369_v55 = vrot.slane %v6367_v14, 4 }
 0x510   : > { %v16371_v9 = vld [vmem:[#allocation2 + $0x2c4] sm:$0xc]  ;;  %6649 = vst [vmem:[#allocation3 + $0x3a0] sm:$0xf] %v6319_v36  ;;  %v6370_v17 = vrot.slane %v16338_v63, 6  ;;  %v6377_v56 = vrot.slane %v16353_v46, 6  ;;  %v6357_v39 = vsel %vm15578_vm11, %v6355_v0, %v6356_v45  ;;  %v6361_v32 = vsel %vm15578_vm11, %v10900_v37, %v6360_v19 }
 0x511   : > { %v6326_v12 = vsel %vm15578_vm11, %v17495_v61, %v6325_v10  ;;  %v10902_v10 = vrot.slane %v16351_v18, 10  ;;  %6650 = vst [vmem:[#allocation3 + $0x3a4] sm:$0xf] %v6322_v24  ;;  %v16384_v41 = vld [vmem:[#allocation2 + $0x2c8] sm:$0xf]  ;;  %v6376_v28 = vrot.slane %v6374_v60, 4  ;;  %v6364_v6 = vsel %vm15578_vm11, %v6362_v54, %v6363_v57 }
 0x512   : > { %v16386_v20 = vld [vmem:[#allocation2 + $0x2e0] sm:$0xf]  ;;  %6651 = vst [vmem:[#allocation3 + $0x3a8] sm:$0xf] %v6326_v12  ;;  %v10903_v38 = vrot.slane %v16371_v9, 10  ;;  %v6381_v4 = vrot.slane %v16384_v41, 6  ;;  %v6368_v19 = vsel %vm15578_vm11, %v10901_v27, %v6367_v14  ;;  %v6371_v63 = vsel %vm15578_vm11, %v6369_v55, %v6370_v17 }
 0x513   : > { %v5977_v2 = vld [vmem:[#allocation2 + $0x2cc] sm:$0x3]  ;;  %6652 = vst [vmem:[#allocation3 + $0x3ac] sm:$0xf] %v6329_v31  ;;  %v16401_v22 = vld [vmem:[#allocation2 + $0x2dc] sm:$0xc]  ;;  %v6375_v47 = vsel %vm15578_vm11, %v10902_v10, %v6374_v60  ;;  %v6378_v14 = vsel %vm15578_vm11, %v6376_v28, %v6377_v56 }
 0x514   : > { %v16403_v25 = vld [vmem:[#allocation2 + $0x2f8] sm:$0xf]  ;;  %6653 = vst [vmem:[#allocation3 + $0x3b0] sm:$0xf] %v6333_v35  ;;  %v6388_v30 = vrot.slane %v16386_v20, 6  ;;  %v6384_v52 = vrot.slane %v5977_v2, 6  ;;  %v6382_v31 = vsel %vm15578_vm11, %v10903_v38, %v6381_v4 }
 0x515   : > { %v16412_v29 = vld [vmem:[#allocation2 + $0x2e4] sm:$0x3]  ;;  %6654 = vst [vmem:[#allocation3 + $0x3b4] sm:$0xf] %v6336_v15  ;;  %v16420_v44 = vld [vmem:[#allocation2 + $0x2f4] sm:$0xc] }
 0x516   : > { %v16422_v42 = vld [vmem:[#allocation2 + $0x310] sm:$0xf]  ;;  %6655 = vst [vmem:[#allocation3 + $0x3b8] sm:$0xf] %v6340_v3  ;;  %v6395_v13 = vrot.slane %v16403_v25, 6  ;;  %v6383_v16 = vrot.slane %v6381_v4, 4 }
 0x517   : > { %v16430_v33 = vld [vmem:[#allocation2 + $0x2fc] sm:$0x3]  ;;  %6656 = vst [vmem:[#allocation3 + $0x3bc] sm:$0xf] %v6343_v53  ;;  %v16438_v1 = vld [vmem:[#allocation2 + $0x30c] sm:$0xc] }
 0x518   : > { %v16440_v11 = vld [vmem:[#allocation2 + $0x314] sm:$0x3]  ;;  %6657 = vst [vmem:[#allocation3 + $0x3c0] sm:$0xf] %v6347_v8  ;;  %v10904_v40 = vrot.slane %v16401_v22, 10  ;;  %v6391_v48 = vrot.slane %v16412_v29, 6  ;;  %v6385_v7 = vsel %vm15578_vm11, %v6383_v16, %v6384_v52 }
 0x519   : > { %v6402_v49 = vrot.slane %v16422_v42, 6  ;;  %6658 = vst [vmem:[#allocation3 + $0x3c4] sm:$0xf] %v6350_v26  ;;  %v6390_v5 = vrot.slane %v6388_v30, 4  ;;  %v10905_v21 = vrot.slane %v16420_v44, 10  ;;  %v6397_v62 = vrot.slane %v6395_v13, 4 }
 0x51a   : > { %v16452_v34 = vld [vmem:[#allocation2 + $0x328] sm:$0xf]  ;;  %6659 = vst [vmem:[#allocation3 + $0x3c8] sm:$0xf] %v6354_v23  ;;  %v6398_v50 = vrot.slane %v16430_v33, 6  ;;  %v10906_v58 = vrot.slane %v16438_v1, 10  ;;  %v6389_v17 = vsel %vm15578_vm11, %v10904_v40, %v6388_v30 }
 0x51b   : > { %v6405_v51 = vrot.slane %v16440_v11, 6  ;;  %6660 = vst [vmem:[#allocation3 + $0x3cc] sm:$0xf] %v6357_v39  ;;  %v5987_v59 = vld [vmem:[#allocation2 + $0x324] sm:$0xc]  ;;  %v6404_v36 = vrot.slane %v6402_v49, 4  ;;  %v6392_v10 = vsel %vm15578_vm11, %v6390_v5, %v6391_v48  ;;  %v6396_v38 = vsel %vm15578_vm11, %v10905_v21, %v6395_v13 }
 0x51c   : > { %v16463_v45 = vld [vmem:[#allocation2 + $0x340] sm:$0xf]  ;;  %6661 = vst [vmem:[#allocation3 + $0x3d0] sm:$0xf] %v6361_v32  ;;  %v6409_v24 = vrot.slane %v16452_v34, 6  ;;  %v10907_v57 = vrot.slane %v5987_v59, 10  ;;  %v6399_v22 = vsel %vm15578_vm11, %v6397_v62, %v6398_v50  ;;  %v6403_v29 = vsel %vm15578_vm11, %v10906_v58, %v6402_v49 }
 0x51d   : > { %v5989_v18 = vld [vmem:[#allocation2 + $0x32c] sm:$0x3]  ;;  %6662 = vst [vmem:[#allocation3 + $0x3d4] sm:$0xf] %v6364_v6  ;;  %v5990_v0 = vld [vmem:[#allocation2 + $0x33c] sm:$0xc]  ;;  %v6406_v25 = vsel %vm15578_vm11, %v6404_v36, %v6405_v51 }
 0x51e   : > { %v5992_v37 = vld [vmem:[#allocation2 + $0x344] sm:$0x3]  ;;  %6663 = vst [vmem:[#allocation3 + $0x3d8] sm:$0xf] %v6368_v19  ;;  %v6416_v61 = vrot.slane %v16463_v45, 6  ;;  %v6411_v27 = vrot.slane %v6409_v24, 4  ;;  %v6410_v33 = vsel %vm15578_vm11, %v10907_v57, %v6409_v24 }
 0x51f   : > { %v5993_v12 = vld [vmem:[#allocation2 + $0x354] sm:$0xc]  ;;  %6664 = vst [vmem:[#allocation3 + $0x3dc] sm:$0xf] %v6371_v63  ;;  %v5994_v60 = vld [vmem:[#allocation2 + $0x358] sm:$0xf] }
 0x520   : > { %v16481_v54 = vld [vmem:[#allocation2 + $0x370] sm:$0xf]  ;;  %6665 = vst [vmem:[#allocation3 + $0x3e0] sm:$0xf] %v6375_v47  ;;  %v6412_v46 = vrot.slane %v5989_v18, 6  ;;  %v10908_v9 = vrot.slane %v5990_v0, 10 }
 0x521   : > { %v6419_v55 = vrot.slane %v5992_v37, 6  ;;  %6666 = vst [vmem:[#allocation3 + $0x3e4] sm:$0xf] %v6378_v14  ;;  %v5995_v56 = vld [vmem:[#allocation2 + $0x35c] sm:$0x3]  ;;  %v6418_v41 = vrot.slane %v6416_v61, 4 }
 0x522   : > { %v16487_v35 = vld [vmem:[#allocation2 + $0x388] sm:$0xf]  ;;  %6667 = vst [vmem:[#allocation3 + $0x3e8] sm:$0xf] %v6382_v31  ;;  %v10909_v20 = vrot.slane %v5993_v12, 10  ;;  %v6423_v15 = vrot.slane %v5994_v60, 6  ;;  %v6413_v23 = vsel %vm15578_vm11, %v6411_v27, %v6412_v46  ;;  %v6417_v49 = vsel %vm15578_vm11, %v10908_v9, %v6416_v61 }
 0x523   : > { %v6430_v28 = vrot.slane %v16481_v54, 6  ;;  %6668 = vst [vmem:[#allocation3 + $0x3ec] sm:$0xf] %v6385_v7  ;;  %v5996_v2 = vld [vmem:[#allocation2 + $0x36c] sm:$0xc]  ;;  %v6426_v53 = vrot.slane %v5995_v56, 6  ;;  %v6420_v5 = vsel %vm15578_vm11, %v6418_v41, %v6419_v55 }
 0x524   : > { %v5998_v3 = vld [vmem:[#allocation2 + $0x374] sm:$0x3]  ;;  %6669 = vst [vmem:[#allocation3 + $0x3f0] sm:$0xf] %v6389_v17  ;;  %v5999_v4 = vld [vmem:[#allocation2 + $0x384] sm:$0xc]  ;;  %v6424_v50 = vsel %vm15578_vm11, %v10909_v20, %v6423_v15 }
 0x525   : > { %v6437_v30 = vrot.slane %v16487_v35, 6  ;;  %6670 = vst [vmem:[#allocation3 + $0x3f4] sm:$0xf] %v6392_v10  ;;  %v6001_v8 = vld [vmem:[#allocation2 + $0x38c] sm:$0x3]  ;;  %v6425_v42 = vrot.slane %v6423_v15, 4 }
 0x526   : > { %v6003_v44 = vld [vmem:[#allocation2 + $0x3a0] sm:$0xf]  ;;  %6671 = vst [vmem:[#allocation3 + $0x3f8] sm:$0xf] %v6396_v38  ;;  %v10910_v26 = vrot.slane %v5996_v2, 10  ;;  %v6432_v52 = vrot.slane %v6430_v28, 4 }
 0x527   : > { %v6433_v13 = vrot.slane %v5998_v3, 6  ;;  %6672 = vst [vmem:[#allocation3 + $0x3fc] sm:$0xf] %v6399_v22  ;;  %v6002_v39 = vld [vmem:[#allocation2 + $0x39c] sm:$0xc]  ;;  %v10911_v11 = vrot.slane %v5999_v4, 10  ;;  %v6427_v19 = vsel %vm15578_vm11, %v6425_v42, %v6426_v53 }
 0x528   : > { %v6006_v1 = vld [vmem:[#allocation2 + $0x3b8] sm:$0xf]  ;;  %6673 = vst [vmem:[#allocation3 + $0x400] sm:$0xf] %v6403_v29  ;;  %v6439_v16 = vrot.slane %v6437_v30, 4  ;;  %v6440_v40 = vrot.slane %v6001_v8, 6  ;;  %v6431_v36 = vsel %vm15578_vm11, %v10910_v26, %v6430_v28 }
 0x529   : > { %v6444_v48 = vrot.slane %v6003_v44, 6  ;;  %6674 = vst [vmem:[#allocation3 + $0x404] sm:$0xf] %v6406_v25  ;;  %v6004_v32 = vld [vmem:[#allocation2 + $0x3a4] sm:$0x3]  ;;  %v10912_v21 = vrot.slane %v6002_v39, 10  ;;  %v6434_v0 = vsel %vm15578_vm11, %v6432_v52, %v6433_v13  ;;  %v6438_v61 = vsel %vm15578_vm11, %v10911_v11, %v6437_v30 }
 0x52a   : > { %v6009_v6 = vld [vmem:[#allocation2 + $0x3d0] sm:$0xf]  ;;  %6675 = vst [vmem:[#allocation3 + $0x408] sm:$0xf] %v6410_v33  ;;  %v6005_v34 = vld [vmem:[#allocation2 + $0x3b4] sm:$0xc]  ;;  %v6441_v60 = vsel %vm15578_vm11, %v6439_v16, %v6440_v40 }
 0x52b   : > { %v6451_v62 = vrot.slane %v6006_v1, 6  ;;  %6676 = vst [vmem:[#allocation3 + $0x40c] sm:$0xf] %v6413_v23  ;;  %v6007_v58 = vld [vmem:[#allocation2 + $0x3bc] sm:$0x3]  ;;  %v6447_v59 = vrot.slane %v6004_v32, 6  ;;  %v6445_v9 = vsel %vm15578_vm11, %v10912_v21, %v6444_v48 }
 0x52c   : > { %v6008_v51 = vld [vmem:[#allocation2 + $0x3cc] sm:$0xc]  ;;  %6677 = vst [vmem:[#allocation3 + $0x410] sm:$0xf] %v6417_v49  ;;  %v6458_v45 = vrot.slane %v6009_v6, 6  ;;  %v6446_v24 = vrot.slane %v6444_v48, 4 }
 0x52d   : > { %v6010_v63 = vld [vmem:[#allocation2 + $0x3d4] sm:$0x3]  ;;  %6678 = vst [vmem:[#allocation3 + $0x414] sm:$0xf] %v6420_v5  ;;  %v10913_v18 = vrot.slane %v6005_v34, 10  ;;  %v6453_v37 = vrot.slane %v6451_v62, 4 }
 0x52e   : > { %v6012_v47 = vld [vmem:[#allocation2 + $0x3e8] sm:$0xf]  ;;  %6679 = vst [vmem:[#allocation3 + $0x418] sm:$0xf] %v6424_v50  ;;  %v6454_v14 = vrot.slane %v6007_v58, 6  ;;  %v10914_v12 = vrot.slane %v6008_v51, 10  ;;  %v6448_v56 = vsel %vm15578_vm11, %v6446_v24, %v6447_v59 }
 0x52f   : > { %v6011_v57 = vld [vmem:[#allocation2 + $0x3e4] sm:$0xc]  ;;  %6680 = vst [vmem:[#allocation3 + $0x41c] sm:$0xf] %v6427_v19  ;;  %v6461_v31 = vrot.slane %v6010_v63, 6  ;;  %v6460_v54 = vrot.slane %v6458_v45, 4  ;;  %v6452_v20 = vsel %vm15578_vm11, %v10913_v18, %v6451_v62 }
 0x530   : > { %v6015_v7 = vld [vmem:[#allocation2 + $0x400] sm:$0xf]  ;;  %6681 = vst [vmem:[#allocation3 + $0x420] sm:$0xf] %v6431_v36  ;;  %v6465_v27 = vrot.slane %v6012_v47, 6  ;;  %v10915_v55 = vrot.slane %v6011_v57, 10  ;;  %v6455_v2 = vsel %vm15578_vm11, %v6453_v37, %v6454_v14  ;;  %v6459_v4 = vsel %vm15578_vm11, %v10914_v12, %v6458_v45 }
 0x531   : > { %v6013_v46 = vld [vmem:[#allocation2 + $0x3ec] sm:$0x3]  ;;  %6682 = vst [vmem:[#allocation3 + $0x424] sm:$0xf] %v6434_v0  ;;  %v6014_v17 = vld [vmem:[#allocation2 + $0x3fc] sm:$0xc]  ;;  %v6462_v8 = vsel %vm15578_vm11, %v6460_v54, %v6461_v31 }
 0x532   : > { %v6472_v10 = vrot.slane %v6015_v7, 6  ;;  %6683 = vst [vmem:[#allocation3 + $0x428] sm:$0xf] %v6438_v61  ;;  %v6016_v35 = vld [vmem:[#allocation2 + $0x404] sm:$0x3]  ;;  %v6468_v15 = vrot.slane %v6013_v46, 6  ;;  %v6466_v52 = vsel %vm15578_vm11, %v10915_v55, %v6465_v27 }
 0x533   : > { %v6018_v41 = vld [vmem:[#allocation2 + $0x418] sm:$0xf]  ;;  %6684 = vst [vmem:[#allocation3 + $0x42c] sm:$0xf] %v6441_v60  ;;  %v6017_v28 = vld [vmem:[#allocation2 + $0x414] sm:$0xc] }
 0x534   : > { %v6479_v38 = vrot.slane %v6018_v41, 6  ;;  %6685 = vst [vmem:[#allocation3 + $0x430] sm:$0xf] %v6445_v9  ;;  %v6467_v3 = vrot.slane %v6465_v27, 4  ;;  %v10916_v22 = vrot.slane %v6014_v17, 10  ;;  %v6474_v30 = vrot.slane %v6472_v10, 4 }
 0x535   : > { %v6019_v53 = vld [vmem:[#allocation2 + $0x41c] sm:$0x3]  ;;  %6686 = vst [vmem:[#allocation3 + $0x434] sm:$0xf] %v6448_v56  ;;  %v6475_v29 = vrot.slane %v6016_v35, 6  ;;  %v10917_v44 = vrot.slane %v6017_v28, 10 }
 0x536   : > { %v6021_v25 = vld [vmem:[#allocation2 + $0x430] sm:$0xf]  ;;  %6687 = vst [vmem:[#allocation3 + $0x438] sm:$0xf] %v6452_v20  ;;  %v6020_v42 = vld [vmem:[#allocation2 + $0x42c] sm:$0xc]  ;;  %v6469_v39 = vsel %vm15578_vm11, %v6467_v3, %v6468_v15  ;;  %v6473_v16 = vsel %vm15578_vm11, %v10916_v22, %v6472_v10 }
 0x537   : > { %v6486_v26 = vrot.slane %v6021_v25, 6  ;;  %6688 = vst [vmem:[#allocation3 + $0x43c] sm:$0xf] %v6455_v2  ;;  %v6481_v13 = vrot.slane %v6479_v38, 4  ;;  %v6482_v33 = vrot.slane %v6019_v53, 6  ;;  %v10918_v40 = vrot.slane %v6020_v42, 10 }
 0x538   : > { %v6022_v23 = vld [vmem:[#allocation2 + $0x434] sm:$0x3]  ;;  %6689 = vst [vmem:[#allocation3 + $0x440] sm:$0xf] %v6459_v4  ;;  %v6023_v1 = vld [vmem:[#allocation2 + $0x444] sm:$0xc]  ;;  %v6476_v32 = vsel %vm15578_vm11, %v6474_v30, %v6475_v29  ;;  %v6480_v34 = vsel %vm15578_vm11, %v10917_v44, %v6479_v38 }
 0x539   : > { %v6024_v11 = vld [vmem:[#allocation2 + $0x448] sm:$0xf]  ;;  %6690 = vst [vmem:[#allocation3 + $0x444] sm:$0xf] %v6462_v8  ;;  %v6025_v49 = vld [vmem:[#allocation2 + $0x44c] sm:$0x3]  ;;  %v6483_v51 = vsel %vm15578_vm11, %v6481_v13, %v6482_v33  ;;  %v6487_v63 = vsel %vm15578_vm11, %v10918_v40, %v6486_v26 }
 0x53a   : > { %v6493_v48 = vrot.slane %v6024_v11, 6  ;;  %6691 = vst [vmem:[#allocation3 + $0x448] sm:$0xf] %v6466_v52  ;;  %v6488_v6 = vrot.slane %v6486_v26, 4  ;;  %v6489_v5 = vrot.slane %v6022_v23, 6  ;;  %v10919_v62 = vrot.slane %v6023_v1, 10 }
 0x53b   : > { %v6026_v21 = vld [vmem:[#allocation2 + $0x45c] sm:$0xc]  ;;  %6692 = vst [vmem:[#allocation3 + $0x44c] sm:$0xf] %v6469_v39  ;;  %v6496_v50 = vrot.slane %v6025_v49, 6 }
 0x53c   : > { %v6027_v58 = vld [vmem:[#allocation2 + $0x460] sm:$0xf]  ;;  %6693 = vst [vmem:[#allocation3 + $0x450] sm:$0xf] %v6473_v16  ;;  %v6495_v19 = vrot.slane %v6493_v48, 4  ;;  %v10920_v36 = vrot.slane %v6026_v21, 10  ;;  %v6490_v18 = vsel %vm15578_vm11, %v6488_v6, %v6489_v5  ;;  %v6494_v14 = vsel %vm15578_vm11, %v10919_v62, %v6493_v48 }
 0x53d   : > { %v6500_v59 = vrot.slane %v6027_v58, 6  ;;  %v6028_v45 = vld [vmem:[#allocation2 + $0x464] sm:$0x3]  ;;  %6694 = vst [vmem:[#allocation3 + $0x454] sm:$0xf] %v6476_v32 }
 0x53e   : > { %v6029_v24 = vld [vmem:[#allocation2 + $0x474] sm:$0xc]  ;;  %6695 = vst [vmem:[#allocation3 + $0x458] sm:$0xf] %v6480_v34  ;;  %v6503_v0 = vrot.slane %v6028_v45, 6  ;;  %v6497_v31 = vsel %vm15578_vm11, %v6495_v19, %v6496_v50 }
 0x53f   : > { %v6502_v47 = vrot.slane %v6500_v59, 4  ;;  %v6030_v37 = vld [vmem:[#allocation2 + $0x478] sm:$0xf]  ;;  %6696 = vst [vmem:[#allocation3 + $0x45c] sm:$0xf] %v6483_v51  ;;  %v10921_v57 = vrot.slane %v6029_v24, 10  ;;  %v6501_v60 = vsel %vm15578_vm11, %v10920_v36, %v6500_v59 }
 0x540   : > { %v6507_v61 = vrot.slane %v6030_v37, 6  ;;  %v6031_v12 = vld [vmem:[#allocation2 + $0x47c] sm:$0x3]  ;;  %6697 = vst [vmem:[#allocation3 + $0x460] sm:$0xf] %v6487_v63 }
 0x541   : > { %v6510_v7 = vrot.slane %v6031_v12, 6  ;;  %6698 = vst [vmem:[#allocation3 + $0x464] sm:$0xf] %v6490_v18  ;;  %v6504_v27 = vsel %vm15578_vm11, %v6502_v47, %v6503_v0 }
 0x542   : > { %v6509_v54 = vrot.slane %v6507_v61, 4  ;;  %6699 = vst [vmem:[#allocation3 + $0x468] sm:$0xf] %v6494_v14  ;;  %v6508_v46 = vsel %vm15578_vm11, %v10921_v57, %v6507_v61 }
 0x543   : > { %6700 = vst [vmem:[#allocation3 + $0x46c] sm:$0xf] %v6497_v31 }
 0x544   : > { %6701 = vst [vmem:[#allocation3 + $0x470] sm:$0xf] %v6501_v60  ;;  %v6511_v9 = vsel %vm15578_vm11, %v6509_v54, %v6510_v7 }
 0x545   : > { %6702 = vst [vmem:[#allocation3 + $0x474] sm:$0xf] %v6504_v27 }
 0x546   : > { %6703 = vst [vmem:[#allocation3 + $0x478] sm:$0xf] %v6508_v46 }
 0x547   : > { %6704 = vst [vmem:[#allocation3 + $0x47c] sm:$0xf] %v6511_v9 }
 0x548 PF: > { %s12533_s29 = smul.u32 576, %s13012_s22  ;;  %s6705_s22 = ssub.s32 16, %s13099_s28 }
 0x549   : > { %s12524_s8 = sshll.u32 %s6705_s22, 3  ;;  %s8552_s10 = ssub.s32 24, %s13099_s28 }
 0x54a   : > { %s16565_s7 = scalar_lea.vmem %s17059_s2, %s12533_s29  ;;  %s16586_s9 = scalar_lea.vmem [#allocation3], %s12524_s8 }
 0x54b   : > { %v12558_v55 = vld [vmem:[%s16565_s7 + $0x78] sm:$0xff]  ;;  %v12557_v17 = vld [vmem:[%s16565_s7 + $0x70] sm:$0xff]  ;;  %v12556_v56 = vld [vmem:[%s16565_s7 + $0x68] sm:$0xff]  ;;  %s11430_s11 = sshll.u32 %s13099_s28, 3  ;;  %s12674_s13 = sshll.u32 %s8552_s10, 3 }
 0x54c   : > { %v12541_v43 = vld [vmem:[%s16565_s7 + $0x38] sm:$0xff]  ;;  %12918 = vmatpush.bf16.msra.mxu2 %v12558_v55  ;;  %v12540_v10 = vld [vmem:[%s16565_s7 + $0x30] sm:$0xff]  ;;  %6878 = vmatpush.bf16.msra.mxu0 %v12558_v55  ;;  %v12539_v35 = vld [vmem:[%s16565_s7 + $0x28] sm:$0xff]  ;;  %s16715_s14 = scalar_lea.vmem [#allocation3], %s11430_s11  ;;  %s16720_s28 = scalar_lea.vmem [#allocation3], %s12674_s13 }
 0x54d   : > { %12926 = vmatpush.bf16.msra.mxu3 %v12541_v43  ;;  %7023 = vmatpush.bf16.msra.mxu1 %v12541_v43  ;;  %v12555_v41 = vld [vmem:[%s16565_s7 + $0x60] sm:$0xff]  ;;  %v12554_v15 = vld [vmem:[%s16565_s7 + $0x58] sm:$0xff]  ;;  %v12553_v38 = vld [vmem:[%s16565_s7 + $0x50] sm:$0xff] }
 0x54e   : > { %v12538_v20 = vld [vmem:[%s16565_s7 + $0x20] sm:$0xff]  ;;  %v12537_v28 = vld [vmem:[%s16565_s7 + $0x18] sm:$0xff]  ;;  %v12536_v2 = vld [vmem:[%s16565_s7 + $0x10] sm:$0xff] }
 0x54f   : > { %v12552_v3 = vld [vmem:[%s16565_s7 + $0x48] sm:$0xff]  ;;  %v12551_v53 = vld [vmem:[%s16565_s7 + $0x40] sm:$0xff]  ;;  %v12575_v30 = vld [vmem:[%s16565_s7 + $0xb8] sm:$0xff] }
 0x550   : > { %12919 = vmatpush.bf16.msra.mxu2 %v12557_v17  ;;  %6879 = vmatpush.bf16.msra.mxu0 %v12557_v17  ;;  %v12535_v22 = vld [vmem:[%s16565_s7 + $0x8] sm:$0xff]  ;;  %v12534_v4 = vld [vmem:[%s16565_s7] sm:$0xff]  ;;  %v12591_v29 = vld [vmem:[%s16565_s7 + $0xf8] sm:$0xff] }
 0x551   : > { %12927 = vmatpush.bf16.msra.mxu3 %v12540_v10  ;;  %7024 = vmatpush.bf16.msra.mxu1 %v12540_v10  ;;  %v12547_v25 = vld [vmem:[%s16586_s9 + $0x1a0] sm:$0xff]  ;;  %v12607_v26 = vld [vmem:[%s16565_s7 + $0x138] sm:$0xff]  ;;  %v12574_v13 = vld [vmem:[%s16565_s7 + $0xb0] sm:$0xff] }
 0x552   : > { %v12529_v8 = vld [vmem:[%s16586_s9 + $0x20] sm:$0xff]  ;;  %v12623_v52 = vld [vmem:[%s16565_s7 + $0x178] sm:$0xff]  ;;  %v12590_v33 = vld [vmem:[%s16565_s7 + $0xf0] sm:$0xff] }
 0x553   : > { %v12543_v44 = vld [vmem:[%s16586_s9 + $0x180] sm:$0xff]  ;;  %v12606_v23 = vld [vmem:[%s16565_s7 + $0x130] sm:$0xff]  ;;  %v12573_v1 = vld [vmem:[%s16565_s7 + $0xa8] sm:$0xff] }
 0x554   : > { %12920 = vmatpush.bf16.msra.mxu2 %v12556_v56  ;;  %6880 = vmatpush.bf16.msra.mxu0 %v12556_v56  ;;  %v12525_v42 = vld [vmem:[%s16586_s9] sm:$0xff]  ;;  %v12622_v39 = vld [vmem:[%s16565_s7 + $0x170] sm:$0xff]  ;;  %v12589_v11 = vld [vmem:[%s16565_s7 + $0xe8] sm:$0xff] }
 0x555   : > { %12928 = vmatpush.bf16.msra.mxu3 %v12539_v35  ;;  %7025 = vmatpush.bf16.msra.mxu1 %v12539_v35  ;;  %v12605_v16 = vld [vmem:[%s16565_s7 + $0x128] sm:$0xff]  ;;  %v12572_v48 = vld [vmem:[%s16565_s7 + $0xa0] sm:$0xff]  ;;  %v12571_v5 = vld [vmem:[%s16565_s7 + $0x98] sm:$0xff] }
 0x556   : > { %v12621_v40 = vld [vmem:[%s16565_s7 + $0x168] sm:$0xff]  ;;  %v12588_v49 = vld [vmem:[%s16565_s7 + $0xe0] sm:$0xff]  ;;  %v12587_v21 = vld [vmem:[%s16565_s7 + $0xd8] sm:$0xff] }
 0x557   : > { %v12604_v32 = vld [vmem:[%s16565_s7 + $0x120] sm:$0xff]  ;;  %v12548_v34 = vld [vmem:[%s16586_s9 + $0x1a8] sm:$0xff]  ;;  %v12603_v51 = vld [vmem:[%s16565_s7 + $0x118] sm:$0xff] }
 0x558   : > { %12921 = vmatpush.bf16.msra.mxu2 %v12555_v41  ;;  %6881 = vmatpush.bf16.msra.mxu0 %v12555_v41  ;;  %v12620_v6 = vld [vmem:[%s16565_s7 + $0x160] sm:$0xff]  ;;  %v12530_v62 = vld [vmem:[%s16586_s9 + $0x28] sm:$0xff]  ;;  %v12619_v19 = vld [vmem:[%s16565_s7 + $0x158] sm:$0xff] }
 0x559   : > { %12929 = vmatpush.bf16.msra.mxu3 %v12538_v20  ;;  %7026 = vmatpush.bf16.msra.mxu1 %v12538_v20  ;;  %v12544_v50 = vld [vmem:[%s16586_s9 + $0x188] sm:$0xff]  ;;  %v12570_v59 = vld [vmem:[%s16565_s7 + $0x90] sm:$0xff]  ;;  %v12568_v37 = vld [vmem:[%s16565_s7 + $0x80] sm:$0xff] }
 0x55a   : > { %v12526_v58 = vld [vmem:[%s16586_s9 + $0x8] sm:$0xff]  ;;  %v12586_v45 = vld [vmem:[%s16565_s7 + $0xd0] sm:$0xff]  ;;  %v12584_v14 = vld [vmem:[%s16565_s7 + $0xc0] sm:$0xff] }
 0x55b   : > { %v12602_v63 = vld [vmem:[%s16565_s7 + $0x110] sm:$0xff]  ;;  %v12569_v24 = vld [vmem:[%s16565_s7 + $0x88] sm:$0xff]  ;;  %v12600_v57 = vld [vmem:[%s16565_s7 + $0x100] sm:$0xff] }
 0x55c   : > { %12922 = vmatpush.bf16.msra.mxu2 %v12554_v15  ;;  %6882 = vmatpush.bf16.msra.mxu0 %v12554_v15  ;;  %v12618_v36 = vld [vmem:[%s16565_s7 + $0x150] sm:$0xff]  ;;  %v12585_v18 = vld [vmem:[%s16565_s7 + $0xc8] sm:$0xff]  ;;  %v12616_v60 = vld [vmem:[%s16565_s7 + $0x140] sm:$0xff] }
 0x55d   : > { %12930 = vmatpush.bf16.msra.mxu3 %v12537_v28  ;;  %7027 = vmatpush.bf16.msra.mxu1 %v12537_v28  ;;  %v12601_v47 = vld [vmem:[%s16565_s7 + $0x108] sm:$0xff]  ;;  %v12549_v61 = vld [vmem:[%s16586_s9 + $0x1b0] sm:$0xff]  ;;  %v12639_v54 = vld [vmem:[%s16565_s7 + $0x1b8] sm:$0xff] }
 0x55e   : > { %v12617_v0 = vld [vmem:[%s16565_s7 + $0x148] sm:$0xff]  ;;  %v12531_v12 = vld [vmem:[%s16586_s9 + $0x30] sm:$0xff]  ;;  %v12656_v27 = vld [vmem:[%s16565_s7 + $0x1f8] sm:$0xff] }
 0x55f   : > { %v12545_v31 = vld [vmem:[%s16586_s9 + $0x190] sm:$0xff]  ;;  %v12673_v46 = vld [vmem:[%s16565_s7 + $0x238] sm:$0xff]  ;;  %v12560_v15 = vld [vmem:[%s16586_s9 + $0x300] sm:$0xff] }
 0x560   : > { %12923 = vmatpush.bf16.msra.mxu2 %v12553_v38  ;;  %6883 = vmatpush.bf16.msra.mxu0 %v12553_v38  ;;  %v12527_v7 = vld [vmem:[%s16586_s9 + $0x10] sm:$0xff]  ;;  %v12707_v9 = vld [vmem:[%s16565_s7 + $0x78] sm:$0xff]  ;;  %v12576_v28 = vld [vmem:[#allocation3 + $0x80] sm:$0xff] }
 0x561   : > { %12931 = vmatpush.bf16.msra.mxu3 %v12536_v2  ;;  %7028 = vmatpush.bf16.msra.mxu1 %v12536_v2  ;;  %v12550_v55 = vld [vmem:[%s16586_s9 + $0x1b8] sm:$0xff]  ;;  %v12638_v56 = vld [vmem:[%s16565_s7 + $0x1b0] sm:$0xff]  ;;  %v12592_v38 = vld [vmem:[#allocation3 + $0x200] sm:$0xff] }
 0x562   : > { %v12532_v43 = vld [vmem:[%s16586_s9 + $0x38] sm:$0xff]  ;;  %v12655_v35 = vld [vmem:[%s16565_s7 + $0x1f0] sm:$0xff]  ;;  %v12608_v2 = vld [vmem:[#allocation3 + $0x380] sm:$0xff] }
 0x563   : > { %v12546_v17 = vld [vmem:[%s16586_s9 + $0x198] sm:$0xff]  ;;  %v12672_v41 = vld [vmem:[%s16565_s7 + $0x230] sm:$0xff] }
 0x564   : > { %12924 = vmatpush.bf16.msra.mxu2 %v12552_v3  ;;  %6884 = vmatpush.bf16.msra.mxu0 %v12552_v3  ;;  %v12528_v10 = vld [vmem:[%s16586_s9 + $0x18] sm:$0xff]  ;;  %v12706_v20 = vld [vmem:[%s16565_s7 + $0x70] sm:$0xff]  ;;  %v12637_v3 = vld [vmem:[%s16565_s7 + $0x1a8] sm:$0xff] }
 0x565   : > { %12932 = vmatpush.bf16.msra.mxu3 %v12535_v22  ;;  %7029 = vmatpush.bf16.msra.mxu1 %v12535_v22  ;;  %v12654_v22 = vld [vmem:[%s16565_s7 + $0x1e8] sm:$0xff] }
 0x568   : > { %12925 = vmatpush.bf16.msra.mxu2 %v12551_v53  ;;  %6885 = vmatpush.bf16.msra.mxu0 %v12551_v53  ;;  %v12671_v53 = vld [vmem:[%s16565_s7 + $0x228] sm:$0xff] }
 0x569   : > { %12933 = vmatpush.bf16.msra.mxu3 %v12534_v4  ;;  %7030 = vmatpush.bf16.msra.mxu1 %v12534_v4  ;;  %v12705_v4 = vld [vmem:[%s16565_s7 + $0x68] sm:$0xff] }
 0x56b   : > { %6906 = vmatmul.bf16.vlgmr.msra.gmra.mxu2 %v12547_v25  ;;  %6886 = vmatmul.bf16.vlgmr.msra.gmra.mxu0 %v12543_v44  ;;  %v12593_v25 = vld [vmem:[#allocation3 + $0x208] sm:$0xff]  ;;  %v12636_v44 = vld [vmem:[%s16565_s7 + $0x1a0] sm:$0xff] }
 0x56c   : > { %7206 = vmatpush.bf16.msrb.mxu2 %v12575_v30  ;;  %7051 = vmatmul.bf16.vlgmr.msra.gmra.mxu3 %v12529_v8  ;;  %v12561_v30 = vld [vmem:[%s16586_s9 + $0x308] sm:$0xff] }
 0x56d   : > { %7403 = vmatpush.bf16.msrb.mxu3 %v12591_v29  ;;  %7031 = vmatmul.bf16.vlgmr.msra.gmra.mxu1 %v12525_v42  ;;  %v12577_v29 = vld [vmem:[#allocation3 + $0x88] sm:$0xff]  ;;  %v12653_v42 = vld [vmem:[%s16565_s7 + $0x1e0] sm:$0xff] }
 0x56e   : > { %7600 = vmatpush.bf16.msrb.mxu0 %v12607_v26  ;;  %7797 = vmatpush.bf16.msrb.mxu1 %v12623_v52  ;;  %v12609_v8 = vld [vmem:[#allocation3 + $0x388] sm:$0xff]  ;;  %v12670_v26 = vld [vmem:[%s16565_s7 + $0x220] sm:$0xff] }
 0x56f   : > { %v12704_v52 = vld [vmem:[%s16565_s7 + $0x60] sm:$0xff] }
 0x570   : > { %7207 = vmatpush.bf16.msrb.mxu2 %v12574_v13  ;;  %v12562_v13 = vld [vmem:[%s16586_s9 + $0x310] sm:$0xff] }
 0x571   : > { %7404 = vmatpush.bf16.msrb.mxu3 %v12590_v33  ;;  %v12578_v33 = vld [vmem:[#allocation3 + $0x90] sm:$0xff] }
 0x572   : > { %7601 = vmatpush.bf16.msrb.mxu0 %v12606_v23  ;;  %7798 = vmatpush.bf16.msrb.mxu1 %v12622_v39  ;;  %v12594_v23 = vld [vmem:[#allocation3 + $0x210] sm:$0xff] }
 0x573   : > { %v12610_v39 = vld [vmem:[#allocation3 + $0x390] sm:$0xff] }
 0x574   : > { %7208 = vmatpush.bf16.msrb.mxu2 %v12573_v1  ;;  %v12635_v1 = vld [vmem:[%s16565_s7 + $0x198] sm:$0xff] }
 0x575   : > { %7405 = vmatpush.bf16.msrb.mxu3 %v12589_v11  ;;  %v12652_v11 = vld [vmem:[%s16565_s7 + $0x1d8] sm:$0xff] }
 0x576   : > { %7602 = vmatpush.bf16.msrb.mxu0 %v12605_v16  ;;  %7799 = vmatpush.bf16.msrb.mxu1 %v12621_v40  ;;  %v12669_v16 = vld [vmem:[%s16565_s7 + $0x218] sm:$0xff] }
 0x577   : > { %v12563_v40 = vld [vmem:[%s16586_s9 + $0x318] sm:$0xff] }
 0x578   : > { %7209 = vmatpush.bf16.msrb.mxu2 %v12572_v48  ;;  %v12579_v48 = vld [vmem:[#allocation3 + $0x98] sm:$0xff] }
 0x579   : > { %7406 = vmatpush.bf16.msrb.mxu3 %v12588_v49  ;;  %v12703_v49 = vld [vmem:[%s16565_s7 + $0x58] sm:$0xff] }
 0x57a   : > { %7603 = vmatpush.bf16.msrb.mxu0 %v12604_v32  ;;  %7800 = vmatpush.bf16.msrb.mxu1 %v12620_v6  ;;  %v12595_v32 = vld [vmem:[#allocation3 + $0x218] sm:$0xff] }
 0x57b   : > { %6911 = vmatmul.bf16.gmra.mxu2 %v12548_v34  ;;  %6891 = vmatmul.bf16.gmra.mxu0 %v12544_v50  ;;  %v12611_v6 = vld [vmem:[#allocation3 + $0x398] sm:$0xff]  ;;  %v12668_v34 = vld [vmem:[%s16565_s7 + $0x210] sm:$0xff]  ;;  %v12580_v50 = vld [vmem:[#allocation3 + $0xa0] sm:$0xff] }
 0x57c   : > { %7210 = vmatpush.bf16.msrb.mxu2 %v12571_v5  ;;  %7056 = vmatmul.bf16.gmra.mxu3 %v12530_v62  ;;  %v12634_v5 = vld [vmem:[%s16565_s7 + $0x190] sm:$0xff]  ;;  %v12564_v62 = vld [vmem:[%s16586_s9 + $0x320] sm:$0xff] }
 0x57d   : > { %7407 = vmatpush.bf16.msrb.mxu3 %v12587_v21  ;;  %7036 = vmatmul.bf16.gmra.mxu1 %v12526_v58  ;;  %v12651_v21 = vld [vmem:[%s16565_s7 + $0x1d0] sm:$0xff] }
 0x57e   : > { %7604 = vmatpush.bf16.msrb.mxu0 %v12603_v51  ;;  %7801 = vmatpush.bf16.msrb.mxu1 %v12619_v19  ;;  %v12702_v58 = vld [vmem:[%s16565_s7 + $0x50] sm:$0xff]  ;;  %v12596_v51 = vld [vmem:[#allocation3 + $0x220] sm:$0xff] }
 0x57f   : > { %v12612_v19 = vld [vmem:[#allocation3 + $0x3a0] sm:$0xff] }
 0x580   : > { %7211 = vmatpush.bf16.msrb.mxu2 %v12570_v59 }
 0x581   : > { %7408 = vmatpush.bf16.msrb.mxu3 %v12586_v45 }
 0x582   : > { %7605 = vmatpush.bf16.msrb.mxu0 %v12602_v63  ;;  %7802 = vmatpush.bf16.msrb.mxu1 %v12618_v36  ;;  %v12633_v36 = vld [vmem:[%s16565_s7 + $0x188] sm:$0xff] }
 0x584   : > { %7212 = vmatpush.bf16.msrb.mxu2 %v12569_v24  ;;  %v12650_v24 = vld [vmem:[%s16565_s7 + $0x1c8] sm:$0xff] }
 0x585   : > { %7409 = vmatpush.bf16.msrb.mxu3 %v12585_v18 }
 0x586   : > { %7606 = vmatpush.bf16.msrb.mxu0 %v12601_v47  ;;  %7803 = vmatpush.bf16.msrb.mxu1 %v12617_v0 }
 0x588   : > { %7213 = vmatpush.bf16.msrb.mxu2 %v12568_v37 }
 0x589   : > { %7410 = vmatpush.bf16.msrb.mxu3 %v12584_v14 }
 0x58a   : > { %7607 = vmatpush.bf16.msrb.mxu0 %v12600_v57  ;;  %7804 = vmatpush.bf16.msrb.mxu1 %v12616_v60  ;;  %v12565_v60 = vld [vmem:[%s16586_s9 + $0x328] sm:$0xff] }
 0x58b   : > { %6916 = vmatmul.bf16.gmra.mxu2 %v12549_v61  ;;  %6896 = vmatmul.bf16.gmra.mxu0 %v12545_v31  ;;  %v12667_v61 = vld [vmem:[%s16565_s7 + $0x208] sm:$0xff] }
 0x58c   : > { %7061 = vmatmul.bf16.gmra.mxu3 %v12531_v12  ;;  %7997 = vmatpush.bf16.msra.mxu2 %v12639_v54  ;;  %v12581_v54 = vld [vmem:[#allocation3 + $0xa8] sm:$0xff] }
 0x58d   : > { %7041 = vmatmul.bf16.gmra.mxu1 %v12527_v7  ;;  %8196 = vmatpush.bf16.msra.mxu3 %v12656_v27  ;;  %v12701_v27 = vld [vmem:[%s16565_s7 + $0x48] sm:$0xff] }
 0x58e   : > { %8395 = vmatpush.bf16.msra.mxu0 %v12673_v46  ;;  %8719 = vmatpush.bf16.msra.mxu1 %v12707_v9  ;;  %v12597_v46 = vld [vmem:[#allocation3 + $0x228] sm:$0xff] }
 0x58f   : > { %v12613_v9 = vld [vmem:[#allocation3 + $0x3a8] sm:$0xff] }
 0x590   : > { %7998 = vmatpush.bf16.msra.mxu2 %v12638_v56  ;;  %v12649_v56 = vld [vmem:[%s16565_s7 + $0x1c0] sm:$0xff] }
 0x591   : > { %8197 = vmatpush.bf16.msra.mxu3 %v12655_v35 }
 0x592   : > { %8396 = vmatpush.bf16.msra.mxu0 %v12672_v41  ;;  %8720 = vmatpush.bf16.msra.mxu1 %v12706_v20 }
 0x594   : > { %7999 = vmatpush.bf16.msra.mxu2 %v12637_v3 }
 0x595   : > { %8198 = vmatpush.bf16.msra.mxu3 %v12654_v22 }
 0x596   : > { %8397 = vmatpush.bf16.msra.mxu0 %v12671_v53  ;;  %8721 = vmatpush.bf16.msra.mxu1 %v12705_v4  ;;  %v12566_v4 = vld [vmem:[%s16586_s9 + $0x330] sm:$0xff] }
 0x598   : > { %8000 = vmatpush.bf16.msra.mxu2 %v12636_v44 }
 0x599   : > { %8199 = vmatpush.bf16.msra.mxu3 %v12653_v42 }
 0x59a   : > { %8398 = vmatpush.bf16.msra.mxu0 %v12670_v26  ;;  %8722 = vmatpush.bf16.msra.mxu1 %v12704_v52  ;;  %v12690_v52 = vld [vmem:[%s16565_s7 + $0x38] sm:$0xff] }
 0x59b   : > { %6921 = vmatmul.bf16.gmra.mxu2 %v12550_v55  ;;  %6901 = vmatmul.bf16.gmra.mxu0 %v12546_v17 }
 0x59c   : > { %7066 = vmatmul.bf16.gmra.mxu3 %v12532_v43  ;;  %8001 = vmatpush.bf16.msra.mxu2 %v12635_v1 }
 0x59d   : > { %7046 = vmatmul.bf16.gmra.mxu1 %v12528_v10  ;;  %8200 = vmatpush.bf16.msra.mxu3 %v12652_v11  ;;  %v12632_v10 = vld [vmem:[%s16565_s7 + $0x180] sm:$0xff] }
 0x59e   : > { %8399 = vmatpush.bf16.msra.mxu0 %v12669_v16  ;;  %8723 = vmatpush.bf16.msra.mxu1 %v12703_v49 }
 0x5a0   : > { %8002 = vmatpush.bf16.msra.mxu2 %v12634_v5  ;;  %v12583_v5 = vld [vmem:[#allocation3 + $0xb8] sm:$0xff] }
 0x5a1   : > { %8201 = vmatpush.bf16.msra.mxu3 %v12651_v21  ;;  %v12599_v21 = vld [vmem:[#allocation3 + $0x238] sm:$0xff] }
 0x5a2   : > { %8400 = vmatpush.bf16.msra.mxu0 %v12668_v34  ;;  %8724 = vmatpush.bf16.msra.mxu1 %v12702_v58  ;;  %v12615_v34 = vld [vmem:[#allocation3 + $0x3b8] sm:$0xff] }
 0x5a4   : > { %8003 = vmatpush.bf16.msra.mxu2 %v12633_v36 }
 0x5a5   : > { %8202 = vmatpush.bf16.msra.mxu3 %v12650_v24 }
 0x5a6   : > { %8401 = vmatpush.bf16.msra.mxu0 %v12667_v61  ;;  %8725 = vmatpush.bf16.msra.mxu1 %v12701_v27  ;;  %v12658_v27 = vld [vmem:[%s16715_s14 + $0x380] sm:$0xff] }
 0x5a8   : > { %8004 = vmatpush.bf16.msra.mxu2 %v12632_v10  ;;  %v12688_v10 = vld [vmem:[%s16565_s7 + $0x28] sm:$0xff] }
 0x5a9   : > { %8203 = vmatpush.bf16.msra.mxu3 %v12649_v56  ;;  %v12722_v56 = vld [vmem:[%s16565_s7 + $0xa8] sm:$0xff] }
 0x5ab   : > { %7214 = vmatmul.bf16.vlgmr.msrb.gmra.mxu2 %v12560_v15  ;;  %7608 = vmatmul.bf16.vlgmr.msrb.gmra.mxu0 %v12592_v38 }
 0x5ac   : > { %7411 = vmatmul.bf16.vlgmr.msrb.gmra.mxu3 %v12576_v28  ;;  %8864 = vmatpush.bf16.msrb.mxu2 %v12690_v52  ;;  %v12659_v52 = vld [vmem:[%s16715_s14 + $0x388] sm:$0xff] }
 0x5ad   : > { %7805 = vmatmul.bf16.vlgmr.msrb.gmra.mxu1 %v12608_v2  ;;  %v12666_v2 = vld [vmem:[%s16565_s7 + $0x200] sm:$0xff] }
 0x5ae   : > { %8402 = vmatpush.bf16.msra.mxu0 %v12666_v2 }
 0x5bb   : > { %7219 = vmatmul.bf16.gmra.mxu2 %v12561_v30  ;;  %7613 = vmatmul.bf16.gmra.mxu0 %v12593_v25  ;;  %v12582_v30 = vld [vmem:[#allocation3 + $0xb0] sm:$0xff] }
 0x5bc   : > { %7416 = vmatmul.bf16.gmra.mxu3 %v12577_v29  ;;  %v12700_v29 = vld [vmem:[%s16565_s7 + $0x40] sm:$0xff]  ;;  %v12598_v25 = vld [vmem:[#allocation3 + $0x230] sm:$0xff] }
 0x5bd   : > { %7810 = vmatmul.bf16.gmra.mxu1 %v12609_v8  ;;  %v12614_v8 = vld [vmem:[#allocation3 + $0x3b0] sm:$0xff] }
 0x5be   : > { %8726 = vmatpush.bf16.msra.mxu1 %v12700_v29 }
 0x5cb   : > { %7224 = vmatmul.bf16.gmra.mxu2 %v12562_v13  ;;  %7618 = vmatmul.bf16.gmra.mxu0 %v12594_v23  ;;  %v12724_v13 = vld [vmem:[%s16565_s7 + $0xb8] sm:$0xff] }
 0x5cc   : > { %7421 = vmatmul.bf16.gmra.mxu3 %v12578_v33 }
 0x5cd   : > { %7815 = vmatmul.bf16.gmra.mxu1 %v12610_v39  ;;  %9044 = vmatpush.bf16.msrb.mxu3 %v12724_v13  ;;  %v12693_v13 = vld [vmem:[%s16720_s28 + $0x188] sm:$0xff] }
 0x5db   : > { %7229 = vmatmul.bf16.gmra.mxu2 %v12563_v40  ;;  %7623 = vmatmul.bf16.gmra.mxu0 %v12595_v32  ;;  %v12740_v40 = vld [vmem:[%s16565_s7 + $0xf8] sm:$0xff] }
 0x5dc   : > { %7426 = vmatmul.bf16.gmra.mxu3 %v12579_v48  ;;  %9238 = vmatpush.bf16.msrb.mxu0 %v12740_v40  ;;  %v12687_v40 = vld [vmem:[%s16565_s7 + $0x20] sm:$0xff] }
 0x5dd   : > { %7820 = vmatmul.bf16.gmra.mxu1 %v12611_v6  ;;  %v12567_v6 = vld [vmem:[%s16586_s9 + $0x338] sm:$0xff] }
 0x5e8   : > { %v6887_v59 = vpop.f32.mrf.mxu0 }
 0x5ea   : > { %v7032_v45 = vpop.f32.mrf.mxu1 }
 0x5eb   : > { %v16663_v63 = vadd.f32 %v7032_v45, %v6887_v59  ;;  %7234 = vmatmul.bf16.gmra.mxu2 %v12564_v62  ;;  %7628 = vmatmul.bf16.gmra.mxu0 %v12596_v51  ;;  %v12756_v51 = vld [vmem:[%s16565_s7 + $0x138] sm:$0xff]  ;;  %v12723_v59 = vld [vmem:[%s16565_s7 + $0xb0] sm:$0xff] }
 0x5ec   : > { %7431 = vmatmul.bf16.gmra.mxu3 %v12580_v50  ;;  %9432 = vmatpush.bf16.msrb.mxu1 %v12756_v51  ;;  %v12737_v51 = vld [vmem:[%s16565_s7 + $0xe0] sm:$0xff] }
 0x5ed   : > { %7825 = vmatmul.bf16.gmra.mxu1 %v12612_v19  ;;  %v12689_v19 = vld [vmem:[%s16565_s7 + $0x30] sm:$0xff]  ;;  %9045 = vmatpush.bf16.msrb.mxu3 %v12723_v59 }
 0x5ee   : > { %v6907_v18 = vpop.f32.mrf.mxu2  ;;  %8865 = vmatpush.bf16.msrb.mxu2 %v12689_v19 }
 0x5ef   : > { %v7052_v47 = vpop.f32.mrf.mxu3 }
 0x5f0   : > { %v16667_v0 = vadd.f32 %v7052_v47, %v6907_v18  ;;  %v6889_v37 = vpop.f32.mrf.mxu0 }
 0x5f1   : > { %9046 = vmatpush.bf16.msrb.mxu3 %v12722_v56 }
 0x5f2   : > { %v7034_v14 = vpop.f32.mrf.mxu1  ;;  %8866 = vmatpush.bf16.msrb.mxu2 %v12688_v10 }
 0x5f3   : > { %v16669_v57 = vadd.f32 %v7034_v14, %v6889_v37  ;;  %v12739_v14 = vld [vmem:[%s16565_s7 + $0xf0] sm:$0xff] }
 0x5f4   : > { %9239 = vmatpush.bf16.msrb.mxu0 %v12739_v14  ;;  %v12660_v14 = vld [vmem:[%s16715_s14 + $0x390] sm:$0xff] }
 0x5f6   : > { %v6909_v12 = vpop.f32.mrf.mxu2  ;;  %8867 = vmatpush.bf16.msrb.mxu2 %v12687_v40 }
 0x5f7   : > { %v7054_v31 = vpop.f32.mrf.mxu3 }
 0x5f8   : > { %v16672_v7 = vadd.f32 %v7054_v31, %v6909_v12  ;;  %v6892_v55 = vpop.f32.mrf.mxu0 }
 0x5fa   : > { %v7037_v43 = vpop.f32.mrf.mxu1 }
 0x5fb   : > { %v16676_v17 = vadd.f32 %v7037_v43, %v6892_v55  ;;  %7239 = vmatmul.bf16.gmra.mxu2 %v12565_v60  ;;  %7633 = vmatmul.bf16.gmra.mxu0 %v12597_v46  ;;  %v12624_v60 = vld [vmem:[%s16715_s14 + $0x80] sm:$0xff]  ;;  %v12755_v43 = vld [vmem:[%s16565_s7 + $0x130] sm:$0xff] }
 0x5fc   : > { %7436 = vmatmul.bf16.gmra.mxu3 %v12581_v54  ;;  %v12641_v54 = vld [vmem:[%s16715_s14 + $0x200] sm:$0xff]  ;;  %9433 = vmatpush.bf16.msrb.mxu1 %v12755_v43 }
 0x5fd   : > { %7830 = vmatmul.bf16.gmra.mxu1 %v12613_v9  ;;  %v12692_v46 = vld [vmem:[%s16720_s28 + $0x180] sm:$0xff] }
 0x5fe   : > { %v6912_v35 = vpop.f32.mrf.mxu2 }
 0x5ff   : > { %v7057_v41 = vpop.f32.mrf.mxu3 }
 0x600   : > { %v16680_v20 = vadd.f32 %v7057_v41, %v6912_v35  ;;  %v6894_v15 = vpop.f32.mrf.mxu0 }
 0x602   : > { %v7039_v28 = vpop.f32.mrf.mxu1 }
 0x603   : > { %v16682_v38 = vadd.f32 %v7039_v28, %v6894_v15 }
 0x606   : > { %v6914_v3 = vpop.f32.mrf.mxu2 }
 0x607   : > { %v7059_v22 = vpop.f32.mrf.mxu3 }
 0x608   : > { %v16685_v53 = vadd.f32 %v7059_v22, %v6914_v3  ;;  %v6897_v44 = vpop.f32.mrf.mxu0 }
 0x60a   : > { %v7042_v42 = vpop.f32.mrf.mxu1 }
 0x60b   : > { %v16689_v26 = vadd.f32 %v7042_v42, %v6897_v44  ;;  %7244 = vmatmul.bf16.gmra.mxu2 %v12566_v4  ;;  %7638 = vmatmul.bf16.gmra.mxu0 %v12598_v25  ;;  %v12738_v4 = vld [vmem:[%s16565_s7 + $0xe8] sm:$0xff] }
 0x60c   : > { %7441 = vmatmul.bf16.gmra.mxu3 %v12582_v30  ;;  %9240 = vmatpush.bf16.msrb.mxu0 %v12738_v4  ;;  %v12625_v44 = vld [vmem:[%s16715_s14 + $0x88] sm:$0xff] }
 0x60d   : > { %7835 = vmatmul.bf16.gmra.mxu1 %v12614_v8  ;;  %v12642_v42 = vld [vmem:[%s16715_s14 + $0x208] sm:$0xff] }
 0x60e   : > { %v6917_v33 = vpop.f32.mrf.mxu2 }
 0x60f   : > { %v7062_v23 = vpop.f32.mrf.mxu3 }
 0x610   : > { %v16693_v39 = vadd.f32 %v7062_v23, %v6917_v33  ;;  %v6899_v1 = vpop.f32.mrf.mxu0  ;;  %9241 = vmatpush.bf16.msrb.mxu0 %v12737_v51 }
 0x612   : > { %v7044_v11 = vpop.f32.mrf.mxu1 }
 0x613   : > { %v16695_v16 = vadd.f32 %v7044_v11, %v6899_v1  ;;  %v12754_v11 = vld [vmem:[%s16565_s7 + $0x128] sm:$0xff] }
 0x614   : > { %9434 = vmatpush.bf16.msrb.mxu1 %v12754_v11 }
 0x616   : > { %v6919_v48 = vpop.f32.mrf.mxu2 }
 0x617   : > { %v7064_v49 = vpop.f32.mrf.mxu3 }
 0x618   : > { %v16698_v32 = vadd.f32 %v7064_v49, %v6919_v48  ;;  %v6902_v62 = vpop.f32.mrf.mxu0  ;;  %v12721_v48 = vld [vmem:[%s16565_s7 + $0xa0] sm:$0xff] }
 0x619   : > { %9047 = vmatpush.bf16.msrb.mxu3 %v12721_v48 }
 0x61a   : > { %v7047_v50 = vpop.f32.mrf.mxu1 }
 0x61b   : > { %v16701_v58 = vadd.f32 %v7047_v50, %v6902_v62  ;;  %7249 = vmatmul.bf16.gmra.mxu2 %v12567_v6  ;;  %7643 = vmatmul.bf16.gmra.mxu0 %v12599_v21 }
 0x61c   : > { %7446 = vmatmul.bf16.gmra.mxu3 %v12583_v5 }
 0x61d   : > { %7840 = vmatmul.bf16.gmra.mxu1 %v12615_v34 }
 0x61e   : > { %v6922_v45 = vpop.f32.mrf.mxu2 }
 0x61f   : > { %v7067_v36 = vpop.f32.mrf.mxu3 }
 0x620   : > { %v16706_v24 = vadd.f32 %v7067_v36, %v6922_v45  ;;  %v6904_v18 = vpop.f32.mrf.mxu0 }
 0x622   : > { %v7049_v47 = vpop.f32.mrf.mxu1 }
 0x623   : > { %v16710_v37 = vadd.f32 %v7049_v47, %v6904_v18  ;;  %v12626_v18 = vld [vmem:[%s16715_s14 + $0x90] sm:$0xff] }
 0x624   : > { %v12643_v47 = vld [vmem:[%s16715_s14 + $0x210] sm:$0xff] }
 0x626   : > { %v6924_v61 = vpop.f32.mrf.mxu2 }
 0x627   : > { %v7069_v12 = vpop.f32.mrf.mxu3 }
 0x628   : > { %v16713_v31 = vadd.f32 %v7069_v12, %v6924_v61  ;;  %v7609_v9 = vpop.f32.mrf.mxu0  ;;  %v12694_v61 = vld [vmem:[%s16720_s28 + $0x190] sm:$0xff] }
 0x62a   : > { %v7806_v55 = vpop.f32.mrf.mxu1 }
 0x62b   : > { %8005 = vmatmul.bf16.vlgmr.msra.gmra.mxu2 %v12624_v60  ;;  %8403 = vmatmul.bf16.vlgmr.msra.gmra.mxu0 %v12658_v27  ;;  %v12753_v27 = vld [vmem:[%s16565_s7 + $0x120] sm:$0xff] }
 0x62c   : > { %8204 = vmatmul.bf16.vlgmr.msra.gmra.mxu3 %v12641_v54  ;;  %9435 = vmatpush.bf16.msrb.mxu1 %v12753_v27 }
 0x62d   : > { %8727 = vmatmul.bf16.vlgmr.msra.gmra.mxu1 %v12692_v46  ;;  %v12686_v46 = vld [vmem:[%s16565_s7 + $0x18] sm:$0xff] }
 0x62e   : > { %v7215_v35 = vpop.f32.mrf.mxu2  ;;  %8868 = vmatpush.bf16.msrb.mxu2 %v12686_v46 }
 0x62f   : > { %v7412_v41 = vpop.f32.mrf.mxu3  ;;  %v7255_v15 = vadd.f32 %v7215_v35, %v16663_v63 }
 0x630   : > { %v7611_v2 = vpop.f32.mrf.mxu0 }
 0x631   : > { %v7452_v28 = vadd.f32 %v7412_v41, %v7255_v15 }
 0x632   : > { %v7808_v3 = vpop.f32.mrf.mxu1 }
 0x633   : > { %v7649_v22 = vadd.f32 %v7609_v9, %v7452_v28  ;;  %v12720_v9 = vld [vmem:[%s16565_s7 + $0x98] sm:$0xff] }
 0x634   : > { %9048 = vmatpush.bf16.msrb.mxu3 %v12720_v9  ;;  %v12736_v28 = vld [vmem:[%s16565_s7 + $0xd8] sm:$0xff] }
 0x635   : > { %v16728_v30 = vadd.f32 %v7806_v55, %v7649_v22  ;;  %9242 = vmatpush.bf16.msrb.mxu0 %v12736_v28 }
 0x636   : > { %v7217_v29 = vpop.f32.mrf.mxu2 }
 0x637   : > { %v7414_v25 = vpop.f32.mrf.mxu3  ;;  %v7256_v8 = vadd.f32 %v7217_v29, %v16669_v57  ;;  %v12627_v29 = vld [vmem:[%s16715_s14 + $0x98] sm:$0xff] }
 0x638   : > { %v7614_v33 = vpop.f32.mrf.mxu0 }
 0x639   : > { %v7453_v63 = vadd.f32 %v7414_v25, %v7256_v8  ;;  %v12644_v25 = vld [vmem:[%s16715_s14 + $0x218] sm:$0xff] }
 0x63a   : > { %v7811_v23 = vpop.f32.mrf.mxu1  ;;  %v12661_v8 = vld [vmem:[%s16715_s14 + $0x398] sm:$0xff] }
 0x63b   : > { %v7650_v1 = vadd.f32 %v7611_v2, %v7453_v63  ;;  %8010 = vmatmul.bf16.gmra.mxu2 %v12625_v44  ;;  %8408 = vmatmul.bf16.gmra.mxu0 %v12659_v52  ;;  %v12695_v44 = vld [vmem:[%s16720_s28 + $0x198] sm:$0xff] }
 0x63c   : > { %8209 = vmatmul.bf16.gmra.mxu3 %v12642_v42  ;;  %v12752_v63 = vld [vmem:[%s16565_s7 + $0x118] sm:$0xff] }
 0x63d   : > { %8732 = vmatmul.bf16.gmra.mxu1 %v12693_v13  ;;  %v16738_v57 = vadd.f32 %v7808_v3, %v7650_v1 }
 0x63e   : > { %v7220_v49 = vpop.f32.mrf.mxu2  ;;  %9436 = vmatpush.bf16.msrb.mxu1 %v12752_v63 }
 0x63f   : > { %v7417_v6 = vpop.f32.mrf.mxu3  ;;  %v7257_v5 = vadd.f32 %v7220_v49, %v16676_v17 }
 0x640   : > { %v7616_v34 = vpop.f32.mrf.mxu0 }
 0x641   : > { %v7454_v21 = vadd.f32 %v7417_v6, %v7257_v5 }
 0x642   : > { %v7813_v62 = vpop.f32.mrf.mxu1 }
 0x643   : > { %v7651_v50 = vadd.f32 %v7614_v33, %v7454_v21  ;;  %v12685_v33 = vld [vmem:[%s16565_s7 + $0x10] sm:$0xff] }
 0x644   : > { %8869 = vmatpush.bf16.msrb.mxu2 %v12685_v33  ;;  %v12735_v21 = vld [vmem:[%s16565_s7 + $0xd0] sm:$0xff] }
 0x645   : > { %v16742_v19 = vadd.f32 %v7811_v23, %v7651_v50  ;;  %v12719_v23 = vld [vmem:[%s16565_s7 + $0x90] sm:$0xff]  ;;  %9243 = vmatpush.bf16.msrb.mxu0 %v12735_v21 }
 0x646   : > { %v7222_v59 = vpop.f32.mrf.mxu2  ;;  %9049 = vmatpush.bf16.msrb.mxu3 %v12719_v23 }
 0x647   : > { %v7419_v45 = vpop.f32.mrf.mxu3  ;;  %v7258_v36 = vadd.f32 %v7222_v59, %v16682_v38  ;;  %v12628_v59 = vld [vmem:[%s16715_s14 + $0xa0] sm:$0xff] }
 0x648   : > { %v7619_v12 = vpop.f32.mrf.mxu0 }
 0x649   : > { %v7455_v17 = vadd.f32 %v7419_v45, %v7258_v36  ;;  %v12645_v45 = vld [vmem:[%s16715_s14 + $0x220] sm:$0xff] }
 0x64a   : > { %v7816_v60 = vpop.f32.mrf.mxu1  ;;  %v12662_v36 = vld [vmem:[%s16715_s14 + $0x3a0] sm:$0xff] }
 0x64b   : > { %v7652_v54 = vadd.f32 %v7616_v34, %v7455_v17  ;;  %8015 = vmatmul.bf16.gmra.mxu2 %v12626_v18  ;;  %8413 = vmatmul.bf16.gmra.mxu0 %v12660_v14  ;;  %v12696_v18 = vld [vmem:[%s16720_s28 + $0x1a0] sm:$0xff]  ;;  %v12751_v17 = vld [vmem:[%s16565_s7 + $0x110] sm:$0xff] }
 0x64c   : > { %8214 = vmatmul.bf16.gmra.mxu3 %v12643_v47  ;;  %9437 = vmatpush.bf16.msrb.mxu1 %v12751_v17 }
 0x64d   : > { %8737 = vmatmul.bf16.gmra.mxu1 %v12694_v61  ;;  %v16752_v38 = vadd.f32 %v7813_v62, %v7652_v54 }
 0x64e   : > { %v7225_v55 = vpop.f32.mrf.mxu2 }
 0x64f   : > { %v7422_v43 = vpop.f32.mrf.mxu3  ;;  %v7259_v10 = vadd.f32 %v7225_v55, %v16689_v26 }
 0x650   : > { %v7621_v35 = vpop.f32.mrf.mxu0 }
 0x651   : > { %v7456_v56 = vadd.f32 %v7422_v43, %v7259_v10 }
 0x652   : > { %v7818_v41 = vpop.f32.mrf.mxu1 }
 0x653   : > { %v7653_v15 = vadd.f32 %v7619_v12, %v7456_v56  ;;  %v12684_v12 = vld [vmem:[%s16565_s7 + $0x8] sm:$0xff] }
 0x654   : > { %8870 = vmatpush.bf16.msrb.mxu2 %v12684_v12  ;;  %v12734_v56 = vld [vmem:[%s16565_s7 + $0xc8] sm:$0xff] }
 0x655   : > { %v16756_v2 = vadd.f32 %v7816_v60, %v7653_v15  ;;  %v12718_v60 = vld [vmem:[%s16565_s7 + $0x88] sm:$0xff]  ;;  %9244 = vmatpush.bf16.msrb.mxu0 %v12734_v56 }
 0x656   : > { %v7227_v3 = vpop.f32.mrf.mxu2  ;;  %9050 = vmatpush.bf16.msrb.mxu3 %v12718_v60 }
 0x657   : > { %v7424_v22 = vpop.f32.mrf.mxu3  ;;  %v7260_v4 = vadd.f32 %v7227_v3, %v16695_v16  ;;  %v12629_v3 = vld [vmem:[%s16715_s14 + $0xa8] sm:$0xff] }
 0x658   : > { %v7624_v42 = vpop.f32.mrf.mxu0 }
 0x659   : > { %v7457_v26 = vadd.f32 %v7424_v22, %v7260_v4  ;;  %v12646_v22 = vld [vmem:[%s16715_s14 + $0x228] sm:$0xff] }
 0x65a   : > { %v7821_v52 = vpop.f32.mrf.mxu1  ;;  %v12663_v4 = vld [vmem:[%s16715_s14 + $0x3a8] sm:$0xff] }
 0x65b   : > { %v7654_v13 = vadd.f32 %v7621_v35, %v7457_v26  ;;  %8020 = vmatmul.bf16.gmra.mxu2 %v12627_v29  ;;  %8418 = vmatmul.bf16.gmra.mxu0 %v12661_v8  ;;  %v12697_v29 = vld [vmem:[%s16720_s28 + $0x1a8] sm:$0xff] }
 0x65c   : > { %8219 = vmatmul.bf16.gmra.mxu3 %v12644_v25  ;;  %v12750_v26 = vld [vmem:[%s16565_s7 + $0x108] sm:$0xff] }
 0x65d   : > { %8742 = vmatmul.bf16.gmra.mxu1 %v12695_v44  ;;  %v16766_v16 = vadd.f32 %v7818_v41, %v7654_v13 }
 0x65e   : > { %v7230_v1 = vpop.f32.mrf.mxu2  ;;  %9438 = vmatpush.bf16.msrb.mxu1 %v12750_v26  ;;  %v12771_v26 = vld [vmem:[%s16565_s7 + $0x170] sm:$0xff] }
 0x65f   : > { %v7427_v11 = vpop.f32.mrf.mxu3  ;;  %v7261_v40 = vadd.f32 %v7230_v1, %v16701_v58 }
 0x660   : > { %v7626_v49 = vpop.f32.mrf.mxu0 }
 0x661   : > { %v7458_v48 = vadd.f32 %v7427_v11, %v7261_v40 }
 0x662   : > { %v7823_v6 = vpop.f32.mrf.mxu1 }
 0x663   : > { %v7655_v5 = vadd.f32 %v7624_v42, %v7458_v48  ;;  %v12683_v42 = vld [vmem:[%s16565_s7] sm:$0xff] }
 0x664   : > { %8871 = vmatpush.bf16.msrb.mxu2 %v12683_v42  ;;  %v12733_v48 = vld [vmem:[%s16565_s7 + $0xc0] sm:$0xff]  ;;  %v12787_v42 = vld [vmem:[%s16565_s7 + $0x1b0] sm:$0xff] }
 0x665   : > { %v16770_v34 = vadd.f32 %v7821_v52, %v7655_v5  ;;  %v12717_v52 = vld [vmem:[%s16565_s7 + $0x80] sm:$0xff]  ;;  %9245 = vmatpush.bf16.msrb.mxu0 %v12733_v48 }
 0x666   : > { %v7232_v62 = vpop.f32.mrf.mxu2  ;;  %9051 = vmatpush.bf16.msrb.mxu3 %v12717_v52  ;;  %v12675_v48 = vld [vmem:[%s16720_s28] sm:$0xff] }
 0x667   : > { %v7429_v50 = vpop.f32.mrf.mxu3  ;;  %v7262_v51 = vadd.f32 %v7232_v62, %v16710_v37  ;;  %v12630_v62 = vld [vmem:[%s16715_s14 + $0xb0] sm:$0xff] }
 0x668   : > { %v7629_v47 = vpop.f32.mrf.mxu0 }
 0x669   : > { %v7459_v58 = vadd.f32 %v7429_v50, %v7262_v51  ;;  %v12647_v50 = vld [vmem:[%s16715_s14 + $0x230] sm:$0xff] }
 0x66a   : > { %v7826_v14 = vpop.f32.mrf.mxu1  ;;  %v12664_v51 = vld [vmem:[%s16715_s14 + $0x3b0] sm:$0xff] }
 0x66b   : > { %v7656_v61 = vadd.f32 %v7626_v49, %v7459_v58  ;;  %8025 = vmatmul.bf16.gmra.mxu2 %v12628_v59  ;;  %8423 = vmatmul.bf16.gmra.mxu0 %v12662_v36  ;;  %v12698_v59 = vld [vmem:[%s16720_s28 + $0x1b0] sm:$0xff] }
 0x66c   : > { %8224 = vmatmul.bf16.gmra.mxu3 %v12645_v45 }
 0x66d   : > { %8747 = vmatmul.bf16.gmra.mxu1 %v12696_v18  ;;  %v16780_v37 = vadd.f32 %v7823_v6, %v7656_v61  ;;  %v12749_v18 = vld [vmem:[%s16565_s7 + $0x100] sm:$0xff] }
 0x66e   : > { %v7235_v54 = vpop.f32.mrf.mxu2  ;;  %9439 = vmatpush.bf16.msrb.mxu1 %v12749_v18  ;;  %v12770_v18 = vld [vmem:[%s16565_s7 + $0x168] sm:$0xff] }
 0x66f   : > { %v7432_v27 = vpop.f32.mrf.mxu3  ;;  %v7263_v46 = vadd.f32 %v7235_v54, %v16667_v0 }
 0x670   : > { %v7631_v55 = vpop.f32.mrf.mxu0 }
 0x671   : > { %v7460_v9 = vadd.f32 %v7432_v27, %v7263_v46 }
 0x672   : > { %v7828_v43 = vpop.f32.mrf.mxu1 }
 0x673   : > { %v7657_v10 = vadd.f32 %v7629_v47, %v7460_v9  ;;  %v12772_v47 = vld [vmem:[%s16565_s7 + $0x178] sm:$0xff] }
 0x674   : > { %9626 = vmatpush.bf16.msra.mxu2 %v12772_v47  ;;  %v12805_v9 = vld [vmem:[%s16565_s7 + $0x1f8] sm:$0xff] }
 0x675   : > { %v16784_v35 = vadd.f32 %v7826_v14, %v7657_v10  ;;  %v12788_v14 = vld [vmem:[%s16565_s7 + $0x1b8] sm:$0xff]  ;;  %10019 = vmatpush.bf16.msra.mxu0 %v12805_v9  ;;  %v12803_v9 = vld [vmem:[%s16565_s7 + $0x1e8] sm:$0xff] }
 0x676   : > { %v7237_v41 = vpop.f32.mrf.mxu2  ;;  %9823 = vmatpush.bf16.msra.mxu3 %v12788_v14 }
 0x677   : > { %v7434_v15 = vpop.f32.mrf.mxu3  ;;  %v7264_v28 = vadd.f32 %v7237_v41, %v16672_v7  ;;  %v12631_v41 = vld [vmem:[%s16715_s14 + $0xb8] sm:$0xff] }
 0x678   : > { %v7634_v25 = vpop.f32.mrf.mxu0  ;;  %9627 = vmatpush.bf16.msra.mxu2 %v12771_v26  ;;  %v12785_v26 = vld [vmem:[%s16565_s7 + $0x1a0] sm:$0xff] }
 0x679   : > { %v7461_v0 = vadd.f32 %v7434_v15, %v7264_v28  ;;  %v12648_v15 = vld [vmem:[%s16715_s14 + $0x238] sm:$0xff] }
 0x67a   : > { %v7831_v8 = vpop.f32.mrf.mxu1  ;;  %v12665_v28 = vld [vmem:[%s16715_s14 + $0x3b8] sm:$0xff]  ;;  %9824 = vmatpush.bf16.msra.mxu3 %v12787_v42 }
 0x67b   : > { %v7658_v44 = vadd.f32 %v7631_v55, %v7461_v0  ;;  %8030 = vmatmul.bf16.gmra.mxu2 %v12629_v3  ;;  %8428 = vmatmul.bf16.gmra.mxu0 %v12663_v4  ;;  %v12699_v3 = vld [vmem:[%s16720_s28 + $0x1b8] sm:$0xff] }
 0x67c   : > { %8229 = vmatmul.bf16.gmra.mxu3 %v12646_v22  ;;  %9628 = vmatpush.bf16.msra.mxu2 %v12770_v18 }
 0x67d   : > { %8752 = vmatmul.bf16.gmra.mxu1 %v12697_v29  ;;  %v16794_v7 = vadd.f32 %v7828_v43, %v7658_v44  ;;  %v12822_v44 = vld [vmem:[%s16565_s7 + $0x238] sm:$0xff] }
 0x67e   : > { %v7240_v13 = vpop.f32.mrf.mxu2  ;;  %10215 = vmatpush.bf16.msra.mxu1 %v12822_v44  ;;  %v12769_v44 = vld [vmem:[%s16565_s7 + $0x160] sm:$0xff] }
 0x67f   : > { %v7437_v63 = vpop.f32.mrf.mxu3  ;;  %v7265_v33 = vadd.f32 %v7240_v13, %v16680_v20 }
 0x680   : > { %v7636_v1 = vpop.f32.mrf.mxu0  ;;  %9629 = vmatpush.bf16.msra.mxu2 %v12769_v44 }
 0x681   : > { %v7462_v23 = vadd.f32 %v7437_v63, %v7265_v33 }
 0x682   : > { %v7833_v11 = vpop.f32.mrf.mxu1 }
 0x683   : > { %v7659_v40 = vadd.f32 %v7634_v25, %v7462_v23 }
 0x685   : > { %v16798_v49 = vadd.f32 %v7831_v8, %v7659_v40 }
 0x686   : > { %v7242_v6 = vpop.f32.mrf.mxu2 }
 0x687   : > { %v7439_v5 = vpop.f32.mrf.mxu3  ;;  %v7266_v21 = vadd.f32 %v7242_v6, %v16685_v53  ;;  %v12804_v6 = vld [vmem:[%s16565_s7 + $0x1f0] sm:$0xff] }
 0x688   : > { %v7639_v45 = vpop.f32.mrf.mxu0  ;;  %10020 = vmatpush.bf16.msra.mxu0 %v12804_v6  ;;  %v12711_v6 = vld [vmem:[%s16720_s28 + $0x310] sm:$0xff] }
 0x689   : > { %v7463_v20 = vadd.f32 %v7439_v5, %v7266_v21  ;;  %v12725_v5 = vld [vmem:[#allocation3 + $0xc0] sm:$0xff] }
 0x68a   : > { %v7836_v36 = vpop.f32.mrf.mxu1  ;;  %v12741_v21 = vld [vmem:[#allocation3 + $0x240] sm:$0xff] }
 0x68b   : > { %v7660_v58 = vadd.f32 %v7636_v1, %v7463_v20  ;;  %8035 = vmatmul.bf16.gmra.mxu2 %v12630_v62  ;;  %8433 = vmatmul.bf16.gmra.mxu0 %v12664_v51 }
 0x68c   : > { %8234 = vmatmul.bf16.gmra.mxu3 %v12647_v50  ;;  %10021 = vmatpush.bf16.msra.mxu0 %v12803_v9 }
 0x68d   : > { %8757 = vmatmul.bf16.gmra.mxu1 %v12698_v59  ;;  %v16808_v53 = vadd.f32 %v7833_v11, %v7660_v58  ;;  %v12786_v58 = vld [vmem:[%s16565_s7 + $0x1a8] sm:$0xff] }
 0x68e   : > { %v7245_v61 = vpop.f32.mrf.mxu2  ;;  %9825 = vmatpush.bf16.msra.mxu3 %v12786_v58 }
 0x68f   : > { %v7442_v17 = vpop.f32.mrf.mxu3  ;;  %v7267_v12 = vadd.f32 %v7245_v61, %v16693_v39 }
 0x690   : > { %v7641_v54 = vpop.f32.mrf.mxu0 }
 0x691   : > { %v7464_v60 = vadd.f32 %v7442_v17, %v7267_v12 }
 0x692   : > { %v7838_v27 = vpop.f32.mrf.mxu1  ;;  %9826 = vmatpush.bf16.msra.mxu3 %v12785_v26 }
 0x693   : > { %v7661_v46 = vadd.f32 %v7639_v45, %v7464_v60 }
 0x695   : > { %v16812_v55 = vadd.f32 %v7836_v36, %v7661_v46  ;;  %v12821_v36 = vld [vmem:[%s16565_s7 + $0x230] sm:$0xff]  ;;  %v12710_v46 = vld [vmem:[%s16720_s28 + $0x308] sm:$0xff] }
 0x696   : > { %v7247_v43 = vpop.f32.mrf.mxu2  ;;  %10216 = vmatpush.bf16.msra.mxu1 %v12821_v36 }
 0x697   : > { %v7444_v10 = vpop.f32.mrf.mxu3  ;;  %v7268_v56 = vadd.f32 %v7247_v43, %v16698_v32  ;;  %v12726_v43 = vld [vmem:[#allocation3 + $0xc8] sm:$0xff] }
 0x698   : > { %v7644_v22 = vpop.f32.mrf.mxu0 }
 0x699   : > { %v7465_v39 = vadd.f32 %v7444_v10, %v7268_v56  ;;  %v12742_v10 = vld [vmem:[#allocation3 + $0x248] sm:$0xff] }
 0x69a   : > { %v7841_v4 = vpop.f32.mrf.mxu1 }
 0x69b   : > { %v7662_v29 = vadd.f32 %v7641_v54, %v7465_v39  ;;  %8040 = vmatmul.bf16.gmra.mxu2 %v12631_v41  ;;  %8438 = vmatmul.bf16.gmra.mxu0 %v12665_v28 }
 0x69c   : > { %8239 = vmatmul.bf16.gmra.mxu3 %v12648_v15 }
 0x69d   : > { %8762 = vmatmul.bf16.gmra.mxu1 %v12699_v3  ;;  %v16819_v0 = vadd.f32 %v7838_v27, %v7662_v29  ;;  %v12676_v27 = vld [vmem:[%s16720_s28 + $0x8] sm:$0xff] }
 0x69e   : > { %v7250_v25 = vpop.f32.mrf.mxu2 }
 0x69f   : > { %v7447_v32 = vpop.f32.mrf.mxu3  ;;  %v7269_v8 = vadd.f32 %v7250_v25, %v16706_v24  ;;  %v12709_v24 = vld [vmem:[%s16720_s28 + $0x300] sm:$0xff] }
 0x6a0   : > { %v7646_v13 = vpop.f32.mrf.mxu0 }
 0x6a1   : > { %v7466_v52 = vadd.f32 %v7447_v32, %v7269_v8  ;;  %v12820_v8 = vld [vmem:[%s16565_s7 + $0x228] sm:$0xff] }
 0x6a2   : > { %v7843_v63 = vpop.f32.mrf.mxu1  ;;  %10217 = vmatpush.bf16.msra.mxu1 %v12820_v8 }
 0x6a3   : > { %v7663_v33 = vadd.f32 %v7644_v22, %v7466_v52 }
 0x6a5   : > { %v16825_v23 = vadd.f32 %v7841_v4, %v7663_v33 }
 0x6a6   : > { %v7252_v1 = vpop.f32.mrf.mxu2 }
 0x6a7   : > { %v7449_v11 = vpop.f32.mrf.mxu3  ;;  %v7270_v40 = vadd.f32 %v7252_v1, %v16713_v31 }
 0x6a8   : > { %v8404_v50 = vpop.f32.mrf.mxu0 }
 0x6a9   : > { %v7467_v62 = vadd.f32 %v7449_v11, %v7270_v40 }
 0x6aa   : > { %v16831_v51 = vpop.f32.mrf.mxu1 }
 0x6ab   : > { %v7664_v59 = vadd.f32 %v7646_v13, %v7467_v62  ;;  %8872 = vmatmul.bf16.vlgmr.msrb.gmra.mxu2 %v12675_v48  ;;  %9246 = vmatmul.bf16.vlgmr.msrb.gmra.mxu0 %v12725_v5  ;;  %v12802_v5 = vld [vmem:[%s16565_s7 + $0x1e0] sm:$0xff]  ;;  %v12743_v62 = vld [vmem:[#allocation3 + $0x250] sm:$0xff] }
 0x6ac   : > { %9052 = vmatmul.bf16.vlgmr.msrb.gmra.mxu3 %v12709_v24  ;;  %v12677_v24 = vld [vmem:[%s16720_s28 + $0x10] sm:$0xff]  ;;  %10022 = vmatpush.bf16.msra.mxu0 %v12802_v5 }
 0x6ad   : > { %9440 = vmatmul.bf16.vlgmr.msrb.gmra.mxu1 %v12741_v21  ;;  %v16833_v20 = vadd.f32 %v7843_v63, %v7664_v59  ;;  %v12727_v21 = vld [vmem:[#allocation3 + $0xd0] sm:$0xff] }
 0x6ae   : > { %v8006_v31 = vpop.f32.mrf.mxu2 }
 0x6af   : > { %v8205_v45 = vpop.f32.mrf.mxu3  ;;  %v8046_v47 = vadd.f32 %v8006_v31, %v16728_v30 }
 0x6b0   : > { %v8406_v14 = vpop.f32.mrf.mxu0 }
 0x6b1   : > { %v8245_v17 = vadd.f32 %v8205_v45, %v8046_v47 }
 0x6b2   : > { %v16839_v61 = vpop.f32.mrf.mxu1 }
 0x6b3   : > { %v8444_v56 = vadd.f32 %v8404_v50, %v8245_v17 }
 0x6b6   : > { %v8008_v12 = vpop.f32.mrf.mxu2 }
 0x6b7   : > { %v8207_v60 = vpop.f32.mrf.mxu3  ;;  %v8047_v54 = vadd.f32 %v8008_v12, %v16738_v57  ;;  %v8514_v57 = vmul.f32 %v8444_v56, %v8444_v56  ;;  %v12819_v12 = vld [vmem:[%s16565_s7 + $0x220] sm:$0xff] }
 0x6b8   : > { %v8409_v30 = vpop.f32.mrf.mxu0  ;;  %10218 = vmatpush.bf16.msra.mxu1 %v12819_v12 }
 0x6b9   : > { %v8246_v41 = vadd.f32 %v8207_v60, %v8047_v54  ;;  %v12768_v60 = vld [vmem:[%s16565_s7 + $0x158] sm:$0xff] }
 0x6ba   : > { %v16845_v15 = vpop.f32.mrf.mxu1  ;;  %v12784_v54 = vld [vmem:[%s16565_s7 + $0x198] sm:$0xff]  ;;  %9630 = vmatpush.bf16.msra.mxu2 %v12768_v60 }
 0x6bb   : > { %v8445_v28 = vadd.f32 %v8406_v14, %v8246_v41  ;;  %8877 = vmatmul.bf16.gmra.mxu2 %v12676_v27  ;;  %9251 = vmatmul.bf16.gmra.mxu0 %v12726_v43 }
 0x6bc   : > { %9057 = vmatmul.bf16.gmra.mxu3 %v12710_v46 }
 0x6bd   : > { %9445 = vmatmul.bf16.gmra.mxu1 %v12742_v10  ;;  %v12826_v3 = vpack.c.bf16 %v8445_v28, %v8444_v56  ;;  %v8492_v39 = vadd.f32 %v8445_v28, %v8444_v56  ;;  %v8515_v22 = vmul.f32 %v8445_v28, %v8445_v28  ;;  %9827 = vmatpush.bf16.msra.mxu3 %v12784_v54 }
 0x6be   : > { %v8011_v4 = vpop.f32.mrf.mxu2 }
 0x6bf   : > { %v8210_v29 = vpop.f32.mrf.mxu3  ;;  %12827 = vst [vmem:[%s13116_s19] sm:$0xff] %v12826_v3   ;;  %v8530_v25 = vadd.f32 %v8515_v22, %v8514_v57  ;;  %v8048_v32 = vadd.f32 %v8011_v4, %v16742_v19  ;;  %v12678_v57 = vld [vmem:[%s16720_s28 + $0x18] sm:$0xff] }
 0x6c0   : > { %v8411_v52 = vpop.f32.mrf.mxu0  ;;  %v12712_v3 = vld [vmem:[%s16720_s28 + $0x318] sm:$0xff] }
 0x6c1   : > { %v8247_v42 = vadd.f32 %v8210_v29, %v8048_v32  ;;  %v12728_v22 = vld [vmem:[#allocation3 + $0xd8] sm:$0xff] }
 0x6c2   : > { %v16852_v13 = vpop.f32.mrf.mxu1  ;;  %v12744_v4 = vld [vmem:[#allocation3 + $0x258] sm:$0xff] }
 0x6c3   : > { %v8446_v63 = vadd.f32 %v8409_v30, %v8247_v42 }
 0x6c5   : > { %v8493_v33 = vadd.f32 %v8492_v39, %v8446_v63  ;;  %v8516_v1 = vmul.f32 %v8446_v63, %v8446_v63  ;;  %v12801_v39 = vld [vmem:[%s16565_s7 + $0x1d8] sm:$0xff] }
 0x6c6   : > { %v8013_v11 = vpop.f32.mrf.mxu2  ;;  %10023 = vmatpush.bf16.msra.mxu0 %v12801_v39 }
 0x6c7   : > { %v8212_v40 = vpop.f32.mrf.mxu3  ;;  %v8531_v48 = vadd.f32 %v8530_v25, %v8516_v1  ;;  %v8049_v19 = vadd.f32 %v8013_v11, %v16752_v38  ;;  %v12818_v1 = vld [vmem:[%s16565_s7 + $0x218] sm:$0xff]  ;;  %v12767_v11 = vld [vmem:[%s16565_s7 + $0x150] sm:$0xff] }
 0x6c8   : > { %v8414_v59 = vpop.f32.mrf.mxu0  ;;  %10219 = vmatpush.bf16.msra.mxu1 %v12818_v1  ;;  %9631 = vmatpush.bf16.msra.mxu2 %v12767_v11 }
 0x6c9   : > { %v8248_v50 = vadd.f32 %v8212_v40, %v8049_v19  ;;  %v12783_v40 = vld [vmem:[%s16565_s7 + $0x190] sm:$0xff] }
 0x6ca   : > { %v16858_v31 = vpop.f32.mrf.mxu1  ;;  %9828 = vmatpush.bf16.msra.mxu3 %v12783_v40 }
 0x6cb   : > { %v8447_v45 = vadd.f32 %v8411_v52, %v8248_v50  ;;  %8882 = vmatmul.bf16.gmra.mxu2 %v12677_v24  ;;  %9256 = vmatmul.bf16.gmra.mxu0 %v12727_v21 }
 0x6cc   : > { %9062 = vmatmul.bf16.gmra.mxu3 %v12711_v6 }
 0x6cd   : > { %9450 = vmatmul.bf16.gmra.mxu1 %v12743_v62  ;;  %v12831_v38 = vpack.c.bf16 %v8447_v45, %v8446_v63  ;;  %v8494_v36 = vadd.f32 %v8493_v33, %v8447_v45  ;;  %v8517_v18 = vmul.f32 %v8447_v45, %v8447_v45  ;;  %v12679_v45 = vld [vmem:[%s16720_s28 + $0x20] sm:$0xff] }
 0x6ce   : > { %v8016_v58 = vpop.f32.mrf.mxu2 }
 0x6cf   : > { %v8215_v47 = vpop.f32.mrf.mxu3  ;;  %12903 = vst [vmem:[%s13116_s19 + $0x8] sm:$0xff] %v12831_v38   ;;  %v8532_v14 = vadd.f32 %v8531_v48, %v8517_v18  ;;  %v8050_v17 = vadd.f32 %v8016_v58, %v16756_v2  ;;  %v12713_v38 = vld [vmem:[%s16720_s28 + $0x320] sm:$0xff] }
 0x6d0   : > { %v8416_v46 = vpop.f32.mrf.mxu0  ;;  %v12729_v18 = vld [vmem:[#allocation3 + $0xe0] sm:$0xff] }
 0x6d1   : > { %v8249_v27 = vadd.f32 %v8215_v47, %v8050_v17  ;;  %v12745_v58 = vld [vmem:[#allocation3 + $0x260] sm:$0xff] }
 0x6d2   : > { %v16865_v9 = vpop.f32.mrf.mxu1 }
 0x6d3   : > { %v8448_v43 = vadd.f32 %v8414_v59, %v8249_v27 }
 0x6d5   : > { %v8495_v10 = vadd.f32 %v8494_v36, %v8448_v43  ;;  %v8518_v56 = vmul.f32 %v8448_v43, %v8448_v43  ;;  %v12800_v36 = vld [vmem:[%s16565_s7 + $0x1d0] sm:$0xff] }
 0x6d6   : > { %v8018_v41 = vpop.f32.mrf.mxu2  ;;  %10024 = vmatpush.bf16.msra.mxu0 %v12800_v36 }
 0x6d7   : > { %v8217_v30 = vpop.f32.mrf.mxu3  ;;  %v8533_v28 = vadd.f32 %v8532_v14, %v8518_v56  ;;  %v8051_v2 = vadd.f32 %v8018_v41, %v16766_v16  ;;  %v12817_v56 = vld [vmem:[%s16565_s7 + $0x210] sm:$0xff]  ;;  %v12766_v41 = vld [vmem:[%s16565_s7 + $0x148] sm:$0xff] }
 0x6d8   : > { %v8419_v25 = vpop.f32.mrf.mxu0  ;;  %10220 = vmatpush.bf16.msra.mxu1 %v12817_v56  ;;  %9632 = vmatpush.bf16.msra.mxu2 %v12766_v41  ;;  %v12815_v56 = vld [vmem:[%s16565_s7 + $0x200] sm:$0xff] }
 0x6d9   : > { %v8250_v29 = vadd.f32 %v8217_v30, %v8051_v2  ;;  %v12782_v30 = vld [vmem:[%s16565_s7 + $0x188] sm:$0xff] }
 0x6da   : > { %v16871_v32 = vpop.f32.mrf.mxu1  ;;  %9829 = vmatpush.bf16.msra.mxu3 %v12782_v30 }
 0x6db   : > { %v8449_v8 = vadd.f32 %v8416_v46, %v8250_v29  ;;  %8887 = vmatmul.bf16.gmra.mxu2 %v12678_v57  ;;  %9261 = vmatmul.bf16.gmra.mxu0 %v12728_v22 }
 0x6dc   : > { %9067 = vmatmul.bf16.gmra.mxu3 %v12712_v3 }
 0x6dd   : > { %9455 = vmatmul.bf16.gmra.mxu1 %v12744_v4  ;;  %v12836_v16 = vpack.c.bf16 %v8449_v8, %v8448_v43  ;;  %v8496_v44 = vadd.f32 %v8495_v10, %v8449_v8  ;;  %v8519_v26 = vmul.f32 %v8449_v8, %v8449_v8  ;;  %v12680_v8 = vld [vmem:[%s16720_s28 + $0x28] sm:$0xff] }
 0x6de   : > { %v8021_v42 = vpop.f32.mrf.mxu2 }
 0x6df   : > { %v8220_v52 = vpop.f32.mrf.mxu3  ;;  %12904 = vst [vmem:[%s13116_s19 + $0x10] sm:$0xff] %v12836_v16   ;;  %v8534_v63 = vadd.f32 %v8533_v28, %v8519_v26  ;;  %v8052_v33 = vadd.f32 %v8021_v42, %v16770_v34  ;;  %v12714_v16 = vld [vmem:[%s16720_s28 + $0x328] sm:$0xff] }
 0x6e0   : > { %v8421_v19 = vpop.f32.mrf.mxu0  ;;  %v12730_v26 = vld [vmem:[#allocation3 + $0xe8] sm:$0xff] }
 0x6e1   : > { %v8251_v48 = vadd.f32 %v8220_v52, %v8052_v33  ;;  %v12746_v42 = vld [vmem:[#allocation3 + $0x268] sm:$0xff] }
 0x6e2   : > { %v16878_v24 = vpop.f32.mrf.mxu1 }
 0x6e3   : > { %v8450_v6 = vadd.f32 %v8419_v25, %v8251_v48 }
 0x6e5   : > { %v8497_v5 = vadd.f32 %v8496_v44, %v8450_v6  ;;  %v8520_v21 = vmul.f32 %v8450_v6, %v8450_v6  ;;  %v12799_v44 = vld [vmem:[%s16565_s7 + $0x1c8] sm:$0xff] }
 0x6e6   : > { %v8023_v62 = vpop.f32.mrf.mxu2  ;;  %10025 = vmatpush.bf16.msra.mxu0 %v12799_v44 }
 0x6e7   : > { %v8222_v50 = vpop.f32.mrf.mxu3  ;;  %v8535_v59 = vadd.f32 %v8534_v63, %v8520_v21  ;;  %v8053_v34 = vadd.f32 %v8023_v62, %v16780_v37  ;;  %v12816_v21 = vld [vmem:[%s16565_s7 + $0x208] sm:$0xff]  ;;  %v12765_v62 = vld [vmem:[%s16565_s7 + $0x140] sm:$0xff] }
 0x6e8   : > { %v8424_v14 = vpop.f32.mrf.mxu0  ;;  %10221 = vmatpush.bf16.msra.mxu1 %v12816_v21  ;;  %9633 = vmatpush.bf16.msra.mxu2 %v12765_v62 }
 0x6e9   : > { %v8252_v47 = vadd.f32 %v8222_v50, %v8053_v34  ;;  %v12781_v50 = vld [vmem:[%s16565_s7 + $0x180] sm:$0xff] }
 0x6ea   : > { %v16884_v17 = vpop.f32.mrf.mxu1  ;;  %9830 = vmatpush.bf16.msra.mxu3 %v12781_v50 }
 0x6eb   : > { %v8451_v12 = vadd.f32 %v8421_v19, %v8252_v47  ;;  %8892 = vmatmul.bf16.gmra.mxu2 %v12679_v45  ;;  %9266 = vmatmul.bf16.gmra.mxu0 %v12729_v18 }
 0x6ec   : > { %9072 = vmatmul.bf16.gmra.mxu3 %v12713_v38  ;;  %10222 = vmatpush.bf16.msra.mxu1 %v12815_v56 }
 0x6ed   : > { %9460 = vmatmul.bf16.gmra.mxu1 %v12745_v58  ;;  %v12841_v37 = vpack.c.bf16 %v8451_v12, %v8450_v6  ;;  %v8498_v60 = vadd.f32 %v8497_v5, %v8451_v12  ;;  %v8521_v54 = vmul.f32 %v8451_v12, %v8451_v12  ;;  %v12681_v12 = vld [vmem:[%s16720_s28 + $0x30] sm:$0xff] }
 0x6ee   : > { %v8026_v27 = vpop.f32.mrf.mxu2 }
 0x6ef   : > { %v8225_v46 = vpop.f32.mrf.mxu3  ;;  %12905 = vst [vmem:[%s13116_s19 + $0x18] sm:$0xff] %v12841_v37   ;;  %v8536_v43 = vadd.f32 %v8535_v59, %v8521_v54  ;;  %v8054_v10 = vadd.f32 %v8026_v27, %v16784_v35  ;;  %v12715_v37 = vld [vmem:[%s16720_s28 + $0x330] sm:$0xff] }
 0x6f0   : > { %v8426_v2 = vpop.f32.mrf.mxu0  ;;  %v12731_v54 = vld [vmem:[#allocation3 + $0xf0] sm:$0xff] }
 0x6f1   : > { %v8253_v28 = vadd.f32 %v8225_v46, %v8054_v10  ;;  %v12747_v27 = vld [vmem:[#allocation3 + $0x270] sm:$0xff] }
 0x6f2   : > { %v16891_v57 = vpop.f32.mrf.mxu1 }
 0x6f3   : > { %v8452_v3 = vadd.f32 %v8424_v14, %v8253_v28 }
 0x6f5   : > { %v8499_v39 = vadd.f32 %v8498_v60, %v8452_v3  ;;  %v8522_v22 = vmul.f32 %v8452_v3, %v8452_v3  ;;  %v12798_v60 = vld [vmem:[%s16565_s7 + $0x1c0] sm:$0xff] }
 0x6f6   : > { %v8028_v4 = vpop.f32.mrf.mxu2  ;;  %10026 = vmatpush.bf16.msra.mxu0 %v12798_v60  ;;  %v12757_v60 = vld [vmem:[#allocation3 + $0x3c0] sm:$0xff] }
 0x6f7   : > { %v8227_v29 = vpop.f32.mrf.mxu3  ;;  %v8537_v25 = vadd.f32 %v8536_v43, %v8522_v22  ;;  %v8055_v35 = vadd.f32 %v8028_v4, %v16794_v7 }
 0x6f8   : > { %v8429_v63 = vpop.f32.mrf.mxu0 }
 0x6f9   : > { %v8254_v52 = vadd.f32 %v8227_v29, %v8055_v35 }
 0x6fa   : > { %v16897_v33 = vpop.f32.mrf.mxu1 }
 0x6fb   : > { %v8453_v1 = vadd.f32 %v8426_v2, %v8254_v52  ;;  %8897 = vmatmul.bf16.gmra.mxu2 %v12680_v8  ;;  %9271 = vmatmul.bf16.gmra.mxu0 %v12730_v26 }
 0x6fc   : > { %9077 = vmatmul.bf16.gmra.mxu3 %v12714_v16 }
 0x6fd   : > { %9465 = vmatmul.bf16.gmra.mxu1 %v12746_v42  ;;  %v12846_v7 = vpack.c.bf16 %v8453_v1, %v8452_v3  ;;  %v8500_v11 = vadd.f32 %v8499_v39, %v8453_v1  ;;  %v8523_v40 = vmul.f32 %v8453_v1, %v8453_v1  ;;  %v12716_v1 = vld [vmem:[%s16720_s28 + $0x338] sm:$0xff] }
 0x6fe   : > { %v8031_v48 = vpop.f32.mrf.mxu2 }
 0x6ff   : > { %v8230_v19 = vpop.f32.mrf.mxu3  ;;  %12906 = vst [vmem:[%s13116_s19 + $0x20] sm:$0xff] %v12846_v7   ;;  %v8538_v6 = vadd.f32 %v8537_v25, %v8523_v40  ;;  %v8056_v5 = vadd.f32 %v8031_v48, %v16798_v49  ;;  %v12732_v7 = vld [vmem:[#allocation3 + $0xf8] sm:$0xff] }
 0x700   : > { %v8431_v34 = vpop.f32.mrf.mxu0 }
 0x701   : > { %v8255_v59 = vadd.f32 %v8230_v19, %v8056_v5 }
 0x702   : > { %v16904_v45 = vpop.f32.mrf.mxu1 }
 0x703   : > { %v8454_v38 = vadd.f32 %v8429_v63, %v8255_v59  ;;  %v12682_v63 = vld [vmem:[%s16720_s28 + $0x38] sm:$0xff] }
 0x705   : > { %v8501_v36 = vadd.f32 %v8500_v11, %v8454_v38  ;;  %v8524_v18 = vmul.f32 %v8454_v38, %v8454_v38  ;;  %v12748_v11 = vld [vmem:[#allocation3 + $0x278] sm:$0xff] }
 0x706   : > { %v8033_v58 = vpop.f32.mrf.mxu2 }
 0x707   : > { %v8232_v47 = vpop.f32.mrf.mxu3  ;;  %v8539_v49 = vadd.f32 %v8538_v6, %v8524_v18  ;;  %v8057_v14 = vadd.f32 %v8033_v58, %v16808_v53 }
 0x708   : > { %v8434_v43 = vpop.f32.mrf.mxu0 }
 0x709   : > { %v8256_v46 = vadd.f32 %v8232_v47, %v8057_v14 }
 0x70a   : > { %v16910_v10 = vpop.f32.mrf.mxu1 }
 0x70b   : > { %v8455_v41 = vadd.f32 %v8431_v34, %v8256_v46  ;;  %8902 = vmatmul.bf16.gmra.mxu2 %v12681_v12  ;;  %9276 = vmatmul.bf16.gmra.mxu0 %v12731_v54  ;;  %v12773_v54 = vld [vmem:[%s16715_s14 + $0xc0] sm:$0xff] }
 0x70c   : > { %9082 = vmatmul.bf16.gmra.mxu3 %v12715_v37  ;;  %v12807_v46 = vld [vmem:[%s16715_s14 + $0x3c0] sm:$0xff] }
 0x70d   : > { %9470 = vmatmul.bf16.gmra.mxu1 %v12747_v27  ;;  %v12851_v30 = vpack.c.bf16 %v8455_v41, %v8454_v38  ;;  %v8502_v28 = vadd.f32 %v8501_v36, %v8455_v41  ;;  %v8525_v53 = vmul.f32 %v8455_v41, %v8455_v41  ;;  %v12790_v27 = vld [vmem:[%s16715_s14 + $0x240] sm:$0xff] }
 0x70e   : > { %v8036_v2 = vpop.f32.mrf.mxu2 }
 0x70f   : > { %v8235_v3 = vpop.f32.mrf.mxu3  ;;  %12907 = vst [vmem:[%s13116_s19 + $0x28] sm:$0xff] %v12851_v30   ;;  %v8540_v39 = vadd.f32 %v8539_v49, %v8525_v53  ;;  %v8058_v22 = vadd.f32 %v8036_v2, %v16812_v55 }
 0x710   : > { %v8436_v29 = vpop.f32.mrf.mxu0 }
 0x711   : > { %v8257_v4 = vadd.f32 %v8235_v3, %v8058_v22 }
 0x712   : > { %v16915_v25 = vpop.f32.mrf.mxu1 }
 0x713   : > { %v8456_v35 = vadd.f32 %v8434_v43, %v8257_v4 }
 0x715   : > { %v8503_v8 = vadd.f32 %v8502_v28, %v8456_v35  ;;  %v8526_v16 = vmul.f32 %v8456_v35, %v8456_v35 }
 0x716   : > { %v8038_v44 = vpop.f32.mrf.mxu2 }
 0x717   : > { %v8237_v26 = vpop.f32.mrf.mxu3  ;;  %v8541_v42 = vadd.f32 %v8540_v39, %v8526_v16  ;;  %v8059_v52 = vadd.f32 %v8038_v44, %v16819_v0 }
 0x718   : > { %v8439_v48 = vpop.f32.mrf.mxu0 }
 0x719   : > { %v8258_v40 = vadd.f32 %v8237_v26, %v8059_v52  ;;  %v12774_v52 = vld [vmem:[%s16715_s14 + $0xc8] sm:$0xff] }
 0x71a   : > { %v16920_v55 = vpop.f32.mrf.mxu1 }
 0x71b   : > { %v8457_v19 = vadd.f32 %v8436_v29, %v8258_v40  ;;  %8907 = vmatmul.bf16.gmra.mxu2 %v12682_v63  ;;  %9281 = vmatmul.bf16.gmra.mxu0 %v12732_v7  ;;  %v12791_v63 = vld [vmem:[%s16715_s14 + $0x248] sm:$0xff] }
 0x71c   : > { %9087 = vmatmul.bf16.gmra.mxu3 %v12716_v1  ;;  %v12808_v1 = vld [vmem:[%s16715_s14 + $0x3c8] sm:$0xff] }
 0x71d   : > { %9475 = vmatmul.bf16.gmra.mxu1 %v12748_v11  ;;  %v12856_v6 = vpack.c.bf16 %v8457_v19, %v8456_v35  ;;  %v8504_v5 = vadd.f32 %v8503_v8, %v8457_v19  ;;  %v8527_v21 = vmul.f32 %v8457_v19, %v8457_v19 }
 0x71e   : > { %v8041_v62 = vpop.f32.mrf.mxu2 }
 0x71f   : > { %v8240_v0 = vpop.f32.mrf.mxu3  ;;  %12908 = vst [vmem:[%s13116_s19 + $0x30] sm:$0xff] %v12856_v6   ;;  %v8542_v50 = vadd.f32 %v8541_v42, %v8527_v21  ;;  %v8060_v59 = vadd.f32 %v8041_v62, %v16825_v23  ;;  %v12758_v42 = vld [vmem:[#allocation3 + $0x3c8] sm:$0xff] }
 0x720   : > { %v8441_v38 = vpop.f32.mrf.mxu0 }
 0x721   : > { %v8259_v34 = vadd.f32 %v8240_v0, %v8060_v59 }
 0x722   : > { %v16924_v36 = vpop.f32.mrf.mxu1 }
 0x723   : > { %v8458_v18 = vadd.f32 %v8439_v48, %v8259_v34 }
 0x725   : > { %v8505_v58 = vadd.f32 %v8504_v5, %v8458_v18  ;;  %v8528_v47 = vmul.f32 %v8458_v18, %v8458_v18 }
 0x726   : > { %v8043_v49 = vpop.f32.mrf.mxu2 }
 0x727   : > { %v8242_v14 = vpop.f32.mrf.mxu3  ;;  %v8543_v12 = vadd.f32 %v8542_v50, %v8528_v47  ;;  %v8061_v37 = vadd.f32 %v8043_v49, %v16833_v20  ;;  %v12792_v47 = vld [vmem:[%s16715_s14 + $0x250] sm:$0xff] }
 0x728   : > { %v9247_v56 = vpop.f32.mrf.mxu0  ;;  %v12809_v49 = vld [vmem:[%s16715_s14 + $0x3d0] sm:$0xff] }
 0x729   : > { %v8260_v43 = vadd.f32 %v8242_v14, %v8061_v37 }
 0x72a   : > { %v9441_v23 = vpop.f32.mrf.mxu1 }
 0x72b   : > { %v8459_v41 = vadd.f32 %v8441_v38, %v8260_v43  ;;  %9634 = vmatmul.bf16.vlgmr.msra.gmra.mxu2 %v12757_v60  ;;  %10027 = vmatmul.bf16.vlgmr.msra.gmra.mxu0 %v12790_v27 }
 0x72c   : > { %9831 = vmatmul.bf16.vlgmr.msra.gmra.mxu3 %v12773_v54 }
 0x72d   : > { %10223 = vmatmul.bf16.vlgmr.msra.gmra.mxu1 %v12807_v46  ;;  %v12861_v30 = vpack.c.bf16 %v8459_v41, %v8458_v18  ;;  %v16930_v28 = vadd.f32 %v8505_v58, %v8459_v41  ;;  %v8529_v53 = vmul.f32 %v8459_v41, %v8459_v41  ;;  %v12759_v18 = vld [vmem:[#allocation3 + $0x3d0] sm:$0xff] }
 0x72e   : > { %v8873_v20 = vpop.f32.mrf.mxu2  ;;  %v12775_v58 = vld [vmem:[%s16715_s14 + $0xd0] sm:$0xff] }
 0x72f   : > { %v9053_v2 = vpop.f32.mrf.mxu3  ;;  %12909 = vst [vmem:[%s13116_s19 + $0x38] sm:$0xff] %v12861_v30   ;;  %v16933_v3 = vadd.f32 %v8543_v12, %v8529_v53  ;;  %v8874_v39 = vadd.f32 %v8873_v20, %v16831_v51 }
 0x730   : > { %v9249_v4 = vpop.f32.mrf.mxu0 }
 0x731   : > { %v9093_v22 = vadd.f32 %v9053_v2, %v8874_v39  ;;  %v12760_v2 = vld [vmem:[#allocation3 + $0x3d8] sm:$0xff] }
 0x732   : > { %v9443_v29 = vpop.f32.mrf.mxu1  ;;  %v12776_v39 = vld [vmem:[%s16715_s14 + $0xd8] sm:$0xff] }
 0x733   : > { %v9287_v35 = vadd.f32 %v9247_v56, %v9093_v22  ;;  %v12793_v22 = vld [vmem:[%s16715_s14 + $0x258] sm:$0xff] }
 0x735   : > { %v16936_v8 = vadd.f32 %v9441_v23, %v9287_v35 }
 0x736   : > { %v8875_v16 = vpop.f32.mrf.mxu2 }
 0x737   : > { %v9055_v44 = vpop.f32.mrf.mxu3  ;;  %v8876_v26 = vadd.f32 %v8875_v16, %v16839_v61 }
 0x738   : > { %v9252_v11 = vpop.f32.mrf.mxu0 }
 0x739   : > { %v9094_v7 = vadd.f32 %v9055_v44, %v8876_v26 }
 0x73a   : > { %v9446_v40 = vpop.f32.mrf.mxu1 }
 0x73b   : > { %v9288_v48 = vadd.f32 %v9249_v4, %v9094_v7  ;;  %9639 = vmatmul.bf16.gmra.mxu2 %v12758_v42  ;;  %10032 = vmatmul.bf16.gmra.mxu0 %v12791_v63  ;;  %v12810_v4 = vld [vmem:[%s16715_s14 + $0x3d8] sm:$0xff] }
 0x73c   : > { %9836 = vmatmul.bf16.gmra.mxu3 %v12774_v52 }
 0x73d   : > { %10228 = vmatmul.bf16.gmra.mxu1 %v12808_v1  ;;  %v16942_v51 = vadd.f32 %v9443_v29, %v9288_v48 }
 0x73e   : > { %v8878_v19 = vpop.f32.mrf.mxu2 }
 0x73f   : > { %v9058_v6 = vpop.f32.mrf.mxu3  ;;  %v8879_v61 = vadd.f32 %v8878_v19, %v16845_v15 }
 0x740   : > { %v9254_v21 = vpop.f32.mrf.mxu0 }
 0x741   : > { %v9095_v5 = vadd.f32 %v9058_v6, %v8879_v61  ;;  %v12761_v6 = vld [vmem:[#allocation3 + $0x3e0] sm:$0xff] }
 0x742   : > { %v9448_v62 = vpop.f32.mrf.mxu1  ;;  %v12777_v61 = vld [vmem:[%s16715_s14 + $0xe0] sm:$0xff] }
 0x743   : > { %v9289_v0 = vadd.f32 %v9252_v11, %v9095_v5  ;;  %v12794_v5 = vld [vmem:[%s16715_s14 + $0x260] sm:$0xff] }
 0x745   : > { %v16945_v50 = vadd.f32 %v9446_v40, %v9289_v0 }
 0x746   : > { %v8880_v59 = vpop.f32.mrf.mxu2 }
 0x747   : > { %v9060_v34 = vpop.f32.mrf.mxu3  ;;  %v8881_v38 = vadd.f32 %v8880_v59, %v16852_v13 }
 0x748   : > { %v9257_v12 = vpop.f32.mrf.mxu0 }
 0x749   : > { %v9096_v14 = vadd.f32 %v9060_v34, %v8881_v38 }
 0x74a   : > { %v9451_v37 = vpop.f32.mrf.mxu1 }
 0x74b   : > { %v9290_v60 = vadd.f32 %v9254_v21, %v9096_v14  ;;  %9644 = vmatmul.bf16.gmra.mxu2 %v12759_v18  ;;  %10037 = vmatmul.bf16.gmra.mxu0 %v12792_v47  ;;  %v12811_v21 = vld [vmem:[%s16715_s14 + $0x3e0] sm:$0xff] }
 0x74c   : > { %9841 = vmatmul.bf16.gmra.mxu3 %v12775_v58 }
 0x74d   : > { %10233 = vmatmul.bf16.gmra.mxu1 %v12809_v49  ;;  %v16951_v15 = vadd.f32 %v9448_v62, %v9290_v60 }
 0x74e   : > { %v8883_v54 = vpop.f32.mrf.mxu2 }
 0x74f   : > { %v9063_v27 = vpop.f32.mrf.mxu3  ;;  %v8884_v13 = vadd.f32 %v8883_v54, %v16858_v31 }
 0x750   : > { %v9259_v43 = vpop.f32.mrf.mxu0 }
 0x751   : > { %v9097_v46 = vadd.f32 %v9063_v27, %v8884_v13  ;;  %v12762_v27 = vld [vmem:[#allocation3 + $0x3e8] sm:$0xff] }
 0x752   : > { %v9453_v56 = vpop.f32.mrf.mxu1  ;;  %v12778_v13 = vld [vmem:[%s16715_s14 + $0xe8] sm:$0xff] }
 0x753   : > { %v9291_v23 = vadd.f32 %v9257_v12, %v9097_v46  ;;  %v12795_v46 = vld [vmem:[%s16715_s14 + $0x268] sm:$0xff] }
 0x755   : > { %v16954_v41 = vadd.f32 %v9451_v37, %v9291_v23 }
 0x756   : > { %v8885_v30 = vpop.f32.mrf.mxu2 }
 0x757   : > { %v9065_v53 = vpop.f32.mrf.mxu3  ;;  %v8886_v20 = vadd.f32 %v8885_v30, %v16865_v9 }
 0x758   : > { %v9262_v35 = vpop.f32.mrf.mxu0 }
 0x759   : > { %v9098_v29 = vadd.f32 %v9065_v53, %v8886_v20 }
 0x75a   : > { %v9456_v16 = vpop.f32.mrf.mxu1 }
 0x75b   : > { %v9292_v44 = vadd.f32 %v9259_v43, %v9098_v29  ;;  %9649 = vmatmul.bf16.gmra.mxu2 %v12760_v2  ;;  %10042 = vmatmul.bf16.gmra.mxu0 %v12793_v22  ;;  %v12812_v43 = vld [vmem:[%s16715_s14 + $0x3e8] sm:$0xff] }
 0x75c   : > { %9846 = vmatmul.bf16.gmra.mxu3 %v12776_v39 }
 0x75d   : > { %10238 = vmatmul.bf16.gmra.mxu1 %v12810_v4  ;;  %v16960_v31 = vadd.f32 %v9453_v56, %v9292_v44 }
 0x75e   : > { %v8888_v26 = vpop.f32.mrf.mxu2 }
 0x75f   : > { %v9068_v42 = vpop.f32.mrf.mxu3  ;;  %v8889_v9 = vadd.f32 %v8888_v26, %v16871_v32 }
 0x760   : > { %v9264_v63 = vpop.f32.mrf.mxu0 }
 0x761   : > { %v9099_v52 = vadd.f32 %v9068_v42, %v8889_v9  ;;  %v12763_v42 = vld [vmem:[#allocation3 + $0x3f0] sm:$0xff] }
 0x762   : > { %v9458_v1 = vpop.f32.mrf.mxu1  ;;  %v12779_v9 = vld [vmem:[%s16715_s14 + $0xf0] sm:$0xff] }
 0x763   : > { %v9293_v7 = vadd.f32 %v9262_v35, %v9099_v52  ;;  %v12796_v52 = vld [vmem:[%s16715_s14 + $0x270] sm:$0xff] }
 0x765   : > { %v16963_v11 = vadd.f32 %v9456_v16, %v9293_v7 }
 0x766   : > { %v8890_v40 = vpop.f32.mrf.mxu2 }
 0x767   : > { %v9070_v48 = vpop.f32.mrf.mxu3  ;;  %v8891_v19 = vadd.f32 %v8890_v40, %v16878_v24 }
 0x768   : > { %v9267_v0 = vpop.f32.mrf.mxu0 }
 0x769   : > { %v9100_v62 = vadd.f32 %v9070_v48, %v8891_v19 }
 0x76a   : > { %v9461_v59 = vpop.f32.mrf.mxu1 }
 0x76b   : > { %v9294_v34 = vadd.f32 %v9264_v63, %v9100_v62  ;;  %9654 = vmatmul.bf16.gmra.mxu2 %v12761_v6  ;;  %10047 = vmatmul.bf16.gmra.mxu0 %v12794_v5  ;;  %v12813_v63 = vld [vmem:[%s16715_s14 + $0x3f0] sm:$0xff] }
 0x76c   : > { %9851 = vmatmul.bf16.gmra.mxu3 %v12777_v61 }
 0x76d   : > { %10243 = vmatmul.bf16.gmra.mxu1 %v12811_v21  ;;  %v16969_v32 = vadd.f32 %v9458_v1, %v9294_v34 }
 0x76e   : > { %v8893_v38 = vpop.f32.mrf.mxu2 }
 0x76f   : > { %v9073_v18 = vpop.f32.mrf.mxu3  ;;  %v8894_v24 = vadd.f32 %v8893_v38, %v16884_v17 }
 0x770   : > { %v9269_v47 = vpop.f32.mrf.mxu0 }
 0x771   : > { %v9101_v58 = vadd.f32 %v9073_v18, %v8894_v24  ;;  %v12764_v18 = vld [vmem:[#allocation3 + $0x3f8] sm:$0xff] }
 0x772   : > { %v9463_v49 = vpop.f32.mrf.mxu1  ;;  %v12780_v24 = vld [vmem:[%s16715_s14 + $0xf8] sm:$0xff] }
 0x773   : > { %v9295_v14 = vadd.f32 %v9267_v0, %v9101_v58  ;;  %v12797_v58 = vld [vmem:[%s16715_s14 + $0x278] sm:$0xff] }
 0x775   : > { %v16972_v12 = vadd.f32 %v9461_v59, %v9295_v14 }
 0x776   : > { %v8895_v37 = vpop.f32.mrf.mxu2 }
 0x777   : > { %v9075_v60 = vpop.f32.mrf.mxu3  ;;  %v8896_v54 = vadd.f32 %v8895_v37, %v16891_v57 }
 0x778   : > { %v9272_v23 = vpop.f32.mrf.mxu0 }
 0x779   : > { %v9102_v56 = vadd.f32 %v9075_v60, %v8896_v54 }
 0x77a   : > { %v9466_v30 = vpop.f32.mrf.mxu1 }
 0x77b   : > { %v9296_v53 = vadd.f32 %v9269_v47, %v9102_v56  ;;  %9659 = vmatmul.bf16.gmra.mxu2 %v12762_v27  ;;  %10052 = vmatmul.bf16.gmra.mxu0 %v12795_v46  ;;  %v12814_v47 = vld [vmem:[%s16715_s14 + $0x3f8] sm:$0xff] }
 0x77c   : > { %9856 = vmatmul.bf16.gmra.mxu3 %v12778_v13 }
 0x77d   : > { %10248 = vmatmul.bf16.gmra.mxu1 %v12812_v43  ;;  %v16978_v17 = vadd.f32 %v9463_v49, %v9296_v53 }
 0x77e   : > { %v8898_v20 = vpop.f32.mrf.mxu2 }
 0x77f   : > { %v9078_v2 = vpop.f32.mrf.mxu3  ;;  %v8899_v57 = vadd.f32 %v8898_v20, %v16897_v33 }
 0x780   : > { %v9274_v22 = vpop.f32.mrf.mxu0 }
 0x781   : > { %v9103_v39 = vadd.f32 %v9078_v2, %v8899_v57 }
 0x782   : > { %v9468_v4 = vpop.f32.mrf.mxu1 }
 0x783   : > { %v9297_v29 = vadd.f32 %v9272_v23, %v9103_v39 }
 0x785   : > { %v16981_v35 = vadd.f32 %v9466_v30, %v9297_v29 }
 0x786   : > { %v8900_v16 = vpop.f32.mrf.mxu2 }
 0x787   : > { %v9080_v44 = vpop.f32.mrf.mxu3  ;;  %v8901_v26 = vadd.f32 %v8900_v16, %v16904_v45 }
 0x788   : > { %v9277_v7 = vpop.f32.mrf.mxu0 }
 0x789   : > { %v9104_v1 = vadd.f32 %v9080_v44, %v8901_v26 }
 0x78a   : > { %v9471_v40 = vpop.f32.mrf.mxu1 }
 0x78b   : > { %v9298_v48 = vadd.f32 %v9274_v22, %v9104_v1  ;;  %9664 = vmatmul.bf16.gmra.mxu2 %v12763_v42  ;;  %10057 = vmatmul.bf16.gmra.mxu0 %v12796_v52 }
 0x78c   : > { %9861 = vmatmul.bf16.gmra.mxu3 %v12779_v9 }
 0x78d   : > { %10253 = vmatmul.bf16.gmra.mxu1 %v12813_v63  ;;  %v16987_v33 = vadd.f32 %v9468_v4, %v9298_v48 }
 0x78e   : > { %v8903_v19 = vpop.f32.mrf.mxu2 }
 0x78f   : > { %v9083_v6 = vpop.f32.mrf.mxu3  ;;  %v8904_v45 = vadd.f32 %v8903_v19, %v16910_v10 }
 0x790   : > { %v9279_v5 = vpop.f32.mrf.mxu0 }
 0x791   : > { %v9105_v61 = vadd.f32 %v9083_v6, %v8904_v45 }
 0x792   : > { %v9473_v21 = vpop.f32.mrf.mxu1 }
 0x793   : > { %v9299_v62 = vadd.f32 %v9277_v7, %v9105_v61 }
 0x795   : > { %v16990_v0 = vadd.f32 %v9471_v40, %v9299_v62 }
 0x796   : > { %v8905_v59 = vpop.f32.mrf.mxu2 }
 0x797   : > { %v9085_v34 = vpop.f32.mrf.mxu3  ;;  %v8906_v38 = vadd.f32 %v8905_v59, %v16915_v25 }
 0x798   : > { %v9282_v14 = vpop.f32.mrf.mxu0 }
 0x799   : > { %v9106_v49 = vadd.f32 %v9085_v34, %v8906_v38 }
 0x79a   : > { %v9476_v37 = vpop.f32.mrf.mxu1 }
 0x79b   : > { %v9300_v60 = vadd.f32 %v9279_v5, %v9106_v49  ;;  %9669 = vmatmul.bf16.gmra.mxu2 %v12764_v18  ;;  %10062 = vmatmul.bf16.gmra.mxu0 %v12797_v58 }
 0x79c   : > { %9866 = vmatmul.bf16.gmra.mxu3 %v12780_v24 }
 0x79d   : > { %10258 = vmatmul.bf16.gmra.mxu1 %v12814_v47  ;;  %v16996_v10 = vadd.f32 %v9473_v21, %v9300_v60 }
 0x79e   : > { %v8908_v54 = vpop.f32.mrf.mxu2 }
 0x79f   : > { %v9088_v27 = vpop.f32.mrf.mxu3  ;;  %v8909_v13 = vadd.f32 %v8908_v54, %v16920_v55 }
 0x7a0   : > { %v9284_v25 = vpop.f32.mrf.mxu0 }
 0x7a1   : > { %v9107_v46 = vadd.f32 %v9088_v27, %v8909_v13 }
 0x7a2   : > { %v9478_v43 = vpop.f32.mrf.mxu1 }
 0x7a3   : > { %v9301_v56 = vadd.f32 %v9282_v14, %v9107_v46 }
 0x7a5   : > { %v16999_v23 = vadd.f32 %v9476_v37, %v9301_v56 }
 0x7a6   : > { %v8910_v30 = vpop.f32.mrf.mxu2 }
 0x7a7   : > { %v9090_v53 = vpop.f32.mrf.mxu3  ;;  %v8911_v20 = vadd.f32 %v8910_v30, %v16924_v36 }
 0x7a8   : > { %v10028_v57 = vpop.f32.mrf.mxu0 }
 0x7a9   : > { %v9108_v2 = vadd.f32 %v9090_v53, %v8911_v20 }
 0x7aa   : > { %v10224_v39 = vpop.f32.mrf.mxu1 }
 0x7ab   : > { %v9302_v22 = vadd.f32 %v9284_v25, %v9108_v2 }
 0x7ad   : > { %v17002_v4 = vadd.f32 %v9478_v43, %v9302_v22 }
 0x7ae   : > { %v9635_v29 = vpop.f32.mrf.mxu2 }
 0x7af   : > { %v9832_v16 = vpop.f32.mrf.mxu3  ;;  %v9675_v55 = vadd.f32 %v9635_v29, %v16936_v8 }
 0x7b0   : > { %v10030_v44 = vpop.f32.mrf.mxu0 }
 0x7b1   : > { %v9872_v42 = vadd.f32 %v9832_v16, %v9675_v55 }
 0x7b2   : > { %v10226_v26 = vpop.f32.mrf.mxu1 }
 0x7b3   : > { %v10068_v9 = vadd.f32 %v10028_v57, %v9872_v42 }
 0x7b5   : > { %v10264_v48 = vadd.f32 %v10224_v39, %v10068_v9 }
 0x7b6   : > { %v9637_v52 = vpop.f32.mrf.mxu2 }
 0x7b7   : > { %v9834_v63 = vpop.f32.mrf.mxu3  ;;  %v9676_v1 = vadd.f32 %v9637_v52, %v16942_v51  ;;  %v10334_v45 = vmul.f32 %v10264_v48, %v10264_v48 }
 0x7b8   : > { %v10033_v7 = vpop.f32.mrf.mxu0 }
 0x7b9   : > { %v9873_v36 = vadd.f32 %v9834_v63, %v9676_v1 }
 0x7ba   : > { %v10229_v40 = vpop.f32.mrf.mxu1 }
 0x7bb   : > { %v10069_v19 = vadd.f32 %v10030_v44, %v9873_v36 }
 0x7bd   : > { %v10265_v6 = vadd.f32 %v10226_v26, %v10069_v19 }
 0x7be   : > { %v9640_v61 = vpop.f32.mrf.mxu2 }
 0x7bf   : > { %v9837_v5 = vpop.f32.mrf.mxu3  ;;  %v12866_v21 = vpack.c.bf16 %v10265_v6, %v10264_v48  ;;  %v10312_v8 = vadd.f32 %v10265_v6, %v10264_v48  ;;  %v10335_v62 = vmul.f32 %v10265_v6, %v10265_v6  ;;  %v9677_v59 = vadd.f32 %v9640_v61, %v16945_v50 }
 0x7c0   : > { %v10035_v18 = vpop.f32.mrf.mxu0 }
 0x7c1   : > { %12910 = vst [vmem:[%s13116_s19 + $0x40] sm:$0xff] %v12866_v21   ;;  %v10350_v34 = vadd.f32 %v10335_v62, %v10334_v45  ;;  %v9874_v38 = vadd.f32 %v9837_v5, %v9677_v59 }
 0x7c2   : > { %v10231_v24 = vpop.f32.mrf.mxu1 }
 0x7c3   : > { %v10070_v51 = vadd.f32 %v10033_v7, %v9874_v38 }
 0x7c5   : > { %v10266_v58 = vadd.f32 %v10229_v40, %v10070_v51 }
 0x7c6   : > { %v9642_v47 = vpop.f32.mrf.mxu2 }
 0x7c7   : > { %v9839_v49 = vpop.f32.mrf.mxu3  ;;  %v10313_v14 = vadd.f32 %v10312_v8, %v10266_v58  ;;  %v10336_v37 = vmul.f32 %v10266_v58, %v10266_v58  ;;  %v9678_v60 = vadd.f32 %v9642_v47, %v16951_v15 }
 0x7c8   : > { %v10038_v13 = vpop.f32.mrf.mxu0 }
 0x7c9   : > { %v10351_v54 = vadd.f32 %v10350_v34, %v10336_v37  ;;  %v9875_v27 = vadd.f32 %v9839_v49, %v9678_v60 }
 0x7ca   : > { %v10234_v46 = vpop.f32.mrf.mxu1 }
 0x7cb   : > { %v10071_v25 = vadd.f32 %v10035_v18, %v9875_v27 }
 0x7cd   : > { %v10267_v50 = vadd.f32 %v10231_v24, %v10071_v25 }
 0x7ce   : > { %v9645_v43 = vpop.f32.mrf.mxu2 }
 0x7cf   : > { %v9842_v56 = vpop.f32.mrf.mxu3  ;;  %v12871_v30 = vpack.c.bf16 %v10267_v50, %v10266_v58  ;;  %v10314_v53 = vadd.f32 %v10313_v14, %v10267_v50  ;;  %v10337_v20 = vmul.f32 %v10267_v50, %v10267_v50  ;;  %v9679_v2 = vadd.f32 %v9645_v43, %v16954_v41 }
 0x7d0   : > { %v10040_v22 = vpop.f32.mrf.mxu0 }
 0x7d1   : > { %12911 = vst [vmem:[%s13116_s19 + $0x48] sm:$0xff] %v12871_v30   ;;  %v10352_v57 = vadd.f32 %v10351_v54, %v10337_v20  ;;  %v9876_v39 = vadd.f32 %v9842_v56, %v9679_v2 }
 0x7d2   : > { %v10236_v29 = vpop.f32.mrf.mxu1 }
 0x7d3   : > { %v10072_v16 = vadd.f32 %v10038_v13, %v9876_v39 }
 0x7d5   : > { %v10268_v15 = vadd.f32 %v10234_v46, %v10072_v16 }
 0x7d6   : > { %v9647_v55 = vpop.f32.mrf.mxu2 }
 0x7d7   : > { %v9844_v44 = vpop.f32.mrf.mxu3  ;;  %v10315_v26 = vadd.f32 %v10314_v53, %v10268_v15  ;;  %v10338_v42 = vmul.f32 %v10268_v15, %v10268_v15  ;;  %v9680_v9 = vadd.f32 %v9647_v55, %v16960_v31 }
 0x7d8   : > { %v10043_v1 = vpop.f32.mrf.mxu0 }
 0x7d9   : > { %v10353_v52 = vadd.f32 %v10352_v57, %v10338_v42  ;;  %v9877_v63 = vadd.f32 %v9844_v44, %v9680_v9 }
 0x7da   : > { %v10239_v36 = vpop.f32.mrf.mxu1 }
 0x7db   : > { %v10073_v7 = vadd.f32 %v10040_v22, %v9877_v63 }
 0x7dd   : > { %v10269_v41 = vadd.f32 %v10236_v29, %v10073_v7 }
 0x7de   : > { %v9650_v40 = vpop.f32.mrf.mxu2 }
 0x7df   : > { %v9847_v48 = vpop.f32.mrf.mxu3  ;;  %v12876_v19 = vpack.c.bf16 %v10269_v41, %v10268_v15  ;;  %v10316_v6 = vadd.f32 %v10315_v26, %v10269_v41  ;;  %v10339_v45 = vmul.f32 %v10269_v41, %v10269_v41  ;;  %v9681_v61 = vadd.f32 %v9650_v40, %v16963_v11 }
 0x7e0   : > { %v10045_v8 = vpop.f32.mrf.mxu0 }
 0x7e1   : > { %12912 = vst [vmem:[%s13116_s19 + $0x50] sm:$0xff] %v12876_v19   ;;  %v10354_v5 = vadd.f32 %v10353_v52, %v10339_v45  ;;  %v9878_v21 = vadd.f32 %v9847_v48, %v9681_v61 }
 0x7e2   : > { %v10241_v62 = vpop.f32.mrf.mxu1 }
 0x7e3   : > { %v10074_v59 = vadd.f32 %v10043_v1, %v9878_v21 }
 0x7e5   : > { %v10270_v31 = vadd.f32 %v10239_v36, %v10074_v59 }
 0x7e6   : > { %v9652_v34 = vpop.f32.mrf.mxu2 }
 0x7e7   : > { %v9849_v38 = vpop.f32.mrf.mxu3  ;;  %v10317_v18 = vadd.f32 %v10316_v6, %v10270_v31  ;;  %v10340_v24 = vmul.f32 %v10270_v31, %v10270_v31  ;;  %v9682_v51 = vadd.f32 %v9652_v34, %v16969_v32 }
 0x7e8   : > { %v10048_v49 = vpop.f32.mrf.mxu0 }
 0x7e9   : > { %v10355_v58 = vadd.f32 %v10354_v5, %v10340_v24  ;;  %v9879_v47 = vadd.f32 %v9849_v38, %v9682_v51 }
 0x7ea   : > { %v10244_v14 = vpop.f32.mrf.mxu1 }
 0x7eb   : > { %v10075_v37 = vadd.f32 %v10045_v8, %v9879_v47 }
 0x7ed   : > { %v10271_v11 = vadd.f32 %v10241_v62, %v10075_v37 }
 0x7ee   : > { %v9655_v60 = vpop.f32.mrf.mxu2 }
 0x7ef   : > { %v9852_v54 = vpop.f32.mrf.mxu3  ;;  %v12881_v27 = vpack.c.bf16 %v10271_v11, %v10270_v31  ;;  %v10318_v13 = vadd.f32 %v10317_v18, %v10271_v11  ;;  %v10341_v46 = vmul.f32 %v10271_v11, %v10271_v11  ;;  %v9683_v25 = vadd.f32 %v9655_v60, %v16972_v12 }
 0x7f0   : > { %v10050_v56 = vpop.f32.mrf.mxu0 }
 0x7f1   : > { %12913 = vst [vmem:[%s13116_s19 + $0x58] sm:$0xff] %v12881_v27   ;;  %v10356_v50 = vadd.f32 %v10355_v58, %v10341_v46  ;;  %v9880_v43 = vadd.f32 %v9852_v54, %v9683_v25 }
 0x7f2   : > { %v10246_v30 = vpop.f32.mrf.mxu1 }
 0x7f3   : > { %v10076_v53 = vadd.f32 %v10048_v49, %v9880_v43 }
 0x7f5   : > { %v10272_v32 = vadd.f32 %v10244_v14, %v10076_v53 }
 0x7f6   : > { %v9657_v20 = vpop.f32.mrf.mxu2 }
 0x7f7   : > { %v9854_v2 = vpop.f32.mrf.mxu3  ;;  %v10319_v57 = vadd.f32 %v10318_v13, %v10272_v32  ;;  %v10342_v39 = vmul.f32 %v10272_v32, %v10272_v32  ;;  %v9684_v22 = vadd.f32 %v9657_v20, %v16978_v17 }
 0x7f8   : > { %v10053_v15 = vpop.f32.mrf.mxu0 }
 0x7f9   : > { %v10357_v29 = vadd.f32 %v10356_v50, %v10342_v39  ;;  %v9881_v16 = vadd.f32 %v9854_v2, %v9684_v22 }
 0x7fa   : > { %v10249_v55 = vpop.f32.mrf.mxu1 }
 0x7fb   : > { %v10077_v44 = vadd.f32 %v10050_v56, %v9881_v16 }
 0x7fd   : > { %v10273_v12 = vadd.f32 %v10246_v30, %v10077_v44 }
 0x7fe   : > { %v9660_v26 = vpop.f32.mrf.mxu2 }
 0x7ff   : > { %v9857_v42 = vpop.f32.mrf.mxu3  ;;  %v12886_v9 = vpack.c.bf16 %v10273_v12, %v10272_v32  ;;  %v10320_v52 = vadd.f32 %v10319_v57, %v10273_v12  ;;  %v10343_v63 = vmul.f32 %v10273_v12, %v10273_v12  ;;  %v9685_v1 = vadd.f32 %v9660_v26, %v16981_v35 }
 0x800   : > { %v10055_v41 = vpop.f32.mrf.mxu0 }
 0x801   : > { %12914 = vst [vmem:[%s13116_s19 + $0x60] sm:$0xff] %v12886_v9   ;;  %v10358_v36 = vadd.f32 %v10357_v29, %v10343_v63  ;;  %v9882_v7 = vadd.f32 %v9857_v42, %v9685_v1  ;;  %v8545_v9 = vrot.slane %v16933_v3, 4 }
 0x802   : > { %v10251_v48 = vpop.f32.mrf.mxu1 }
 0x803   : > { %v10078_v40 = vadd.f32 %v10053_v15, %v9882_v7 }
 0x805   : > { %v10274_v17 = vadd.f32 %v10249_v55, %v10078_v40  ;;  %v8507_v55 = vrot.slane %v16930_v28, 4 }
 0x806   : > { %v9662_v19 = vpop.f32.mrf.mxu2 }
 0x807   : > { %v9859_v6 = vpop.f32.mrf.mxu3  ;;  %v10321_v45 = vadd.f32 %v10320_v52, %v10274_v17  ;;  %v10344_v61 = vmul.f32 %v10274_v17, %v10274_v17  ;;  %v9686_v5 = vadd.f32 %v9662_v19, %v16987_v33  ;;  %v8508_v1 = vadd.f32 %v8507_v55, %v16930_v28 }
 0x808   : > { %v10058_v59 = vpop.f32.mrf.mxu0 }
 0x809   : > { %v10359_v21 = vadd.f32 %v10358_v36, %v10344_v61  ;;  %v9883_v8 = vadd.f32 %v9859_v6, %v9686_v5 }
 0x80a   : > { %v10254_v35 = vpop.f32.mrf.mxu1 }
 0x80b   : > { %v10079_v62 = vadd.f32 %v10055_v41, %v9883_v8  ;;  %v8546_v41 = vadd.f32 %v8545_v9, %v16933_v3 }
 0x80d   : > { %v10275_v31 = vadd.f32 %v10251_v48, %v10079_v62  ;;  %v8509_v48 = vrot.slane %v8508_v1, 2 }
 0x80e   : > { %v9665_v34 = vpop.f32.mrf.mxu2 }
 0x80f   : > { %v9862_v38 = vpop.f32.mrf.mxu3  ;;  %v12891_v18 = vpack.c.bf16 %v10275_v31, %v10274_v17  ;;  %v10322_v24 = vadd.f32 %v10321_v45, %v10275_v31  ;;  %v10345_v51 = vmul.f32 %v10275_v31, %v10275_v31  ;;  %v9687_v58 = vadd.f32 %v9665_v34, %v16990_v0 }
 0x810   : > { %v10060_v11 = vpop.f32.mrf.mxu0  ;;  %v8547_v45 = vrot.slane %v8546_v41, 2  ;;  %v8510_v5 = vadd.f32 %v8509_v48, %v8508_v1 }
 0x811   : > { %12915 = vst [vmem:[%s13116_s19 + $0x68] sm:$0xff] %v12891_v18   ;;  %v10360_v47 = vadd.f32 %v10359_v21, %v10345_v51  ;;  %v9884_v49 = vadd.f32 %v9862_v38, %v9687_v58 }
 0x812   : > { %v10256_v46 = vpop.f32.mrf.mxu1  ;;  %v8548_v62 = vadd.f32 %v8547_v45, %v8546_v41  ;;  %v8511_v31 = vrot.slane %v8510_v5, 1 }
 0x813   : > { %v10080_v14 = vadd.f32 %v10058_v59, %v9884_v49 }
 0x814   : > { %v8549_v34 = vrot.slane %v8548_v62, 1 }
 0x815   : > { %v10276_v37 = vadd.f32 %v10254_v35, %v10080_v14 }
 0x816   : > { %v9667_v33 = vpop.f32.mrf.mxu2 }
 0x817   : > { %v9864_v60 = vpop.f32.mrf.mxu3  ;;  %v10323_v54 = vadd.f32 %v10322_v24, %v10276_v37  ;;  %v10346_v27 = vmul.f32 %v10276_v37, %v10276_v37  ;;  %v9688_v13 = vadd.f32 %v9667_v33, %v16996_v10  ;;  %v8512_v24 = vadd.f32 %v8511_v31, %v8510_v5 }
 0x818   : > { %v10063_v57 = vpop.f32.mrf.mxu0 }
 0x819   : > { %v10361_v25 = vadd.f32 %v10360_v47, %v10346_v27  ;;  %v9885_v50 = vadd.f32 %v9864_v60, %v9688_v13  ;;  %v8550_v47 = vadd.f32 %v8549_v34, %v8548_v62 }
 0x81a   : > { %v10259_v29 = vpop.f32.mrf.mxu1 }
 0x81b   : > { %v10081_v43 = vadd.f32 %v10060_v11, %v9885_v50 }
 0x81d   : > { %v10277_v56 = vadd.f32 %v10256_v46, %v10081_v43 }
 0x81e   : > { %v9670_v30 = vpop.f32.mrf.mxu2 }
 0x81f   : > { %v9867_v0 = vpop.f32.mrf.mxu3  ;;  %v12896_v53 = vpack.c.bf16 %v10277_v56, %v10276_v37  ;;  %v10324_v32 = vadd.f32 %v10323_v54, %v10277_v56  ;;  %v10347_v20 = vmul.f32 %v10277_v56, %v10277_v56  ;;  %v9689_v2 = vadd.f32 %v9670_v30, %v16999_v23 }
 0x820   : > { %v10065_v63 = vpop.f32.mrf.mxu0 }
 0x821   : > { %12916 = vst [vmem:[%s13116_s19 + $0x70] sm:$0xff] %v12896_v53   ;;  %v10362_v39 = vadd.f32 %v10361_v25, %v10347_v20  ;;  %v9886_v22 = vadd.f32 %v9867_v0, %v9689_v2 }
 0x822   : > { %v10261_v7 = vpop.f32.mrf.mxu1 }
 0x823   : > { %v10082_v16 = vadd.f32 %v10063_v57, %v9886_v22 }
 0x825   : > { %v10278_v15 = vadd.f32 %v10259_v29, %v10082_v16 }
 0x826   : > { %v9672_v10 = vpop.f32.mrf.mxu2 }
 0x827   : > { %v10325_v44 = vadd.f32 %v10324_v32, %v10278_v15  ;;  %v10348_v12 = vmul.f32 %v10278_v15, %v10278_v15  ;;  %v9690_v26 = vadd.f32 %v9672_v10, %v17002_v4  ;;  %v9869_v42 = vpop.f32.mrf.mxu3 }
 0x829   : > { %v10363_v52 = vadd.f32 %v10362_v39, %v10348_v12  ;;  %v9887_v23 = vadd.f32 %v9869_v42, %v9690_v26 }
 0x82b   : > { %v10083_v36 = vadd.f32 %v10065_v63, %v9887_v23 }
 0x82d   : > { %v10279_v40 = vadd.f32 %v10261_v7, %v10083_v36 }
 0x82f   : > { %v12901_v17 = vpack.c.bf16 %v10279_v40, %v10278_v15  ;;  %v10326_v19 = vadd.f32 %v10325_v44, %v10279_v40  ;;  %v10349_v6 = vmul.f32 %v10279_v40, %v10279_v40 }
 0x831   : > { %12917 = vst [vmem:[%s13116_s19 + $0x78] sm:$0xff] %v12901_v17   ;;  %v10327_v4 = vrot.slane %v10326_v19, 4  ;;  %v10364_v61 = vadd.f32 %v10363_v52, %v10349_v6 }
 0x833   : > { %v10328_v21 = vadd.f32 %v10327_v4, %v10326_v19  ;;  %v10365_v8 = vrot.slane %v10364_v61, 4 }
 0x835   : > { %v10329_v59 = vrot.slane %v10328_v21, 2  ;;  %v10366_v28 = vadd.f32 %v10365_v8, %v10364_v61 }
 0x837   : > { %v10330_v35 = vadd.f32 %v10329_v59, %v10328_v21  ;;  %v10367_v3 = vrot.slane %v10366_v28, 2 }
 0x839   : > { %v10331_v38 = vrot.slane %v10330_v35, 1  ;;  %v10368_v18 = vadd.f32 %v10367_v3, %v10366_v28 }
 0x83b   : > { %v10332_v51 = vadd.f32 %v10331_v38, %v10330_v35  ;;  %v10369_v58 = vrot.slane %v10368_v18, 1 }
 0x83d   : > { %v10333_v49 = vadd.f32 %v10332_v51, %v8512_v24  ;;  %v10370_v14 = vadd.f32 %v10369_v58, %v10368_v18 }
 0x83f   : > { %v10371_v37 = vadd.f32 %v10370_v14, %v8550_v47  ;;  %10372 = vst [vmem:[%s258_s16] sm:$0x1] %v10333_v49 }
 0x841   : > { %10373 = vst [vmem:[%s265_s23] sm:$0x1] %v10371_v37 }
 0x842 PF: > { %s24_s26 = sadd.s32 1, %s13028_s26   ;;  %s17496_s22 = smov %s13020_s24 }
 0x843   : > { %p21_p11 = scmp.ge.s32.totalorder %s24_s26, 10   ;;  %s17497_s23 = smov %s13024_s25 }
 0x844   : > { %s17498_s24 = smov %s17501_s0  ;;  %s17499_s25 = smov %s17505_s27 }
 0x845   :  { %23 = sbr.rel (!%p21_p11) target bundleno = 9 (0x9), region = 134 }

</bundles_post_ra>
